<compile_context>
chip_gen: v7x
topology: tpu7x:2x2x1
jax: 0.10.0
libtpu: 0.0.40
codegen_flags: <defaults>
</compile_context>

<pallas_src>
from functools import partial

import jax
import jax.numpy as jnp
from jax.experimental import pallas as pl
from jax.experimental.pallas import tpu as pltpu

NEG_SLOPE = 0.01  # torch F.leaky_relu default negative_slope


def _lrelu(x):
    return jnp.where(x > 0, x, NEG_SLOPE * x)


# ---------------------------------------------------------------------------
# Fused decode_out kernel (one grid step = one (batch, row-tile) of output)
# ---------------------------------------------------------------------------
def _decode_out_kernel(
        f3m, f3u, f3d, f2m, f2u, f2d, f1m, f1u, f1d,
        w1a_ref, w1b_ref, b1_ref, wt1_ref, bt1_ref,
        w2a_ref, w2b_ref, b2_ref, wt2_ref, bt2_ref,
        o_ref, *, TH, W, C, compute_dtype):
    i = pl.program_id(1)
    last = pl.num_programs(1) - 1
    f32 = jnp.float32
    cd = compute_dtype
    C2 = 2 * C
    R1 = TH + 4          # rows of the stage-1 1x1 intermediate
    R2 = TH + 2          # rows of r1 / stage-2 1x1 intermediate

    # --- assemble stage-1 input rows [i*TH-2, i*TH+TH+1]; reflect at image
    #     top/bottom.  The two outermost rows only feed r1 rows that are
    #     themselves replaced by reflection below, so clamped halo data is OK.
    def rows_s1(xm_ref, xu_ref, xd_ref):
        xm = xm_ref[0].astype(cd)                                  # (TH, W, C)
        xu = xu_ref[0].astype(cd)                                  # (2,  W, C)
        xd = xd_ref[0].astype(cd)                                  # (2,  W, C)
        r_m1 = jnp.where(i == 0, xm[1:2], xu[1:2])                 # row -1 -> 1
        r_pH = jnp.where(i == last, xm[TH - 2:TH - 1], xd[0:1])    # row H -> H-2
        return jnp.concatenate([xu[0:1], r_m1, xm, r_pH, xd[1:2]], axis=0)

    x3 = rows_s1(f3m, f3u, f3d)                                    # (TH+4, W, C)
    x2 = rows_s1(f2m, f2u, f2d)

    # --- stage 1: 1x1 conv (concat-free) + leaky_relu --------------------
    y1 = jnp.dot(x3.reshape(R1 * W, C), w1a_ref[...],
                 preferred_element_type=f32)
    y1 = y1 + jnp.dot(x2.reshape(R1 * W, C), w1b_ref[...],
                      preferred_element_type=f32)
    y1 = _lrelu(y1 + b1_ref[...]).reshape(R1, W, C2).astype(cd)
    # reflect-pad W once, on the single 64-channel intermediate
    y1p = jnp.concatenate([y1[:, 1:2], y1, y1[:, W - 2:W - 1]], axis=1)

    # --- stage 1: 3x3 conv as 9 accumulating matmuls (no im2col) ---------
    wt1 = wt1_ref[...]                                             # (9, 2C, C)
    acc1 = jnp.zeros((R2 * W, C), f32)
    for kh in range(3):
        for kw in range(3):
            k = kh * 3 + kw
            lhs = y1p[kh:kh + R2, kw:kw + W, :].reshape(R2 * W, C2)
            acc1 = acc1 + jnp.dot(lhs, wt1[k], preferred_element_type=f32)
    # r1 rows correspond to global rows [i*TH-1, i*TH+TH]
    r1 = _lrelu(acc1 + bt1_ref[...]).reshape(R2, W, C).astype(cd)

    # --- stage 2 H padding: reflect r1 / f1 at the image boundary --------
    r1_top = jnp.where(i == 0, r1[2:3], r1[0:1])
    r1_bot = jnp.where(i == last, r1[TH - 1:TH], r1[TH + 1:TH + 2])
    r1p = jnp.concatenate([r1_top, r1[1:TH + 1], r1_bot], axis=0)  # (TH+2, W, C)

    x1 = f1m[0].astype(cd)                                         # (TH, W, C)
    f1_top = jnp.where(i == 0, x1[1:2], f1u[0].astype(cd))
    f1_bot = jnp.where(i == last, x1[TH - 2:TH - 1], f1d[0].astype(cd))
    f1p = jnp.concatenate([f1_top, x1, f1_bot], axis=0)            # (TH+2, W, C)

    # --- stage 2: 1x1 conv (concat-free) + leaky_relu ---------------------
    y2 = jnp.dot(f1p.reshape(R2 * W, C), w2a_ref[...],
                 preferred_element_type=f32)
    y2 = y2 + jnp.dot(r1p.reshape(R2 * W, C), w2b_ref[...],
                      preferred_element_type=f32)
    y2 = _lrelu(y2 + b2_ref[...]).reshape(R2, W, C2)               # f32 (VPU path)
    y2p = jnp.concatenate([y2[:, 1:2], y2, y2[:, W - 2:W - 1]], axis=1)

    # --- stage 2: 3x3 conv, Cout=1, is_last (no activation) ---------------
    # re-associated reduction: accumulate channels over the 9 taps, reduce once
    wt2 = wt2_ref[...]                                             # (9, 2C) f32
    acc_ch = jnp.zeros((TH, W, C2), f32)
    for kh in range(3):
        for kw in range(3):
            k = kh * 3 + kw
            wv = wt2[k:k + 1, :].reshape(1, 1, C2)
            acc_ch = acc_ch + y2p[kh:kh + TH, kw:kw + W, :] * wv
    z = jnp.sum(acc_ch, axis=-1) + bt2_ref[...]                    # (TH, W)
    o_ref[0] = z.astype(o_ref.dtype)


# ---------------------------------------------------------------------------
# Wrapper
# ---------------------------------------------------------------------------
def _pick_tile_h(H, W, tile_h):
    if tile_h is None:
        budget = 10 * 1024 * 1024            # ~per-step VMEM working set target
        tile_h = max(8, budget // (3400 * max(W, 1)))
    TH = int(min(int(tile_h), H))
    # need H % TH == 0, and TH even unless the whole height fits in one tile
    while TH >= 2 and not (H % TH == 0 and (TH % 2 == 0 or TH == H)):
        TH -= 1
    if TH < 2:
        TH = H
    return TH


def _vmem_limit_bytes():
    # Raise the scoped-VMEM budget when the chip can be queried; stay <= 3/4
    # of physical so v7x (64 MiB) keeps double-buffering headroom.
    try:
        cap = int(pltpu.get_tpu_info().vmem_capacity_bytes)
        return min((cap * 3) // 4, 100 * 1024 * 1024)
    except Exception:
        return None


def tsfuse_final_fuse_nhwc(params, f1n, f2n, f3n, *, tile_h=None, use_bf16=True):
    """f1n, f2n, f3n: NHWC (B, H, W, C) float32 -> (B, H, W) float32."""
    B, H, W, C = f1n.shape
    assert f2n.shape == f1n.shape and f3n.shape == f1n.shape
    assert H >= 2 and W >= 2, (H, W)
    TH = _pick_tile_h(H, W, tile_h)
    assert H % TH == 0 and TH >= 2 and (TH % 2 == 0 or TH == H), (H, TH)
    n_h = H // TH
    thb = TH // 2
    C2 = 2 * C
    cd = jnp.bfloat16 if use_bf16 else jnp.float32

    # weights: MXU operands in compute dtype, VPU / bias params stay f32
    w1a = params["in1_w"][:C].astype(cd)                 # (C, 2C)  for f3
    w1b = params["in1_w"][C:].astype(cd)                 # (C, 2C)  for f2
    b1 = params["in1_b"].reshape(1, C2).astype(jnp.float32)
    wt1 = params["t1_w"].reshape(9, C2, C).astype(cd)    # HWIO -> (9, 2C, C)
    bt1 = params["t1_b"].reshape(1, C).astype(jnp.float32)
    w2a = params["in2_w"][:C].astype(cd)                 # for f1
    w2b = params["in2_w"][C:].astype(cd)                 # for r1
    b2 = params["in2_b"].reshape(1, C2).astype(jnp.float32)
    wt2 = params["t2_w"].reshape(9, C2).astype(jnp.float32)   # VPU path: f32
    bt2 = params["t2_b"].reshape(1, 1).astype(jnp.float32)

    # block specs
    main = pl.BlockSpec((1, TH, W, C), lambda b, i: (b, i, 0, 0))
    # 2-row halos for stage-1 inputs: rows [i*TH-2, i*TH-1] / [(i+1)*TH, +1]
    up2 = pl.BlockSpec((1, 2, W, C),
                       lambda b, i: (b, jnp.maximum(i * thb - 1, 0), 0, 0))
    dn2 = pl.BlockSpec((1, 2, W, C),
                       lambda b, i: (b, jnp.minimum((i + 1) * thb, H // 2 - 1), 0, 0))
    # 1-row halos for f1 (stage-2 input)
    up1 = pl.BlockSpec((1, 1, W, C),
                       lambda b, i: (b, jnp.maximum(i * TH - 1, 0), 0, 0))
    dn1 = pl.BlockSpec((1, 1, W, C),
                       lambda b, i: (b, jnp.minimum((i + 1) * TH, H - 1), 0, 0))

    def full(a):
        nd = a.ndim
        return pl.BlockSpec(a.shape, lambda b, i, _nd=nd: (0,) * _nd)

    out_shape = jax.ShapeDtypeStruct((B, H, W), jnp.float32)
    out_spec = pl.BlockSpec((1, TH, W), lambda b, i: (b, i, 0))

    kernel = partial(_decode_out_kernel, TH=TH, W=W, C=C, compute_dtype=cd)

    # advisory cost estimate
    m1, m2 = (TH + 4) * W, (TH + 2) * W
    flops = B * n_h * (2 * 2 * m1 * C * C2            # stage-1 1x1
                       + 9 * 2 * m2 * C2 * C          # stage-1 3x3
                       + 2 * 2 * m2 * C * C2          # stage-2 1x1
                       + (2 * 9 + 1) * TH * W * C2)   # stage-2 3x3 (VPU)
    bytes_accessed = 4 * B * (3 * H * W * C + H * W) + 4 * (12 * C * C2 + 9 * C2)

    cp_kwargs = dict(dimension_semantics=("parallel", "parallel"))
    vl = _vmem_limit_bytes()
    if vl is not None:
        cp_kwargs["vmem_limit_bytes"] = vl

    return pl.pallas_call(
        kernel,
        out_shape=out_shape,
        grid=(B, n_h),
        in_specs=[main, up2, dn2,            # f3
                  main, up2, dn2,            # f2
                  main, up1, dn1,            # f1
                  full(w1a), full(w1b), full(b1), full(wt1), full(bt1),
                  full(w2a), full(w2b), full(b2), full(wt2), full(bt2)],
        out_specs=out_spec,
        compiler_params=pltpu.CompilerParams(**cp_kwargs),
        cost_estimate=pl.CostEstimate(flops=int(flops), transcendentals=0,
                                      bytes_accessed=int(bytes_accessed)),
    )(f3n, f3n, f3n, f2n, f2n, f2n, f1n, f1n, f1n,
      w1a, w1b, b1, wt1, bt1, w2a, w2b, b2, wt2, bt2)


def tsfuse_final_fuse(params, f1, f2, f3, *, tile_h=None, use_bf16=True):
    """PyTorch-shaped interface: f1, f2, f3 NCHW (B, 32, H, W) -> (B, 1, H, W)."""
    # TODO(synk): in a full TSFuse port keep the pipeline NHWC end-to-end; these
    #             three input transposes are layout glue for the NCHW interface.
    t = lambda a: jnp.transpose(a, (0, 2, 3, 1))
    out = tsfuse_final_fuse_nhwc(params, t(f1), t(f2), t(f3),
                                 tile_h=tile_h, use_bf16=use_bf16)
    return out[:, None, :, :]                           # (B, 1, H, W)


# ---------------------------------------------------------------------------
# Parameter init (decode_out(32)) and pure-JAX reference (correctness only)
# ---------------------------------------------------------------------------
def init_decode_out_params(key, inchannel=32):
    c2 = 2 * inchannel
    ks = jax.random.split(key, 8)
    s = 0.05
    return {
        "in1_w": s * jax.random.normal(ks[0], (c2, c2), jnp.float32),   # (Cin, Cout)
        "in1_b": s * jax.random.normal(ks[1], (c2,), jnp.float32),
        "t1_w": s * jax.random.normal(ks[2], (3, 3, c2, inchannel), jnp.float32),  # HWIO
        "t1_b": s * jax.random.normal(ks[3], (inchannel,), jnp.float32),
        "in2_w": s * jax.random.normal(ks[4], (c2, c2), jnp.float32),
        "in2_b": s * jax.random.normal(ks[5], (c2,), jnp.float32),
        "t2_w": s * jax.random.normal(ks[6], (3, 3, c2, 1), jnp.float32),
        "t2_b": s * jax.random.normal(ks[7], (1,), jnp.float32),
    }


def _ref_forward(params, f1, f2, f3):
    t = lambda a: jnp.transpose(a, (0, 2, 3, 1))

    def c1x1(x, w, b):
        return _lrelu(jnp.einsum("bhwc,cd->bhwd", x, w) + b)

    def c3x3(x, w, b, act):
        xp = jnp.pad(x, ((0, 0), (1, 1), (1, 1), (0, 0)), mode="reflect")
        y = jax.lax.conv_general_dilated(
            xp, w, window_strides=(1, 1), padding="VALID",
            dimension_numbers=("NHWC", "HWIO", "NHWC")) + b
        return _lrelu(y) if act else y

    x = jnp.concatenate([t(f3), t(f2)], axis=-1)
    r1 = c3x3(c1x1(x, params["in1_w"], params["in1_b"]),
              params["t1_w"], params["t1_b"], True)
    x = jnp.concatenate([t(f1), r1], axis=-1)
    out = c3x3(c1x1(x, params["in2_w"], params["in2_b"]),
               params["t2_w"], params["t2_b"], False)
    return jnp.transpose(out, (0, 3, 1, 2))


if __name__ == "__main__":
    key = jax.random.PRNGKey(0)
    B, C, H, W = 2, 32, 32, 32
    k1, k2, k3, kp = jax.random.split(key, 4)
    f1 = jax.random.normal(k1, (B, C, H, W), jnp.float32)
    f2 = jax.random.normal(k2, (B, C, H, W), jnp.float32)
    f3 = jax.random.normal(k3, (B, C, H, W), jnp.float32)
    params = init_decode_out_params(kp, inchannel=32)

    ref = jax.block_until_ready(_ref_forward(params, f1, f2, f3))

    # f32 MXU path with a small tile -> exercises top / interior / bottom halos
    fwd_f32 = jax.jit(partial(tsfuse_final_fuse, tile_h=8, use_bf16=False))
    out_f32 = jax.block_until_ready(fwd_f32(params, f1, f2, f3))
    assert out_f32.shape == (B, 1, H, W), out_f32.shape
    err32 = float(jnp.max(jnp.abs(out_f32 - ref)))
    assert err32 < 5e-4, f"f32 path mismatch: {err32}"

    # bf16 MXU path (default), auto tile size (single row-tile here)
    fwd_bf16 = jax.jit(partial(tsfuse_final_fuse, use_bf16=True))
    out_bf16 = jax.block_until_ready(fwd_bf16(params, f1, f2, f3))
    assert out_bf16.shape == (B, 1, H, W), out_bf16.shape
    err16 = float(jnp.max(jnp.abs(out_bf16 - ref)))
    assert err16 < 1e-1, f"bf16 path mismatch: {err16}"

    print("KERNEL_OK")
</pallas_src>

<mosaic_0001>
module attributes {stable_mosaic.version = 11 : i64} {
  func.func @_decode_out_kernel(%arg0: i32, %arg1: i32, %arg2: memref<1x8x32x32xf32, #tpu.memory_space<vmem>>, %arg3: memref<1x2x32x32xf32, #tpu.memory_space<vmem>>, %arg4: memref<1x2x32x32xf32, #tpu.memory_space<vmem>>, %arg5: memref<1x8x32x32xf32, #tpu.memory_space<vmem>>, %arg6: memref<1x2x32x32xf32, #tpu.memory_space<vmem>>, %arg7: memref<1x2x32x32xf32, #tpu.memory_space<vmem>>, %arg8: memref<1x8x32x32xf32, #tpu.memory_space<vmem>>, %arg9: memref<1x1x32x32xf32, #tpu.memory_space<vmem>>, %arg10: memref<1x1x32x32xf32, #tpu.memory_space<vmem>>, %arg11: memref<32x64xf32, #tpu.memory_space<vmem>>, %arg12: memref<32x64xf32, #tpu.memory_space<vmem>>, %arg13: memref<1x64xf32, #tpu.memory_space<vmem>>, %arg14: memref<9x64x32xf32, #tpu.memory_space<vmem>>, %arg15: memref<1x32xf32, #tpu.memory_space<vmem>>, %arg16: memref<32x64xf32, #tpu.memory_space<vmem>>, %arg17: memref<32x64xf32, #tpu.memory_space<vmem>>, %arg18: memref<1x64xf32, #tpu.memory_space<vmem>>, %arg19: memref<9x64xf32, #tpu.memory_space<vmem>>, %arg20: memref<1x1xf32, #tpu.memory_space<vmem>>, %arg21: memref<1x8x32xf32, #tpu.memory_space<vmem>>) attributes {dimension_semantics = [#tpu.dimension_semantics<parallel>, #tpu.dimension_semantics<parallel>], iteration_bounds = array<i64: 2, 4>, scalar_prefetch = 0 : i64, scratch_operands = 0 : i64, tpu.core_type = #tpu.core_type<tc>, window_params = [{transform_indices = @transform_0, window_bounds = array<i64: 1, 8, 32, 32>}, {transform_indices = @transform_1, window_bounds = array<i64: 1, 2, 32, 32>}, {transform_indices = @transform_2, window_bounds = array<i64: 1, 2, 32, 32>}, {transform_indices = @transform_3, window_bounds = array<i64: 1, 8, 32, 32>}, {transform_indices = @transform_4, window_bounds = array<i64: 1, 2, 32, 32>}, {transform_indices = @transform_5, window_bounds = array<i64: 1, 2, 32, 32>}, {transform_indices = @transform_6, window_bounds = array<i64: 1, 8, 32, 32>}, {transform_indices = @transform_7, window_bounds = array<i64: 1, 1, 32, 32>}, {transform_indices = @transform_8, window_bounds = array<i64: 1, 1, 32, 32>}, {pipeline_mode = #tpu.pipeline_mode<synchronous>, transform_indices = @transform_9, window_bounds = array<i64: 32, 64>}, {pipeline_mode = #tpu.pipeline_mode<synchronous>, transform_indices = @transform_10, window_bounds = array<i64: 32, 64>}, {pipeline_mode = #tpu.pipeline_mode<synchronous>, transform_indices = @transform_11, window_bounds = array<i64: 1, 64>}, {pipeline_mode = #tpu.pipeline_mode<synchronous>, transform_indices = @transform_12, window_bounds = array<i64: 9, 64, 32>}, {pipeline_mode = #tpu.pipeline_mode<synchronous>, transform_indices = @transform_13, window_bounds = array<i64: 1, 32>}, {pipeline_mode = #tpu.pipeline_mode<synchronous>, transform_indices = @transform_14, window_bounds = array<i64: 32, 64>}, {pipeline_mode = #tpu.pipeline_mode<synchronous>, transform_indices = @transform_15, window_bounds = array<i64: 32, 64>}, {pipeline_mode = #tpu.pipeline_mode<synchronous>, transform_indices = @transform_16, window_bounds = array<i64: 1, 64>}, {pipeline_mode = #tpu.pipeline_mode<synchronous>, transform_indices = @transform_17, window_bounds = array<i64: 9, 64>}, {pipeline_mode = #tpu.pipeline_mode<synchronous>, transform_indices = @transform_18, window_bounds = array<i64: 1, 1>}, {transform_indices = @transform_19, window_bounds = array<i64: 1, 8, 32>}]} {
    %c0 = arith.constant 0 : index
    %c0_0 = arith.constant 0 : index
    %c0_1 = arith.constant 0 : index
    %c0_2 = arith.constant 0 : index
    %0 = vector.load %arg2[%c0, %c0_0, %c0_1, %c0_2] : memref<1x8x32x32xf32, #tpu.memory_space<vmem>>, vector<1x8x32x32xf32>
    %1 = vector.shape_cast %0 : vector<1x8x32x32xf32> to vector<8x32x32xf32>
    %c0_3 = arith.constant 0 : index
    %c0_4 = arith.constant 0 : index
    %c0_5 = arith.constant 0 : index
    %c0_6 = arith.constant 0 : index
    %2 = vector.load %arg3[%c0_3, %c0_4, %c0_5, %c0_6] : memref<1x2x32x32xf32, #tpu.memory_space<vmem>>, vector<1x2x32x32xf32>
    %3 = vector.shape_cast %2 : vector<1x2x32x32xf32> to vector<2x32x32xf32>
    %c0_7 = arith.constant 0 : index
    %c0_8 = arith.constant 0 : index
    %c0_9 = arith.constant 0 : index
    %c0_10 = arith.constant 0 : index
    %4 = vector.load %arg4[%c0_7, %c0_8, %c0_9, %c0_10] : memref<1x2x32x32xf32, #tpu.memory_space<vmem>>, vector<1x2x32x32xf32>
    %5 = vector.shape_cast %4 : vector<1x2x32x32xf32> to vector<2x32x32xf32>
    %c0_i32 = arith.constant 0 : i32
    %6 = arith.cmpi eq, %arg1, %c0_i32 : i32
    %7 = vector.extract_strided_slice %1 {offsets = [1, 0, 0], sizes = [1, 32, 32], strides = [1, 1, 1]} : vector<8x32x32xf32> to vector<1x32x32xf32>
    %8 = vector.extract_strided_slice %3 {offsets = [1, 0, 0], sizes = [1, 32, 32], strides = [1, 1, 1]} : vector<2x32x32xf32> to vector<1x32x32xf32>
    %9 = arith.select %6, %7, %8 : vector<1x32x32xf32>
    %c3_i32 = arith.constant 3 : i32
    %10 = arith.cmpi eq, %arg1, %c3_i32 : i32
    %11 = vector.extract_strided_slice %1 {offsets = [6, 0, 0], sizes = [1, 32, 32], strides = [1, 1, 1]} : vector<8x32x32xf32> to vector<1x32x32xf32>
    %12 = vector.extract_strided_slice %5 {offsets = [0, 0, 0], sizes = [1, 32, 32], strides = [1, 1, 1]} : vector<2x32x32xf32> to vector<1x32x32xf32>
    %13 = arith.select %10, %11, %12 : vector<1x32x32xf32>
    %14 = vector.extract_strided_slice %3 {offsets = [0, 0, 0], sizes = [1, 32, 32], strides = [1, 1, 1]} : vector<2x32x32xf32> to vector<1x32x32xf32>
    %15 = vector.extract_strided_slice %5 {offsets = [1, 0, 0], sizes = [1, 32, 32], strides = [1, 1, 1]} : vector<2x32x32xf32> to vector<1x32x32xf32>
    %16 = tpu.concatenate %14, %9, %1, %13, %15 in 0 : vector<1x32x32xf32>, vector<1x32x32xf32>, vector<8x32x32xf32>, vector<1x32x32xf32>, vector<1x32x32xf32> -> vector<12x32x32xf32>
    %c0_11 = arith.constant 0 : index
    %c0_12 = arith.constant 0 : index
    %c0_13 = arith.constant 0 : index
    %c0_14 = arith.constant 0 : index
    %17 = vector.load %arg5[%c0_11, %c0_12, %c0_13, %c0_14] : memref<1x8x32x32xf32, #tpu.memory_space<vmem>>, vector<1x8x32x32xf32>
    %18 = vector.shape_cast %17 : vector<1x8x32x32xf32> to vector<8x32x32xf32>
    %c0_15 = arith.constant 0 : index
    %c0_16 = arith.constant 0 : index
    %c0_17 = arith.constant 0 : index
    %c0_18 = arith.constant 0 : index
    %19 = vector.load %arg6[%c0_15, %c0_16, %c0_17, %c0_18] : memref<1x2x32x32xf32, #tpu.memory_space<vmem>>, vector<1x2x32x32xf32>
    %20 = vector.shape_cast %19 : vector<1x2x32x32xf32> to vector<2x32x32xf32>
    %c0_19 = arith.constant 0 : index
    %c0_20 = arith.constant 0 : index
    %c0_21 = arith.constant 0 : index
    %c0_22 = arith.constant 0 : index
    %21 = vector.load %arg7[%c0_19, %c0_20, %c0_21, %c0_22] : memref<1x2x32x32xf32, #tpu.memory_space<vmem>>, vector<1x2x32x32xf32>
    %22 = vector.shape_cast %21 : vector<1x2x32x32xf32> to vector<2x32x32xf32>
    %c0_i32_23 = arith.constant 0 : i32
    %23 = arith.cmpi eq, %arg1, %c0_i32_23 : i32
    %24 = vector.extract_strided_slice %18 {offsets = [1, 0, 0], sizes = [1, 32, 32], strides = [1, 1, 1]} : vector<8x32x32xf32> to vector<1x32x32xf32>
    %25 = vector.extract_strided_slice %20 {offsets = [1, 0, 0], sizes = [1, 32, 32], strides = [1, 1, 1]} : vector<2x32x32xf32> to vector<1x32x32xf32>
    %26 = arith.select %23, %24, %25 : vector<1x32x32xf32>
    %c3_i32_24 = arith.constant 3 : i32
    %27 = arith.cmpi eq, %arg1, %c3_i32_24 : i32
    %28 = vector.extract_strided_slice %18 {offsets = [6, 0, 0], sizes = [1, 32, 32], strides = [1, 1, 1]} : vector<8x32x32xf32> to vector<1x32x32xf32>
    %29 = vector.extract_strided_slice %22 {offsets = [0, 0, 0], sizes = [1, 32, 32], strides = [1, 1, 1]} : vector<2x32x32xf32> to vector<1x32x32xf32>
    %30 = arith.select %27, %28, %29 : vector<1x32x32xf32>
    %31 = vector.extract_strided_slice %20 {offsets = [0, 0, 0], sizes = [1, 32, 32], strides = [1, 1, 1]} : vector<2x32x32xf32> to vector<1x32x32xf32>
    %32 = vector.extract_strided_slice %22 {offsets = [1, 0, 0], sizes = [1, 32, 32], strides = [1, 1, 1]} : vector<2x32x32xf32> to vector<1x32x32xf32>
    %33 = tpu.concatenate %31, %26, %18, %30, %32 in 0 : vector<1x32x32xf32>, vector<1x32x32xf32>, vector<8x32x32xf32>, vector<1x32x32xf32>, vector<1x32x32xf32> -> vector<12x32x32xf32>
    %34 = vector.shape_cast %16 : vector<12x32x32xf32> to vector<384x32xf32>
    %c0_25 = arith.constant 0 : index
    %c0_26 = arith.constant 0 : index
    %35 = vector.load %arg11[%c0_25, %c0_26] : memref<32x64xf32, #tpu.memory_space<vmem>>, vector<32x64xf32>
    %cst = arith.constant dense<0.000000e+00> : vector<384x64xf32>
    %36 = tpu.matmul %34, %35, %cst {dimension_numbers = #tpu.dot_dimension_numbers<[1], [0], [0], [1], [0, 0, 1, 1], [], []>} : vector<384x32xf32>, vector<32x64xf32>, vector<384x64xf32> -> vector<384x64xf32>
    %37 = vector.shape_cast %33 : vector<12x32x32xf32> to vector<384x32xf32>
    %c0_27 = arith.constant 0 : index
    %c0_28 = arith.constant 0 : index
    %38 = vector.load %arg12[%c0_27, %c0_28] : memref<32x64xf32, #tpu.memory_space<vmem>>, vector<32x64xf32>
    %cst_29 = arith.constant dense<0.000000e+00> : vector<384x64xf32>
    %39 = tpu.matmul %37, %38, %cst_29 {dimension_numbers = #tpu.dot_dimension_numbers<[1], [0], [0], [1], [0, 0, 1, 1], [], []>} : vector<384x32xf32>, vector<32x64xf32>, vector<384x64xf32> -> vector<384x64xf32>
    %40 = arith.addf %36, %39 : vector<384x64xf32>
    %c0_30 = arith.constant 0 : index
    %c0_31 = arith.constant 0 : index
    %41 = vector.load %arg13[%c0_30, %c0_31] : memref<1x64xf32, #tpu.memory_space<vmem>>, vector<1x64xf32>
    %42 = vector.broadcast %41 : vector<1x64xf32> to vector<384x64xf32>
    %43 = arith.addf %40, %42 : vector<384x64xf32>
    %cst_32 = arith.constant 0.000000e+00 : f32
    %44 = vector.broadcast %cst_32 : f32 to vector<384x64xf32>
    %45 = arith.cmpf ogt, %43, %44 : vector<384x64xf32>
    %cst_33 = arith.constant 0.00999999977 : f32
    %46 = vector.broadcast %cst_33 : f32 to vector<384x64xf32>
    %47 = arith.mulf %46, %43 : vector<384x64xf32>
    %48 = arith.select %45, %43, %47 : vector<384x64xi1>, vector<384x64xf32>
    %49 = vector.shape_cast %48 : vector<384x64xf32> to vector<12x32x64xf32>
    %50 = vector.extract_strided_slice %49 {offsets = [0, 1, 0], sizes = [12, 1, 64], strides = [1, 1, 1]} : vector<12x32x64xf32> to vector<12x1x64xf32>
    %51 = vector.extract_strided_slice %49 {offsets = [0, 30, 0], sizes = [12, 1, 64], strides = [1, 1, 1]} : vector<12x32x64xf32> to vector<12x1x64xf32>
    %52 = tpu.concatenate %50, %49, %51 in 1 : vector<12x1x64xf32>, vector<12x32x64xf32>, vector<12x1x64xf32> -> vector<12x34x64xf32>
    %c0_34 = arith.constant 0 : index
    %c0_35 = arith.constant 0 : index
    %c0_36 = arith.constant 0 : index
    %53 = vector.load %arg14[%c0_34, %c0_35, %c0_36] : memref<9x64x32xf32, #tpu.memory_space<vmem>>, vector<9x64x32xf32>
    %cst_37 = arith.constant 0.000000e+00 : f32
    %54 = vector.broadcast %cst_37 : f32 to vector<320x32xf32>
    %55 = vector.extract_strided_slice %52 {offsets = [0, 0, 0], sizes = [10, 32, 64], strides = [1, 1, 1]} : vector<12x34x64xf32> to vector<10x32x64xf32>
    %56 = vector.shape_cast %55 : vector<10x32x64xf32> to vector<320x64xf32>
    %57 = vector.extract_strided_slice %53 {offsets = [0, 0, 0], sizes = [1, 64, 32], strides = [1, 1, 1]} : vector<9x64x32xf32> to vector<1x64x32xf32>
    %58 = vector.shape_cast %57 : vector<1x64x32xf32> to vector<64x32xf32>
    %cst_38 = arith.constant dense<0.000000e+00> : vector<320x32xf32>
    %59 = tpu.matmul %56, %58, %cst_38 {dimension_numbers = #tpu.dot_dimension_numbers<[1], [0], [0], [1], [0, 0, 1, 1], [], []>} : vector<320x64xf32>, vector<64x32xf32>, vector<320x32xf32> -> vector<320x32xf32>
    %60 = arith.addf %54, %59 : vector<320x32xf32>
    %61 = vector.extract_strided_slice %52 {offsets = [0, 1, 0], sizes = [10, 32, 64], strides = [1, 1, 1]} : vector<12x34x64xf32> to vector<10x32x64xf32>
    %62 = vector.shape_cast %61 : vector<10x32x64xf32> to vector<320x64xf32>
    %63 = vector.extract_strided_slice %53 {offsets = [1, 0, 0], sizes = [1, 64, 32], strides = [1, 1, 1]} : vector<9x64x32xf32> to vector<1x64x32xf32>
    %64 = vector.shape_cast %63 : vector<1x64x32xf32> to vector<64x32xf32>
    %cst_39 = arith.constant dense<0.000000e+00> : vector<320x32xf32>
    %65 = tpu.matmul %62, %64, %cst_39 {dimension_numbers = #tpu.dot_dimension_numbers<[1], [0], [0], [1], [0, 0, 1, 1], [], []>} : vector<320x64xf32>, vector<64x32xf32>, vector<320x32xf32> -> vector<320x32xf32>
    %66 = arith.addf %60, %65 : vector<320x32xf32>
    %67 = vector.extract_strided_slice %52 {offsets = [0, 2, 0], sizes = [10, 32, 64], strides = [1, 1, 1]} : vector<12x34x64xf32> to vector<10x32x64xf32>
    %68 = vector.shape_cast %67 : vector<10x32x64xf32> to vector<320x64xf32>
    %69 = vector.extract_strided_slice %53 {offsets = [2, 0, 0], sizes = [1, 64, 32], strides = [1, 1, 1]} : vector<9x64x32xf32> to vector<1x64x32xf32>
    %70 = vector.shape_cast %69 : vector<1x64x32xf32> to vector<64x32xf32>
    %cst_40 = arith.constant dense<0.000000e+00> : vector<320x32xf32>
    %71 = tpu.matmul %68, %70, %cst_40 {dimension_numbers = #tpu.dot_dimension_numbers<[1], [0], [0], [1], [0, 0, 1, 1], [], []>} : vector<320x64xf32>, vector<64x32xf32>, vector<320x32xf32> -> vector<320x32xf32>
    %72 = arith.addf %66, %71 : vector<320x32xf32>
    %73 = vector.extract_strided_slice %52 {offsets = [1, 0, 0], sizes = [10, 32, 64], strides = [1, 1, 1]} : vector<12x34x64xf32> to vector<10x32x64xf32>
    %74 = vector.shape_cast %73 : vector<10x32x64xf32> to vector<320x64xf32>
    %75 = vector.extract_strided_slice %53 {offsets = [3, 0, 0], sizes = [1, 64, 32], strides = [1, 1, 1]} : vector<9x64x32xf32> to vector<1x64x32xf32>
    %76 = vector.shape_cast %75 : vector<1x64x32xf32> to vector<64x32xf32>
    %cst_41 = arith.constant dense<0.000000e+00> : vector<320x32xf32>
    %77 = tpu.matmul %74, %76, %cst_41 {dimension_numbers = #tpu.dot_dimension_numbers<[1], [0], [0], [1], [0, 0, 1, 1], [], []>} : vector<320x64xf32>, vector<64x32xf32>, vector<320x32xf32> -> vector<320x32xf32>
    %78 = arith.addf %72, %77 : vector<320x32xf32>
    %79 = vector.extract_strided_slice %52 {offsets = [1, 1, 0], sizes = [10, 32, 64], strides = [1, 1, 1]} : vector<12x34x64xf32> to vector<10x32x64xf32>
    %80 = vector.shape_cast %79 : vector<10x32x64xf32> to vector<320x64xf32>
    %81 = vector.extract_strided_slice %53 {offsets = [4, 0, 0], sizes = [1, 64, 32], strides = [1, 1, 1]} : vector<9x64x32xf32> to vector<1x64x32xf32>
    %82 = vector.shape_cast %81 : vector<1x64x32xf32> to vector<64x32xf32>
    %cst_42 = arith.constant dense<0.000000e+00> : vector<320x32xf32>
    %83 = tpu.matmul %80, %82, %cst_42 {dimension_numbers = #tpu.dot_dimension_numbers<[1], [0], [0], [1], [0, 0, 1, 1], [], []>} : vector<320x64xf32>, vector<64x32xf32>, vector<320x32xf32> -> vector<320x32xf32>
    %84 = arith.addf %78, %83 : vector<320x32xf32>
    %85 = vector.extract_strided_slice %52 {offsets = [1, 2, 0], sizes = [10, 32, 64], strides = [1, 1, 1]} : vector<12x34x64xf32> to vector<10x32x64xf32>
    %86 = vector.shape_cast %85 : vector<10x32x64xf32> to vector<320x64xf32>
    %87 = vector.extract_strided_slice %53 {offsets = [5, 0, 0], sizes = [1, 64, 32], strides = [1, 1, 1]} : vector<9x64x32xf32> to vector<1x64x32xf32>
    %88 = vector.shape_cast %87 : vector<1x64x32xf32> to vector<64x32xf32>
    %cst_43 = arith.constant dense<0.000000e+00> : vector<320x32xf32>
    %89 = tpu.matmul %86, %88, %cst_43 {dimension_numbers = #tpu.dot_dimension_numbers<[1], [0], [0], [1], [0, 0, 1, 1], [], []>} : vector<320x64xf32>, vector<64x32xf32>, vector<320x32xf32> -> vector<320x32xf32>
    %90 = arith.addf %84, %89 : vector<320x32xf32>
    %91 = vector.extract_strided_slice %52 {offsets = [2, 0, 0], sizes = [10, 32, 64], strides = [1, 1, 1]} : vector<12x34x64xf32> to vector<10x32x64xf32>
    %92 = vector.shape_cast %91 : vector<10x32x64xf32> to vector<320x64xf32>
    %93 = vector.extract_strided_slice %53 {offsets = [6, 0, 0], sizes = [1, 64, 32], strides = [1, 1, 1]} : vector<9x64x32xf32> to vector<1x64x32xf32>
    %94 = vector.shape_cast %93 : vector<1x64x32xf32> to vector<64x32xf32>
    %cst_44 = arith.constant dense<0.000000e+00> : vector<320x32xf32>
    %95 = tpu.matmul %92, %94, %cst_44 {dimension_numbers = #tpu.dot_dimension_numbers<[1], [0], [0], [1], [0, 0, 1, 1], [], []>} : vector<320x64xf32>, vector<64x32xf32>, vector<320x32xf32> -> vector<320x32xf32>
    %96 = arith.addf %90, %95 : vector<320x32xf32>
    %97 = vector.extract_strided_slice %52 {offsets = [2, 1, 0], sizes = [10, 32, 64], strides = [1, 1, 1]} : vector<12x34x64xf32> to vector<10x32x64xf32>
    %98 = vector.shape_cast %97 : vector<10x32x64xf32> to vector<320x64xf32>
    %99 = vector.extract_strided_slice %53 {offsets = [7, 0, 0], sizes = [1, 64, 32], strides = [1, 1, 1]} : vector<9x64x32xf32> to vector<1x64x32xf32>
    %100 = vector.shape_cast %99 : vector<1x64x32xf32> to vector<64x32xf32>
    %cst_45 = arith.constant dense<0.000000e+00> : vector<320x32xf32>
    %101 = tpu.matmul %98, %100, %cst_45 {dimension_numbers = #tpu.dot_dimension_numbers<[1], [0], [0], [1], [0, 0, 1, 1], [], []>} : vector<320x64xf32>, vector<64x32xf32>, vector<320x32xf32> -> vector<320x32xf32>
    %102 = arith.addf %96, %101 : vector<320x32xf32>
    %103 = vector.extract_strided_slice %52 {offsets = [2, 2, 0], sizes = [10, 32, 64], strides = [1, 1, 1]} : vector<12x34x64xf32> to vector<10x32x64xf32>
    %104 = vector.shape_cast %103 : vector<10x32x64xf32> to vector<320x64xf32>
    %105 = vector.extract_strided_slice %53 {offsets = [8, 0, 0], sizes = [1, 64, 32], strides = [1, 1, 1]} : vector<9x64x32xf32> to vector<1x64x32xf32>
    %106 = vector.shape_cast %105 : vector<1x64x32xf32> to vector<64x32xf32>
    %cst_46 = arith.constant dense<0.000000e+00> : vector<320x32xf32>
    %107 = tpu.matmul %104, %106, %cst_46 {dimension_numbers = #tpu.dot_dimension_numbers<[1], [0], [0], [1], [0, 0, 1, 1], [], []>} : vector<320x64xf32>, vector<64x32xf32>, vector<320x32xf32> -> vector<320x32xf32>
    %108 = arith.addf %102, %107 : vector<320x32xf32>
    %c0_47 = arith.constant 0 : index
    %c0_48 = arith.constant 0 : index
    %109 = vector.load %arg15[%c0_47, %c0_48] : memref<1x32xf32, #tpu.memory_space<vmem>>, vector<1x32xf32>
    %110 = vector.broadcast %109 : vector<1x32xf32> to vector<320x32xf32>
    %111 = arith.addf %108, %110 : vector<320x32xf32>
    %cst_49 = arith.constant 0.000000e+00 : f32
    %112 = vector.broadcast %cst_49 : f32 to vector<320x32xf32>
    %113 = arith.cmpf ogt, %111, %112 : vector<320x32xf32>
    %cst_50 = arith.constant 0.00999999977 : f32
    %114 = vector.broadcast %cst_50 : f32 to vector<320x32xf32>
    %115 = arith.mulf %114, %111 : vector<320x32xf32>
    %116 = arith.select %113, %111, %115 : vector<320x32xi1>, vector<320x32xf32>
    %117 = vector.shape_cast %116 : vector<320x32xf32> to vector<10x32x32xf32>
    %c0_i32_51 = arith.constant 0 : i32
    %118 = arith.cmpi eq, %arg1, %c0_i32_51 : i32
    %119 = vector.extract_strided_slice %117 {offsets = [2, 0, 0], sizes = [1, 32, 32], strides = [1, 1, 1]} : vector<10x32x32xf32> to vector<1x32x32xf32>
    %120 = vector.extract_strided_slice %117 {offsets = [0, 0, 0], sizes = [1, 32, 32], strides = [1, 1, 1]} : vector<10x32x32xf32> to vector<1x32x32xf32>
    %121 = arith.select %118, %119, %120 : vector<1x32x32xf32>
    %c3_i32_52 = arith.constant 3 : i32
    %122 = arith.cmpi eq, %arg1, %c3_i32_52 : i32
    %123 = vector.extract_strided_slice %117 {offsets = [7, 0, 0], sizes = [1, 32, 32], strides = [1, 1, 1]} : vector<10x32x32xf32> to vector<1x32x32xf32>
    %124 = vector.extract_strided_slice %117 {offsets = [9, 0, 0], sizes = [1, 32, 32], strides = [1, 1, 1]} : vector<10x32x32xf32> to vector<1x32x32xf32>
    %125 = arith.select %122, %123, %124 : vector<1x32x32xf32>
    %126 = vector.extract_strided_slice %117 {offsets = [1, 0, 0], sizes = [8, 32, 32], strides = [1, 1, 1]} : vector<10x32x32xf32> to vector<8x32x32xf32>
    %127 = tpu.concatenate %121, %126, %125 in 0 : vector<1x32x32xf32>, vector<8x32x32xf32>, vector<1x32x32xf32> -> vector<10x32x32xf32>
    %c0_53 = arith.constant 0 : index
    %c0_54 = arith.constant 0 : index
    %c0_55 = arith.constant 0 : index
    %c0_56 = arith.constant 0 : index
    %128 = vector.load %arg8[%c0_53, %c0_54, %c0_55, %c0_56] : memref<1x8x32x32xf32, #tpu.memory_space<vmem>>, vector<1x8x32x32xf32>
    %129 = vector.shape_cast %128 : vector<1x8x32x32xf32> to vector<8x32x32xf32>
    %c0_i32_57 = arith.constant 0 : i32
    %130 = arith.cmpi eq, %arg1, %c0_i32_57 : i32
    %131 = vector.extract_strided_slice %129 {offsets = [1, 0, 0], sizes = [1, 32, 32], strides = [1, 1, 1]} : vector<8x32x32xf32> to vector<1x32x32xf32>
    %c0_58 = arith.constant 0 : index
    %c0_59 = arith.constant 0 : index
    %c0_60 = arith.constant 0 : index
    %c0_61 = arith.constant 0 : index
    %132 = vector.load %arg9[%c0_58, %c0_59, %c0_60, %c0_61] : memref<1x1x32x32xf32, #tpu.memory_space<vmem>>, vector<1x1x32x32xf32>
    %133 = vector.shape_cast %132 : vector<1x1x32x32xf32> to vector<1x32x32xf32>
    %134 = arith.select %130, %131, %133 : vector<1x32x32xf32>
    %c3_i32_62 = arith.constant 3 : i32
    %135 = arith.cmpi eq, %arg1, %c3_i32_62 : i32
    %136 = vector.extract_strided_slice %129 {offsets = [6, 0, 0], sizes = [1, 32, 32], strides = [1, 1, 1]} : vector<8x32x32xf32> to vector<1x32x32xf32>
    %c0_63 = arith.constant 0 : index
    %c0_64 = arith.constant 0 : index
    %c0_65 = arith.constant 0 : index
    %c0_66 = arith.constant 0 : index
    %137 = vector.load %arg10[%c0_63, %c0_64, %c0_65, %c0_66] : memref<1x1x32x32xf32, #tpu.memory_space<vmem>>, vector<1x1x32x32xf32>
    %138 = vector.shape_cast %137 : vector<1x1x32x32xf32> to vector<1x32x32xf32>
    %139 = arith.select %135, %136, %138 : vector<1x32x32xf32>
    %140 = tpu.concatenate %134, %129, %139 in 0 : vector<1x32x32xf32>, vector<8x32x32xf32>, vector<1x32x32xf32> -> vector<10x32x32xf32>
    %141 = vector.shape_cast %140 : vector<10x32x32xf32> to vector<320x32xf32>
    %c0_67 = arith.constant 0 : index
    %c0_68 = arith.constant 0 : index
    %142 = vector.load %arg16[%c0_67, %c0_68] : memref<32x64xf32, #tpu.memory_space<vmem>>, vector<32x64xf32>
    %cst_69 = arith.constant dense<0.000000e+00> : vector<320x64xf32>
    %143 = tpu.matmul %141, %142, %cst_69 {dimension_numbers = #tpu.dot_dimension_numbers<[1], [0], [0], [1], [0, 0, 1, 1], [], []>} : vector<320x32xf32>, vector<32x64xf32>, vector<320x64xf32> -> vector<320x64xf32>
    %144 = vector.shape_cast %127 : vector<10x32x32xf32> to vector<320x32xf32>
    %c0_70 = arith.constant 0 : index
    %c0_71 = arith.constant 0 : index
    %145 = vector.load %arg17[%c0_70, %c0_71] : memref<32x64xf32, #tpu.memory_space<vmem>>, vector<32x64xf32>
    %cst_72 = arith.constant dense<0.000000e+00> : vector<320x64xf32>
    %146 = tpu.matmul %144, %145, %cst_72 {dimension_numbers = #tpu.dot_dimension_numbers<[1], [0], [0], [1], [0, 0, 1, 1], [], []>} : vector<320x32xf32>, vector<32x64xf32>, vector<320x64xf32> -> vector<320x64xf32>
    %147 = arith.addf %143, %146 : vector<320x64xf32>
    %c0_73 = arith.constant 0 : index
    %c0_74 = arith.constant 0 : index
    %148 = vector.load %arg18[%c0_73, %c0_74] : memref<1x64xf32, #tpu.memory_space<vmem>>, vector<1x64xf32>
    %149 = vector.broadcast %148 : vector<1x64xf32> to vector<320x64xf32>
    %150 = arith.addf %147, %149 : vector<320x64xf32>
    %cst_75 = arith.constant 0.000000e+00 : f32
    %151 = vector.broadcast %cst_75 : f32 to vector<320x64xf32>
    %152 = arith.cmpf ogt, %150, %151 : vector<320x64xf32>
    %cst_76 = arith.constant 0.00999999977 : f32
    %153 = vector.broadcast %cst_76 : f32 to vector<320x64xf32>
    %154 = arith.mulf %153, %150 : vector<320x64xf32>
    %155 = arith.select %152, %150, %154 : vector<320x64xi1>, vector<320x64xf32>
    %156 = vector.shape_cast %155 : vector<320x64xf32> to vector<10x32x64xf32>
    %157 = vector.extract_strided_slice %156 {offsets = [0, 1, 0], sizes = [10, 1, 64], strides = [1, 1, 1]} : vector<10x32x64xf32> to vector<10x1x64xf32>
    %158 = vector.extract_strided_slice %156 {offsets = [0, 30, 0], sizes = [10, 1, 64], strides = [1, 1, 1]} : vector<10x32x64xf32> to vector<10x1x64xf32>
    %159 = tpu.concatenate %157, %156, %158 in 1 : vector<10x1x64xf32>, vector<10x32x64xf32>, vector<10x1x64xf32> -> vector<10x34x64xf32>
    %c0_77 = arith.constant 0 : index
    %c0_78 = arith.constant 0 : index
    %160 = vector.load %arg19[%c0_77, %c0_78] : memref<9x64xf32, #tpu.memory_space<vmem>>, vector<9x64xf32>
    %cst_79 = arith.constant 0.000000e+00 : f32
    %161 = vector.broadcast %cst_79 : f32 to vector<8x32x64xf32>
    %162 = vector.extract_strided_slice %160 {offsets = [0, 0], sizes = [1, 64], strides = [1, 1]} : vector<9x64xf32> to vector<1x64xf32>
    %163 = vector.shape_cast %162 : vector<1x64xf32> to vector<1x1x64xf32>
    %164 = vector.extract_strided_slice %159 {offsets = [0, 0, 0], sizes = [8, 32, 64], strides = [1, 1, 1]} : vector<10x34x64xf32> to vector<8x32x64xf32>
    %165 = vector.broadcast %163 : vector<1x1x64xf32> to vector<8x32x64xf32>
    %166 = arith.mulf %164, %165 : vector<8x32x64xf32>
    %167 = arith.addf %161, %166 : vector<8x32x64xf32>
    %168 = vector.extract_strided_slice %160 {offsets = [1, 0], sizes = [1, 64], strides = [1, 1]} : vector<9x64xf32> to vector<1x64xf32>
    %169 = vector.shape_cast %168 : vector<1x64xf32> to vector<1x1x64xf32>
    %170 = vector.extract_strided_slice %159 {offsets = [0, 1, 0], sizes = [8, 32, 64], strides = [1, 1, 1]} : vector<10x34x64xf32> to vector<8x32x64xf32>
    %171 = vector.broadcast %169 : vector<1x1x64xf32> to vector<8x32x64xf32>
    %172 = arith.mulf %170, %171 : vector<8x32x64xf32>
    %173 = arith.addf %167, %172 : vector<8x32x64xf32>
    %174 = vector.extract_strided_slice %160 {offsets = [2, 0], sizes = [1, 64], strides = [1, 1]} : vector<9x64xf32> to vector<1x64xf32>
    %175 = vector.shape_cast %174 : vector<1x64xf32> to vector<1x1x64xf32>
    %176 = vector.extract_strided_slice %159 {offsets = [0, 2, 0], sizes = [8, 32, 64], strides = [1, 1, 1]} : vector<10x34x64xf32> to vector<8x32x64xf32>
    %177 = vector.broadcast %175 : vector<1x1x64xf32> to vector<8x32x64xf32>
    %178 = arith.mulf %176, %177 : vector<8x32x64xf32>
    %179 = arith.addf %173, %178 : vector<8x32x64xf32>
    %180 = vector.extract_strided_slice %160 {offsets = [3, 0], sizes = [1, 64], strides = [1, 1]} : vector<9x64xf32> to vector<1x64xf32>
    %181 = vector.shape_cast %180 : vector<1x64xf32> to vector<1x1x64xf32>
    %182 = vector.extract_strided_slice %159 {offsets = [1, 0, 0], sizes = [8, 32, 64], strides = [1, 1, 1]} : vector<10x34x64xf32> to vector<8x32x64xf32>
    %183 = vector.broadcast %181 : vector<1x1x64xf32> to vector<8x32x64xf32>
    %184 = arith.mulf %182, %183 : vector<8x32x64xf32>
    %185 = arith.addf %179, %184 : vector<8x32x64xf32>
    %186 = vector.extract_strided_slice %160 {offsets = [4, 0], sizes = [1, 64], strides = [1, 1]} : vector<9x64xf32> to vector<1x64xf32>
    %187 = vector.shape_cast %186 : vector<1x64xf32> to vector<1x1x64xf32>
    %188 = vector.extract_strided_slice %159 {offsets = [1, 1, 0], sizes = [8, 32, 64], strides = [1, 1, 1]} : vector<10x34x64xf32> to vector<8x32x64xf32>
    %189 = vector.broadcast %187 : vector<1x1x64xf32> to vector<8x32x64xf32>
    %190 = arith.mulf %188, %189 : vector<8x32x64xf32>
    %191 = arith.addf %185, %190 : vector<8x32x64xf32>
    %192 = vector.extract_strided_slice %160 {offsets = [5, 0], sizes = [1, 64], strides = [1, 1]} : vector<9x64xf32> to vector<1x64xf32>
    %193 = vector.shape_cast %192 : vector<1x64xf32> to vector<1x1x64xf32>
    %194 = vector.extract_strided_slice %159 {offsets = [1, 2, 0], sizes = [8, 32, 64], strides = [1, 1, 1]} : vector<10x34x64xf32> to vector<8x32x64xf32>
    %195 = vector.broadcast %193 : vector<1x1x64xf32> to vector<8x32x64xf32>
    %196 = arith.mulf %194, %195 : vector<8x32x64xf32>
    %197 = arith.addf %191, %196 : vector<8x32x64xf32>
    %198 = vector.extract_strided_slice %160 {offsets = [6, 0], sizes = [1, 64], strides = [1, 1]} : vector<9x64xf32> to vector<1x64xf32>
    %199 = vector.shape_cast %198 : vector<1x64xf32> to vector<1x1x64xf32>
    %200 = vector.extract_strided_slice %159 {offsets = [2, 0, 0], sizes = [8, 32, 64], strides = [1, 1, 1]} : vector<10x34x64xf32> to vector<8x32x64xf32>
    %201 = vector.broadcast %199 : vector<1x1x64xf32> to vector<8x32x64xf32>
    %202 = arith.mulf %200, %201 : vector<8x32x64xf32>
    %203 = arith.addf %197, %202 : vector<8x32x64xf32>
    %204 = vector.extract_strided_slice %160 {offsets = [7, 0], sizes = [1, 64], strides = [1, 1]} : vector<9x64xf32> to vector<1x64xf32>
    %205 = vector.shape_cast %204 : vector<1x64xf32> to vector<1x1x64xf32>
    %206 = vector.extract_strided_slice %159 {offsets = [2, 1, 0], sizes = [8, 32, 64], strides = [1, 1, 1]} : vector<10x34x64xf32> to vector<8x32x64xf32>
    %207 = vector.broadcast %205 : vector<1x1x64xf32> to vector<8x32x64xf32>
    %208 = arith.mulf %206, %207 : vector<8x32x64xf32>
    %209 = arith.addf %203, %208 : vector<8x32x64xf32>
    %210 = vector.extract_strided_slice %160 {offsets = [8, 0], sizes = [1, 64], strides = [1, 1]} : vector<9x64xf32> to vector<1x64xf32>
    %211 = vector.shape_cast %210 : vector<1x64xf32> to vector<1x1x64xf32>
    %212 = vector.extract_strided_slice %159 {offsets = [2, 2, 0], sizes = [8, 32, 64], strides = [1, 1, 1]} : vector<10x34x64xf32> to vector<8x32x64xf32>
    %213 = vector.broadcast %211 : vector<1x1x64xf32> to vector<8x32x64xf32>
    %214 = arith.mulf %212, %213 : vector<8x32x64xf32>
    %215 = arith.addf %209, %214 : vector<8x32x64xf32>
    %cst_80 = arith.constant dense<0.000000e+00> : vector<8x32xf32>
    %216 = vector.multi_reduction <add>, %215, %cst_80 [2] : vector<8x32x64xf32> to vector<8x32xf32>
    %c0_81 = arith.constant 0 : index
    %c0_82 = arith.constant 0 : index
    %217 = vector.load %arg20[%c0_81, %c0_82] : memref<1x1xf32, #tpu.memory_space<vmem>>, vector<1x1xf32>
    %218 = vector.broadcast %217 : vector<1x1xf32> to vector<8x32xf32>
    %219 = arith.addf %216, %218 : vector<8x32xf32>
    %c0_83 = arith.constant 0 : index
    %c0_84 = arith.constant 0 : index
    %c0_85 = arith.constant 0 : index
    %220 = vector.load %arg21[%c0_83, %c0_84, %c0_85] : memref<1x8x32xf32, #tpu.memory_space<vmem>>, vector<1x8x32xf32>
    %221 = vector.shape_cast %220 : vector<1x8x32xf32> to vector<8x32xf32>
    %222 = vector.shape_cast %219 : vector<8x32xf32> to vector<1x8x32xf32>
    tpu.vector_store %arg21[%c0_83, %c0_84, %c0_85], %222 {strides = array<i32>} : memref<1x8x32xf32, #tpu.memory_space<vmem>>, vector<1x8x32xf32>,
    return
  }
  func.func @transform_0(%arg0: i32, %arg1: i32) -> (i32, i32, i32, i32) {
    %c0_i32 = arith.constant 0 : i32
    %c0_i32_0 = arith.constant 0 : i32
    %c0_i32_1 = arith.constant 0 : i32
    return %arg0, %arg1, %c0_i32, %c0_i32_0 : i32, i32, i32, i32
  }
  func.func @transform_1(%arg0: i32, %arg1: i32) -> (i32, i32, i32, i32) {
    %c4_i32 = arith.constant 4 : i32
    %0 = arith.muli %arg1, %c4_i32 : i32
    %c1_i32 = arith.constant 1 : i32
    %1 = arith.subi %0, %c1_i32 : i32
    %c0_i32 = arith.constant 0 : i32
    %2 = arith.maxsi %1, %c0_i32 : i32
    %c0_i32_0 = arith.constant 0 : i32
    %c0_i32_1 = arith.constant 0 : i32
    %c0_i32_2 = arith.constant 0 : i32
    return %arg0, %2, %c0_i32_0, %c0_i32_1 : i32, i32, i32, i32
  }
  func.func @transform_2(%arg0: i32, %arg1: i32) -> (i32, i32, i32, i32) {
    %c1_i32 = arith.constant 1 : i32
    %0 = arith.addi %arg1, %c1_i32 : i32
    %c4_i32 = arith.constant 4 : i32
    %1 = arith.muli %0, %c4_i32 : i32
    %c15_i32 = arith.constant 15 : i32
    %2 = arith.minsi %1, %c15_i32 : i32
    %c0_i32 = arith.constant 0 : i32
    %c0_i32_0 = arith.constant 0 : i32
    %c0_i32_1 = arith.constant 0 : i32
    return %arg0, %2, %c0_i32, %c0_i32_0 : i32, i32, i32, i32
  }
  func.func @transform_3(%arg0: i32, %arg1: i32) -> (i32, i32, i32, i32) {
    %c0_i32 = arith.constant 0 : i32
    %c0_i32_0 = arith.constant 0 : i32
    %c0_i32_1 = arith.constant 0 : i32
    return %arg0, %arg1, %c0_i32, %c0_i32_0 : i32, i32, i32, i32
  }
  func.func @transform_4(%arg0: i32, %arg1: i32) -> (i32, i32, i32, i32) {
    %c4_i32 = arith.constant 4 : i32
    %0 = arith.muli %arg1, %c4_i32 : i32
    %c1_i32 = arith.constant 1 : i32
    %1 = arith.subi %0, %c1_i32 : i32
    %c0_i32 = arith.constant 0 : i32
    %2 = arith.maxsi %1, %c0_i32 : i32
    %c0_i32_0 = arith.constant 0 : i32
    %c0_i32_1 = arith.constant 0 : i32
    %c0_i32_2 = arith.constant 0 : i32
    return %arg0, %2, %c0_i32_0, %c0_i32_1 : i32, i32, i32, i32
  }
  func.func @transform_5(%arg0: i32, %arg1: i32) -> (i32, i32, i32, i32) {
    %c1_i32 = arith.constant 1 : i32
    %0 = arith.addi %arg1, %c1_i32 : i32
    %c4_i32 = arith.constant 4 : i32
    %1 = arith.muli %0, %c4_i32 : i32
    %c15_i32 = arith.constant 15 : i32
    %2 = arith.minsi %1, %c15_i32 : i32
    %c0_i32 = arith.constant 0 : i32
    %c0_i32_0 = arith.constant 0 : i32
    %c0_i32_1 = arith.constant 0 : i32
    return %arg0, %2, %c0_i32, %c0_i32_0 : i32, i32, i32, i32
  }
  func.func @transform_6(%arg0: i32, %arg1: i32) -> (i32, i32, i32, i32) {
    %c0_i32 = arith.constant 0 : i32
    %c0_i32_0 = arith.constant 0 : i32
    %c0_i32_1 = arith.constant 0 : i32
    return %arg0, %arg1, %c0_i32, %c0_i32_0 : i32, i32, i32, i32
  }
  func.func @transform_7(%arg0: i32, %arg1: i32) -> (i32, i32, i32, i32) {
    %c8_i32 = arith.constant 8 : i32
    %0 = arith.muli %arg1, %c8_i32 : i32
    %c1_i32 = arith.constant 1 : i32
    %1 = arith.subi %0, %c1_i32 : i32
    %c0_i32 = arith.constant 0 : i32
    %2 = arith.maxsi %1, %c0_i32 : i32
    %c0_i32_0 = arith.constant 0 : i32
    %c0_i32_1 = arith.constant 0 : i32
    %c0_i32_2 = arith.constant 0 : i32
    return %arg0, %2, %c0_i32_0, %c0_i32_1 : i32, i32, i32, i32
  }
  func.func @transform_8(%arg0: i32, %arg1: i32) -> (i32, i32, i32, i32) {
    %c1_i32 = arith.constant 1 : i32
    %0 = arith.addi %arg1, %c1_i32 : i32
    %c8_i32 = arith.constant 8 : i32
    %1 = arith.muli %0, %c8_i32 : i32
    %c31_i32 = arith.constant 31 : i32
    %2 = arith.minsi %1, %c31_i32 : i32
    %c0_i32 = arith.constant 0 : i32
    %c0_i32_0 = arith.constant 0 : i32
    %c0_i32_1 = arith.constant 0 : i32
    return %arg0, %2, %c0_i32, %c0_i32_0 : i32, i32, i32, i32
  }
  func.func @transform_9(%arg0: i32, %arg1: i32) -> (i32, i32) {
    %c0_i32 = arith.constant 0 : i32
    %c0_i32_0 = arith.constant 0 : i32
    %c0_i32_1 = arith.constant 0 : i32
    return %c0_i32, %c0_i32_0 : i32, i32
  }
  func.func @transform_10(%arg0: i32, %arg1: i32) -> (i32, i32) {
    %c0_i32 = arith.constant 0 : i32
    %c0_i32_0 = arith.constant 0 : i32
    %c0_i32_1 = arith.constant 0 : i32
    return %c0_i32, %c0_i32_0 : i32, i32
  }
  func.func @transform_11(%arg0: i32, %arg1: i32) -> (i32, i32) {
    %c0_i32 = arith.constant 0 : i32
    %c0_i32_0 = arith.constant 0 : i32
    %c0_i32_1 = arith.constant 0 : i32
    return %c0_i32, %c0_i32_0 : i32, i32
  }
  func.func @transform_12(%arg0: i32, %arg1: i32) -> (i32, i32, i32) {
    %c0_i32 = arith.constant 0 : i32
    %c0_i32_0 = arith.constant 0 : i32
    %c0_i32_1 = arith.constant 0 : i32
    %c0_i32_2 = arith.constant 0 : i32
    return %c0_i32, %c0_i32_0, %c0_i32_1 : i32, i32, i32
  }
  func.func @transform_13(%arg0: i32, %arg1: i32) -> (i32, i32) {
    %c0_i32 = arith.constant 0 : i32
    %c0_i32_0 = arith.constant 0 : i32
    %c0_i32_1 = arith.constant 0 : i32
    return %c0_i32, %c0_i32_0 : i32, i32
  }
  func.func @transform_14(%arg0: i32, %arg1: i32) -> (i32, i32) {
    %c0_i32 = arith.constant 0 : i32
    %c0_i32_0 = arith.constant 0 : i32
    %c0_i32_1 = arith.constant 0 : i32
    return %c0_i32, %c0_i32_0 : i32, i32
  }
  func.func @transform_15(%arg0: i32, %arg1: i32) -> (i32, i32) {
    %c0_i32 = arith.constant 0 : i32
    %c0_i32_0 = arith.constant 0 : i32
    %c0_i32_1 = arith.constant 0 : i32
    return %c0_i32, %c0_i32_0 : i32, i32
  }
  func.func @transform_16(%arg0: i32, %arg1: i32) -> (i32, i32) {
    %c0_i32 = arith.constant 0 : i32
    %c0_i32_0 = arith.constant 0 : i32
    %c0_i32_1 = arith.constant 0 : i32
    return %c0_i32, %c0_i32_0 : i32, i32
  }
  func.func @transform_17(%arg0: i32, %arg1: i32) -> (i32, i32) {
    %c0_i32 = arith.constant 0 : i32
    %c0_i32_0 = arith.constant 0 : i32
    %c0_i32_1 = arith.constant 0 : i32
    return %c0_i32, %c0_i32_0 : i32, i32
  }
  func.func @transform_18(%arg0: i32, %arg1: i32) -> (i32, i32) {
    %c0_i32 = arith.constant 0 : i32
    %c0_i32_0 = arith.constant 0 : i32
    %c0_i32_1 = arith.constant 0 : i32
    return %c0_i32, %c0_i32_0 : i32, i32
  }
  func.func @transform_19(%arg0: i32, %arg1: i32) -> (i32, i32, i32) {
    %c0_i32 = arith.constant 0 : i32
    %c0_i32_0 = arith.constant 0 : i32
    return %arg0, %arg1, %c0_i32 : i32, i32, i32
  }
}

</mosaic_0001>

<bundles_post_ra>
// kernel: tsfuse_final_fuse.1
= control target key start
LH: loop header
LB: loop body
LE: loop exit
PB: predicated region body
PF: predicated region fallthrough
CT: control target
= control target key end

     0   :  { %s17153_s0 = inlined_call_operand.vmem [shape: f32[2,32,32,32], index: 0, kind: input, shape index: {}, may-alias: {0,1,2}]   ;;  %s17154_s1 = inlined_call_operand.vmem [shape: f32[2,32,32,32], index: 1, kind: input, shape index: {}, may-alias: {0,1,2}]   ;;  %s17155_s2 = inlined_call_operand.vmem [shape: f32[2,32,32,32], index: 2, kind: input, shape index: {}, may-alias: {0,1,2}]   ;;  %s17156_s3 = inlined_call_operand.vmem [shape: f32[2,32,32,32], index: 3, kind: input, shape index: {}, may-alias: {3,4,5}]   ;;  %s17157_s4 = inlined_call_operand.vmem [shape: f32[2,32,32,32], index: 4, kind: input, shape index: {}, may-alias: {3,4,5}]   ;;  %s17158_s5 = inlined_call_operand.vmem [shape: f32[2,32,32,32], index: 5, kind: input, shape index: {}, may-alias: {3,4,5}]   ;;  %s17159_s6 = inlined_call_operand.vmem [shape: f32[2,32,32,32], index: 6, kind: input, shape index: {}, may-alias: {6,7,8}]   ;;  %s17160_s7 = inlined_call_operand.vmem [shape: f32[2,32,32,32], index: 7, kind: input, shape index: {}, may-alias: {6,7,8}]   ;;  %s17161_s8 = inlined_call_operand.vmem [shape: f32[2,32,32,32], index: 8, kind: input, shape index: {}, may-alias: {6,7,8}]   ;;  %s17162_s9 = inlined_call_operand.vmem [shape: f32[32,64], index: 9, kind: input, shape index: {}]   ;;  %s17163_s10 = inlined_call_operand.vmem [shape: f32[32,64], index: 10, kind: input, shape index: {}]   ;;  %s17164_s11 = inlined_call_operand.vmem [shape: f32[1,64], index: 11, kind: input, shape index: {}]   ;;  %s17165_s12 = inlined_call_operand.vmem [shape: f32[9,64,32], index: 12, kind: input, shape index: {}]   ;;  %s17166_s13 = inlined_call_operand.vmem [shape: f32[1,32], index: 13, kind: input, shape index: {}]   ;;  %s17167_s14 = inlined_call_operand.vmem [shape: f32[32,64], index: 14, kind: input, shape index: {}]   ;;  %s17168_s15 = inlined_call_operand.vmem [shape: f32[32,64], index: 15, kind: input, shape index: {}]   ;;  %s17169_s16 = inlined_call_operand.vmem [shape: f32[1,64], index: 16, kind: input, shape index: {}]   ;;  %s17170_s17 = inlined_call_operand.vmem [shape: f32[9,64], index: 17, kind: input, shape index: {}]   ;;  %s17171_s18 = inlined_call_operand.<no memory space> [shape: f32[1,1], index: 18, kind: input, shape index: {}]   ;;  %s17172_s19 = inlined_call_operand.hbm [shape: f32[2,32,32], index: 19, kind: output, shape index: {}]  }
   0x1   :  { %17435 = sst [smem:[#allocation97_spill]] %s17153_s0  ;;  %v24_v0 = vstv %s17171_s18 }
   0x2   :  { %17436 = sst [smem:[#allocation98_spill]] %s17154_s1  ;;  %25 = vst [vmem:[#allocation2] sm:$0x1] %v24_v0 }
   0x3   :  { %17437 = sst [smem:[#allocation99_spill]] %s17155_s2 }
   0x4   :  { %17438 = sst [smem:[#allocation100_spill]] %s17156_s3 }
   0x5   :  { %17439 = sst [smem:[#allocation101_spill]] %s17163_s10 }
   0x6   :  { %17440 = sst [smem:[#allocation102_spill]] %s17169_s16 }
   0x7   :  { %17441 = sst [smem:[#allocation103_spill]] %s17170_s17 }
   0x8   :  { %17442 = sst [smem:[#allocation104_spill]] %s17172_s19 }
   0x9   :  { %26 = vsyncpa [#allocation4], 0 }
   0xa   :  { %28 = vsyncpa [#allocation4 + $0x1], 0  ;;  %s12470_s20 = smov 0   ;;  %s12472_s21 = smov 0  }
   0xb   :  { %s12474_s1 = smov 0   ;;  %s12476_s22 = smov 0  }
   0xc   :  { %s12478_s2 = smov 0   ;;  %s12480_s23 = smov 0  }
   0xd   :  { %s12482_s24 = smov 0   ;;  %s12484_s25 = smov 0  }
   0xe LB: > { %17443 = sst [smem:[#allocation6_spill]] %s12335_s20  ;;  %s9354_s18 = sadd.s32 4294967295, %s12363_s25   ;;  %s12363_s25 = sphi %s12484_s25, %s34_s25   ;;  %s12359_s24 = sphi %s12482_s24, %s17913_s24   ;;  %s12355_s23 = sphi %s12480_s23, %s17912_s23   ;;  %s12351_s2 = sphi %s12478_s2, %s17911_s2   ;;  %s12347_s22 = sphi %s12476_s22, %s17910_s22   ;;  %s12343_s1 = sphi %s12474_s1, %s17909_s1   ;;  %s12339_s21 = sphi %s12472_s21, %s17908_s21   ;;  %s12335_s20 = sphi %s12470_s20, %s17907_s20  }
   0xf   : > { %17444 = sst [smem:[#allocation7_spill]] %s12339_s21  ;;  %s9355_s3 = sadd.s32 4294967294, %s12363_s25  }
  0x10   : > { %17445 = sst [smem:[#allocation8_spill]] %s12343_s1  ;;  %s43_s26 = sadd.s32 1, %s12355_s23 }
  0x11   : > { %17446 = sst [smem:[#allocation9_spill]] %s12351_s2  ;;  %p44_p0 = scmp.ge.s32.totalorder %s43_s26, 4 }
  0x12   : > { %17447 = sst [smem:[#allocation10_spill]] %s12355_s23  ;;  %s46_s27 = sadd.s32 1, %s12359_s24 }
  0x13   : > { %17448 = sst [smem:[#allocation11_spill]] %s12359_s24  ;;  %p575_p1 = scmp.ne.s32.totalorder %s12343_s1, %s12339_s21 }
  0x14   : > { %17449 = sst [smem:[#allocation12_spill]] %s12363_s25  ;;  %p576_p2 = scmp.eq.s32.totalorder %s9354_s18, 7 }
  0x15   : > { %s17915_s26 = smov (%p44_p0, %s43_s26), 0  ;;  %s17917_s27 = smov (!%p44_p0, %s46_s27), %s12359_s24 }
  0x16   : > { %17450 = sst [smem:[#allocation13_spill]] %s17915_s26  ;;  %s561_s28 = ssub.s32 %s12355_s23, %s17915_s26 }
  0x17   : > { %p12521_p3 = por %p576_p2, %p575_p1  ;;  %p48_p4 = scmp.ge.s32.totalorder %s17917_s27, 2 }
  0x18   : > { %p581_p5 = scmp.ne.s32.totalorder %s12339_s21, %s12335_s20  ;;  %p582_p6 = scmp.eq.s32.totalorder %s9355_s3, 7 }
  0x19   : > { %s17451_s29 = scalar_select %p12521_p3, 1, 0 }
  0x1a   : > { %p9376_p7 = scmp.ge.s32.totalorder %s12363_s25, 1  ;;  %s17919_s27 = smov (%p48_p4, %s17917_s27), 0 }
  0x1b   : > { %17452 = sst [smem:[#allocation14_spill]] %s17451_s29  ;;  %p12530_p8 = por %p582_p6, %p581_p5 }
  0x1c   : > { %17453 = sst [smem:[#allocation15_spill]] %s17919_s27  ;;  %p800_p9 = scmp.lt.s32.totalorder %s12363_s25, 9 }
  0x1d   : > { %s17454_s0 = scalar_select %p12530_p8, 1, 0 }
  0x1e   : > { %s560_s30 = ssub.s32 %s12359_s24, %s17919_s27  ;;  %s565_s18 = sadd.s32 1, %s12343_s1 }
  0x1f   : > { %17455 = sst [smem:[#allocation16_spill]] %s17454_s0  ;;  %s562_s19 = sor.u32 %s561_s28, %s560_s30 }
  0x20   : > { %p801_p10 = pnand %p9376_p7, %p800_p9  ;;  %p563_p11 = scmp.eq.s32.totalorder %s562_s19, 0 }
  0x22   : > { %s12539_s26 = scalar_select %p563_p11, %s12343_s1, %s565_s18  }
  0x23   : > { %804 = sbr.rel (%p801_p10) target bundleno = 1959 (0x7a7), region = 96 }
  0x24   : > { %17456 = sst [smem:[#allocation17_spill]] %s12539_s26 }
  0x2a   : > { %s17457_s10 = sld [smem:[#allocation101_spill]]  ;;  %s12551_s19 = sshll.u32 %s12347_s22, 3  ;;  %v1226_v7 = vld [vmem:[%s17162_s9] sm:$0xff]  ;;  %v1227_v8 = vld [vmem:[%s17162_s9 + $0x8] sm:$0xff]  ;;  %v1228_v10 = vld [vmem:[%s17162_s9 + $0x10] sm:$0xff]  ;;  %vm1234_vm0 = vcmask 261120  }
  0x2b   : > { %p964_p12 = scmp.lt.s32.totalorder %s12351_s2, 1  ;;  %p966_p13 = scmp.lt.s32.totalorder %s12551_s19, 31  ;;  %v11607_v9 = vpack.c.bf16 %v1227_v8, %v1226_v7  ;;  %v1229_v11 = vld [vmem:[%s17162_s9 + $0x18] sm:$0xff]  ;;  %v17461_v17 = vmov 0  ;;  %v17465_v39 = vmov 0  ;;  %vm2404_vm5 = vcmask 1040384  }
  0x2c   : > { %s9382_s28 = sshll.u32 %s12347_s22, 2  ;;  %p1154_p4 = scmp.eq.s32.totalorder %s12347_s22, 0  ;;  %v11611_v16 = vpack.c.bf16 %v1229_v11, %v1228_v10  ;;  %vm2653_vm6 = vcmask 1046528   ;;  %vm2744_vm7 = vcmask 523264  }
  0x2d   : > { %s965_s30 = scalar_select %p964_p12, %s12351_s2, 1 }
  0x2e   : > { %s967_s3 = scalar_select %p966_p13, %s12551_s19, 31 }
  0x2f   : > { %s9383_s26 = sadd.s32 4294967295, %s9382_s28  ;;  %s9988_s23 = sadd.s32 4, %s9382_s28 }
  0x30   : > { %v1230_v1 = vld [vmem:[%s17457_s10] sm:$0xff]  ;;  %v1231_v2 = vld [vmem:[%s17457_s10 + $0x8] sm:$0xff]  ;;  %v1232_v3 = vld [vmem:[%s17457_s10 + $0x10] sm:$0xff]  ;;  %s9379_s20 = sshll.u32 %s967_s3, 2  ;;  %p976_p0 = scmp.gt.s32.totalorder %s9383_s26, 0 }
  0x31   : > { %v11599_v4 = vpack.c.bf16 %v1231_v2, %v1230_v1  ;;  %v1233_v5 = vld [vmem:[%s17457_s10 + $0x18] sm:$0xff]  ;;  %s12567_s10 = sshll.u32 %s965_s30, 7  ;;  %p995_p1 = scmp.lt.s32.totalorder %s9988_s23, 15 }
  0x32   : > { %v11603_v6 = vpack.c.bf16 %v1233_v5, %v1232_v3  ;;  %s970_s29 = sadd.s32 %s12567_s10, %s9379_s20  ;;  %s17921_s26 = smov (!%p976_p0, %s9383_s26), 0 }
  0x33   : > { %11600 = vmatprep.subr.bf16.mxu0 %v11599_v4  ;;  %s17923_s23 = smov (!%p995_p1, %s9988_s23), 15  ;;  %s9384_s18 = sshll.u32 %s17921_s26, 1 }
  0x34   : > { %11602 = vmatpush3.bf16.msra.mxu0 %v11599_v4  ;;  %s12570_s24 = sshll.u32 %s970_s29, 3  ;;  %p981_p2 = scmp.lt.s32.totalorder %s9384_s18, 31 }
  0x35   : > { %11604 = vmatprep.subr.bf16.mxu0 %v11603_v6  ;;  %s9389_s27 = sshll.u32 %s17923_s23, 1  ;;  %p1162_p6 = scmp.eq.s32.totalorder %s12347_s22, 3 }
  0x36   : > { %s17925_s18 = smov (!%p981_p2, %s9384_s18), 31  ;;  %p12573_p5 = scmp.lt.s32.totalorder %s9389_s27, 31 }
  0x37   : > { %s1155_s28 = scalar_select %p1154_p4, 1, 0 }
  0x38   : > { %11606 = vmatpush3.bf16.msra.mxu0 %v11603_v6  ;;  %s9385_s30 = sshll.u32 %s17925_s18, 2  ;;  %s17459_s18 = sld [smem:[#allocation100_spill]] }
  0x39   : > { %11608 = vmatprep.subr.bf16.mxu0 %v11607_v9  ;;  %s985_s20 = sadd.s32 %s9385_s30, %s12567_s10  ;;  %v1156_v12 = vstv %s1155_s28  ;;  %s17460_s1 = sld [smem:[#allocation97_spill]] }
  0x3a   : > { %s9387_s23 = sshll.u32 %s985_s20, 3  ;;  %s17927_s27 = smov (!%p12573_p5, %s9389_s27), 31  ;;  %vm12608_vm1 = vcmp.eq.s32.totalorder %v1156_v12, 1 }
  0x3b   : > { %s12600_s29 = scalar_lea.vmem %s17157_s4, %s9387_s23  ;;  %v17462_v17 = vsel %vm12608_vm1, 4294967295, %v17461_v17  ;;  %s9390_s17 = sshll.u32 %s17927_s27, 2 }
  0x3c   : > { %v1202_v13 = vld [vmem:[%s12600_s29] sm:$0xff]  ;;  %v1203_v14 = vld [vmem:[%s12600_s29 + $0x8] sm:$0xff]  ;;  %v1204_v15 = vld [vmem:[%s12600_s29 + $0x10] sm:$0xff]  ;;  %17463 = vst [vmem:[#allocation18_spill] sm:$0xff] %v17462_v17  ;;  %s12616_s16 = scalar_select %p1162_p6, 1, 0 }
  0x3d   : > { %10627 = vmatprep.mubr.msk.f32.mxu0 %vm1234_vm0, %v1202_v13  ;;  %v1206_v19 = vld [vmem:[%s12600_s29 + $0x20] sm:$0xff]  ;;  %s17464_s28 = sld [smem:[#allocation98_spill]]  ;;  %v1205_v22 = vld [vmem:[%s12600_s29 + $0x18] sm:$0xff]  ;;  %v1207_v23 = vld [vmem:[%s12600_s29 + $0x28] sm:$0xff]  ;;  %s12633_s20 = sadd.s32 %s9390_s17, %s12567_s10 }
  0x3e   : > { %s12589_s21 = scalar_lea.vmem %s17459_s18, %s12570_s24  ;;  %10628 = vmatmul.mubr.msk.f32.vlgmr.msra.gmra.mrb[0].mxu0 %vm1234_vm0, %v1203_v14  ;;  %s9392_s27 = sshll.u32 %s12633_s20, 3  ;;  %v1164_v26 = vstv %s12616_s16  ;;  %v1208_v30 = vld [vmem:[%s12600_s29 + $0x30] sm:$0xff]  ;;  %v1209_v43 = vld [vmem:[%s12600_s29 + $0x38] sm:$0xff] }
  0x3f   : > { %s12595_s0 = scalar_lea.vmem %s17460_s1, %s12570_s24  ;;  %v1174_v18 = vld [vmem:[%s12589_s21 + $0x20] sm:$0xff]  ;;  %v1175_v20 = vld [vmem:[%s12589_s21 + $0x28] sm:$0xff]  ;;  %11610 = vmatpush3.bf16.msra.mxu0 %v11607_v9  ;;  %10630 = vmatprep.mubr.msk.f32.mxu0 %vm1234_vm0, %v1204_v15  ;;  %v1176_v24 = vld [vmem:[%s12589_s21 + $0x30] sm:$0xff]  ;;  %s12669_s30 = scalar_lea.vmem %s17158_s5, %s9392_s27  ;;  %vm12684_vm2 = vcmp.eq.s32.totalorder %v1164_v26, 1 }
  0x40   : > { %v12621_v21 = vld [vmem:[%s12595_s0 + $0x20] sm:$0xff]  ;;  %v1218_v25 = vsel %vm12608_vm1, %v1174_v18, %v1206_v19  ;;  %11612 = vmatprep.subr.bf16.mxu0 %v11611_v16  ;;  %v12643_v28 = vld [vmem:[%s12595_s0 + $0x28] sm:$0xff]  ;;  %v12658_v33 = vld [vmem:[%s12595_s0 + $0x30] sm:$0xff]  ;;  %v1219_v37 = vsel %vm12608_vm1, %v1175_v20, %v1207_v23  ;;  %v17466_v39 = vsel %vm12684_vm2, 4294967295, %v17465_v39  ;;  %v1220_v41 = vsel %vm12608_vm1, %v1176_v24, %v1208_v30  ;;  %s17468_s29 = sld [smem:[#allocation99_spill]]  ;;  %s14987_s26 = scalar_lea.vmem %s17159_s6, %s12570_s24 }
  0x41   : > { %v12676_v36 = vld [vmem:[%s12595_s0 + $0x38] sm:$0xff]  ;;  %17467 = vst [vmem:[#allocation19_spill] sm:$0xff] %v17466_v39  ;;  %v1170_v48 = vld [vmem:[%s12589_s21] sm:$0xff]  ;;  %v1171_v49 = vld [vmem:[%s12589_s21 + $0x8] sm:$0xff]  ;;  %s9994_s24 = sadd.s32 8, %s12551_s19  ;;  %s17901_s25 = sld [smem:[#allocation9_spill]] }
  0x42   : > { %10631 = vmatmul.mubr.msk.f32.gmra.mrb[2].mxu0 %vm1234_vm0, %v1205_v22  ;;  %v12682_v38 = vld [vmem:[%s12589_s21 + $0xd8] sm:$0xff]  ;;  %v1172_v50 = vld [vmem:[%s12589_s21 + $0x10] sm:$0xff]  ;;  %v1178_v52 = vld [vmem:[%s12589_s21 + $0x40] sm:$0xff]  ;;  %p15046_p10 = scmp.lt.s32.totalorder %s9994_s24, 31 }
  0x43   : > { %s12626_s3 = scalar_lea.vmem %s17464_s28, %s9387_s23  ;;  %10633 = vmatprep.mubr.msk.f32.mxu0 %vm1234_vm0, %v1218_v25  ;;  %11614 = vmatpush3.bf16.msra.mxu0 %v11611_v16  ;;  %v12689_v40 = vld [vmem:[%s12669_s30 + $0x18] sm:$0xff]  ;;  %v1179_v53 = vld [vmem:[%s12589_s21 + $0x48] sm:$0xff]  ;;  %v1180_v54 = vld [vmem:[%s12589_s21 + $0x50] sm:$0xff] }
  0x44   : > { %v12640_v27 = vld [vmem:[%s12626_s3 + $0x20] sm:$0xff]  ;;  %v12646_v29 = vld [vmem:[%s12626_s3 + $0x28] sm:$0xff]  ;;  %v12661_v34 = vld [vmem:[%s12626_s3 + $0x30] sm:$0xff]  ;;  %v1225_v44 = vsel %vm12684_vm2, %v12682_v38, %v12689_v40  ;;  %s17931_s24 = smov (!%p15046_p10, %s9994_s24), 31 }
  0x45   : > { %v1158_v31 = vsel %vm12608_vm1, %v12621_v21, %v12640_v27  ;;  %v1159_v32 = vsel %vm12608_vm1, %v12643_v28, %v12646_v29  ;;  %v1160_v35 = vsel %vm12608_vm1, %v12658_v33, %v12661_v34  ;;  %v1177_v42 = vld [vmem:[%s12589_s21 + $0x38] sm:$0xff]  ;;  %v1182_v56 = vld [vmem:[%s12589_s21 + $0x60] sm:$0xff]  ;;  %v1183_v57 = vld [vmem:[%s12589_s21 + $0x68] sm:$0xff]  ;;  %s17933_s24 = smov (!%p15046_p10, %s17931_s24), 31 }
  0x46   : > { %v12700_v45 = vld [vmem:[%s12626_s3 + $0x38] sm:$0xff]  ;;  %10634 = vmatmul.mubr.msk.f32.gmra.mrb[4].mxu0 %vm1234_vm0, %v1219_v37  ;;  %v1221_v47 = vsel %vm12608_vm1, %v1177_v42, %v1209_v43  ;;  %v1184_v58 = vld [vmem:[%s12589_s21 + $0x70] sm:$0xff]  ;;  %v1186_v60 = vld [vmem:[%s12589_s21 + $0x80] sm:$0xff]  ;;  %s12749_s16 = scalar_lea.vmem %s17468_s29, %s9392_s27  ;;  %s17903_s29 = sld [smem:[#allocation104_spill]] }
  0x47   : > { %v1161_v46 = vsel %vm12608_vm1, %v12676_v36, %v12700_v45  ;;  %10636 = vmatprep.mubr.msk.f32.mxu0 %vm1234_vm0, %v1220_v41  ;;  %v1173_v51 = vld [vmem:[%s12589_s21 + $0x18] sm:$0xff]  ;;  %v1187_v61 = vld [vmem:[%s12589_s21 + $0x88] sm:$0xff]  ;;  %v12742_v62 = vld [vmem:[%s12595_s0 + $0xc0] sm:$0xff] }
  0x48   : > { %v1181_v55 = vld [vmem:[%s12589_s21 + $0x58] sm:$0xff]  ;;  %v12753_v63 = vld [vmem:[%s12595_s0 + $0xc8] sm:$0xff]  ;;  %v12756_v0 = vld [vmem:[%s12749_s16] sm:$0xff] }
  0x49   : > { %v1185_v59 = vld [vmem:[%s12589_s21 + $0x78] sm:$0xff]  ;;  %v12759_v1 = vld [vmem:[%s12749_s16 + $0x8] sm:$0xff]  ;;  %v1188_v2 = vld [vmem:[%s12589_s21 + $0x90] sm:$0xff]  ;;  %v1166_v3 = vsel %vm12684_vm2, %v12742_v62, %v12756_v0 }
  0x4a   : > { %10637 = vmatmul.mubr.msk.f32.gmra.mrb[6].mxu0 %vm1234_vm0, %v1221_v47  ;;  %v1167_v4 = vsel %vm12684_vm2, %v12753_v63, %v12759_v1  ;;  %v12772_v5 = vld [vmem:[%s12595_s0 + $0xd0] sm:$0xff]  ;;  %v1189_v7 = vld [vmem:[%s12589_s21 + $0x98] sm:$0xff]  ;;  %v1190_v11 = vld [vmem:[%s12589_s21 + $0xa0] sm:$0xff] }
  0x4b   : > { %10639 = vmatprep.mubr.msk.f32.mxu0 %vm1234_vm0, %v1170_v48  ;;  %v12775_v6 = vld [vmem:[%s12749_s16 + $0x10] sm:$0xff]  ;;  %v12780_v8 = vld [vmem:[%s12595_s0 + $0xd8] sm:$0xff]  ;;  %v1191_v13 = vld [vmem:[%s12589_s21 + $0xa8] sm:$0xff] }
  0x4c   : > { %v1168_v9 = vsel %vm12684_vm2, %v12772_v5, %v12775_v6  ;;  %v12787_v10 = vld [vmem:[%s12749_s16 + $0x18] sm:$0xff]  ;;  %v1192_v14 = vld [vmem:[%s12589_s21 + $0xb0] sm:$0xff]  ;;  %v1194_v16 = vld [vmem:[%s12589_s21 + $0xc0] sm:$0xff] }
  0x4d   : > { %v1169_v12 = vsel %vm12684_vm2, %v12780_v8, %v12787_v10  ;;  %v1193_v15 = vld [vmem:[%s12589_s21 + $0xb8] sm:$0xff]  ;;  %v1196_v19 = vld [vmem:[%s12589_s21 + $0xd0] sm:$0xff]  ;;  %v1199_v22 = vld [vmem:[%s12589_s21 + $0xe8] sm:$0xff] }
  0x4e   : > { %10640 = vmatmul.mubr.msk.f32.gmra.mrb[8].mxu0 %vm1234_vm0, %v1171_v49  ;;  %v1200_v23 = vld [vmem:[%s12589_s21 + $0xf0] sm:$0xff]  ;;  %v1201_v25 = vld [vmem:[%s12589_s21 + $0xf8] sm:$0xff]  ;;  %v1211_v30 = vld [vmem:[%s12669_s30 + $0x8] sm:$0xff] }
  0x4f   : > { %10642 = vmatprep.mubr.msk.f32.mxu0 %vm1234_vm0, %v1172_v50  ;;  %v1212_v37 = vld [vmem:[%s12669_s30 + $0x10] sm:$0xff]  ;;  %v1214_v43 = vld [vmem:[%s12669_s30 + $0x20] sm:$0xff]  ;;  %v1215_v47 = vld [vmem:[%s12669_s30 + $0x28] sm:$0xff] }
  0x50   : > { %v1216_v48 = vld [vmem:[%s12669_s30 + $0x30] sm:$0xff]  ;;  %v1217_v49 = vld [vmem:[%s12669_s30 + $0x38] sm:$0xff]  ;;  %v1138_v50 = vld [vmem:[%s12626_s3] sm:$0xff] }
  0x51   : > { %v1140_v40 = vld [vmem:[%s12626_s3 + $0x10] sm:$0xff]  ;;  %v1107_v27 = vld [vmem:[%s12595_s0 + $0x8] sm:$0xff]  ;;  %v1121_v45 = vld [vmem:[%s12595_s0 + $0x78] sm:$0xff] }
  0x52   : > { %10643 = vmatmul.mubr.msk.f32.gmra.mrb[10].mxu0 %vm1234_vm0, %v1173_v51  ;;  %v1106_v51 = vld [vmem:[%s12595_s0] sm:$0xff]  ;;  %v1108_v29 = vld [vmem:[%s12595_s0 + $0x10] sm:$0xff]  ;;  %v1115_v34 = vld [vmem:[%s12595_s0 + $0x48] sm:$0xff] }
  0x53   : > { %10645 = vmatprep.mubr.msk.f32.mxu0 %vm1234_vm0, %v1174_v18  ;;  %v1195_v18 = vld [vmem:[%s12589_s21 + $0xc8] sm:$0xff]  ;;  %v1152_v6 = vld [vmem:[%s12749_s16 + $0x30] sm:$0xff] }
  0x54   : > { %v1223_v41 = vsel %vm12684_vm2, %v1195_v18, %v1211_v30  ;;  %v2570_v0 = vld [vmem:[%s17165_s12 + $0x48] sm:$0xff]  ;;  %v2584_v30 = vld [vmem:[%s17165_s12 + $0xb8] sm:$0xff] }
  0x55   : > { %v1151_v1 = vld [vmem:[%s12749_s16 + $0x28] sm:$0xff] }
  0x56   : > { %10646 = vmatmul.mubr.msk.f32.gmra.mrb[12].mxu0 %vm1234_vm0, %v1175_v20  ;;  %v1198_v20 = vld [vmem:[%s12589_s21 + $0xe0] sm:$0xff]  ;;  %v2574_v10 = vld [vmem:[%s17165_s12 + $0x68] sm:$0xff] }
  0x57   : > { %10648 = vmatprep.mubr.msk.f32.mxu0 %vm1234_vm0, %v1176_v24  ;;  %v1210_v24 = vld [vmem:[%s12669_s30] sm:$0xff]  ;;  %s17709_s30 = sld [smem:[#allocation103_spill]] }
  0x58   : > { %v1222_v26 = vsel %vm12684_vm2, %v1194_v16, %v1210_v24  ;;  %v2582_v24 = vld [vmem:[%s17165_s12 + $0xa8] sm:$0xff] }
  0x5a   : > { %10649 = vmatmul.mubr.msk.f32.gmra.mrb[14].mxu0 %vm1234_vm0, %v1177_v42  ;;  %v1224_v42 = vsel %vm12684_vm2, %v1196_v19, %v1212_v37 }
  0x5b   : > { %10651 = vmatprep.mubr.msk.f32.mxu0 %vm1234_vm0, %v1178_v52  ;;  %v1123_v52 = vld [vmem:[%s12595_s0 + $0x88] sm:$0xff] }
  0x5e   : > { %10652 = vmatmul.mubr.msk.f32.gmra.mrb[16].mxu0 %vm1234_vm0, %v1179_v53  ;;  %v1124_v53 = vld [vmem:[%s12595_s0 + $0x90] sm:$0xff] }
  0x5f   : > { %10654 = vmatprep.mubr.msk.f32.mxu0 %vm1234_vm0, %v1180_v54  ;;  %v1125_v54 = vld [vmem:[%s12595_s0 + $0x98] sm:$0xff] }
  0x62   : > { %10655 = vmatmul.mubr.msk.f32.gmra.mrb[18].mxu0 %vm1234_vm0, %v1181_v55  ;;  %v1126_v55 = vld [vmem:[%s12595_s0 + $0xa0] sm:$0xff] }
  0x63   : > { %10657 = vmatprep.mubr.msk.f32.mxu0 %vm1234_vm0, %v1182_v56  ;;  %v1127_v56 = vld [vmem:[%s12595_s0 + $0xa8] sm:$0xff] }
  0x66   : > { %10658 = vmatmul.mubr.msk.f32.gmra.mrb[20].mxu0 %vm1234_vm0, %v1183_v57  ;;  %v1128_v57 = vld [vmem:[%s12595_s0 + $0xb0] sm:$0xff] }
  0x67   : > { %10660 = vmatprep.mubr.msk.f32.mxu0 %vm1234_vm0, %v1184_v58  ;;  %v1129_v58 = vld [vmem:[%s12595_s0 + $0xb8] sm:$0xff] }
  0x6a   : > { %10661 = vmatmul.mubr.msk.f32.gmra.mrb[22].mxu0 %vm1234_vm0, %v1185_v59  ;;  %v1134_v59 = vld [vmem:[%s12595_s0 + $0xe0] sm:$0xff] }
  0x6b   : > { %10663 = vmatprep.mubr.msk.f32.mxu0 %vm1234_vm0, %v1186_v60  ;;  %v1135_v60 = vld [vmem:[%s12595_s0 + $0xe8] sm:$0xff] }
  0x6e   : > { %10664 = vmatmul.mubr.msk.f32.gmra.mrb[24].mxu0 %vm1234_vm0, %v1187_v61  ;;  %v1136_v61 = vld [vmem:[%s12595_s0 + $0xf0] sm:$0xff] }
  0x6f   : > { %10666 = vmatprep.mubr.msk.f32.mxu0 %vm1234_vm0, %v1188_v2  ;;  %v1137_v2 = vld [vmem:[%s12595_s0 + $0xf8] sm:$0xff] }
  0x72   : > { %10667 = vmatmul.mubr.msk.f32.gmra.mrb[26].mxu0 %vm1234_vm0, %v1189_v7 }
  0x73   : > { %10669 = vmatprep.mubr.msk.f32.mxu0 %vm1234_vm0, %v1190_v11 }
  0x76   : > { %10670 = vmatmul.mubr.msk.f32.gmra.mrb[28].mxu0 %vm1234_vm0, %v1191_v13  ;;  %v2576_v13 = vld [vmem:[%s17165_s12 + $0x78] sm:$0xff] }
  0x77   : > { %10672 = vmatprep.mubr.msk.f32.mxu0 %vm1234_vm0, %v1192_v14 }
  0x7a   : > { %10673 = vmatmul.mubr.msk.f32.gmra.mrb[30].mxu0 %vm1234_vm0, %v1193_v15  ;;  %v2577_v15 = vld [vmem:[%s17165_s12 + $0x80] sm:$0xff] }
  0x7b   : > { %10675 = vmatprep.mubr.msk.f32.mxu0 %vm1234_vm0, %v1194_v16  ;;  %v2578_v16 = vld [vmem:[%s17165_s12 + $0x88] sm:$0xff] }
  0x7e   : > { %10676 = vmatmul.mubr.msk.f32.gmra.mrb[32].mxu0 %vm1234_vm0, %v1195_v18  ;;  %v13002_v18 = vpack.c.bf16 %v2578_v16, %v2577_v15 }
  0x7f   : > { %10678 = vmatprep.mubr.msk.f32.mxu0 %vm1234_vm0, %v1196_v19  ;;  %v2579_v19 = vld [vmem:[%s17165_s12 + $0x90] sm:$0xff] }
  0x80   : > { %11775 = vmatprep.subr.bf16.mxu1 %v13002_v18 }
  0x81   : > { %11779 = vmatpush3.bf16.msra.mxu1 %v13002_v18 }
  0x82   : > { %10679 = vmatmul.mubr.msk.f32.gmra.mrb[34].mxu0 %vm1234_vm0, %v12682_v38  ;;  %v1139_v38 = vld [vmem:[%s12626_s3 + $0x8] sm:$0xff] }
  0x83   : > { %10681 = vmatprep.mubr.msk.f32.mxu0 %vm1234_vm0, %v1198_v20  ;;  %v2580_v20 = vld [vmem:[%s17165_s12 + $0x98] sm:$0xff] }
  0x86   : > { %10682 = vmatmul.mubr.msk.f32.gmra.mrb[36].mxu0 %vm1234_vm0, %v1199_v22  ;;  %v13012_v22 = vpack.c.bf16 %v2580_v20, %v2579_v19 }
  0x87   : > { %10684 = vmatprep.mubr.msk.f32.mxu0 %vm1234_vm0, %v1200_v23  ;;  %v2581_v23 = vld [vmem:[%s17165_s12 + $0xa0] sm:$0xff] }
  0x88   : > { %11776 = vmatprep.subr.bf16.mxu1 %v13012_v22 }
  0x89   : > { %11780 = vmatpush3.bf16.msra.mxu1 %v13012_v22 }
  0x8a   : > { %10685 = vmatmul.mubr.msk.f32.gmra.mrb[38].mxu0 %vm1234_vm0, %v1201_v25  ;;  %v13022_v25 = vpack.c.bf16 %v2582_v24, %v2581_v23 }
  0x8b   : > { %10687 = vmatprep.mubr.msk.f32.mxu0 %vm1234_vm0, %v1222_v26  ;;  %v2583_v26 = vld [vmem:[%s17165_s12 + $0xb0] sm:$0xff] }
  0x8c   : > { %11777 = vmatprep.subr.bf16.mxu1 %v13022_v25  ;;  %v13032_v37 = vpack.c.bf16 %v2584_v30, %v2583_v26 }
  0x8d   : > { %11781 = vmatpush3.bf16.msra.mxu1 %v13022_v25 }
  0x8e   : > { %10688 = vmatmul.mubr.msk.f32.gmra.mrb[40].mxu0 %vm1234_vm0, %v1223_v41  ;;  %11778 = vmatprep.subr.bf16.mxu1 %v13032_v37  ;;  %v2585_v41 = vld [vmem:[%s17165_s12 + $0xc0] sm:$0xff] }
  0x8f   : > { %10690 = vmatprep.mubr.msk.f32.mxu0 %vm1234_vm0, %v1224_v42  ;;  %v2586_v42 = vld [vmem:[%s17165_s12 + $0xc8] sm:$0xff] }
  0x91   : > { %11782 = vmatpush3.bf16.msra.mxu1 %v13032_v37 }
  0x92   : > { %10691 = vmatmul.mubr.msk.f32.gmra.mrb[42].mxu0 %vm1234_vm0, %v1225_v44  ;;  %v1141_v44 = vld [vmem:[%s12626_s3 + $0x18] sm:$0xff]  ;;  %s14927_s3 = sadd.s32 4294967295, %s12551_s19  ;;  %s9426_s19 = sshll.u32 %s17933_s24, 2 }
  0x93   : > { %10693 = vmatprep.mubr.msk.f32.mxu0 %vm1234_vm0, %v1214_v43  ;;  %v13042_v43 = vpack.c.bf16 %v2586_v42, %v2585_v41  ;;  %p1074_p7 = scmp.gt.s32.totalorder %s14927_s3, 0  ;;  %p9414_p9 = scmp.lt.s32.totalorder %s14927_s3, 31 }
  0x94   : > { %s1099_s17 = sadd.s32 %s9426_s19, %s12567_s10 }
  0x95   : > { %11664 = vmatprep.subr.bf16.mxu1 %v13042_v43  ;;  %s1075_s20 = scalar_select %p1074_p7, %s14927_s3, 0 }
  0x96   : > { %10694 = vmatmul.mubr.msk.f32.gmra.mrb[44].mxu0 %vm1234_vm0, %v1215_v47  ;;  %v2561_v47 = vld [vmem:[%s17165_s12] sm:$0xff]  ;;  %s9428_s2 = sshll.u32 %s1099_s17, 3  ;;  %s17900_s17 = sld [smem:[#allocation7_spill]] }
  0x97   : > { %10696 = vmatprep.mubr.msk.f32.mxu0 %vm1234_vm0, %v1216_v48  ;;  %v2562_v48 = vld [vmem:[%s17165_s12 + $0x8] sm:$0xff]  ;;  %s17929_s20 = smov (!%p9414_p9, %s1075_s20), 31  ;;  %s1101_s3 = scalar_lea.vmem %s17161_s8, %s9428_s2 }
  0x98   : > { %s9419_s27 = sshll.u32 %s17929_s20, 2 }
  0x99   : > { %s1082_s23 = sadd.s32 %s9419_s27, %s12567_s10  ;;  %s17708_s27 = sld [smem:[#allocation102_spill]] }
  0x9a   : > { %10697 = vmatmul.mubr.msk.f32.gmra.mrb[46].mxu0 %vm1234_vm0, %v1217_v49  ;;  %v13051_v49 = vpack.c.bf16 %v2562_v48, %v2561_v47  ;;  %s9421_s18 = sshll.u32 %s1082_s23, 3 }
  0x9b   : > { %10707 = vmatprep.mubr.msk.f32.mxu0 %vm1234_vm0, %v1138_v50  ;;  %v13057_v50 = vld [vmem:[%s17164_s11] ss:$0 sm:$0xff]  ;;  %s1084_s21 = scalar_lea.vmem %s17160_s7, %s9421_s18 }
  0x9c   : > { %s960_s2 = sand.u32 1, %s17900_s17  }
  0x9d   : > { %s17046_s28 = sshll.u32 %s960_s2, 3 }
  0x9e   : > { %10708 = vmatmul.mubr.msk.f32.vlgmr.msra.gmra.mrb[0].mxu0 %vm1234_vm0, %v1139_v38  ;;  %s962_s20 = scalar_lea.vmem [#allocation3], %s17046_s28 }
  0x9f   : > { %10710 = vmatprep.mubr.msk.f32.mxu0 %vm1234_vm0, %v1140_v40  ;;  %s9105_s23 = sshll.u32 %s962_s20, 4  ;;  %s17099_s23 = int_to_ptr.vmem [resolvable:$true] %s9105_s23 }
  0xa0   : > { %s12269_s24 = scalar_lea.vmem %s17099_s23, 128 }
  0xa1   : > { %p12270_p11 = scmp.ne.s32.totalorder %s17099_s23, %s12269_s24 }
  0xa2   : > { %10711 = vmatmul.mubr.msk.f32.gmra.mrb[2].mxu0 %vm1234_vm0, %v1141_v44 }
  0xa3   : > { %10713 = vmatprep.mubr.msk.f32.mxu0 %vm1234_vm0, %v1158_v31  ;;  %v1109_v31 = vld [vmem:[%s12595_s0 + $0x18] sm:$0xff]  ;;  %p12271_p12 = pnand %p12270_p11, %p12521_p3 }
  0xa5   : > { %p12272_p13 = pneg %p12271_p12 }
  0xa6   : > { %10714 = vmatmul.mubr.msk.f32.gmra.mrb[4].mxu0 %vm1234_vm0, %v1159_v32  ;;  %v1114_v32 = vld [vmem:[%s12595_s0 + $0x40] sm:$0xff] }
  0xa7   : > { %10716 = vmatprep.mubr.msk.f32.mxu0 %vm1234_vm0, %v1160_v35  ;;  %v1116_v35 = vld [vmem:[%s12595_s0 + $0x50] sm:$0xff] }
  0xaa   : > { %10717 = vmatmul.mubr.msk.f32.gmra.mrb[6].mxu0 %vm1234_vm0, %v1161_v46  ;;  %v1122_v46 = vld [vmem:[%s12595_s0 + $0x80] sm:$0xff] }
  0xab   : > { %10719 = vmatprep.mubr.msk.f32.mxu0 %vm1234_vm0, %v1106_v51  ;;  %v2587_v51 = vld [vmem:[%s17165_s12 + $0xd0] sm:$0xff] }
  0xae   : > { %10720 = vmatmul.mubr.msk.f32.gmra.mrb[8].mxu0 %vm1234_vm0, %v1107_v27 }
  0xaf   : > { %10722 = vmatprep.mubr.msk.f32.mxu0 %vm1234_vm0, %v1108_v29  ;;  %v2588_v29 = vld [vmem:[%s17165_s12 + $0xd8] sm:$0xff] }
  0xb2   : > { %10723 = vmatmul.mubr.msk.f32.gmra.mrb[10].mxu0 %vm1234_vm0, %v1109_v31  ;;  %v2589_v31 = vld [vmem:[%s17165_s12 + $0xe0] sm:$0xff] }
  0xb3   : > { %10725 = vmatprep.mubr.msk.f32.mxu0 %vm1234_vm0, %v12621_v21  ;;  %v1117_v21 = vld [vmem:[%s12595_s0 + $0x58] sm:$0xff] }
  0xb6   : > { %10726 = vmatmul.mubr.msk.f32.gmra.mrb[12].mxu0 %vm1234_vm0, %v12643_v28  ;;  %v1118_v28 = vld [vmem:[%s12595_s0 + $0x60] sm:$0xff] }
  0xb7   : > { %10728 = vmatprep.mubr.msk.f32.mxu0 %vm1234_vm0, %v12658_v33  ;;  %v1119_v33 = vld [vmem:[%s12595_s0 + $0x68] sm:$0xff] }
  0xba   : > { %10729 = vmatmul.mubr.msk.f32.gmra.mrb[14].mxu0 %vm1234_vm0, %v12676_v36  ;;  %v1120_v36 = vld [vmem:[%s12595_s0 + $0x70] sm:$0xff]  ;;  %s12366_s0 = smov [#allocation3]  }
  0xbb   : > { %10731 = vmatprep.mubr.msk.f32.mxu0 %vm1234_vm0, %v1114_v32  ;;  %v2590_v32 = vld [vmem:[%s17165_s12 + $0xe8] sm:$0xff]  ;;  %s12273_s19 = sshll.u32 %s12366_s0, 4  ;;  %s12274_s19 = int_to_ptr.vmem [resolvable:$false] %s12273_s19 }
  0xbc   : > { %p12276_p0 = scmp.lt.s32.totalorder %s17099_s23, %s12274_s19 }
  0xbe   : > { %10732 = vmatmul.mubr.msk.f32.gmra.mrb[16].mxu0 %vm1234_vm0, %v1115_v34 }
  0xbf   : > { %10734 = vmatprep.mubr.msk.f32.mxu0 %vm1234_vm0, %v1116_v35  ;;  %v2591_v35 = vld [vmem:[%s17165_s12 + $0xf0] sm:$0xff] }
  0xc2   : > { %10735 = vmatmul.mubr.msk.f32.gmra.mrb[18].mxu0 %vm1234_vm0, %v1117_v21  ;;  %v2592_v21 = vld [vmem:[%s17165_s12 + $0xf8] sm:$0xff] }
  0xc3   : > { %10737 = vmatprep.mubr.msk.f32.mxu0 %vm1234_vm0, %v1118_v28 }
  0xc6   : > { %10738 = vmatmul.mubr.msk.f32.gmra.mrb[20].mxu0 %vm1234_vm0, %v1119_v33 }
  0xc7   : > { %10740 = vmatprep.mubr.msk.f32.mxu0 %vm1234_vm0, %v1120_v36  ;;  %v2563_v36 = vld [vmem:[%s17165_s12 + $0x10] sm:$0xff] }
  0xca   : > { %10741 = vmatmul.mubr.msk.f32.gmra.mrb[22].mxu0 %vm1234_vm0, %v1121_v45 }
  0xcb   : > { %10743 = vmatprep.mubr.msk.f32.mxu0 %vm1234_vm0, %v1122_v46 }
  0xce   : > { %10744 = vmatmul.mubr.msk.f32.gmra.mrb[24].mxu0 %vm1234_vm0, %v1123_v52 }
  0xcf   : > { %10746 = vmatprep.mubr.msk.f32.mxu0 %vm1234_vm0, %v1124_v53  ;;  %v13083_v53 = vpack.c.bf16 %v2588_v29, %v2587_v51 }
  0xd2   : > { %10747 = vmatmul.mubr.msk.f32.gmra.mrb[26].mxu0 %vm1234_vm0, %v1125_v54  ;;  %v13085_v54 = vpack.c.bf16 %v2590_v32, %v2589_v31 }
  0xd3   : > { %10749 = vmatprep.mubr.msk.f32.mxu0 %vm1234_vm0, %v1126_v55  ;;  %v2564_v55 = vld [vmem:[%s17165_s12 + $0x18] sm:$0xff] }
  0xd6   : > { %10750 = vmatmul.mubr.msk.f32.gmra.mrb[28].mxu0 %vm1234_vm0, %v1127_v56  ;;  %v2565_v56 = vld [vmem:[%s17165_s12 + $0x20] sm:$0xff] }
  0xd7   : > { %10752 = vmatprep.mubr.msk.f32.mxu0 %vm1234_vm0, %v1128_v57  ;;  %v2566_v57 = vld [vmem:[%s17165_s12 + $0x28] sm:$0xff] }
  0xda   : > { %10753 = vmatmul.mubr.msk.f32.gmra.mrb[30].mxu0 %vm1234_vm0, %v1129_v58 }
  0xdb   : > { %10755 = vmatprep.mubr.msk.f32.mxu0 %vm1234_vm0, %v12742_v62  ;;  %v2569_v62 = vld [vmem:[%s17165_s12 + $0x40] sm:$0xff] }
  0xde   : > { %10756 = vmatmul.mubr.msk.f32.gmra.mrb[32].mxu0 %vm1234_vm0, %v12753_v63  ;;  %v11615_v63 = vpack.c.bf16 %v2570_v0, %v2569_v62 }
  0xdf   : > { %10758 = vmatprep.mubr.msk.f32.mxu0 %vm1234_vm0, %v12772_v5  ;;  %v2572_v5 = vld [vmem:[%s17165_s12 + $0x58] sm:$0xff] }
  0xe0   : > { %11616 = vmatprep.subr.bf16.mxu0 %v11615_v63 }
  0xe1   : > { %11618 = vmatpush3.bf16.msra.mxu0 %v11615_v63 }
  0xe2   : > { %10759 = vmatmul.mubr.msk.f32.gmra.mrb[34].mxu0 %vm1234_vm0, %v12780_v8  ;;  %v1153_v8 = vld [vmem:[%s12749_s16 + $0x38] sm:$0xff] }
  0xe3   : > { %10761 = vmatprep.mubr.msk.f32.mxu0 %vm1234_vm0, %v1134_v59 }
  0xe6   : > { %10762 = vmatmul.mubr.msk.f32.gmra.mrb[36].mxu0 %vm1234_vm0, %v1135_v60 }
  0xe7   : > { %10764 = vmatprep.mubr.msk.f32.mxu0 %vm1234_vm0, %v1136_v61  ;;  %v13097_v61 = vpack.c.bf16 %v2592_v21, %v2591_v35 }
  0xea   : > { %10765 = vmatmul.mubr.msk.f32.gmra.mrb[38].mxu0 %vm1234_vm0, %v1137_v2 }
  0xeb   : > { %10767 = vmatprep.mubr.msk.f32.mxu0 %vm1234_vm0, %v1166_v3  ;;  %v1150_v3 = vld [vmem:[%s12749_s16 + $0x20] sm:$0xff] }
  0xee   : > { %10768 = vmatmul.mubr.msk.f32.gmra.mrb[40].mxu0 %vm1234_vm0, %v1167_v4  ;;  %v2571_v4 = vld [vmem:[%s17165_s12 + $0x50] sm:$0xff] }
  0xef   : > { %10770 = vmatprep.mubr.msk.f32.mxu0 %vm1234_vm0, %v1168_v9  ;;  %v11619_v7 = vpack.c.bf16 %v2572_v5, %v2571_v4  ;;  %v2573_v9 = vld [vmem:[%s17165_s12 + $0x60] sm:$0xff]  ;;  %v13101_v4 = vpack.c.bf16 %v2566_v57, %v2565_v56  ;;  %v2567_v5 = vld [vmem:[%s17165_s12 + $0x30] sm:$0xff] }
  0xf0   : > { %v11623_v11 = vpack.c.bf16 %v2574_v10, %v2573_v9 }
  0xf1   : > { %11620 = vmatprep.subr.bf16.mxu0 %v11619_v7 }
  0xf2   : > { %10771 = vmatmul.mubr.msk.f32.gmra.mrb[42].mxu0 %vm1234_vm0, %v1169_v12  ;;  %v2575_v12 = vld [vmem:[%s17165_s12 + $0x70] sm:$0xff] }
  0xf3   : > { %10773 = vmatprep.mubr.msk.f32.mxu0 %vm1234_vm0, %v1150_v3  ;;  %11622 = vmatpush3.bf16.msra.mxu0 %v11619_v7  ;;  %v11627_v14 = vpack.c.bf16 %v2576_v13, %v2575_v12 }
  0xf4   : > { %11624 = vmatprep.subr.bf16.mxu0 %v11623_v11 }
  0xf6   : > { %10774 = vmatmul.mubr.msk.f32.gmra.mrb[44].mxu0 %vm1234_vm0, %v1151_v1  ;;  %v13099_v1 = vpack.c.bf16 %v2564_v55, %v2563_v36 }
  0xf7   : > { %10776 = vmatprep.mubr.msk.f32.mxu0 %vm1234_vm0, %v1152_v6  ;;  %11626 = vmatpush3.bf16.msra.mxu0 %v11623_v11  ;;  %v2568_v6 = vld [vmem:[%s17165_s12 + $0x38] sm:$0xff] }
  0xf8   : > { %11628 = vmatprep.subr.bf16.mxu0 %v11627_v14  ;;  %v13117_v20 = vpack.c.bf16 %v2568_v6, %v2567_v5 }
  0xfa   : > { %10777 = vmatmul.mubr.msk.f32.gmra.mrb[46].mxu0 %vm1234_vm0, %v1153_v8 }
  0xfb   : > { %11630 = vmatpush3.bf16.msra.mxu0 %v11627_v14 }
  0xfc   : > { %11632 = vmatprep.subr.bf16.mxu0 %v13051_v49 }
 0x171   : > { %v10709_v38 = vpop.f32.mrb[0].mxu0 }
 0x172   : > { %v2141_v40 = vadd.f32 %v10709_v38, %v13057_v50  ;;  %v1894_v44 = vpop.f32.mrb[1].mxu0 }
 0x173   : > { %v2140_v27 = vadd.f32 %v13057_v50, %v1894_v44 }
 0x174   : > { %vm2189_vm3 = vcmp.gt.f32.partialorder %v2141_v40, 0.0  ;;  %v2237_v34 = vmul.f32 0.01, %v2141_v40 }
 0x175   : > { %vm2188_vm4 = vcmp.gt.f32.partialorder %v2140_v27, 0.0  ;;  %v2236_v28 = vmul.f32 0.01, %v2140_v27  ;;  %v10712_v33 = vpop.f32.mrb[2].mxu0 }
 0x176   : > { %v2285_v45 = vsel %vm2189_vm3, %v2141_v40, %v2237_v34  ;;  %v2143_v46 = vadd.f32 %v10712_v33, %v13057_v50  ;;  %v1904_v52 = vpop.f32.mrb[3].mxu0 }
 0x177   : > { %v2406_v58 = vrot.slane %v2285_v45, 7  ;;  %v2284_v59 = vsel %vm2188_vm4, %v2140_v27, %v2236_v28  ;;  %v2142_v60 = vadd.f32 %v13057_v50, %v1904_v52 }
 0x178   : > { %v2344_v2 = vrot.slane %v2284_v59, 1  ;;  %v2405_v62 = vrot.slane %v2284_v59, 7  ;;  %vm2191_vm8 = vcmp.gt.f32.partialorder %v2143_v46, 0.0  ;;  %v2239_v0 = vmul.f32 0.01, %v2143_v46 }
 0x179   : > { %vm2190_vm9 = vcmp.gt.f32.partialorder %v2142_v60, 0.0  ;;  %v2238_v3 = vmul.f32 0.01, %v2142_v60  ;;  %v10715_v63 = vpop.f32.mrb[4].mxu0 }
 0x17a   : > { %v2287_v7 = vsel %vm2191_vm8, %v2143_v46, %v2239_v0  ;;  %v2145_v8 = vadd.f32 %v10715_v63, %v13057_v50  ;;  %v1914_v9 = vpop.f32.mrb[5].mxu0  ;;  %v13111_v10 = vsel %vm2404_vm5, %v2405_v62, %v2406_v58  ;;  %v13114_v11 = vsel %vm2404_vm5, %v2344_v2, %v2405_v62 }
 0x17b   : > { %v2410_v12 = vrot.slane %v2287_v7, 7  ;;  %v2513_v13 = vrot.slane %v2287_v7, 5  ;;  %v2286_v14 = vsel %vm2190_vm9, %v2142_v60, %v2238_v3  ;;  %v2144_v15 = vadd.f32 %v13057_v50, %v1914_v9 }
 0x17c   : > { %v2408_v16 = vrot.slane %v2286_v14, 7  ;;  %vm2193_vm10 = vcmp.gt.f32.partialorder %v2145_v8, 0.0  ;;  %v2241_v19 = vmul.f32 0.01, %v2145_v8  ;;  %v2654_v26 = vrot.slane %v13114_v11, 1 }
 0x17d   : > { %vm2192_vm11 = vcmp.gt.f32.partialorder %v2144_v15, 0.0  ;;  %v2240_v23 = vmul.f32 0.01, %v2144_v15  ;;  %v10718_v24 = vpop.f32.mrb[6].mxu0  ;;  %v2655_v30 = vrot.slane %v13111_v10, 1  ;;  %v13130_v27 = vsel %vm2404_vm5, %v2410_v12, %v2513_v13 }
 0x17e   : > { %v13122_v41 = vsel %vm2404_vm5, %v2406_v58, %v2408_v16  ;;  %v13125_v42 = vsel %vm2404_vm5, %v2408_v16, %v2410_v12  ;;  %v2289_v47 = vsel %vm2193_vm10, %v2145_v8, %v2241_v19  ;;  %v2147_v48 = vadd.f32 %v10718_v24, %v13057_v50  ;;  %v1924_v38 = vpop.f32.mrb[7].mxu0  ;;  %17469 = vst [vmem:[#allocation20_spill] sm:$0xff] %v13130_v27  ;;  %v2593_v24 = vld [vmem:[%s17165_s12 + $0x100] sm:$0xff] }
 0x17f   : > { %v2657_v40 = vrot.slane %v13122_v41, 1  ;;  %v2413_v44 = vrot.slane %v2289_v47, 7  ;;  %v2288_v51 = vsel %vm2192_vm11, %v2144_v15, %v2240_v23  ;;  %v2146_v34 = vadd.f32 %v13057_v50, %v1924_v38 }
 0x180   : > { %v2345_v29 = vrot.slane %v2288_v51, 1  ;;  %v2412_v31 = vrot.slane %v2288_v51, 7  ;;  %vm2195_vm12 = vcmp.gt.f32.partialorder %v2147_v48, 0.0  ;;  %v2243_v32 = vmul.f32 0.01, %v2147_v48 }
 0x181   : > { %v2656_v35 = vsel %vm2653_vm6, %v2654_v26, %v2655_v30  ;;  %v10721_v21 = vpop.f32.mrb[8].mxu0  ;;  %v2658_v28 = vsel %vm2653_vm6, %v2655_v30, %v2657_v40  ;;  %v2659_v33 = vrot.slane %v13125_v42, 1  ;;  %vm2194_vm13 = vcmp.gt.f32.partialorder %v2146_v34, 0.0  ;;  %v2594_v26 = vld [vmem:[%s17165_s12 + $0x108] sm:$0xff] }
 0x182   : > { %v13137_v36 = vsel %vm2404_vm5, %v2412_v31, %v2413_v44  ;;  %v13140_v45 = vsel %vm2404_vm5, %v2345_v29, %v2412_v31  ;;  %v13142_v46 = vsel %vm2195_vm12, %v2147_v48, %v2243_v32  ;;  %10795 = vmatprep.mubr.msk.f32.mxu0 %vm2744_vm7, %v2656_v35  ;;  %v2149_v52 = vadd.f32 %v10721_v21, %v13057_v50  ;;  %v1934_v55 = vpop.f32.mrb[9].mxu0 }
 0x183   : > { %v2417_v56 = vrot.slane %v13142_v46, 7  ;;  %v2514_v57 = vrot.slane %v13142_v46, 5  ;;  %v2242_v58 = vmul.f32 0.01, %v2146_v34  ;;  %10796 = vmatmul.mubr.msk.f32.vlgmr.msra.gmra.mrb[48].mxu0 %vm2744_vm7, %v2658_v28  ;;  %v2148_v60 = vadd.f32 %v13057_v50, %v1934_v55 }
 0x184   : > { %vm2197_vm14 = vcmp.gt.f32.partialorder %v2149_v52, 0.0  ;;  %v2245_v59 = vmul.f32 0.01, %v2149_v52  ;;  %v2660_v2 = vsel %vm2653_vm6, %v2657_v40, %v2659_v33  ;;  %11634 = vmatpush3.bf16.msra.mxu0 %v13051_v49  ;;  %v2661_v3 = vrot.slane %v13130_v27, 1 }
 0x185   : > { %v2290_v62 = vsel %vm2194_vm13, %v2146_v34, %v2242_v58  ;;  %10798 = vmatprep.mubr.msk.f32.mxu0 %vm2744_vm7, %v2660_v2  ;;  %v10724_v0 = vpop.f32.mrb[10].mxu0  ;;  %v2663_v63 = vrot.slane %v13140_v45, 1  ;;  %v2664_v5 = vrot.slane %v13137_v36, 1  ;;  %11636 = vmatprep.subr.bf16.mxu0 %v13099_v1  ;;  %vm2196_vm15 = vcmp.gt.f32.partialorder %v2148_v60, 0.0 }
 0x186   : > { %v2415_v6 = vrot.slane %v2290_v62, 7  ;;  %v2293_v7 = vsel %vm2197_vm14, %v2149_v52, %v2245_v59  ;;  %v2244_v8 = vmul.f32 0.01, %v2148_v60  ;;  %v1944_v9 = vpop.f32.mrb[11].mxu0  ;;  %v2151_v49 = vadd.f32 %v10724_v0, %v13057_v50 }
 0x187   : > { %v2420_v12 = vrot.slane %v2293_v7, 7  ;;  %v2150_v13 = vadd.f32 %v13057_v50, %v1944_v9  ;;  %v2662_v14 = vsel %vm2653_vm6, %v2659_v33, %v2661_v3  ;;  %v13170_v23 = vsel %vm2653_vm6, %v2663_v63, %v2664_v5 }
 0x188   : > { %v13161_v15 = vsel %vm2404_vm5, %v2413_v44, %v2415_v6  ;;  %v13166_v16 = vsel %vm2404_vm5, %v2415_v6, %v2417_v56  ;;  %v2292_v19 = vsel %vm2196_vm15, %v2148_v60, %v2244_v8  ;;  %10799 = vmatmul.mubr.msk.f32.gmra.mrb[50].mxu0 %vm2744_vm7, %v2662_v14  ;;  %17470 = vst [vmem:[#allocation21_spill] sm:$0xff] %v13170_v23  ;;  %vm2199_vm3 = vcmp.gt.f32.partialorder %v2151_v49, 0.0 }
 0x189   : > { %v2346_v30 = vrot.slane %v2292_v19, 1  ;;  %v2419_v47 = vrot.slane %v2292_v19, 7  ;;  %v2247_v48 = vmul.f32 0.01, %v2151_v49  ;;  %10801 = vmatprep.mubr.msk.f32.mxu0 %vm2744_vm7, %v13170_v23  ;;  %v10727_v38 = vpop.f32.mrb[12].mxu0  ;;  %11638 = vmatpush3.bf16.msra.mxu0 %v13099_v1  ;;  %vm2198_vm4 = vcmp.gt.f32.partialorder %v2150_v13, 0.0 }
 0x18a   : > { %v2246_v40 = vmul.f32 0.01, %v2150_v13  ;;  %v2153_v44 = vadd.f32 %v10727_v38, %v13057_v50  ;;  %v1954_v51 = vpop.f32.mrb[13].mxu0  ;;  %v2666_v29 = vrot.slane %v13161_v15, 1  ;;  %11640 = vmatprep.subr.bf16.mxu0 %v13101_v4  ;;  %v13194_v28 = vpack.c.bf16 %v2594_v26, %v2593_v24 }
 0x18b   : > { %v13185_v31 = vsel %vm2404_vm5, %v2419_v47, %v2420_v12  ;;  %v13188_v32 = vsel %vm2404_vm5, %v2346_v30, %v2419_v47  ;;  %v13190_v34 = vsel %vm2199_vm3, %v2151_v49, %v2247_v48  ;;  %v2152_v35 = vadd.f32 %v13057_v50, %v1954_v51 }
 0x18c   : > { %v2424_v1 = vrot.slane %v13190_v34, 7  ;;  %v2294_v21 = vsel %vm2198_vm4, %v2150_v13, %v2246_v40  ;;  %vm2201_vm8 = vcmp.gt.f32.partialorder %v2153_v44, 0.0  ;;  %v2249_v52 = vmul.f32 0.01, %v2153_v44 }
 0x18d   : > { %v2422_v33 = vrot.slane %v2294_v21, 7  ;;  %vm2200_vm9 = vcmp.gt.f32.partialorder %v2152_v35, 0.0  ;;  %v2248_v55 = vmul.f32 0.01, %v2152_v35  ;;  %11642 = vmatpush3.bf16.msra.mxu0 %v13101_v4  ;;  %v13198_v58 = vsel %vm2653_vm6, %v2664_v5, %v2666_v29  ;;  %v10730_v60 = vpop.f32.mrb[14].mxu0 }
 0x18e   : > { %17471 = vst [vmem:[#allocation22_spill] sm:$0xff] %v13198_v58  ;;  %v2668_v59 = vrot.slane %v13166_v16, 1  ;;  %v13204_v2 = vsel %vm2404_vm5, %v2417_v56, %v2514_v57  ;;  %v2672_v62 = vrot.slane %v13188_v32, 1  ;;  %11644 = vmatprep.subr.bf16.mxu0 %v13117_v20  ;;  %v2297_v3 = vsel %vm2201_vm8, %v2153_v44, %v2249_v52  ;;  %10802 = vmatmul.mubr.msk.f32.gmra.mrb[52].mxu0 %vm2744_vm7, %v13198_v58  ;;  %v1964_v46 = vpop.f32.mrb[15].mxu0 }
 0x18f   : > { %17472 = vst [vmem:[#allocation23_spill] sm:$0xff] %v13204_v2  ;;  %v13209_v0 = vsel %vm2404_vm5, %v2420_v12, %v2422_v33  ;;  %v13214_v4 = vsel %vm2404_vm5, %v2422_v33, %v2424_v1  ;;  %v2296_v63 = vsel %vm2200_vm9, %v2152_v35, %v2248_v55  ;;  %v2427_v56 = vrot.slane %v2297_v3, 7 }
 0x190   : > { %v2347_v57 = vrot.slane %v2296_v63, 1  ;;  %v2426_v5 = vrot.slane %v2296_v63, 7  ;;  %v13219_v6 = vsel %vm2653_vm6, %v2666_v29, %v2668_v59  ;;  %v2155_v7 = vadd.f32 %v10730_v60, %v13057_v50 }
 0x191   : > { %17473 = vst [vmem:[#allocation24_spill] sm:$0xff] %v13219_v6  ;;  %10804 = vmatprep.mubr.msk.f32.mxu0 %vm2744_vm7, %v13219_v6  ;;  %v2154_v8 = vadd.f32 %v13057_v50, %v1964_v46  ;;  %v2670_v9 = vrot.slane %v13204_v2, 1  ;;  %v2673_v12 = vrot.slane %v13185_v31, 1  ;;  %v10733_v49 = vpop.f32.mrb[16].mxu0  ;;  %11646 = vmatpush3.bf16.msra.mxu0 %v13117_v20  ;;  %v2515_v13 = vrot.slane %v13190_v34, 5 }
 0x192   : > { %v13230_v14 = vsel %vm2404_vm5, %v2426_v5, %v2427_v56  ;;  %v2157_v19 = vadd.f32 %v10733_v49, %v13057_v50  ;;  %v1974_v24 = vpop.f32.mrb[17].mxu0  ;;  %v2675_v26 = vrot.slane %v13209_v0, 1  ;;  %11648 = vmatprep.subr.bf16.mxu0 %v13002_v18  ;;  %vm2203_vm10 = vcmp.gt.f32.partialorder %v2155_v7, 0.0 }
 0x193   : > { %v2251_v30 = vmul.f32 0.01, %v2155_v7  ;;  %vm2202_vm11 = vcmp.gt.f32.partialorder %v2154_v8, 0.0  ;;  %v2250_v47 = vmul.f32 0.01, %v2154_v8  ;;  %v13236_v48 = vsel %vm2653_vm6, %v2668_v59, %v2670_v9 }
 0x194   : > { %17474 = vst [vmem:[#allocation25_spill] sm:$0xff] %v13236_v48  ;;  %v13239_v20 = vsel %vm2653_vm6, %v2672_v62, %v2673_v12  ;;  %vm2205_vm12 = vcmp.gt.f32.partialorder %v2157_v19, 0.0  ;;  %v2253_v38 = vmul.f32 0.01, %v2157_v19  ;;  %v13242_v40 = vsel %vm2404_vm5, %v2347_v57, %v2426_v5  ;;  %10805 = vmatmul.mubr.msk.f32.gmra.mrb[54].mxu0 %vm2744_vm7, %v13236_v48 }
 0x195   : > { %17475 = vst [vmem:[#allocation26_spill] sm:$0xff] %v13239_v20  ;;  %v13244_v44 = vsel %vm2203_vm10, %v2155_v7, %v2251_v30  ;;  %v2298_v51 = vsel %vm2202_vm11, %v2154_v8, %v2250_v47  ;;  %v2156_v29 = vadd.f32 %v13057_v50, %v1974_v24  ;;  %v10736_v35 = vpop.f32.mrb[18].mxu0  ;;  %10807 = vmatprep.mubr.msk.f32.mxu0 %vm2744_vm7, %v13239_v20  ;;  %v2677_v3 = vrot.slane %v13214_v4, 1 }
 0x196   : > { %v17190_v21 = vrot.slane %v13244_v44, 7  ;;  %v2429_v33 = vrot.slane %v2298_v51, 7  ;;  %v2301_v52 = vsel %vm2205_vm12, %v2157_v19, %v2253_v38  ;;  %v13253_v55 = vsel %vm2653_vm6, %v2673_v12, %v2675_v26  ;;  %v1984_v59 = vpop.f32.mrb[19].mxu0 }
 0x197   : > { %17476 = vst [vmem:[#allocation27_spill] sm:$0xff] %v13253_v55  ;;  %v2434_v60 = vrot.slane %v2301_v52, 7  ;;  %vm2204_vm13 = vcmp.gt.f32.partialorder %v2156_v29, 0.0  ;;  %v2252_v62 = vmul.f32 0.01, %v2156_v29  ;;  %v2159_v57 = vadd.f32 %v10736_v35, %v13057_v50 }
 0x198   : > { %v13257_v63 = vsel %vm2404_vm5, %v2427_v56, %v2429_v33  ;;  %v13262_v46 = vsel %vm2404_vm5, %v2429_v33, %v17190_v21  ;;  %v2158_v5 = vadd.f32 %v13057_v50, %v1984_v59  ;;  %10808 = vmatmul.mubr.msk.f32.gmra.mrb[56].mxu0 %vm2744_vm7, %v13253_v55  ;;  %v13269_v8 = vsel %vm2653_vm6, %v2675_v26, %v2677_v3 }
 0x199   : > { %v2300_v7 = vsel %vm2204_vm13, %v2156_v29, %v2252_v62  ;;  %17477 = vst [vmem:[#allocation28_spill] sm:$0xff] %v13269_v8  ;;  %v13274_v56 = vsel %vm2404_vm5, %v2424_v1, %v2515_v13  ;;  %v2681_v9 = vrot.slane %v13242_v40, 1  ;;  %v10739_v12 = vpop.f32.mrb[20].mxu0  ;;  %vm3435_vm14 = vcmask 1045504   ;;  %10810 = vmatprep.mubr.msk.f32.mxu0 %vm2744_vm7, %v13269_v8 }
 0x19a   : > { %17478 = vst [vmem:[#allocation29_spill] sm:$0xff] %v13274_v56  ;;  %v2348_v49 = vrot.slane %v2300_v7, 1  ;;  %v2433_v19 = vrot.slane %v2300_v7, 7  ;;  %vm2207_vm15 = vcmp.gt.f32.partialorder %v2159_v57, 0.0  ;;  %v2255_v24 = vmul.f32 0.01, %v2159_v57 }
 0x19b   : > { %v1994_v30 = vpop.f32.mrb[21].mxu0  ;;  %vm2206_vm3 = vcmp.gt.f32.partialorder %v2158_v5, 0.0  ;;  %v2254_v26 = vmul.f32 0.01, %v2158_v5  ;;  %v2679_v47 = vrot.slane %v13274_v56, 1  ;;  %v2682_v34 = vrot.slane %v13230_v14, 1 }
 0x19c   : > { %v2516_v1 = vrot.slane %v13244_v44, 5  ;;  %v13283_v13 = vsel %vm2404_vm5, %v2433_v19, %v2434_v60  ;;  %v13285_v38 = vsel %vm2207_vm15, %v2159_v57, %v2255_v24  ;;  %v2161_v51 = vadd.f32 %v10739_v12, %v13057_v50 }
 0x19d   : > { %v13289_v29 = vsel %vm2404_vm5, %v2348_v49, %v2433_v19  ;;  %v17193_v35 = vrot.slane %v13285_v38, 7  ;;  %v2302_v33 = vsel %vm2206_vm3, %v2158_v5, %v2254_v26  ;;  %v13293_v52 = vsel %vm2653_vm6, %v2677_v3, %v2679_v47  ;;  %v10742_v59 = vpop.f32.mrb[22].mxu0 }
 0x19e   : > { %17479 = vst [vmem:[#allocation30_spill] sm:$0xff] %v13293_v52  ;;  %v2436_v62 = vrot.slane %v2302_v33, 7  ;;  %10811 = vmatmul.mubr.msk.f32.gmra.mrb[58].mxu0 %vm2744_vm7, %v13293_v52  ;;  %v13298_v7 = vsel %vm2653_vm6, %v2681_v9, %v2682_v34  ;;  %vm2209_vm4 = vcmp.gt.f32.partialorder %v2161_v51, 0.0  ;;  %v2257_v57 = vmul.f32 0.01, %v2161_v51  ;;  %v2004_v12 = vpop.f32.mrb[23].mxu0 }
 0x19f   : > { %17480 = vst [vmem:[#allocation31_spill] sm:$0xff] %v13298_v7  ;;  %10813 = vmatprep.mubr.msk.f32.mxu0 %vm2744_vm7, %v13298_v7  ;;  %v2160_v49 = vadd.f32 %v13057_v50, %v1994_v30  ;;  %v2684_v5 = vrot.slane %v13257_v63, 1  ;;  %v3468_v19 = vrot.slane %v13262_v46, 2  ;;  %v2686_v47 = vrot.slane %v13262_v46, 1 }
 0x1a0   : > { %v13307_v24 = vsel %vm2404_vm5, %v2434_v60, %v2436_v62  ;;  %v13312_v9 = vsel %vm2404_vm5, %v2436_v62, %v17193_v35  ;;  %v2305_v26 = vsel %vm2209_vm4, %v2161_v51, %v2257_v57  ;;  %v17482_v60 = vrot.slane %v13257_v63, 2 }
 0x1a1   : > { %v2441_v33 = vrot.slane %v2305_v26, 7  ;;  %vm2208_vm8 = vcmp.gt.f32.partialorder %v2160_v49, 0.0  ;;  %v2256_v30 = vmul.f32 0.01, %v2160_v49  ;;  %v13316_v21 = vsel %vm2653_vm6, %v2682_v34, %v2684_v5  ;;  %v10745_v3 = vpop.f32.mrb[24].mxu0 }
 0x1a2   : > { %17481 = vst [vmem:[#allocation32_spill] sm:$0xff] %v13316_v21  ;;  %10814 = vmatmul.mubr.msk.f32.gmra.mrb[60].mxu0 %vm2744_vm7, %v13316_v21  ;;  %v13323_v39 = vsel %vm3435_vm14, %v17482_v60, %v3468_v19  ;;  %v13326_v62 = vsel %vm2653_vm6, %v2684_v5, %v2686_v47  ;;  %v17485_v51 = vrot.slane %v13244_v44, 7  ;;  %v2163_v26 = vadd.f32 %v10742_v59, %v13057_v50  ;;  %v2014_v34 = vpop.f32.mrb[25].mxu0 }
 0x1a3   : > { %17483 = vst [vmem:[#allocation33_spill] sm:$0xff] %v13323_v39  ;;  %17484 = vst [vmem:[#allocation34_spill] sm:$0xff] %v13326_v62  ;;  %v2304_v35 = vsel %vm2208_vm8, %v2160_v49, %v2256_v30  ;;  %10968 = vmatprep.mubr.msk.f32.mxu1 %vm2744_vm7, %v13323_v39  ;;  %10816 = vmatprep.mubr.msk.f32.mxu0 %vm2744_vm7, %v13326_v62  ;;  %v2162_v60 = vadd.f32 %v13057_v50, %v2004_v12 }
 0x1a4   : > { %v2552_v57 = vsel %vm2404_vm5, %v17485_v51, %v2516_v1  ;;  %v2349_v5 = vrot.slane %v2304_v35, 1  ;;  %v2440_v56 = vrot.slane %v2304_v35, 7  ;;  %vm2211_vm9 = vcmp.gt.f32.partialorder %v2163_v26, 0.0 }
 0x1a5   : > { %v3470_v17 = vrot.slane %v2552_v57, 2  ;;  %v2688_v21 = vrot.slane %v2552_v57, 1  ;;  %v2259_v44 = vmul.f32 0.01, %v2163_v26  ;;  %vm2210_vm10 = vcmp.gt.f32.partialorder %v2162_v60, 0.0  ;;  %v10748_v30 = vpop.f32.mrb[26].mxu0 }
 0x1a6   : > { %v2258_v59 = vmul.f32 0.01, %v2162_v60  ;;  %v2517_v51 = vrot.slane %v13285_v38, 5  ;;  %v13345_v39 = vsel %vm2404_vm5, %v2440_v56, %v2441_v33  ;;  %v2024_v12 = vpop.f32.mrb[27].mxu0  ;;  %v3473_v57 = vrot.slane %v13283_v13, 2 }
 0x1a7   : > { %v13338_v1 = vsel %vm3435_vm14, %v3468_v19, %v3470_v17  ;;  %v13341_v49 = vsel %vm2653_vm6, %v2686_v47, %v2688_v21  ;;  %v13349_v35 = vsel %vm2211_vm9, %v2163_v26, %v2259_v44  ;;  %v3472_v17 = vrot.slane %v13289_v29, 2 }
 0x1a8   : > { %17486 = vst [vmem:[#allocation35_spill] sm:$0xff] %v13338_v1  ;;  %17487 = vst [vmem:[#allocation36_spill] sm:$0xff] %v13341_v49  ;;  %10969 = vmatmul.mubr.msk.f32.vlgmr.msra.gmra.mrb[0].mxu1 %vm2744_vm7, %v13338_v1  ;;  %10817 = vmatmul.mubr.msk.f32.gmra.mrb[62].mxu0 %vm2744_vm7, %v13341_v49  ;;  %v13355_v21 = vsel %vm2404_vm5, %v2349_v5, %v2440_v56  ;;  %v17209_v19 = vrot.slane %v13349_v35, 7  ;;  %v2306_v47 = vsel %vm2210_vm10, %v2162_v60, %v2258_v59 }
 0x1a9   : > { %11666 = vmatpush3.bf16.msra.mxu1 %v13042_v43  ;;  %v2443_v62 = vrot.slane %v2306_v47, 7  ;;  %v2690_v26 = vrot.slane %v13289_v29, 1  ;;  %v2691_v44 = vrot.slane %v13283_v13, 1  ;;  %v2165_v1 = vadd.f32 %v10745_v3, %v13057_v50  ;;  %v10751_v59 = vpop.f32.mrb[28].mxu0 }
 0x1aa   : > { %11668 = vmatprep.subr.bf16.mxu1 %v13083_v53  ;;  %v13365_v49 = vsel %vm3435_vm14, %v3472_v17, %v3473_v57  ;;  %v2164_v56 = vadd.f32 %v13057_v50, %v2014_v34  ;;  %v2693_v60 = vrot.slane %v13307_v24, 1  ;;  %v3475_v5 = vrot.slane %v13307_v24, 2  ;;  %v2034_v34 = vpop.f32.mrb[29].mxu0 }
 0x1ab   : > { %17488 = vst [vmem:[#allocation37_spill] sm:$0xff] %v13365_v49  ;;  %v13371_v43 = vsel %vm2404_vm5, %v2441_v33, %v2443_v62  ;;  %v13376_v47 = vsel %vm2404_vm5, %v2443_v62, %v17209_v19  ;;  %10971 = vmatprep.mubr.msk.f32.mxu1 %vm2744_vm7, %v13365_v49  ;;  %v13381_v3 = vsel %vm2653_vm6, %v2690_v26, %v2691_v44  ;;  %vm2213_vm11 = vcmp.gt.f32.partialorder %v2165_v1, 0.0 }
 0x1ac   : > { %17489 = vst [vmem:[#allocation38_spill] sm:$0xff] %v13371_v43  ;;  %17490 = vst [vmem:[#allocation39_spill] sm:$0xff] %v13376_v47  ;;  %10819 = vmatprep.mubr.msk.f32.mxu0 %vm2744_vm7, %v13381_v3  ;;  %v2261_v17 = vmul.f32 0.01, %v2165_v1  ;;  %vm2212_vm12 = vcmp.gt.f32.partialorder %v2164_v56, 0.0  ;;  %v13386_v7 = vsel %vm2653_vm6, %v2691_v44, %v2693_v60  ;;  %v13392_v62 = vsel %vm3435_vm14, %v3473_v57, %v3475_v5 }
 0x1ad   : > { %17491 = vst [vmem:[#allocation40_spill] sm:$0xff] %v13381_v3  ;;  %v2260_v33 = vmul.f32 0.01, %v2164_v56  ;;  %17492 = vst [vmem:[#allocation41_spill] sm:$0xff] %v13386_v7  ;;  %11670 = vmatpush3.bf16.msra.mxu1 %v13083_v53  ;;  %10820 = vmatmul.mubr.msk.f32.gmra.mrb[64].mxu0 %vm2744_vm7, %v13386_v7  ;;  %v2695_v26 = vrot.slane %v13312_v9, 1  ;;  %v3477_v19 = vrot.slane %v13312_v9, 2  ;;  %v2167_v49 = vadd.f32 %v10748_v30, %v13057_v50 }
 0x1ae   : > { %17493 = vst [vmem:[#allocation42_spill] sm:$0xff] %v13392_v62  ;;  %11672 = vmatprep.subr.bf16.mxu1 %v13085_v54  ;;  %v2309_v3 = vsel %vm2213_vm11, %v2165_v1, %v2261_v17  ;;  %10972 = vmatmul.mubr.msk.f32.gmra.mrb[2].mxu1 %vm2744_vm7, %v13392_v62  ;;  %v2166_v53 = vadd.f32 %v13057_v50, %v2024_v12  ;;  %v17494_v44 = vrot.slane %v13285_v38, 7  ;;  %v10754_v7 = vpop.f32.mrb[30].mxu0  ;;  %v2518_v38 = vrot.slane %v13349_v35, 5 }
 0x1af   : > { %v2308_v52 = vsel %vm2212_vm12, %v2164_v56, %v2260_v33  ;;  %v2448_v8 = vrot.slane %v2309_v3, 7  ;;  %v13405_v20 = vsel %vm2653_vm6, %v2693_v60, %v2695_v26  ;;  %v2044_v30 = vpop.f32.mrb[31].mxu0  ;;  %v13410_v1 = vsel %vm3435_vm14, %v3475_v5, %v3477_v19 }
 0x1b0   : > { %v2553_v57 = vsel %vm2404_vm5, %v17494_v44, %v2517_v51  ;;  %v2350_v55 = vrot.slane %v2308_v52, 1  ;;  %v2447_v2 = vrot.slane %v2308_v52, 7  ;;  %17495 = vst [vmem:[#allocation43_spill] sm:$0xff] %v13405_v20  ;;  %10822 = vmatprep.mubr.msk.f32.mxu0 %vm2744_vm7, %v13405_v20  ;;  %17496 = vst [vmem:[#allocation44_spill] sm:$0xff] %v13410_v1  ;;  %vm2215_vm13 = vcmp.gt.f32.partialorder %v2167_v49, 0.0  ;;  %10974 = vmatprep.mubr.msk.f32.mxu1 %vm2744_vm7, %v13410_v1 }
 0x1b1   : > { %v2263_v12 = vmul.f32 0.01, %v2167_v49  ;;  %vm2214_vm15 = vcmp.gt.f32.partialorder %v2166_v53, 0.0  ;;  %11674 = vmatpush3.bf16.msra.mxu1 %v13085_v54  ;;  %v2262_v52 = vmul.f32 0.01, %v2166_v53  ;;  %v2697_v56 = vrot.slane %v2553_v57, 1 }
 0x1b2   : > { %v13415_v51 = vsel %vm2404_vm5, %v2447_v2, %v2448_v8  ;;  %11676 = vmatprep.subr.bf16.mxu1 %v13097_v61  ;;  %v3479_v5 = vrot.slane %v2553_v57, 2  ;;  %v2699_v3 = vrot.slane %v13355_v21, 1  ;;  %v2700_v17 = vrot.slane %v13345_v39, 1  ;;  %v13424_v54 = vpop.f32.mrb[32].mxu0 }
 0x1b3   : > { %17497 = vst [vmem:[#allocation45_spill] sm:$0xff] %v13415_v51  ;;  %v13420_v60 = vsel %vm2215_vm13, %v2167_v49, %v2263_v12  ;;  %v13427_v33 = vsel %vm2404_vm5, %v2350_v55, %v2447_v2  ;;  %v2310_v62 = vsel %vm2214_vm15, %v2166_v53, %v2262_v52  ;;  %v13431_v1 = vsel %vm2653_vm6, %v2695_v26, %v2697_v56  ;;  %v13433_v20 = vpop.f32.mrb[33].mxu0 }
 0x1b4   : > { %17498 = vst [vmem:[#allocation46_spill] sm:$0xff] %v13427_v33  ;;  %v17231_v44 = vrot.slane %v13420_v60, 7  ;;  %17499 = vst [vmem:[#allocation47_spill] sm:$0xff] %v13431_v1  ;;  %v2450_v49 = vrot.slane %v2310_v62, 7  ;;  %10823 = vmatmul.mubr.msk.f32.gmra.mrb[66].mxu0 %vm2744_vm7, %v13431_v1  ;;  %v13438_v57 = vsel %vm3435_vm14, %v3477_v19, %v3479_v5  ;;  %v13441_v12 = vsel %vm2653_vm6, %v2699_v3, %v2700_v17 }
 0x1b5   : > { %17500 = vst [vmem:[#allocation48_spill] sm:$0xff] %v13438_v57  ;;  %17501 = vst [vmem:[#allocation49_spill] sm:$0xff] %v13441_v12  ;;  %v3481_v2 = vrot.slane %v13355_v21, 2  ;;  %11678 = vmatpush3.bf16.msra.mxu1 %v13097_v61  ;;  %10825 = vmatprep.mubr.msk.f32.mxu0 %vm2744_vm7, %v13441_v12  ;;  %v3482_v55 = vrot.slane %v13345_v39, 2  ;;  %v2169_v62 = vadd.f32 %v10751_v59, %v13057_v50  ;;  %v2702_v26 = vrot.slane %v13371_v43, 1  ;;  %v13463_v5 = vpop.f32.mrb[34].mxu0 }
 0x1b6   : > { %10975 = vmatmul.mubr.msk.f32.gmra.mrb[4].mxu1 %vm2744_vm7, %v13438_v57  ;;  %v2168_v19 = vadd.f32 %v13057_v50, %v2034_v34  ;;  %v13454_v53 = vsel %vm2404_vm5, %v2448_v8, %v2450_v49  ;;  %v13459_v61 = vsel %vm2404_vm5, %v2450_v49, %v17231_v44  ;;  %v3484_v52 = vrot.slane %v13371_v43, 2  ;;  %11680 = vmatprep.subr.bf16.mxu1 %v13194_v28  ;;  %v13469_v8 = vpop.f32.mrb[35].mxu0 }
 0x1b7   : > { %17502 = vst [vmem:[#allocation50_spill] sm:$0xff] %v13454_v53  ;;  %17503 = vst [vmem:[#allocation51_spill] sm:$0xff] %v13459_v61  ;;  %v2704_v56 = vrot.slane %v13376_v47, 1  ;;  %v13467_v59 = vsel %vm3435_vm14, %v3481_v2, %v3482_v55  ;;  %vm2217_vm3 = vcmp.gt.f32.partialorder %v2169_v62, 0.0  ;;  %v2265_v34 = vmul.f32 0.01, %v2169_v62 }
 0x1b8   : > { %17504 = vst [vmem:[#allocation52_spill] sm:$0xff] %v13467_v59  ;;  %vm2216_vm4 = vcmp.gt.f32.partialorder %v2168_v19, 0.0  ;;  %10977 = vmatprep.mubr.msk.f32.mxu1 %vm2744_vm7, %v13467_v59  ;;  %v2264_v3 = vmul.f32 0.01, %v2168_v19  ;;  %v13474_v49 = vsel %vm2653_vm6, %v2700_v17, %v2702_v26  ;;  %v13477_v44 = vsel %vm3435_vm14, %v3482_v55, %v3484_v52 }
 0x1b9   : > { %17505 = vst [vmem:[#allocation53_spill] sm:$0xff] %v13474_v49  ;;  %17506 = vst [vmem:[#allocation54_spill] sm:$0xff] %v13477_v44  ;;  %v13480_v57 = vsel %vm2653_vm6, %v2702_v26, %v2704_v56  ;;  %v2313_v2 = vsel %vm2217_vm3, %v2169_v62, %v2265_v34  ;;  %10826 = vmatmul.mubr.msk.f32.gmra.mrb[68].mxu0 %vm2744_vm7, %v13474_v49  ;;  %v3486_v12 = vrot.slane %v13376_v47, 2  ;;  %v17508_v55 = vrot.slane %v13349_v35, 7  ;;  %v13495_v34 = vpop.f32.mrb[36].mxu0 }
 0x1ba   : > { %17507 = vst [vmem:[#allocation55_spill] sm:$0xff] %v13480_v57  ;;  %10978 = vmatmul.mubr.msk.f32.gmra.mrb[6].mxu1 %vm2744_vm7, %v13477_v44  ;;  %v2171_v59 = vadd.f32 %v10754_v7, %v13057_v50  ;;  %v2170_v17 = vadd.f32 %v13057_v50, %v2044_v30  ;;  %v2455_v1 = vrot.slane %v2313_v2, 7  ;;  %v2312_v48 = vsel %vm2216_vm4, %v2168_v19, %v2264_v3  ;;  %v13500_v7 = vpop.f32.mrb[37].mxu0 }
 0x1bb   : > { %10828 = vmatprep.mubr.msk.f32.mxu0 %vm2744_vm7, %v13480_v57  ;;  %v2554_v62 = vsel %vm2404_vm5, %v17508_v55, %v2518_v38  ;;  %v2708_v26 = vrot.slane %v13427_v33, 1  ;;  %v2351_v44 = vrot.slane %v2312_v48, 1  ;;  %v2454_v49 = vrot.slane %v2312_v48, 7 }
 0x1bc   : > { %v13498_v6 = vsel %vm3435_vm14, %v3484_v52, %v3486_v12  ;;  %vm2219_vm8 = vcmp.gt.f32.partialorder %v2171_v59, 0.0  ;;  %v2267_v30 = vmul.f32 0.01, %v2171_v59  ;;  %vm2218_vm9 = vcmp.gt.f32.partialorder %v2170_v17, 0.0 }
 0x1bd   : > { %17509 = vst [vmem:[#allocation56_spill] sm:$0xff] %v13498_v6  ;;  %10980 = vmatprep.mubr.msk.f32.mxu1 %vm2744_vm7, %v13498_v6  ;;  %v2266_v35 = vmul.f32 0.01, %v2170_v17  ;;  %v2706_v19 = vrot.slane %v2554_v62, 1  ;;  %v2519_v38 = vrot.slane %v13420_v60, 5  ;;  %v13506_v3 = vsel %vm2404_vm5, %v2454_v49, %v2455_v1  ;;  %v13515_v58 = vpop.f32.mrb[38].mxu0 }
 0x1be   : > { %17510 = vst [vmem:[#allocation57_spill] sm:$0xff] %v13506_v3  ;;  %v3488_v2 = vrot.slane %v2554_v62, 2  ;;  %v2709_v48 = vrot.slane %v13415_v51, 1  ;;  %v13509_v52 = vsel %vm2219_vm8, %v2171_v59, %v2267_v30  ;;  %v3490_v6 = vrot.slane %v13427_v33, 2 }
 0x1bf   : > { %v2314_v55 = vsel %vm2218_vm9, %v2170_v17, %v2266_v35  ;;  %v13512_v57 = vsel %vm2653_vm6, %v2704_v56, %v2706_v19  ;;  %v13518_v27 = vsel %vm2404_vm5, %v2351_v44, %v2454_v49  ;;  %v17255_v23 = vrot.slane %v13509_v52, 7  ;;  %v13526_v17 = vpop.f32.mrb[39].mxu0 }
 0x1c0   : > { %17511 = vst [vmem:[#allocation58_spill] sm:$0xff] %v13512_v57  ;;  %v2457_v47 = vrot.slane %v2314_v55, 7  ;;  %10829 = vmatmul.mubr.msk.f32.gmra.mrb[70].mxu0 %vm2744_vm7, %v13512_v57  ;;  %v13524_v59 = vsel %vm3435_vm14, %v3486_v12, %v3488_v2  ;;  %v13531_v56 = vsel %vm2653_vm6, %v2708_v26, %v2709_v48  ;;  %v3491_v44 = vrot.slane %v13415_v51, 2 }
 0x1c1   : > { %17512 = vst [vmem:[#allocation59_spill] sm:$0xff] %v13524_v59  ;;  %10981 = vmatmul.mubr.msk.f32.gmra.mrb[8].mxu1 %vm2744_vm7, %v13524_v59  ;;  %17513 = vst [vmem:[#allocation60_spill] sm:$0xff] %v13531_v56  ;;  %v2173_v49 = vadd.f32 %v13424_v54, %v13057_v50  ;;  %v2172_v62 = vadd.f32 %v13057_v50, %v13433_v20  ;;  %10831 = vmatprep.mubr.msk.f32.mxu0 %vm2744_vm7, %v13531_v56  ;;  %v2711_v26 = vrot.slane %v13454_v53, 1 }
 0x1c2   : > { %v13539_v30 = vsel %vm2404_vm5, %v2455_v1, %v2457_v47  ;;  %v13544_v12 = vsel %vm2404_vm5, %v2457_v47, %v17255_v23  ;;  %v3493_v35 = vrot.slane %v13454_v53, 2  ;;  %v13551_v54 = vsel %vm3435_vm14, %v3490_v6, %v3491_v44  ;;  %v13553_v1 = vpop.f32.mrb[40].mxu0 }
 0x1c3   : > { %17514 = vst [vmem:[#allocation61_spill] sm:$0xff] %v13539_v30  ;;  %17515 = vst [vmem:[#allocation62_spill] sm:$0xff] %v13544_v12  ;;  %vm2221_vm10 = vcmp.gt.f32.partialorder %v2173_v49, 0.0  ;;  %v2269_v20 = vmul.f32 0.01, %v2173_v49  ;;  %vm2220_vm11 = vcmp.gt.f32.partialorder %v2172_v62, 0.0  ;;  %10983 = vmatprep.mubr.msk.f32.mxu1 %vm2744_vm7, %v13551_v54  ;;  %v13558_v19 = vsel %vm2653_vm6, %v2709_v48, %v2711_v26 }
 0x1c4   : > { %17516 = vst [vmem:[#allocation63_spill] sm:$0xff] %v13551_v54  ;;  %v2268_v47 = vmul.f32 0.01, %v2172_v62  ;;  %17517 = vst [vmem:[#allocation64_spill] sm:$0xff] %v13558_v19  ;;  %v13561_v2 = vsel %vm3435_vm14, %v3491_v44, %v3493_v35  ;;  %v2713_v55 = vrot.slane %v13459_v61, 1  ;;  %v13564_v23 = vpop.f32.mrb[41].mxu0  ;;  %10832 = vmatmul.mubr.msk.f32.gmra.mrb[72].mxu0 %vm2744_vm7, %v13558_v19  ;;  %v2175_v48 = vadd.f32 %v13463_v5, %v13057_v50 }
 0x1c5   : > { %17518 = vst [vmem:[#allocation65_spill] sm:$0xff] %v13561_v2  ;;  %v2317_v6 = vsel %vm2221_vm10, %v2173_v49, %v2269_v20  ;;  %10984 = vmatmul.mubr.msk.f32.gmra.mrb[10].mxu1 %vm2744_vm7, %v13561_v2  ;;  %v3495_v54 = vrot.slane %v13459_v61, 2  ;;  %v2174_v44 = vadd.f32 %v13057_v50, %v13469_v8  ;;  %v17520_v49 = vrot.slane %v13420_v60, 7  ;;  %v13586_v5 = vpop.f32.mrb[42].mxu0 }
 0x1c6   : > { %v2462_v59 = vrot.slane %v2317_v6, 7  ;;  %v2316_v56 = vsel %vm2220_vm11, %v2172_v62, %v2268_v47  ;;  %v13576_v57 = vsel %vm2653_vm6, %v2711_v26, %v2713_v55  ;;  %vm2223_vm12 = vcmp.gt.f32.partialorder %v2175_v48, 0.0 }
 0x1c7   : > { %17519 = vst [vmem:[#allocation66_spill] sm:$0xff] %v13576_v57  ;;  %v2555_v20 = vsel %vm2404_vm5, %v17520_v49, %v2519_v38  ;;  %v2461_v19 = vrot.slane %v2316_v56, 7  ;;  %10834 = vmatprep.mubr.msk.f32.mxu0 %vm2744_vm7, %v13576_v57  ;;  %v13584_v2 = vsel %vm3435_vm14, %v3493_v35, %v3495_v54  ;;  %v2271_v8 = vmul.f32 0.01, %v2175_v48  ;;  %v13595_v35 = vpop.f32.mrb[43].mxu0 }
 0x1c8   : > { %17521 = vst [vmem:[#allocation67_spill] sm:$0xff] %v13584_v2  ;;  %10986 = vmatprep.mubr.msk.f32.mxu1 %vm2744_vm7, %v13584_v2  ;;  %vm2222_vm13 = vcmp.gt.f32.partialorder %v2174_v44, 0.0  ;;  %v2270_v62 = vmul.f32 0.01, %v2174_v44  ;;  %v2715_v26 = vrot.slane %v2555_v20, 1  ;;  %v2520_v60 = vrot.slane %v13509_v52, 5 }
 0x1c9   : > { %v13592_v38 = vsel %vm2404_vm5, %v2461_v19, %v2462_v59  ;;  %v3497_v47 = vrot.slane %v2555_v20, 2  ;;  %v2717_v6 = vrot.slane %v13518_v27, 1  ;;  %v13597_v49 = vsel %vm2223_vm12, %v2175_v48, %v2271_v8  ;;  %v13609_v43 = vpop.f32.mrb[44].mxu0 }
 0x1ca   : > { %v2318_v57 = vsel %vm2222_vm13, %v2174_v44, %v2270_v62  ;;  %v13600_v61 = vsel %vm2653_vm6, %v2713_v55, %v2715_v26  ;;  %v2718_v2 = vrot.slane %v13506_v3, 1  ;;  %v2352_v53 = vrot.slane %v2316_v56, 1  ;;  %v13620_v44 = vpop.f32.mrb[45].mxu0 }
 0x1cb   : > { %17522 = vst [vmem:[#allocation68_spill] sm:$0xff] %v13600_v61  ;;  %v17282_v51 = vrot.slane %v13597_v49, 7  ;;  %v2464_v33 = vrot.slane %v2318_v57, 7  ;;  %10835 = vmatmul.mubr.msk.f32.gmra.mrb[74].mxu0 %vm2744_vm7, %v13600_v61  ;;  %v13607_v20 = vsel %vm3435_vm14, %v3495_v54, %v3497_v47  ;;  %v3499_v48 = vrot.slane %v13518_v27, 2 }
 0x1cc   : > { %17523 = vst [vmem:[#allocation69_spill] sm:$0xff] %v13607_v20  ;;  %10987 = vmatmul.mubr.msk.f32.gmra.mrb[12].mxu1 %vm2744_vm7, %v13607_v20  ;;  %v13614_v55 = vsel %vm2653_vm6, %v2717_v6, %v2718_v2  ;;  %v3500_v56 = vrot.slane %v13506_v3, 2  ;;  %v2177_v57 = vadd.f32 %v13495_v34, %v13057_v50  ;;  %v2176_v62 = vadd.f32 %v13057_v50, %v13500_v7 }
 0x1cd   : > { %17524 = vst [vmem:[#allocation70_spill] sm:$0xff] %v13614_v55  ;;  %v13623_v54 = vsel %vm2404_vm5, %v2462_v59, %v2464_v33  ;;  %v13628_v8 = vsel %vm2404_vm5, %v2464_v33, %v17282_v51  ;;  %10837 = vmatprep.mubr.msk.f32.mxu0 %vm2744_vm7, %v13614_v55  ;;  %v2720_v26 = vrot.slane %v13539_v30, 1  ;;  %v3502_v59 = vrot.slane %v13539_v30, 2  ;;  %v13645_v7 = vpop.f32.mrb[46].mxu0 }
 0x1ce   : > { %v13636_v34 = vsel %vm3435_vm14, %v3499_v48, %v3500_v56  ;;  %vm2225_vm15 = vcmp.gt.f32.partialorder %v2177_v57, 0.0  ;;  %v2273_v47 = vmul.f32 0.01, %v2177_v57  ;;  %vm2224_vm3 = vcmp.gt.f32.partialorder %v2176_v62, 0.0  ;;  %v13655_v61 = vpop.f32.mrb[47].mxu0 }
 0x1cf   : > { %17525 = vst [vmem:[#allocation71_spill] sm:$0xff] %v13636_v34  ;;  %10989 = vmatprep.mubr.msk.f32.mxu1 %vm2744_vm7, %v13636_v34  ;;  %v2272_v33 = vmul.f32 0.01, %v2176_v62  ;;  %v13642_v6 = vsel %vm2653_vm6, %v2718_v2, %v2720_v26  ;;  %v2722_v51 = vrot.slane %v13544_v12, 1  ;;  %v13650_v48 = vsel %vm3435_vm14, %v3500_v56, %v3502_v59 }
 0x1d0   : > { %17526 = vst [vmem:[#allocation72_spill] sm:$0xff] %v13642_v6  ;;  %v2321_v20 = vsel %vm2225_vm15, %v2177_v57, %v2273_v47  ;;  %10838 = vmatmul.mubr.msk.f32.gmra.mrb[76].mxu0 %vm2744_vm7, %v13642_v6  ;;  %17527 = vst [vmem:[#allocation73_spill] sm:$0xff] %v13650_v48  ;;  %v3504_v55 = vrot.slane %v13544_v12, 2  ;;  %v2179_v34 = vadd.f32 %v13515_v58, %v13057_v50  ;;  %10990 = vmatmul.mubr.msk.f32.gmra.mrb[14].mxu1 %vm2744_vm7, %v13650_v48 }
 0x1d1   : > { %v2469_v2 = vrot.slane %v2321_v20, 7  ;;  %v2320_v30 = vsel %vm2224_vm3, %v2176_v62, %v2272_v33  ;;  %v13660_v57 = vsel %vm2653_vm6, %v2720_v26, %v2722_v51  ;;  %v2178_v47 = vadd.f32 %v13057_v50, %v13526_v17 }
 0x1d2   : > { %17528 = vst [vmem:[#allocation74_spill] sm:$0xff] %v13660_v57  ;;  %v13665_v56 = vsel %vm2404_vm5, %v2352_v53, %v2461_v19  ;;  %v2468_v6 = vrot.slane %v2320_v30, 7  ;;  %10840 = vmatprep.mubr.msk.f32.mxu0 %vm2744_vm7, %v13660_v57  ;;  %v13670_v58 = vsel %vm3435_vm14, %v3502_v59, %v3504_v55  ;;  %vm2227_vm4 = vcmp.gt.f32.partialorder %v2179_v34, 0.0 }
 0x1d3   : > { %17529 = vst [vmem:[#allocation75_spill] sm:$0xff] %v13670_v58  ;;  %10992 = vmatprep.mubr.msk.f32.mxu1 %vm2744_vm7, %v13670_v58  ;;  %v2275_v20 = vmul.f32 0.01, %v2179_v34  ;;  %vm2226_vm8 = vcmp.gt.f32.partialorder %v2178_v47, 0.0  ;;  %v2274_v62 = vmul.f32 0.01, %v2178_v47 }
 0x1d4   : > { %v17530_v26 = vrot.slane %v13509_v52, 7  ;;  %v13678_v53 = vsel %vm2404_vm5, %v2468_v6, %v2469_v2  ;;  %v2726_v48 = vrot.slane %v13665_v56, 1  ;;  %v2727_v57 = vrot.slane %v13592_v38, 1 }
 0x1d5   : > { %v13680_v33 = vsel %vm2227_vm4, %v2179_v34, %v2275_v20  ;;  %v2322_v59 = vsel %vm2226_vm8, %v2178_v47, %v2274_v62  ;;  %v2353_v58 = vrot.slane %v2320_v30, 1  ;;  %v3508_v47 = vrot.slane %v13665_v56, 2 }
 0x1d6   : > { %v2556_v50 = vsel %vm2404_vm5, %v17530_v26, %v2520_v60  ;;  %v17305_v12 = vrot.slane %v13680_v33, 7  ;;  %v2471_v3 = vrot.slane %v2322_v59, 7  ;;  %v13694_v34 = vsel %vm2653_vm6, %v2726_v48, %v2727_v57 }
 0x1d7   : > { %v2724_v17 = vrot.slane %v2556_v50, 1  ;;  %v3506_v19 = vrot.slane %v2556_v50, 2  ;;  %17533 = vst [vmem:[#allocation78_spill] sm:$0xff] %v13694_v34  ;;  %v3509_v20 = vrot.slane %v13592_v38, 2  ;;  %v2521_v48 = vrot.slane %v13597_v49, 5 }
 0x1d8   : > { %v13699_v30 = vsel %vm2404_vm5, %v2469_v2, %v2471_v3  ;;  %v3511_v2 = vrot.slane %v13623_v54, 2  ;;  %v2731_v26 = vrot.slane %v13628_v8, 1  ;;  %v13731_v59 = vsel %vm2404_vm5, %v2353_v58, %v2468_v6 }
 0x1d9   : > { %v13686_v52 = vsel %vm2653_vm6, %v2722_v51, %v2724_v17  ;;  %v13691_v60 = vsel %vm3435_vm14, %v3504_v55, %v3506_v19  ;;  %v13704_v51 = vsel %vm2404_vm5, %v2471_v3, %v17305_v12  ;;  %v2729_v55 = vrot.slane %v13623_v54, 1  ;;  %v13722_v3 = vld [vmem:[%s17164_s11] ss:$0 sm:$0xff] }
 0x1da   : > { %17531 = vst [vmem:[#allocation76_spill] sm:$0xff] %v13686_v52  ;;  %10841 = vmatmul.mubr.msk.f32.gmra.mrb[78].mxu0 %vm2744_vm7, %v13686_v52  ;;  %17532 = vst [vmem:[#allocation77_spill] sm:$0xff] %v13691_v60  ;;  %10993 = vmatmul.mubr.msk.f32.gmra.mrb[16].mxu1 %vm2744_vm7, %v13691_v60  ;;  %v13713_v62 = vsel %vm3435_vm14, %v3508_v47, %v3509_v20  ;;  %v2181_v50 = vadd.f32 %v13722_v3, %v13553_v1  ;;  %v3513_v19 = vrot.slane %v13628_v8, 2 }
 0x1db   : > { %17534 = vst [vmem:[#allocation79_spill] sm:$0xff] %v13704_v51  ;;  %10843 = vmatprep.mubr.msk.f32.mxu0 %vm2744_vm7, %v13694_v34  ;;  %17535 = vst [vmem:[#allocation80_spill] sm:$0xff] %v13713_v62  ;;  %10995 = vmatprep.mubr.msk.f32.mxu1 %vm2744_vm7, %v13713_v62  ;;  %v13727_v17 = vsel %vm2653_vm6, %v2727_v57, %v2729_v55  ;;  %v2180_v47 = vadd.f32 %v13722_v3, %v13564_v23  ;;  %v17540_v57 = vrot.slane %v13597_v49, 7 }
 0x1dc   : > { %17536 = vst [vmem:[#allocation81_spill] sm:$0xff] %v13727_v17  ;;  %v13738_v12 = vsel %vm3435_vm14, %v3509_v20, %v3511_v2  ;;  %v13741_v62 = vsel %vm2653_vm6, %v2729_v55, %v2731_v26  ;;  %v13748_v1 = vsel %vm3435_vm14, %v3511_v2, %v3513_v19  ;;  %v2183_v23 = vadd.f32 %v13722_v3, %v13586_v5 }
 0x1dd   : > { %17537 = vst [vmem:[#allocation82_spill] sm:$0xff] %v13738_v12  ;;  %17538 = vst [vmem:[#allocation83_spill] sm:$0xff] %v13741_v62  ;;  %v2182_v6 = vadd.f32 %v13722_v3, %v13595_v35  ;;  %v2557_v58 = vsel %vm2404_vm5, %v17540_v57, %v2521_v48  ;;  %vm2229_vm9 = vcmp.gt.f32.partialorder %v2181_v50, 0.0  ;;  %v2735_v20 = vrot.slane %v13731_v59, 1 }
 0x1de   : > { %10844 = vmatmul.mubr.msk.f32.gmra.mrb[80].mxu0 %vm2744_vm7, %v13727_v17  ;;  %10996 = vmatmul.mubr.msk.f32.gmra.mrb[18].mxu1 %vm2744_vm7, %v13738_v12  ;;  %17539 = vst [vmem:[#allocation84_spill] sm:$0xff] %v13748_v1  ;;  %v2277_v55 = vmul.f32 0.01, %v2181_v50  ;;  %vm2228_vm10 = vcmp.gt.f32.partialorder %v2180_v47, 0.0  ;;  %v2733_v2 = vrot.slane %v2557_v58, 1  ;;  %v3515_v12 = vrot.slane %v2557_v58, 2 }
 0x1df   : > { %10846 = vmatprep.mubr.msk.f32.mxu0 %vm2744_vm7, %v13741_v62  ;;  %10998 = vmatprep.mubr.msk.f32.mxu1 %vm2744_vm7, %v13748_v1  ;;  %v2276_v60 = vmul.f32 0.01, %v2180_v47  ;;  %v2736_v1 = vrot.slane %v13678_v53, 1  ;;  %v3517_v62 = vrot.slane %v13731_v59, 2  ;;  %v3518_v5 = vrot.slane %v13678_v53, 2 }
 0x1e0   : > { %vm2231_vm11 = vcmp.gt.f32.partialorder %v2183_v23, 0.0  ;;  %v2279_v35 = vmul.f32 0.01, %v2183_v23  ;;  %v2278_v17 = vmul.f32 0.01, %v2182_v6  ;;  %v13764_v49 = vsel %vm2653_vm6, %v2731_v26, %v2733_v2 }
 0x1e1   : > { %17541 = vst [vmem:[#allocation85_spill] sm:$0xff] %v13764_v49  ;;  %vm2230_vm12 = vcmp.gt.f32.partialorder %v2182_v6, 0.0  ;;  %v13769_v48 = vsel %vm3435_vm14, %v3513_v19, %v3515_v12  ;;  %v13772_v57 = vsel %vm2653_vm6, %v2735_v20, %v2736_v1  ;;  %v13775_v58 = vsel %vm3435_vm14, %v3517_v62, %v3518_v5 }
 0x1e2   : > { %10847 = vmatmul.mubr.msk.f32.gmra.mrb[82].mxu0 %vm2744_vm7, %v13764_v49  ;;  %17542 = vst [vmem:[#allocation86_spill] sm:$0xff] %v13769_v48  ;;  %17543 = vst [vmem:[#allocation87_spill] sm:$0xff] %v13772_v57  ;;  %10999 = vmatmul.mubr.msk.f32.gmra.mrb[20].mxu1 %vm2744_vm7, %v13769_v48  ;;  %v2738_v26 = vrot.slane %v13699_v30, 1  ;;  %v3520_v2 = vrot.slane %v13699_v30, 2  ;;  %v2522_v49 = vrot.slane %v13680_v33, 5  ;;  %v2740_v12 = vrot.slane %v13704_v51, 1 }
 0x1e3   : > { %17544 = vst [vmem:[#allocation88_spill] sm:$0xff] %v13775_v58  ;;  %10849 = vmatprep.mubr.msk.f32.mxu0 %vm2744_vm7, %v13772_v57  ;;  %11001 = vmatprep.mubr.msk.f32.mxu1 %vm2744_vm7, %v13775_v58  ;;  %v3522_v62 = vrot.slane %v13704_v51, 2  ;;  %v2325_v19 = vsel %vm2229_vm9, %v2181_v50, %v2277_v55  ;;  %v13790_v20 = vsel %vm2228_vm10, %v2180_v47, %v2276_v60 }
 0x1e4   : > { %v13793_v48 = vsel %vm2231_vm11, %v2183_v23, %v2279_v35  ;;  %v2326_v57 = vsel %vm2230_vm12, %v2182_v6, %v2278_v17  ;;  %v13797_v34 = vsel %vm2653_vm6, %v2736_v1, %v2738_v26  ;;  %v13800_v52 = vsel %vm3435_vm14, %v3518_v5, %v3520_v2 }
 0x1e5   : > { %17545 = vst [vmem:[#allocation89_spill] sm:$0xff] %v13797_v34  ;;  %17546 = vst [vmem:[#allocation90_spill] sm:$0xff] %v13800_v52  ;;  %v13803_v58 = vsel %vm2653_vm6, %v2738_v26, %v2740_v12  ;;  %v13806_v51 = vsel %vm3435_vm14, %v3520_v2, %v3522_v62  ;;  %v2476_v60 = vrot.slane %v2325_v19, 7  ;;  %v2475_v50 = vrot.slane %v13790_v20, 7 }
 0x1e6   : > { %17547 = vst [vmem:[#allocation91_spill] sm:$0xff] %v13803_v58  ;;  %17548 = vst [vmem:[#allocation92_spill] sm:$0xff] %v13806_v51  ;;  %10850 = vmatmul.mubr.msk.f32.gmra.mrb[84].mxu0 %vm2744_vm7, %v13797_v34  ;;  %11002 = vmatmul.mubr.msk.f32.gmra.mrb[22].mxu1 %vm2744_vm7, %v13800_v52  ;;  %v2480_v17 = vrot.slane %v13793_v48, 7  ;;  %v2478_v47 = vrot.slane %v2326_v57, 7  ;;  %v17549_v1 = vrot.slane %v13680_v33, 7  ;;  %v2185_v5 = vadd.f32 %v13722_v3, %v13609_v43  ;;  %v2595_v33 = vld [vmem:[%s17165_s12 + $0x110] sm:$0xff] }
 0x1e7   : > { %10852 = vmatprep.mubr.msk.f32.mxu0 %vm2744_vm7, %v13803_v58  ;;  %11004 = vmatprep.mubr.msk.f32.mxu1 %vm2744_vm7, %v13806_v51  ;;  %v2184_v35 = vadd.f32 %v13722_v3, %v13620_v44  ;;  %v13844_v43 = vsel %vm2404_vm5, %v2475_v50, %v2476_v60 }
 0x1e8   : > { %v2558_v23 = vsel %vm2404_vm5, %v17549_v1, %v2522_v49  ;;  %v2596_v49 = vld [vmem:[%s17165_s12 + $0x118] sm:$0xff]  ;;  %v13847_v44 = vsel %vm2404_vm5, %v2476_v60, %v2478_v47  ;;  %v13852_v57 = vsel %vm2404_vm5, %v2478_v47, %v2480_v17  ;;  %v2281_v60 = vmul.f32 0.01, %v2185_v5 }
 0x1e9   : > { %v2742_v6 = vrot.slane %v2558_v23, 1  ;;  %v3524_v55 = vrot.slane %v2558_v23, 2  ;;  %v11683_v19 = vpack.c.bf16 %v2596_v49, %v2595_v33  ;;  %v2280_v1 = vmul.f32 0.01, %v2184_v35 }
 0x1ea   : > { %vm2233_vm13 = vcmp.gt.f32.partialorder %v2185_v5, 0.0  ;;  %vm2232_vm15 = vcmp.gt.f32.partialorder %v2184_v35, 0.0  ;;  %v2523_v33 = vrot.slane %v13793_v48, 5 }
 0x1eb   : > { %v13826_v26 = vsel %vm2653_vm6, %v2740_v12, %v2742_v6  ;;  %v13829_v2 = vsel %vm3435_vm14, %v3522_v62, %v3524_v55  ;;  %v2187_v12 = vadd.f32 %v13722_v3, %v13645_v7  ;;  %v2186_v62 = vadd.f32 %v13722_v3, %v13655_v61  ;;  %v2597_v61 = vld [vmem:[%s17165_s12 + $0x120] sm:$0xff]  ;;  %v2598_v7 = vld [vmem:[%s17165_s12 + $0x128] sm:$0xff] }
 0x1ec   : > { %10853 = vmatmul.mubr.msk.f32.gmra.mrb[86].mxu0 %vm2744_vm7, %v13826_v26  ;;  %11005 = vmatmul.mubr.msk.f32.gmra.mrb[24].mxu1 %vm2744_vm7, %v13829_v2  ;;  %v2329_v23 = vsel %vm2233_vm13, %v2185_v5, %v2281_v60  ;;  %v13877_v6 = vsel %vm2232_vm15, %v2184_v35, %v2280_v1  ;;  %v11687_v55 = vpack.c.bf16 %v2598_v7, %v2597_v61  ;;  %v2600_v5 = vld [vmem:[%s17165_s12 + $0x138] sm:$0xff] }
 0x1ed   : > { %10871 = vmatprep.mubr.msk.f32.mxu0 %vm2744_vm7, %v13114_v11  ;;  %11023 = vmatprep.mubr.msk.f32.mxu1 %vm2744_vm7, %v13140_v45  ;;  %v2283_v3 = vmul.f32 0.01, %v2187_v12  ;;  %v2282_v47 = vmul.f32 0.01, %v2186_v62  ;;  %vm2235_vm3 = vcmp.gt.f32.partialorder %v2187_v12, 0.0  ;;  %vm2234_vm4 = vcmp.gt.f32.partialorder %v2186_v62, 0.0 }
 0x1ee   : > { %v17332_v60 = vrot.slane %v13877_v6, 7 }
 0x1ef   : > { %v2331_v35 = vsel %vm2235_vm3, %v2187_v12, %v2283_v3  ;;  %v2330_v49 = vsel %vm2234_vm4, %v2186_v62, %v2282_v47  ;;  %v2601_v62 = vld [vmem:[%s17165_s12 + $0x140] sm:$0xff] }
 0x1f0   : > { %10872 = vmatmul.mubr.msk.f32.vlgmr.msra.gmra.mrb[48].mxu0 %vm2744_vm7, %v13111_v10  ;;  %11024 = vmatmul.mubr.msk.f32.vlgmr.msra.gmra.mrb[26].mxu1 %vm2744_vm7, %v13137_v36  ;;  %v2487_v61 = vrot.slane %v2331_v35, 7  ;;  %v2524_v7 = vrot.slane %v2331_v35, 5  ;;  %v2485_v12 = vrot.slane %v2330_v49, 7  ;;  %v17560_v35 = vld [vmem:[#allocation57_spill] sm:$0xff] }
 0x1f1   : > { %11682 = vmatpush3.bf16.msra.mxu1 %v13194_v28  ;;  %10874 = vmatprep.mubr.msk.f32.mxu0 %vm2744_vm7, %v13122_v41  ;;  %v2599_v28 = vld [vmem:[%s17165_s12 + $0x130] sm:$0xff] }
 0x1f2   : > { %11026 = vmatprep.mubr.msk.f32.mxu1 %vm2744_vm7, %v13161_v15  ;;  %11684 = vmatprep.subr.bf16.mxu1 %v11683_v19  ;;  %v11691_v1 = vpack.c.bf16 %v2600_v5, %v2599_v28  ;;  %v13934_v47 = vsel %vm2404_vm5, %v2485_v12, %v2487_v61  ;;  %v17558_v28 = vld [vmem:[#allocation50_spill] sm:$0xff]  ;;  %v17559_v5 = vld [vmem:[#allocation51_spill] sm:$0xff]  ;;  %v17561_v49 = vld [vmem:[#allocation61_spill] sm:$0xff] }
 0x1f3   : > { %11650 = vmatpush3.bf16.msra.mxu0 %v13002_v18  ;;  %v2483_v18 = vrot.slane %v2329_v23, 7  ;;  %17552 = vst [vmem:[#allocation95_spill] sm:$0xff] %v13934_v47  ;;  %v13937_v23 = vsel %vm2404_vm5, %v2487_v61, %v2524_v7  ;;  %v17563_v61 = vld [vmem:[#allocation79_spill] sm:$0xff] }
 0x1f4   : > { %10875 = vmatmul.mubr.msk.f32.gmra.mrb[50].mxu0 %vm2744_vm7, %v13125_v42  ;;  %11027 = vmatmul.mubr.msk.f32.gmra.mrb[28].mxu1 %vm2744_vm7, %v13166_v16  ;;  %17553 = vst [vmem:[#allocation96_spill] sm:$0xff] %v13937_v23  ;;  %v17565_v23 = vld [vmem:[#allocation20_spill] sm:$0xff] }
 0x1f5   : > { %10877 = vmatprep.mubr.msk.f32.mxu0 %vm2744_vm7, %v13140_v45  ;;  %11029 = vmatprep.mubr.msk.f32.mxu1 %vm2744_vm7, %v13188_v32  ;;  %v13921_v3 = vsel %vm2404_vm5, %v17332_v60, %v2483_v18  ;;  %v3443_v47 = vrot.slane %v17565_v23, 2  ;;  %v17568_v23 = vld [vmem:[#allocation25_spill] sm:$0xff] }
 0x1f6   : > { %11686 = vmatpush3.bf16.msra.mxu1 %v11683_v19  ;;  %11652 = vmatprep.subr.bf16.mxu0 %v13012_v22  ;;  %v2602_v19 = vld [vmem:[%s17165_s12 + $0x148] sm:$0xff]  ;;  %17550 = vst [vmem:[#allocation93_spill] sm:$0xff] %v13921_v3 }
 0x1f7   : > { %11688 = vmatprep.subr.bf16.mxu1 %v11687_v55  ;;  %11654 = vmatpush3.bf16.msra.mxu0 %v13012_v22  ;;  %v13911_v22 = vsel %vm2404_vm5, %v2480_v17, %v2523_v33  ;;  %v13924_v48 = vpack.c.bf16 %v2602_v19, %v2601_v62  ;;  %v13931_v17 = vsel %vm2404_vm5, %v2483_v18, %v2485_v12  ;;  %v17557_v33 = vld [vmem:[#allocation45_spill] sm:$0xff]  ;;  %v17562_v18 = vld [vmem:[#allocation62_spill] sm:$0xff]  ;;  %v3436_v12 = vrot.slane %v13114_v11, 2 }
 0x1f8   : > { %10878 = vmatmul.mubr.msk.f32.gmra.mrb[52].mxu0 %vm2744_vm7, %v13137_v36  ;;  %11030 = vmatmul.mubr.msk.f32.gmra.mrb[30].mxu1 %vm2744_vm7, %v13185_v31  ;;  %17551 = vst [vmem:[#allocation94_spill] sm:$0xff] %v13931_v17  ;;  %v3437_v62 = vrot.slane %v13111_v10, 2  ;;  %v2604_v19 = vld [vmem:[%s17165_s12 + $0x158] sm:$0xff]  ;;  %v3441_v11 = vrot.slane %v13125_v42, 2  ;;  %v3446_v42 = vrot.slane %v13137_v36, 2  ;;  %v3448_v36 = vrot.slane %v13161_v15, 2 }
 0x1f9   : > { %10880 = vmatprep.mubr.msk.f32.mxu0 %vm2744_vm7, %v13161_v15  ;;  %11032 = vmatprep.mubr.msk.f32.mxu1 %vm2744_vm7, %v13209_v0  ;;  %v17566_v17 = vld [vmem:[#allocation22_spill] sm:$0xff] }
 0x1fa   : > { %11690 = vmatpush3.bf16.msra.mxu1 %v11687_v55  ;;  %11656 = vmatprep.subr.bf16.mxu0 %v13022_v25  ;;  %v17556_v55 = vld [vmem:[#allocation46_spill] sm:$0xff]  ;;  %v3438_v10 = vsel %vm3435_vm14, %v3436_v12, %v3437_v62  ;;  %v3445_v12 = vrot.slane %v13140_v45, 2  ;;  %v3444_v45 = vsel %vm3435_vm14, %v3441_v11, %v3443_v47 }
 0x1fb   : > { %11692 = vmatprep.subr.bf16.mxu1 %v11691_v1  ;;  %11658 = vmatpush3.bf16.msra.mxu0 %v13022_v25  ;;  %v17554_v25 = vld [vmem:[#allocation38_spill] sm:$0xff] }
 0x1fc   : > { %10881 = vmatmul.mubr.msk.f32.gmra.mrb[54].mxu0 %vm2744_vm7, %v13166_v16  ;;  %11033 = vmatmul.mubr.msk.f32.gmra.mrb[32].mxu1 %vm2744_vm7, %v13214_v4  ;;  %v2608_v47 = vld [vmem:[%s17165_s12 + $0x178] sm:$0xff] }
 0x1fd   : > { %10883 = vmatprep.mubr.msk.f32.mxu0 %vm2744_vm7, %v13188_v32  ;;  %11035 = vmatprep.mubr.msk.f32.mxu1 %vm2744_vm7, %v13242_v40  ;;  %v17569_v15 = vld [vmem:[#allocation26_spill] sm:$0xff] }
 0x1fe   : > { %11694 = vmatpush3.bf16.msra.mxu1 %v11691_v1  ;;  %11660 = vmatprep.subr.bf16.mxu0 %v13032_v37  ;;  %v2354_v1 = vrot.slane %v13790_v20, 1  ;;  %v3439_v20 = vrot.slane %v13122_v41, 2  ;;  %v17564_v41 = vld [vmem:[#allocation21_spill] sm:$0xff] }
 0x1ff   : > { %11662 = vmatpush3.bf16.msra.mxu0 %v13032_v37  ;;  %11696 = vmatprep.subr.bf16.mxu1 %v13924_v48  ;;  %v17555_v37 = vld [vmem:[#allocation39_spill] sm:$0xff] }
 0x200   : > { %10884 = vmatmul.mubr.msk.f32.gmra.mrb[56].mxu0 %vm2744_vm7, %v13185_v31  ;;  %11036 = vmatmul.mubr.msk.f32.gmra.mrb[34].mxu1 %vm2744_vm7, %v13230_v14  ;;  %v14058_v7 = vsel %vm2404_vm5, %v2354_v1, %v2475_v50  ;;  %v2603_v50 = vld [vmem:[%s17165_s12 + $0x150] sm:$0xff]  ;;  %v3440_v60 = vsel %vm3435_vm14, %v3437_v62, %v3439_v20  ;;  %v3442_v3 = vsel %vm3435_vm14, %v3439_v20, %v3441_v11  ;;  %v2606_v62 = vld [vmem:[%s17165_s12 + $0x168] sm:$0xff] }
 0x201   : > { %10886 = vmatprep.mubr.msk.f32.mxu0 %vm2744_vm7, %v13209_v0  ;;  %11038 = vmatprep.mubr.msk.f32.mxu1 %vm2744_vm7, %v13257_v63  ;;  %v11699_v1 = vpack.c.bf16 %v2604_v19, %v2603_v50  ;;  %v14114_v20 = vsel %vm3435_vm14, %v3445_v12, %v3446_v42  ;;  %v14128_v50 = vsel %vm3435_vm14, %v3446_v42, %v3448_v36  ;;  %v17570_v19 = vld [vmem:[#allocation23_spill] sm:$0xff] }
 0x202   : > { %v2609_v42 = vld [vmem:[%s17165_s12 + $0x180] sm:$0xff] }
 0x204   : > { %10887 = vmatmul.mubr.msk.f32.gmra.mrb[58].mxu0 %vm2744_vm7, %v13214_v4  ;;  %11039 = vmatmul.mubr.msk.f32.gmra.mrb[36].mxu1 %vm2744_vm7, %v13262_v46 }
 0x205   : > { %10889 = vmatprep.mubr.msk.f32.mxu0 %vm2744_vm7, %v13242_v40  ;;  %11041 = vmatprep.mubr.msk.f32.mxu1 %vm2744_vm7, %v13289_v29 }
 0x208   : > { %10890 = vmatmul.mubr.msk.f32.gmra.mrb[60].mxu0 %vm2744_vm7, %v13230_v14  ;;  %11042 = vmatmul.mubr.msk.f32.gmra.mrb[38].mxu1 %vm2744_vm7, %v13283_v13 }
 0x209   : > { %10892 = vmatprep.mubr.msk.f32.mxu0 %vm2744_vm7, %v13257_v63  ;;  %11044 = vmatprep.mubr.msk.f32.mxu1 %vm2744_vm7, %v13307_v24 }
 0x20c   : > { %10893 = vmatmul.mubr.msk.f32.gmra.mrb[62].mxu0 %vm2744_vm7, %v13262_v46  ;;  %11045 = vmatmul.mubr.msk.f32.gmra.mrb[0].mxu1 %vm2744_vm7, %v13312_v9 }
 0x20d   : > { %10895 = vmatprep.mubr.msk.f32.mxu0 %vm2744_vm7, %v13289_v29  ;;  %11047 = vmatprep.mubr.msk.f32.mxu1 %vm2744_vm7, %v13355_v21 }
 0x210   : > { %10896 = vmatmul.mubr.msk.f32.gmra.mrb[64].mxu0 %vm2744_vm7, %v13283_v13  ;;  %11048 = vmatmul.mubr.msk.f32.gmra.mrb[2].mxu1 %vm2744_vm7, %v13345_v39 }
 0x211   : > { %10898 = vmatprep.mubr.msk.f32.mxu0 %vm2744_vm7, %v13307_v24  ;;  %11050 = vmatprep.mubr.msk.f32.mxu1 %vm2744_vm7, %v17554_v25 }
 0x214   : > { %10899 = vmatmul.mubr.msk.f32.gmra.mrb[66].mxu0 %vm2744_vm7, %v13312_v9  ;;  %11051 = vmatmul.mubr.msk.f32.gmra.mrb[4].mxu1 %vm2744_vm7, %v17555_v37 }
 0x215   : > { %10901 = vmatprep.mubr.msk.f32.mxu0 %vm2744_vm7, %v13355_v21  ;;  %11053 = vmatprep.mubr.msk.f32.mxu1 %vm2744_vm7, %v17556_v55 }
 0x218   : > { %10902 = vmatmul.mubr.msk.f32.gmra.mrb[68].mxu0 %vm2744_vm7, %v13345_v39  ;;  %11054 = vmatmul.mubr.msk.f32.gmra.mrb[6].mxu1 %vm2744_vm7, %v17557_v33 }
 0x219   : > { %10904 = vmatprep.mubr.msk.f32.mxu0 %vm2744_vm7, %v17554_v25  ;;  %11056 = vmatprep.mubr.msk.f32.mxu1 %vm2744_vm7, %v17558_v28 }
 0x21c   : > { %10905 = vmatmul.mubr.msk.f32.gmra.mrb[70].mxu0 %vm2744_vm7, %v17555_v37  ;;  %11057 = vmatmul.mubr.msk.f32.gmra.mrb[8].mxu1 %vm2744_vm7, %v17559_v5 }
 0x21d   : > { %10907 = vmatprep.mubr.msk.f32.mxu0 %vm2744_vm7, %v17556_v55  ;;  %11059 = vmatprep.mubr.msk.f32.mxu1 %vm2744_vm7, %v13518_v27 }
 0x220   : > { %10908 = vmatmul.mubr.msk.f32.gmra.mrb[72].mxu0 %vm2744_vm7, %v17557_v33  ;;  %11060 = vmatmul.mubr.msk.f32.gmra.mrb[10].mxu1 %vm2744_vm7, %v17560_v35 }
 0x221   : > { %10910 = vmatprep.mubr.msk.f32.mxu0 %vm2744_vm7, %v17558_v28  ;;  %11062 = vmatprep.mubr.msk.f32.mxu1 %vm2744_vm7, %v17561_v49 }
 0x224   : > { %10911 = vmatmul.mubr.msk.f32.gmra.mrb[74].mxu0 %vm2744_vm7, %v17559_v5  ;;  %11063 = vmatmul.mubr.msk.f32.gmra.mrb[12].mxu1 %vm2744_vm7, %v17562_v18 }
 0x225   : > { %10913 = vmatprep.mubr.msk.f32.mxu0 %vm2744_vm7, %v13518_v27  ;;  %11065 = vmatprep.mubr.msk.f32.mxu1 %vm2744_vm7, %v13665_v56 }
 0x228   : > { %10914 = vmatmul.mubr.msk.f32.gmra.mrb[76].mxu0 %vm2744_vm7, %v17560_v35  ;;  %11066 = vmatmul.mubr.msk.f32.gmra.mrb[14].mxu1 %vm2744_vm7, %v13592_v38 }
 0x229   : > { %10916 = vmatprep.mubr.msk.f32.mxu0 %vm2744_vm7, %v17561_v49  ;;  %11068 = vmatprep.mubr.msk.f32.mxu1 %vm2744_vm7, %v13623_v54 }
 0x22c   : > { %10917 = vmatmul.mubr.msk.f32.gmra.mrb[78].mxu0 %vm2744_vm7, %v17562_v18  ;;  %11069 = vmatmul.mubr.msk.f32.gmra.mrb[16].mxu1 %vm2744_vm7, %v13628_v8 }
 0x22d   : > { %10919 = vmatprep.mubr.msk.f32.mxu0 %vm2744_vm7, %v13665_v56  ;;  %11071 = vmatprep.mubr.msk.f32.mxu1 %vm2744_vm7, %v13731_v59 }
 0x230   : > { %10920 = vmatmul.mubr.msk.f32.gmra.mrb[80].mxu0 %vm2744_vm7, %v13592_v38  ;;  %11072 = vmatmul.mubr.msk.f32.gmra.mrb[18].mxu1 %vm2744_vm7, %v13678_v53 }
 0x231   : > { %10922 = vmatprep.mubr.msk.f32.mxu0 %vm2744_vm7, %v13623_v54  ;;  %11074 = vmatprep.mubr.msk.f32.mxu1 %vm2744_vm7, %v13699_v30 }
 0x234   : > { %10923 = vmatmul.mubr.msk.f32.gmra.mrb[82].mxu0 %vm2744_vm7, %v13628_v8  ;;  %11075 = vmatmul.mubr.msk.f32.gmra.mrb[20].mxu1 %vm2744_vm7, %v17563_v61 }
 0x235   : > { %10925 = vmatprep.mubr.msk.f32.mxu0 %vm2744_vm7, %v13731_v59  ;;  %11077 = vmatprep.mubr.msk.f32.mxu1 %vm2744_vm7, %v14058_v7 }
 0x238   : > { %10926 = vmatmul.mubr.msk.f32.gmra.mrb[84].mxu0 %vm2744_vm7, %v13678_v53  ;;  %11078 = vmatmul.mubr.msk.f32.gmra.mrb[22].mxu1 %vm2744_vm7, %v13844_v43 }
 0x239   : > { %10928 = vmatprep.mubr.msk.f32.mxu0 %vm2744_vm7, %v13699_v30  ;;  %11080 = vmatprep.mubr.msk.f32.mxu1 %vm2744_vm7, %v13847_v44 }
 0x23c   : > { %10929 = vmatmul.mubr.msk.f32.gmra.mrb[86].mxu0 %vm2744_vm7, %v17563_v61  ;;  %11081 = vmatmul.mubr.msk.f32.gmra.mrb[24].mxu1 %vm2744_vm7, %v13852_v57 }
 0x23d   : > { %10947 = vmatprep.mubr.msk.f32.mxu0 %vm2744_vm7, %v3438_v10  ;;  %11099 = vmatprep.mubr.msk.f32.mxu1 %vm2744_vm7, %v17564_v41  ;;  %v2605_v10 = vld [vmem:[%s17165_s12 + $0x160] sm:$0xff] }
 0x23e   : > { %v17571_v41 = vld [vmem:[#allocation27_spill] sm:$0xff] }
 0x240   : > { %10948 = vmatmul.mubr.msk.f32.vlgmr.msra.gmra.mrb[48].mxu0 %vm2744_vm7, %v3440_v60  ;;  %11100 = vmatmul.mubr.msk.f32.vlgmr.msra.gmra.mrb[26].mxu1 %vm2744_vm7, %v17566_v17  ;;  %v17567_v60 = vld [vmem:[#allocation24_spill] sm:$0xff]  ;;  %v11703_v17 = vpack.c.bf16 %v2606_v62, %v2605_v10  ;;  %v3454_v10 = vrot.slane %v13188_v32, 2 }
 0x241   : > { %11698 = vmatpush3.bf16.msra.mxu1 %v13924_v48  ;;  %10950 = vmatprep.mubr.msk.f32.mxu0 %vm2744_vm7, %v3442_v3  ;;  %v3450_v48 = vrot.slane %v13166_v16, 2  ;;  %v2607_v3 = vld [vmem:[%s17165_s12 + $0x170] sm:$0xff]  ;;  %v3452_v16 = vrot.slane %v17570_v19, 2  ;;  %v2610_v62 = vld [vmem:[%s17165_s12 + $0x188] sm:$0xff]  ;;  %v3459_v19 = vrot.slane %v13214_v4, 2 }
 0x242   : > { %11102 = vmatprep.mubr.msk.f32.mxu1 %vm2744_vm7, %v17567_v60  ;;  %11700 = vmatprep.subr.bf16.mxu1 %v11699_v1  ;;  %v11707_v11 = vpack.c.bf16 %v2608_v47, %v2607_v3  ;;  %v17572_v60 = vld [vmem:[#allocation28_spill] sm:$0xff]  ;;  %v17573_v3 = vld [vmem:[#allocation30_spill] sm:$0xff] }
 0x243   : > { %v14136_v12 = vsel %vm3435_vm14, %v3448_v36, %v3450_v48  ;;  %v3457_v36 = vrot.slane %v13209_v0, 2 }
 0x244   : > { %10951 = vmatmul.mubr.msk.f32.gmra.mrb[50].mxu0 %vm2744_vm7, %v3444_v45  ;;  %11103 = vmatmul.mubr.msk.f32.gmra.mrb[28].mxu1 %vm2744_vm7, %v17568_v23  ;;  %v14151_v45 = vsel %vm3435_vm14, %v3450_v48, %v3452_v16  ;;  %v14154_v23 = vpack.c.bf16 %v2610_v62, %v2609_v42  ;;  %v17575_v16 = vld [vmem:[#allocation29_spill] sm:$0xff] }
 0x245   : > { %10953 = vmatprep.mubr.msk.f32.mxu0 %vm2744_vm7, %v14114_v20  ;;  %11105 = vmatprep.mubr.msk.f32.mxu1 %vm2744_vm7, %v17569_v15  ;;  %v3461_v42 = vrot.slane %v17575_v16, 2  ;;  %v14178_v62 = vsel %vm3435_vm14, %v3457_v36, %v3459_v19 }
 0x246   : > { %11702 = vmatpush3.bf16.msra.mxu1 %v11699_v1  ;;  %v3455_v1 = vrot.slane %v13185_v31, 2 }
 0x247   : > { %11704 = vmatprep.subr.bf16.mxu1 %v11703_v17  ;;  %v14187_v16 = vsel %vm3435_vm14, %v3459_v19, %v3461_v42  ;;  %v17581_v42 = vld [vmem:[#allocation41_spill] sm:$0xff] }
 0x248   : > { %10954 = vmatmul.mubr.msk.f32.gmra.mrb[52].mxu0 %vm2744_vm7, %v14128_v50  ;;  %11106 = vmatmul.mubr.msk.f32.gmra.mrb[30].mxu1 %vm2744_vm7, %v17571_v41  ;;  %v14161_v47 = vsel %vm3435_vm14, %v3454_v10, %v3455_v1  ;;  %v14169_v48 = vsel %vm3435_vm14, %v3455_v1, %v3457_v36  ;;  %v17576_v10 = vld [vmem:[#allocation32_spill] sm:$0xff]  ;;  %v17577_v1 = vld [vmem:[#allocation34_spill] sm:$0xff] }
 0x249   : > { %10956 = vmatprep.mubr.msk.f32.mxu0 %vm2744_vm7, %v14136_v12  ;;  %11108 = vmatprep.mubr.msk.f32.mxu1 %vm2744_vm7, %v17572_v60  ;;  %v17584_v60 = vld [vmem:[#allocation49_spill] sm:$0xff]  ;;  %v17588_v41 = vld [vmem:[#allocation60_spill] sm:$0xff] }
 0x24a   : > { %11706 = vmatpush3.bf16.msra.mxu1 %v11703_v17  ;;  %v17574_v17 = vld [vmem:[#allocation31_spill] sm:$0xff] }
 0x24b   : > { %11708 = vmatprep.subr.bf16.mxu1 %v11707_v11 }
 0x24c   : > { %10957 = vmatmul.mubr.msk.f32.gmra.mrb[54].mxu0 %vm2744_vm7, %v14151_v45  ;;  %11109 = vmatmul.mubr.msk.f32.gmra.mrb[32].mxu1 %vm2744_vm7, %v17573_v3  ;;  %v3463_v3 = vrot.slane %v13242_v40, 2 }
 0x24d   : > { %10959 = vmatprep.mubr.msk.f32.mxu0 %vm2744_vm7, %v14161_v47  ;;  %11111 = vmatprep.mubr.msk.f32.mxu1 %vm2744_vm7, %v17574_v17  ;;  %v17579_v17 = vld [vmem:[#allocation40_spill] sm:$0xff] }
 0x24e   : > { %11710 = vmatpush3.bf16.msra.mxu1 %v11707_v11  ;;  %v3464_v11 = vrot.slane %v13230_v14, 2 }
 0x24f   : > { %11712 = vmatprep.subr.bf16.mxu1 %v14154_v23 }
 0x250   : > { %10960 = vmatmul.mubr.msk.f32.gmra.mrb[56].mxu0 %vm2744_vm7, %v14169_v48  ;;  %11112 = vmatmul.mubr.msk.f32.gmra.mrb[34].mxu1 %vm2744_vm7, %v17576_v10  ;;  %v17578_v10 = vld [vmem:[#allocation36_spill] sm:$0xff]  ;;  %v14194_v36 = vsel %vm3435_vm14, %v3463_v3, %v3464_v11  ;;  %v17583_v3 = vld [vmem:[#allocation47_spill] sm:$0xff] }
 0x251   : > { %10962 = vmatprep.mubr.msk.f32.mxu0 %vm2744_vm7, %v14178_v62  ;;  %11114 = vmatprep.mubr.msk.f32.mxu1 %vm2744_vm7, %v17577_v1  ;;  %v17580_v1 = vrot.slane %v13257_v63, 2 }
 0x253   : > { %v14203_v19 = vsel %vm3435_vm14, %v3464_v11, %v17580_v1  ;;  %v17586_v11 = vld [vmem:[#allocation55_spill] sm:$0xff]  ;;  %v17587_v1 = vld [vmem:[#allocation58_spill] sm:$0xff] }
 0x254   : > { %10963 = vmatmul.mubr.msk.f32.gmra.mrb[58].mxu0 %vm2744_vm7, %v14187_v16  ;;  %11115 = vmatmul.mubr.msk.f32.gmra.mrb[36].mxu1 %vm2744_vm7, %v17578_v10  ;;  %v17582_v10 = vld [vmem:[#allocation43_spill] sm:$0xff] }
 0x255   : > { %10965 = vmatprep.mubr.msk.f32.mxu0 %vm2744_vm7, %v14194_v36  ;;  %11117 = vmatprep.mubr.msk.f32.mxu1 %vm2744_vm7, %v17579_v17  ;;  %v17585_v17 = vld [vmem:[#allocation53_spill] sm:$0xff] }
 0x258   : > { %10966 = vmatmul.mubr.msk.f32.gmra.mrb[60].mxu0 %vm2744_vm7, %v14203_v19  ;;  %11118 = vmatmul.mubr.msk.f32.gmra.mrb[38].mxu1 %vm2744_vm7, %v17581_v42  ;;  %v17589_v42 = vld [vmem:[#allocation64_spill] sm:$0xff] }
 0x259   : > { %11120 = vmatprep.mubr.msk.f32.mxu1 %vm2744_vm7, %v17582_v10  ;;  %v17590_v10 = vld [vmem:[#allocation66_spill] sm:$0xff] }
 0x25c   : > { %11121 = vmatmul.mubr.msk.f32.gmra.mrb[0].mxu1 %vm2744_vm7, %v17583_v3  ;;  %v17591_v3 = vld [vmem:[#allocation68_spill] sm:$0xff] }
 0x25d   : > { %11123 = vmatprep.mubr.msk.f32.mxu1 %vm2744_vm7, %v17584_v60  ;;  %v17592_v60 = vld [vmem:[#allocation70_spill] sm:$0xff] }
 0x260   : > { %11124 = vmatmul.mubr.msk.f32.gmra.mrb[2].mxu1 %vm2744_vm7, %v17585_v17  ;;  %v17593_v17 = vld [vmem:[#allocation72_spill] sm:$0xff] }
 0x261   : > { %11126 = vmatprep.mubr.msk.f32.mxu1 %vm2744_vm7, %v17586_v11  ;;  %v17594_v11 = vld [vmem:[#allocation74_spill] sm:$0xff] }
 0x264   : > { %11127 = vmatmul.mubr.msk.f32.gmra.mrb[4].mxu1 %vm2744_vm7, %v17587_v1  ;;  %v17595_v1 = vld [vmem:[#allocation76_spill] sm:$0xff] }
 0x265   : > { %11129 = vmatprep.mubr.msk.f32.mxu1 %vm2744_vm7, %v17588_v41  ;;  %v17596_v41 = vld [vmem:[#allocation78_spill] sm:$0xff] }
 0x268   : > { %11130 = vmatmul.mubr.msk.f32.gmra.mrb[6].mxu1 %vm2744_vm7, %v17589_v42  ;;  %v17597_v42 = vld [vmem:[#allocation81_spill] sm:$0xff] }
 0x269   : > { %11132 = vmatprep.mubr.msk.f32.mxu1 %vm2744_vm7, %v17590_v10  ;;  %v17598_v10 = vld [vmem:[#allocation83_spill] sm:$0xff] }
 0x26c   : > { %11133 = vmatmul.mubr.msk.f32.gmra.mrb[8].mxu1 %vm2744_vm7, %v17591_v3  ;;  %v17599_v3 = vld [vmem:[#allocation85_spill] sm:$0xff] }
 0x26d   : > { %11135 = vmatprep.mubr.msk.f32.mxu1 %vm2744_vm7, %v17592_v60  ;;  %v17600_v60 = vld [vmem:[#allocation87_spill] sm:$0xff] }
 0x270   : > { %11136 = vmatmul.mubr.msk.f32.gmra.mrb[10].mxu1 %vm2744_vm7, %v17593_v17  ;;  %v4227_v17 = vrot.slane %v13844_v43, 1 }
 0x271   : > { %11138 = vmatprep.mubr.msk.f32.mxu1 %vm2744_vm7, %v17594_v11  ;;  %v4226_v11 = vrot.slane %v14058_v7, 1 }
 0x274   : > { %11139 = vmatmul.mubr.msk.f32.gmra.mrb[12].mxu1 %vm2744_vm7, %v17595_v1 }
 0x275   : > { %11141 = vmatprep.mubr.msk.f32.mxu1 %vm2744_vm7, %v17596_v41 }
 0x278   : > { %11142 = vmatmul.mubr.msk.f32.gmra.mrb[14].mxu1 %vm2744_vm7, %v17597_v42  ;;  %v4229_v42 = vrot.slane %v13847_v44, 1 }
 0x279   : > { %11144 = vmatprep.mubr.msk.f32.mxu1 %vm2744_vm7, %v17598_v10  ;;  %v4231_v10 = vrot.slane %v13852_v57, 1 }
 0x27c   : > { %11145 = vmatmul.mubr.msk.f32.gmra.mrb[16].mxu1 %vm2744_vm7, %v17599_v3  ;;  %v14258_v3 = vsel %vm2653_vm6, %v4226_v11, %v4227_v17 }
 0x27d   : > { %11147 = vmatprep.mubr.msk.f32.mxu1 %vm2744_vm7, %v17600_v60  ;;  %17601 = vst [vmem:[#allocation38_spill] sm:$0xff] %v14258_v3  ;;  %v14263_v60 = vsel %vm2653_vm6, %v4227_v17, %v4229_v42  ;;  %v2612_v17 = vld [vmem:[%s17165_s12 + $0x198] sm:$0xff] }
 0x280   : > { %11148 = vmatmul.mubr.msk.f32.gmra.mrb[18].mxu1 %vm2744_vm7, %v13797_v34  ;;  %v4233_v34 = vrot.slane %v13911_v22, 1 }
 0x281   : > { %11150 = vmatprep.mubr.msk.f32.mxu1 %vm2744_vm7, %v13803_v58  ;;  %v14269_v58 = vsel %vm2653_vm6, %v4229_v42, %v4231_v10 }
 0x282   : > { %v14274_v11 = vsel %vm2653_vm6, %v4231_v10, %v4233_v34  ;;  %v2613_v34 = vld [vmem:[%s17165_s12 + $0x1a0] sm:$0xff]  ;;  %v2614_v10 = vld [vmem:[%s17165_s12 + $0x1a8] sm:$0xff] }
 0x283   : > { %17602 = vst [vmem:[#allocation39_spill] sm:$0xff] %v14274_v11 }
 0x284   : > { %11151 = vmatmul.mubr.msk.f32.gmra.mrb[20].mxu1 %vm2744_vm7, %v13826_v26 }
 0x285   : > { %11153 = vmatprep.mubr.msk.f32.mxu1 %vm2744_vm7, %v14258_v3  ;;  %v2611_v3 = vld [vmem:[%s17165_s12 + $0x190] sm:$0xff] }
 0x286   : > { %v11715_v42 = vpack.c.bf16 %v2612_v17, %v2611_v3  ;;  %v2616_v3 = vld [vmem:[%s17165_s12 + $0x1b8] sm:$0xff]  ;;  %v17603_v17 = vld [vmem:[#allocation33_spill] sm:$0xff] }
 0x288   : > { %11154 = vmatmul.mubr.msk.f32.gmra.mrb[22].mxu1 %vm2744_vm7, %v14263_v60 }
 0x289   : > { %11156 = vmatprep.mubr.msk.f32.mxu1 %vm2744_vm7, %v14269_v58 }
 0x28c   : > { %11157 = vmatmul.mubr.msk.f32.gmra.mrb[24].mxu1 %vm2744_vm7, %v14274_v11  ;;  %v11719_v11 = vpack.c.bf16 %v2614_v10, %v2613_v34  ;;  %v17606_v34 = vld [vmem:[#allocation42_spill] sm:$0xff]  ;;  %v17607_v10 = vld [vmem:[#allocation44_spill] sm:$0xff] }
 0x28d   : > { %11175 = vmatprep.mubr.msk.f32.mxu1 %vm2744_vm7, %v14114_v20  ;;  %v2615_v20 = vld [vmem:[%s17165_s12 + $0x1b0] sm:$0xff] }
 0x290   : > { %11176 = vmatmul.mubr.msk.f32.vlgmr.msra.gmra.mrb[26].mxu1 %vm2744_vm7, %v14128_v50  ;;  %v11723_v50 = vpack.c.bf16 %v2616_v3, %v2615_v20  ;;  %v17608_v20 = vld [vmem:[#allocation48_spill] sm:$0xff] }
 0x291   : > { %11714 = vmatpush3.bf16.msra.mxu1 %v14154_v23  ;;  %11178 = vmatprep.mubr.msk.f32.mxu1 %vm2744_vm7, %v14136_v12  ;;  %v2617_v12 = vld [vmem:[%s17165_s12 + $0x1c0] sm:$0xff]  ;;  %v2618_v23 = vld [vmem:[%s17165_s12 + $0x1c8] sm:$0xff] }
 0x292   : > { %11716 = vmatprep.subr.bf16.mxu1 %v11715_v42  ;;  %v17609_v3 = vld [vmem:[#allocation52_spill] sm:$0xff] }
 0x294   : > { %11179 = vmatmul.mubr.msk.f32.gmra.mrb[28].mxu1 %vm2744_vm7, %v14151_v45  ;;  %v11727_v45 = vpack.c.bf16 %v2618_v23, %v2617_v12  ;;  %v17611_v12 = vld [vmem:[#allocation56_spill] sm:$0xff]  ;;  %v17612_v23 = vld [vmem:[#allocation59_spill] sm:$0xff] }
 0x295   : > { %11181 = vmatprep.mubr.msk.f32.mxu1 %vm2744_vm7, %v14161_v47  ;;  %11718 = vmatpush3.bf16.msra.mxu1 %v11715_v42  ;;  %v17604_v42 = vld [vmem:[#allocation35_spill] sm:$0xff] }
 0x296   : > { %11720 = vmatprep.subr.bf16.mxu1 %v11719_v11 }
 0x298   : > { %11182 = vmatmul.mubr.msk.f32.gmra.mrb[30].mxu1 %vm2744_vm7, %v14169_v48 }
 0x299   : > { %11184 = vmatprep.mubr.msk.f32.mxu1 %vm2744_vm7, %v14178_v62  ;;  %11722 = vmatpush3.bf16.msra.mxu1 %v11719_v11  ;;  %v17605_v11 = vld [vmem:[#allocation37_spill] sm:$0xff] }
 0x29a   : > { %11724 = vmatprep.subr.bf16.mxu1 %v11723_v50 }
 0x29c   : > { %11185 = vmatmul.mubr.msk.f32.gmra.mrb[32].mxu1 %vm2744_vm7, %v14187_v16 }
 0x29d   : > { %11187 = vmatprep.mubr.msk.f32.mxu1 %vm2744_vm7, %v14194_v36  ;;  %11726 = vmatpush3.bf16.msra.mxu1 %v11723_v50  ;;  %v17610_v50 = vld [vmem:[#allocation54_spill] sm:$0xff] }
 0x29e   : > { %11728 = vmatprep.subr.bf16.mxu1 %v11727_v45 }
 0x2a0   : > { %11188 = vmatmul.mubr.msk.f32.gmra.mrb[34].mxu1 %vm2744_vm7, %v14203_v19 }
 0x2a1   : > { %11190 = vmatprep.mubr.msk.f32.mxu1 %vm2744_vm7, %v17603_v17 }
 0x2a4   : > { %11191 = vmatmul.mubr.msk.f32.gmra.mrb[36].mxu1 %vm2744_vm7, %v17604_v42 }
 0x2a5   : > { %11193 = vmatprep.mubr.msk.f32.mxu1 %vm2744_vm7, %v17605_v11  ;;  %v17613_v11 = vld [vmem:[#allocation63_spill] sm:$0xff] }
 0x2a8   : > { %11194 = vmatmul.mubr.msk.f32.gmra.mrb[38].mxu1 %vm2744_vm7, %v17606_v34  ;;  %v17614_v34 = vld [vmem:[#allocation65_spill] sm:$0xff] }
 0x2a9   : > { %11196 = vmatprep.mubr.msk.f32.mxu1 %vm2744_vm7, %v17607_v10  ;;  %v17615_v10 = vld [vmem:[#allocation67_spill] sm:$0xff] }
 0x2ac   : > { %11197 = vmatmul.mubr.msk.f32.gmra.mrb[0].mxu1 %vm2744_vm7, %v17608_v20  ;;  %v17616_v20 = vld [vmem:[#allocation69_spill] sm:$0xff] }
 0x2ad   : > { %11199 = vmatprep.mubr.msk.f32.mxu1 %vm2744_vm7, %v17609_v3  ;;  %v17617_v3 = vld [vmem:[#allocation71_spill] sm:$0xff] }
 0x2b0   : > { %11200 = vmatmul.mubr.msk.f32.gmra.mrb[2].mxu1 %vm2744_vm7, %v17610_v50  ;;  %v17618_v50 = vld [vmem:[#allocation73_spill] sm:$0xff] }
 0x2b1   : > { %11202 = vmatprep.mubr.msk.f32.mxu1 %vm2744_vm7, %v17611_v12  ;;  %v17619_v12 = vld [vmem:[#allocation75_spill] sm:$0xff] }
 0x2b4   : > { %11203 = vmatmul.mubr.msk.f32.gmra.mrb[4].mxu1 %vm2744_vm7, %v17612_v23  ;;  %v17620_v23 = vld [vmem:[#allocation77_spill] sm:$0xff] }
 0x2b5   : > { %11205 = vmatprep.mubr.msk.f32.mxu1 %vm2744_vm7, %v17613_v11  ;;  %v17621_v11 = vld [vmem:[#allocation80_spill] sm:$0xff] }
 0x2b8   : > { %11206 = vmatmul.mubr.msk.f32.gmra.mrb[6].mxu1 %vm2744_vm7, %v17614_v34  ;;  %v17622_v34 = vld [vmem:[#allocation82_spill] sm:$0xff] }
 0x2b9   : > { %11208 = vmatprep.mubr.msk.f32.mxu1 %vm2744_vm7, %v17615_v10  ;;  %v17623_v10 = vld [vmem:[#allocation84_spill] sm:$0xff] }
 0x2bc   : > { %11209 = vmatmul.mubr.msk.f32.gmra.mrb[8].mxu1 %vm2744_vm7, %v17616_v20  ;;  %v17624_v20 = vld [vmem:[#allocation86_spill] sm:$0xff] }
 0x2bd   : > { %11211 = vmatprep.mubr.msk.f32.mxu1 %vm2744_vm7, %v17617_v3  ;;  %v17625_v3 = vld [vmem:[#allocation88_spill] sm:$0xff] }
 0x2c0   : > { %11212 = vmatmul.mubr.msk.f32.gmra.mrb[10].mxu1 %vm2744_vm7, %v17618_v50  ;;  %v4549_v50 = vrot.slane %v13844_v43, 2 }
 0x2c1   : > { %11214 = vmatprep.mubr.msk.f32.mxu1 %vm2744_vm7, %v17619_v12  ;;  %v4548_v12 = vrot.slane %v14058_v7, 2 }
 0x2c4   : > { %11215 = vmatmul.mubr.msk.f32.gmra.mrb[12].mxu1 %vm2744_vm7, %v17620_v23 }
 0x2c5   : > { %11217 = vmatprep.mubr.msk.f32.mxu1 %vm2744_vm7, %v17621_v11 }
 0x2c8   : > { %11218 = vmatmul.mubr.msk.f32.gmra.mrb[14].mxu1 %vm2744_vm7, %v17622_v34  ;;  %v4551_v34 = vrot.slane %v13847_v44, 2 }
 0x2c9   : > { %11220 = vmatprep.mubr.msk.f32.mxu1 %vm2744_vm7, %v17623_v10  ;;  %v4553_v10 = vrot.slane %v13852_v57, 2 }
 0x2cc   : > { %11221 = vmatmul.mubr.msk.f32.gmra.mrb[16].mxu1 %vm2744_vm7, %v17624_v20  ;;  %v14380_v20 = vsel %vm3435_vm14, %v4548_v12, %v4549_v50 }
 0x2cd   : > { %11223 = vmatprep.mubr.msk.f32.mxu1 %vm2744_vm7, %v17625_v3  ;;  %17626 = vst [vmem:[#allocation46_spill] sm:$0xff] %v14380_v20  ;;  %v14385_v3 = vsel %vm3435_vm14, %v4549_v50, %v4551_v34 }
 0x2d0   : > { %11224 = vmatmul.mubr.msk.f32.gmra.mrb[18].mxu1 %vm2744_vm7, %v13800_v52  ;;  %v4555_v52 = vrot.slane %v13911_v22, 2  ;;  %v2620_v22 = vld [vmem:[%s17165_s12 + $0x1d8] sm:$0xff] }
 0x2d1   : > { %11226 = vmatprep.mubr.msk.f32.mxu1 %vm2744_vm7, %v13806_v51  ;;  %v14391_v51 = vsel %vm3435_vm14, %v4551_v34, %v4553_v10 }
 0x2d2   : > { %17627 = vst [vmem:[#allocation45_spill] sm:$0xff] %v14391_v51  ;;  %v14396_v12 = vsel %vm3435_vm14, %v4553_v10, %v4555_v52  ;;  %v2621_v52 = vld [vmem:[%s17165_s12 + $0x1e0] sm:$0xff]  ;;  %v2622_v10 = vld [vmem:[%s17165_s12 + $0x1e8] sm:$0xff] }
 0x2d4   : > { %11227 = vmatmul.mubr.msk.f32.gmra.mrb[20].mxu1 %vm2744_vm7, %v13829_v2 }
 0x2d5   : > { %11229 = vmatprep.mubr.msk.f32.mxu1 %vm2744_vm7, %v14380_v20  ;;  %v2619_v20 = vld [vmem:[%s17165_s12 + $0x1d0] sm:$0xff] }
 0x2d6   : > { %v11731_v34 = vpack.c.bf16 %v2620_v22, %v2619_v20  ;;  %v2623_v22 = vld [vmem:[%s17165_s12 + $0x1f0] sm:$0xff] }
 0x2d8   : > { %11230 = vmatmul.mubr.msk.f32.gmra.mrb[22].mxu1 %vm2744_vm7, %v14385_v3 }
 0x2d9   : > { %11232 = vmatprep.mubr.msk.f32.mxu1 %vm2744_vm7, %v14391_v51 }
 0x2dc   : > { %11233 = vmatmul.mubr.msk.f32.gmra.mrb[24].mxu1 %vm2744_vm7, %v14396_v12 }
 0x2dd   : > { %11251 = vmatprep.mubr.msk.f32.mxu1 %vm2744_vm7, %v13188_v32  ;;  %v11735_v32 = vpack.c.bf16 %v2622_v10, %v2621_v52  ;;  %v2626_v52 = vld [vmem:[%s17165_s12 + $0x208] sm:$0xff] }
 0x2df   : > { %v14408_v50 = vpop.f32.mrb[62].mxu0 }
 0x2e0   : > { %17628 = vst [vmem:[#allocation50_spill] sm:$0xff] %v14408_v50  ;;  %v14416_v51 = vpop.f32.mrb[63].mxu0  ;;  %11252 = vmatmul.mubr.msk.f32.vlgmr.msra.gmra.mrb[26].mxu1 %vm2744_vm7, %v13185_v31  ;;  %v2624_v50 = vld [vmem:[%s17165_s12 + $0x1f8] sm:$0xff] }
 0x2e1   : > { %17629 = vst [vmem:[#allocation51_spill] sm:$0xff] %v14416_v51  ;;  %11730 = vmatpush3.bf16.msra.mxu1 %v11727_v45  ;;  %11254 = vmatprep.mubr.msk.f32.mxu1 %vm2744_vm7, %v13209_v0  ;;  %v11739_v31 = vpack.c.bf16 %v2624_v50, %v2623_v22  ;;  %v2625_v45 = vld [vmem:[%s17165_s12 + $0x200] sm:$0xff] }
 0x2e2   : > { %11732 = vmatprep.subr.bf16.mxu1 %v11731_v34 }
 0x2e3   : > { %v14422_v20 = vpop.f32.mrb[64].mxu0 }
 0x2e4   : > { %v14430_v51 = vpop.f32.mrb[65].mxu0  ;;  %11255 = vmatmul.mubr.msk.f32.gmra.mrb[28].mxu1 %vm2744_vm7, %v13214_v4  ;;  %v14450_v4 = vpack.c.bf16 %v2626_v52, %v2625_v45  ;;  %v17639_v45 = vld [vmem:[#allocation94_spill] sm:$0xff] }
 0x2e5   : > { %11257 = vmatprep.mubr.msk.f32.mxu1 %vm2744_vm7, %v13242_v40  ;;  %11734 = vmatpush3.bf16.msra.mxu1 %v11731_v34 }
 0x2e6   : > { %11736 = vmatprep.subr.bf16.mxu1 %v11735_v32 }
 0x2e7   : > { %v14436_v0 = vpop.f32.mrb[66].mxu0 }
 0x2e8   : > { %v14444_v10 = vpop.f32.mrb[67].mxu0  ;;  %11258 = vmatmul.mubr.msk.f32.gmra.mrb[30].mxu1 %vm2744_vm7, %v13230_v14 }
 0x2e9   : > { %11260 = vmatprep.mubr.msk.f32.mxu1 %vm2744_vm7, %v13257_v63  ;;  %11738 = vmatpush3.bf16.msra.mxu1 %v11735_v32 }
 0x2ea   : > { %11740 = vmatprep.subr.bf16.mxu1 %v11739_v31 }
 0x2eb   : > { %v14452_v40 = vpop.f32.mrb[68].mxu0 }
 0x2ec   : > { %v14454_v34 = vpop.f32.mrb[69].mxu0  ;;  %11261 = vmatmul.mubr.msk.f32.gmra.mrb[32].mxu1 %vm2744_vm7, %v13262_v46 }
 0x2ed   : > { %11263 = vmatprep.mubr.msk.f32.mxu1 %vm2744_vm7, %v13289_v29  ;;  %11742 = vmatpush3.bf16.msra.mxu1 %v11739_v31 }
 0x2ee   : > { %11744 = vmatprep.subr.bf16.mxu1 %v14450_v4 }
 0x2ef   : > { %v14461_v14 = vpop.f32.mrb[70].mxu0 }
 0x2f0   : > { %v14463_v63 = vpop.f32.mrb[71].mxu0  ;;  %11264 = vmatmul.mubr.msk.f32.gmra.mrb[34].mxu1 %vm2744_vm7, %v13283_v13 }
 0x2f1   : > { %11266 = vmatprep.mubr.msk.f32.mxu1 %vm2744_vm7, %v13307_v24 }
 0x2f3   : > { %v14469_v50 = vpop.f32.mrb[72].mxu0 }
 0x2f4   : > { %v14471_v32 = vpop.f32.mrb[73].mxu0  ;;  %11267 = vmatmul.mubr.msk.f32.gmra.mrb[36].mxu1 %vm2744_vm7, %v13312_v9 }
 0x2f5   : > { %11269 = vmatprep.mubr.msk.f32.mxu1 %vm2744_vm7, %v13355_v21 }
 0x2f7   : > { %v14477_v46 = vpop.f32.mrb[74].mxu0 }
 0x2f8   : > { %v14479_v29 = vpop.f32.mrb[75].mxu0  ;;  %11270 = vmatmul.mubr.msk.f32.gmra.mrb[38].mxu1 %vm2744_vm7, %v13345_v39 }
 0x2f9   : > { %11272 = vmatprep.mubr.msk.f32.mxu1 %vm2744_vm7, %v17554_v25 }
 0x2fb   : > { %v14485_v13 = vpop.f32.mrb[76].mxu0 }
 0x2fc   : > { %v14487_v24 = vpop.f32.mrb[77].mxu0  ;;  %11273 = vmatmul.mubr.msk.f32.gmra.mrb[0].mxu1 %vm2744_vm7, %v17555_v37 }
 0x2fd   : > { %11275 = vmatprep.mubr.msk.f32.mxu1 %vm2744_vm7, %v17556_v55 }
 0x2ff   : > { %v14493_v9 = vpop.f32.mrb[78].mxu0 }
 0x300   : > { %v14495_v21 = vpop.f32.mrb[79].mxu0  ;;  %11276 = vmatmul.mubr.msk.f32.gmra.mrb[2].mxu1 %vm2744_vm7, %v17557_v33 }
 0x301   : > { %11278 = vmatprep.mubr.msk.f32.mxu1 %vm2744_vm7, %v17558_v28 }
 0x303   : > { %v14501_v39 = vpop.f32.mrb[80].mxu0 }
 0x304   : > { %v14503_v25 = vpop.f32.mrb[81].mxu0  ;;  %11279 = vmatmul.mubr.msk.f32.gmra.mrb[4].mxu1 %vm2744_vm7, %v17559_v5 }
 0x305   : > { %17630 = vst [vmem:[#allocation57_spill] sm:$0xff] %v14503_v25  ;;  %11281 = vmatprep.mubr.msk.f32.mxu1 %vm2744_vm7, %v13518_v27  ;;  %v17644_v25 = vld [vmem:[#allocation31_spill] sm:$0xff] }
 0x307   : > { %v14509_v37 = vpop.f32.mrb[82].mxu0 }
 0x308   : > { %17631 = vst [vmem:[#allocation61_spill] sm:$0xff] %v14509_v37  ;;  %v14511_v55 = vpop.f32.mrb[83].mxu0  ;;  %11282 = vmatmul.mubr.msk.f32.gmra.mrb[6].mxu1 %vm2744_vm7, %v17560_v35 }
 0x309   : > { %17632 = vst [vmem:[#allocation62_spill] sm:$0xff] %v14511_v55  ;;  %11284 = vmatprep.mubr.msk.f32.mxu1 %vm2744_vm7, %v17561_v49  ;;  %v17642_v55 = vld [vmem:[#allocation28_spill] sm:$0xff] }
 0x30b   : > { %v14517_v33 = vpop.f32.mrb[84].mxu0 }
 0x30c   : > { %17633 = vst [vmem:[#allocation79_spill] sm:$0xff] %v14517_v33  ;;  %v14519_v28 = vpop.f32.mrb[85].mxu0  ;;  %11285 = vmatmul.mubr.msk.f32.gmra.mrb[8].mxu1 %vm2744_vm7, %v17562_v18  ;;  %v17641_v33 = vld [vmem:[#allocation27_spill] sm:$0xff] }
 0x30d   : > { %17634 = vst [vmem:[#allocation21_spill] sm:$0xff] %v14519_v28  ;;  %11287 = vmatprep.mubr.msk.f32.mxu1 %vm2744_vm7, %v13665_v56  ;;  %v2630_v28 = vld [vmem:[%s17165_s12 + $0x228] sm:$0xff] }
 0x30f   : > { %v14525_v27 = vpop.f32.mrb[86].mxu0 }
 0x310   : > { %17635 = vst [vmem:[#allocation20_spill] sm:$0xff] %v14525_v27  ;;  %v14527_v5 = vpop.f32.mrb[87].mxu0  ;;  %11288 = vmatmul.mubr.msk.f32.gmra.mrb[10].mxu1 %vm2744_vm7, %v13592_v38  ;;  %v2629_v27 = vld [vmem:[%s17165_s12 + $0x220] sm:$0xff] }
 0x311   : > { %17636 = vst [vmem:[#allocation22_spill] sm:$0xff] %v14527_v5  ;;  %11290 = vmatprep.mubr.msk.f32.mxu1 %vm2744_vm7, %v13623_v54  ;;  %v11751_v37 = vpack.c.bf16 %v2630_v28, %v2629_v27  ;;  %v17647_v28 = vld [vmem:[#allocation36_spill] sm:$0xff] }
 0x312   : > { %v17648_v27 = vld [vmem:[#allocation40_spill] sm:$0xff] }
 0x313   : > { %v14533_v35 = vpop.f32.mrb[48].mxu0 }
 0x314   : > { %v14535_v49 = vpop.f32.mrb[49].mxu0  ;;  %11291 = vmatmul.mubr.msk.f32.gmra.mrb[12].mxu1 %vm2744_vm7, %v13628_v8 }
 0x315   : > { %11293 = vmatprep.mubr.msk.f32.mxu1 %vm2744_vm7, %v13731_v59  ;;  %v2355_v59 = vrot.slane %v13877_v6, 1 }
 0x317   : > { %v14541_v56 = vpop.f32.mrb[50].mxu0 }
 0x318   : > { %v14543_v18 = vpop.f32.mrb[51].mxu0  ;;  %11294 = vmatmul.mubr.msk.f32.gmra.mrb[14].mxu1 %vm2744_vm7, %v13678_v53 }
 0x319   : > { %11296 = vmatprep.mubr.msk.f32.mxu1 %vm2744_vm7, %v13699_v30 }
 0x31b   : > { %v14549_v38 = vpop.f32.mrb[52].mxu0 }
 0x31c   : > { %v14551_v54 = vpop.f32.mrb[53].mxu0  ;;  %11297 = vmatmul.mubr.msk.f32.gmra.mrb[16].mxu1 %vm2744_vm7, %v17563_v61  ;;  %v17637_v61 = vrot.slane %v13877_v6, 7  ;;  %v2628_v6 = vld [vmem:[%s17165_s12 + $0x218] sm:$0xff] }
 0x31d   : > { %11299 = vmatprep.mubr.msk.f32.mxu1 %vm2744_vm7, %v14058_v7 }
 0x31e   : > { %v14575_v7 = vsel %vm2404_vm5, %v2355_v59, %v17637_v61  ;;  %v17640_v61 = vld [vmem:[#allocation95_spill] sm:$0xff] }
 0x31f   : > { %v14557_v8 = vpop.f32.mrb[54].mxu0 }
 0x320   : > { %v14560_v22 = vpop.f32.mrb[55].mxu0  ;;  %11300 = vmatmul.mubr.msk.f32.gmra.mrb[18].mxu1 %vm2744_vm7, %v13844_v43 }
 0x321   : > { %11302 = vmatprep.mubr.msk.f32.mxu1 %vm2744_vm7, %v13847_v44  ;;  %v17638_v44 = vld [vmem:[#allocation93_spill] sm:$0xff] }
 0x323   : > { %v14566_v53 = vpop.f32.mrb[56].mxu0 }
 0x324   : > { %v14568_v30 = vpop.f32.mrb[57].mxu0  ;;  %11303 = vmatmul.mubr.msk.f32.gmra.mrb[20].mxu1 %vm2744_vm7, %v13852_v57  ;;  %v2627_v57 = vld [vmem:[%s17165_s12 + $0x210] sm:$0xff] }
 0x325   : > { %11305 = vmatprep.mubr.msk.f32.mxu1 %vm2744_vm7, %v14575_v7  ;;  %v11747_v5 = vpack.c.bf16 %v2628_v6, %v2627_v57  ;;  %v2632_v57 = vld [vmem:[%s17165_s12 + $0x238] sm:$0xff] }
 0x326   : > { %v17643_v6 = vld [vmem:[#allocation30_spill] sm:$0xff] }
 0x327   : > { %v14579_v31 = vpop.f32.mrb[58].mxu0 }
 0x328   : > { %v14581_v43 = vpop.f32.mrb[59].mxu0  ;;  %11306 = vmatmul.mubr.msk.f32.gmra.mrb[22].mxu1 %vm2744_vm7, %v17638_v44 }
 0x329   : > { %11308 = vmatprep.mubr.msk.f32.mxu1 %vm2744_vm7, %v17639_v45 }
 0x32b   : > { %v14587_v52 = vpop.f32.mrb[60].mxu0 }
 0x32c   : > { %v14595_v59 = vpop.f32.mrb[61].mxu0  ;;  %11309 = vmatmul.mubr.msk.f32.gmra.mrb[24].mxu1 %vm2744_vm7, %v17640_v61 }
 0x32d   : > { %11327 = vmatprep.mubr.msk.f32.mxu1 %vm2744_vm7, %v17569_v15  ;;  %v2631_v15 = vld [vmem:[%s17165_s12 + $0x230] sm:$0xff] }
 0x330   : > { %11328 = vmatmul.mubr.msk.f32.vlgmr.msra.gmra.mrb[26].mxu1 %vm2744_vm7, %v17641_v33  ;;  %v17646_v33 = vld [vmem:[#allocation34_spill] sm:$0xff] }
 0x331   : > { %11746 = vmatpush3.bf16.msra.mxu1 %v14450_v4  ;;  %11330 = vmatprep.mubr.msk.f32.mxu1 %vm2744_vm7, %v17642_v55  ;;  %v11755_v4 = vpack.c.bf16 %v2632_v57, %v2631_v15  ;;  %v17645_v55 = vld [vmem:[#allocation32_spill] sm:$0xff]  ;;  %v17652_v15 = vld [vmem:[#allocation49_spill] sm:$0xff]  ;;  %v17654_v57 = vld [vmem:[#allocation55_spill] sm:$0xff] }
 0x332   : > { %11748 = vmatprep.subr.bf16.mxu1 %v11747_v5 }
 0x334   : > { %11331 = vmatmul.mubr.msk.f32.gmra.mrb[28].mxu1 %vm2744_vm7, %v17643_v6  ;;  %v17649_v6 = vld [vmem:[#allocation41_spill] sm:$0xff] }
 0x335   : > { %11333 = vmatprep.mubr.msk.f32.mxu1 %vm2744_vm7, %v17644_v25  ;;  %11750 = vmatpush3.bf16.msra.mxu1 %v11747_v5  ;;  %v17650_v25 = vld [vmem:[#allocation43_spill] sm:$0xff] }
 0x336   : > { %11752 = vmatprep.subr.bf16.mxu1 %v11751_v37  ;;  %v17651_v5 = vld [vmem:[#allocation47_spill] sm:$0xff] }
 0x338   : > { %11334 = vmatmul.mubr.msk.f32.gmra.mrb[30].mxu1 %vm2744_vm7, %v17645_v55  ;;  %v17655_v55 = vld [vmem:[#allocation58_spill] sm:$0xff] }
 0x339   : > { %11336 = vmatprep.mubr.msk.f32.mxu1 %vm2744_vm7, %v17646_v33  ;;  %11754 = vmatpush3.bf16.msra.mxu1 %v11751_v37  ;;  %v17653_v37 = vld [vmem:[#allocation53_spill] sm:$0xff] }
 0x33a   : > { %11756 = vmatprep.subr.bf16.mxu1 %v11755_v4  ;;  %v6057_v33 = vld [vmem:[%s17168_s15 + $0x8] sm:$0xff] }
 0x33c   : > { %11337 = vmatmul.mubr.msk.f32.gmra.mrb[32].mxu1 %vm2744_vm7, %v17647_v28  ;;  %v17656_v28 = vld [vmem:[#allocation60_spill] sm:$0xff] }
 0x33d   : > { %11339 = vmatprep.mubr.msk.f32.mxu1 %vm2744_vm7, %v17648_v27  ;;  %11758 = vmatpush3.bf16.msra.mxu1 %v11755_v4  ;;  %v6056_v4 = vld [vmem:[%s17168_s15] sm:$0xff] }
 0x33e   : > { %v11759_v27 = vpack.c.bf16 %v6057_v33, %v6056_v4  ;;  %v17664_v4 = vld [vmem:[#allocation83_spill] sm:$0xff]  ;;  %v17665_v33 = vld [vmem:[#allocation85_spill] sm:$0xff] }
 0x340   : > { %11340 = vmatmul.mubr.msk.f32.gmra.mrb[34].mxu1 %vm2744_vm7, %v17649_v6  ;;  %11760 = vmatprep.subr.bf16.mxu0 %v11759_v27  ;;  %v17657_v6 = vld [vmem:[#allocation64_spill] sm:$0xff] }
 0x341   : > { %11342 = vmatprep.mubr.msk.f32.mxu1 %vm2744_vm7, %v17650_v25  ;;  %11762 = vmatpush3.bf16.msra.mxu0 %v11759_v27  ;;  %v17658_v25 = vld [vmem:[#allocation66_spill] sm:$0xff]  ;;  %v17667_v27 = vld [vmem:[#allocation89_spill] sm:$0xff] }
 0x344   : > { %11343 = vmatmul.mubr.msk.f32.gmra.mrb[36].mxu1 %vm2744_vm7, %v17651_v5  ;;  %v17659_v5 = vld [vmem:[#allocation68_spill] sm:$0xff] }
 0x345   : > { %11345 = vmatprep.mubr.msk.f32.mxu1 %vm2744_vm7, %v17652_v15  ;;  %v17660_v15 = vld [vmem:[#allocation70_spill] sm:$0xff] }
 0x348   : > { %11346 = vmatmul.mubr.msk.f32.gmra.mrb[38].mxu1 %vm2744_vm7, %v17653_v37  ;;  %v17661_v37 = vld [vmem:[#allocation72_spill] sm:$0xff] }
 0x349   : > { %11348 = vmatprep.mubr.msk.f32.mxu1 %vm2744_vm7, %v17654_v57  ;;  %v17662_v57 = vld [vmem:[#allocation74_spill] sm:$0xff] }
 0x34c   : > { %11349 = vmatmul.mubr.msk.f32.gmra.mrb[0].mxu1 %vm2744_vm7, %v17655_v55  ;;  %v17663_v55 = vld [vmem:[#allocation81_spill] sm:$0xff] }
 0x34d   : > { %11351 = vmatprep.mubr.msk.f32.mxu1 %vm2744_vm7, %v17656_v28  ;;  %v17666_v28 = vld [vmem:[#allocation87_spill] sm:$0xff] }
 0x350   : > { %11352 = vmatmul.mubr.msk.f32.gmra.mrb[2].mxu1 %vm2744_vm7, %v17657_v6  ;;  %v17668_v6 = vld [vmem:[#allocation91_spill] sm:$0xff] }
 0x351   : > { %11354 = vmatprep.mubr.msk.f32.mxu1 %vm2744_vm7, %v17658_v25  ;;  %v5186_v25 = vrot.slane %v17638_v44, 1 }
 0x354   : > { %11355 = vmatmul.mubr.msk.f32.gmra.mrb[4].mxu1 %vm2744_vm7, %v17659_v5  ;;  %v5188_v5 = vrot.slane %v17639_v45, 1 }
 0x355   : > { %11357 = vmatprep.mubr.msk.f32.mxu1 %vm2744_vm7, %v17660_v15  ;;  %v5190_v15 = vrot.slane %v17640_v61, 1 }
 0x358   : > { %11358 = vmatmul.mubr.msk.f32.gmra.mrb[6].mxu1 %vm2744_vm7, %v17661_v37  ;;  %v17670_v37 = vld [vmem:[#allocation39_spill] sm:$0xff] }
 0x359   : > { %11360 = vmatprep.mubr.msk.f32.mxu1 %vm2744_vm7, %v17662_v57  ;;  %v5189_v57 = vsel %vm2653_vm6, %v5186_v25, %v5188_v5 }
 0x35c   : > { %11361 = vmatmul.mubr.msk.f32.gmra.mrb[8].mxu1 %vm2744_vm7, %v17595_v1  ;;  %v5185_v1 = vrot.slane %v14575_v7, 1 }
 0x35d   : > { %11363 = vmatprep.mubr.msk.f32.mxu1 %vm2744_vm7, %v17596_v41  ;;  %v17669_v41 = vld [vmem:[#allocation38_spill] sm:$0xff] }
 0x360   : > { %11364 = vmatmul.mubr.msk.f32.gmra.mrb[10].mxu1 %vm2744_vm7, %v17663_v55  ;;  %v17671_v55 = vld [vmem:[#allocation96_spill] sm:$0xff] }
 0x361   : > { %11366 = vmatprep.mubr.msk.f32.mxu1 %vm2744_vm7, %v17664_v4  ;;  %v5192_v4 = vrot.slane %v17671_v55, 1 }
 0x364   : > { %11367 = vmatmul.mubr.msk.f32.gmra.mrb[12].mxu1 %vm2744_vm7, %v17665_v33  ;;  %v17680_v33 = vld [vmem:[#allocation63_spill] sm:$0xff] }
 0x365   : > { %11369 = vmatprep.mubr.msk.f32.mxu1 %vm2744_vm7, %v17666_v28  ;;  %v17681_v28 = vld [vmem:[#allocation65_spill] sm:$0xff] }
 0x368   : > { %11370 = vmatmul.mubr.msk.f32.gmra.mrb[14].mxu1 %vm2744_vm7, %v17667_v27  ;;  %v17682_v27 = vld [vmem:[#allocation67_spill] sm:$0xff] }
 0x369   : > { %11372 = vmatprep.mubr.msk.f32.mxu1 %vm2744_vm7, %v17668_v6  ;;  %v17683_v6 = vld [vmem:[#allocation69_spill] sm:$0xff] }
 0x36c   : > { %11373 = vmatmul.mubr.msk.f32.gmra.mrb[16].mxu1 %vm2744_vm7, %v13826_v26  ;;  %v5187_v26 = vsel %vm2653_vm6, %v5185_v1, %v5186_v25  ;;  %v17685_v1 = vld [vmem:[#allocation73_spill] sm:$0xff]  ;;  %v17686_v25 = vld [vmem:[#allocation75_spill] sm:$0xff] }
 0x36d   : > { %11375 = vmatprep.mubr.msk.f32.mxu1 %vm2744_vm7, %v17669_v41  ;;  %v17684_v41 = vld [vmem:[#allocation71_spill] sm:$0xff] }
 0x370   : > { %11376 = vmatmul.mubr.msk.f32.gmra.mrb[18].mxu1 %vm2744_vm7, %v14263_v60  ;;  %v5191_v60 = vsel %vm2653_vm6, %v5188_v5, %v5190_v15  ;;  %v17687_v5 = vld [vmem:[#allocation82_spill] sm:$0xff] }
 0x371   : > { %11378 = vmatprep.mubr.msk.f32.mxu1 %vm2744_vm7, %v14269_v58  ;;  %v5193_v58 = vsel %vm2653_vm6, %v5190_v15, %v5192_v4  ;;  %v17688_v15 = vld [vmem:[#allocation84_spill] sm:$0xff] }
 0x372   : > { %v17692_v4 = vld [vmem:[#allocation92_spill] sm:$0xff] }
 0x374   : > { %11379 = vmatmul.mubr.msk.f32.gmra.mrb[20].mxu1 %vm2744_vm7, %v17670_v37  ;;  %v17689_v37 = vld [vmem:[#allocation86_spill] sm:$0xff] }
 0x375   : > { %11381 = vmatprep.mubr.msk.f32.mxu1 %vm2744_vm7, %v5187_v26  ;;  %v17690_v26 = vld [vmem:[#allocation88_spill] sm:$0xff] }
 0x378   : > { %11382 = vmatmul.mubr.msk.f32.gmra.mrb[22].mxu1 %vm2744_vm7, %v5189_v57  ;;  %v17691_v57 = vld [vmem:[#allocation90_spill] sm:$0xff] }
 0x379   : > { %11384 = vmatprep.mubr.msk.f32.mxu1 %vm2744_vm7, %v5191_v60  ;;  %v5508_v60 = vrot.slane %v17638_v44, 2  ;;  %v5514_v44 = vrot.slane %v17671_v55, 2  ;;  %v6052_v55 = vld [vmem:[%s17167_s14] sm:$0xff] }
 0x37c   : > { %11385 = vmatmul.mubr.msk.f32.gmra.mrb[24].mxu1 %vm2744_vm7, %v5193_v58  ;;  %v17694_v58 = vld [vmem:[#allocation45_spill] sm:$0xff] }
 0x37d   : > { %11403 = vmatprep.mubr.msk.f32.mxu1 %vm2744_vm7, %v14161_v47  ;;  %v17672_v47 = vld [vmem:[#allocation37_spill] sm:$0xff] }
 0x380   : > { %11404 = vmatmul.mubr.msk.f32.vlgmr.msra.gmra.mrb[26].mxu1 %vm2744_vm7, %v14169_v48  ;;  %v17673_v48 = vld [vmem:[#allocation42_spill] sm:$0xff] }
 0x381   : > { %11406 = vmatprep.mubr.msk.f32.mxu1 %vm2744_vm7, %v14178_v62  ;;  %v17674_v62 = vld [vmem:[#allocation44_spill] sm:$0xff] }
 0x384   : > { %11407 = vmatmul.mubr.msk.f32.gmra.mrb[28].mxu1 %vm2744_vm7, %v14187_v16  ;;  %v17675_v16 = vld [vmem:[#allocation48_spill] sm:$0xff] }
 0x385   : > { %11409 = vmatprep.mubr.msk.f32.mxu1 %vm2744_vm7, %v14194_v36  ;;  %v17676_v36 = vld [vmem:[#allocation52_spill] sm:$0xff] }
 0x388   : > { %11410 = vmatmul.mubr.msk.f32.gmra.mrb[30].mxu1 %vm2744_vm7, %v14203_v19  ;;  %v17677_v19 = vld [vmem:[#allocation54_spill] sm:$0xff] }
 0x389   : > { %11412 = vmatprep.mubr.msk.f32.mxu1 %vm2744_vm7, %v17603_v17  ;;  %v17678_v17 = vld [vmem:[#allocation56_spill] sm:$0xff] }
 0x38c   : > { %11413 = vmatmul.mubr.msk.f32.gmra.mrb[32].mxu1 %vm2744_vm7, %v17604_v42  ;;  %v17679_v42 = vld [vmem:[#allocation59_spill] sm:$0xff] }
 0x38d   : > { %11415 = vmatprep.mubr.msk.f32.mxu1 %vm2744_vm7, %v17672_v47  ;;  %v5510_v47 = vrot.slane %v17639_v45, 2 }
 0x390   : > { %11416 = vmatmul.mubr.msk.f32.gmra.mrb[34].mxu1 %vm2744_vm7, %v17673_v48  ;;  %v5512_v48 = vrot.slane %v17640_v61, 2  ;;  %v6059_v61 = vld [vmem:[%s17168_s15 + $0x18] sm:$0xff] }
 0x391   : > { %11418 = vmatprep.mubr.msk.f32.mxu1 %vm2744_vm7, %v17674_v62 }
 0x392   : > { %v5515_v45 = vsel %vm3435_vm14, %v5512_v48, %v5514_v44 }
 0x394   : > { %11419 = vmatmul.mubr.msk.f32.gmra.mrb[36].mxu1 %vm2744_vm7, %v17675_v16  ;;  %v6053_v16 = vld [vmem:[%s17167_s14 + $0x8] sm:$0xff] }
 0x395   : > { %11421 = vmatprep.mubr.msk.f32.mxu1 %vm2744_vm7, %v17676_v36  ;;  %v14800_v36 = vpack.c.bf16 %v6053_v16, %v6052_v55 }
 0x398   : > { %11422 = vmatmul.mubr.msk.f32.gmra.mrb[38].mxu1 %vm2744_vm7, %v17677_v19 }
 0x399   : > { %11424 = vmatprep.mubr.msk.f32.mxu1 %vm2744_vm7, %v17678_v17 }
 0x39c   : > { %11425 = vmatmul.mubr.msk.f32.gmra.mrb[0].mxu1 %vm2744_vm7, %v17679_v42 }
 0x39d   : > { %11427 = vmatprep.mubr.msk.f32.mxu1 %vm2744_vm7, %v17680_v33 }
 0x3a0   : > { %11428 = vmatmul.mubr.msk.f32.gmra.mrb[2].mxu1 %vm2744_vm7, %v17681_v28 }
 0x3a1   : > { %11430 = vmatprep.mubr.msk.f32.mxu1 %vm2744_vm7, %v17682_v27 }
 0x3a4   : > { %11431 = vmatmul.mubr.msk.f32.gmra.mrb[4].mxu1 %vm2744_vm7, %v17683_v6 }
 0x3a5   : > { %11433 = vmatprep.mubr.msk.f32.mxu1 %vm2744_vm7, %v17684_v41 }
 0x3a8   : > { %11434 = vmatmul.mubr.msk.f32.gmra.mrb[6].mxu1 %vm2744_vm7, %v17685_v1 }
 0x3a9   : > { %11436 = vmatprep.mubr.msk.f32.mxu1 %vm2744_vm7, %v17686_v25  ;;  %v14810_v25 = vld [vmem:[%s17166_s13] ss:$0 sm:$0xff] }
 0x3ac   : > { %11437 = vmatmul.mubr.msk.f32.gmra.mrb[8].mxu1 %vm2744_vm7, %v17620_v23  ;;  %v5507_v23 = vrot.slane %v14575_v7, 2  ;;  %v5511_v7 = vsel %vm3435_vm14, %v5508_v60, %v5510_v47 }
 0x3ad   : > { %11439 = vmatprep.mubr.msk.f32.mxu1 %vm2744_vm7, %v17621_v11  ;;  %v17693_v11 = vld [vmem:[#allocation46_spill] sm:$0xff] }
 0x3b0   : > { %11440 = vmatmul.mubr.msk.f32.gmra.mrb[10].mxu1 %vm2744_vm7, %v17687_v5 }
 0x3b1   : > { %11442 = vmatprep.mubr.msk.f32.mxu1 %vm2744_vm7, %v17688_v15 }
 0x3b4   : > { %11443 = vmatmul.mubr.msk.f32.gmra.mrb[12].mxu1 %vm2744_vm7, %v17689_v37 }
 0x3b5   : > { %11445 = vmatprep.mubr.msk.f32.mxu1 %vm2744_vm7, %v17690_v26 }
 0x3b8   : > { %11446 = vmatmul.mubr.msk.f32.gmra.mrb[14].mxu1 %vm2744_vm7, %v17691_v57 }
 0x3b9   : > { %11448 = vmatprep.mubr.msk.f32.mxu1 %vm2744_vm7, %v17692_v4 }
 0x3bc   : > { %11449 = vmatmul.mubr.msk.f32.gmra.mrb[16].mxu1 %vm2744_vm7, %v13829_v2  ;;  %v5509_v2 = vsel %vm3435_vm14, %v5507_v23, %v5508_v60 }
 0x3bd   : > { %11451 = vmatprep.mubr.msk.f32.mxu1 %vm2744_vm7, %v17693_v11 }
 0x3c0   : > { %11452 = vmatmul.mubr.msk.f32.gmra.mrb[18].mxu1 %vm2744_vm7, %v14385_v3  ;;  %v5513_v3 = vsel %vm3435_vm14, %v5510_v47, %v5512_v48 }
 0x3c1   : > { %11454 = vmatprep.mubr.msk.f32.mxu1 %vm2744_vm7, %v17694_v58  ;;  %v6054_v58 = vld [vmem:[%s17167_s14 + $0x10] sm:$0xff] }
 0x3c4   : > { %11455 = vmatmul.mubr.msk.f32.gmra.mrb[20].mxu1 %vm2744_vm7, %v14396_v12  ;;  %v6058_v12 = vld [vmem:[%s17168_s15 + $0x10] sm:$0xff] }
 0x3c5   : > { %11457 = vmatprep.mubr.msk.f32.mxu1 %vm2744_vm7, %v5509_v2  ;;  %v11763_v62 = vpack.c.bf16 %v6059_v61, %v6058_v12 }
 0x3c7   : > { %11764 = vmatprep.subr.bf16.mxu0 %v11763_v62 }
 0x3c8   : > { %11458 = vmatmul.mubr.msk.f32.gmra.mrb[22].mxu1 %vm2744_vm7, %v5511_v7  ;;  %11766 = vmatpush3.bf16.msra.mxu0 %v11763_v62 }
 0x3c9   : > { %11460 = vmatprep.mubr.msk.f32.mxu1 %vm2744_vm7, %v5513_v3  ;;  %11768 = vmatprep.subr.bf16.mxu0 %v14800_v36 }
 0x3cc   : > { %11461 = vmatmul.mubr.msk.f32.gmra.mrb[24].mxu1 %vm2744_vm7, %v5515_v45 }
 0x453   : > { %v11405_v19 = vpop.f32.mrb[26].mxu1 }
 0x454   : > { %v11783_v17 = vadd.f32 %v11405_v19, %v14533_v35  ;;  %v5590_v42 = vpop.f32.mrb[27].mxu1 }
 0x455   : > { %v11784_v33 = vadd.f32 %v5590_v42, %v14535_v49 }
 0x456   : > { %v5837_v37 = vadd.f32 %v11783_v17, %v14810_v25 }
 0x457   : > { %v11408_v28 = vpop.f32.mrb[28].mxu1  ;;  %v5836_v49 = vadd.f32 %v11784_v33, %v14810_v25 }
 0x458   : > { %v11785_v27 = vadd.f32 %v11408_v28, %v14541_v56  ;;  %v5600_v6 = vpop.f32.mrb[29].mxu1  ;;  %v5917_v4 = vmul.f32 0.01, %v5837_v37  ;;  %vm5877_vm8 = vcmp.gt.f32.partialorder %v5837_v37, 0.0 }
 0x459   : > { %v11786_v41 = vadd.f32 %v5600_v6, %v14543_v18  ;;  %v5916_v11 = vmul.f32 0.01, %v5836_v49  ;;  %vm5876_vm9 = vcmp.gt.f32.partialorder %v5836_v49, 0.0 }
 0x45a   : > { %v5957_v2 = vsel %vm5877_vm8, %v5837_v37, %v5917_v4 }
 0x45b   : > { %v11411_v1 = vpop.f32.mrb[30].mxu1  ;;  %v5838_v47 = vadd.f32 %v11786_v41, %v14810_v25 }
 0x45c   : > { %v11787_v5 = vadd.f32 %v11411_v1, %v14549_v38  ;;  %v5610_v15 = vpop.f32.mrb[31].mxu1  ;;  %v5839_v38 = vadd.f32 %v11785_v27, %v14810_v25 }
 0x45d   : > { %v11788_v35 = vadd.f32 %v5610_v15, %v14551_v54  ;;  %vm5878_vm13 = vcmp.gt.f32.partialorder %v5838_v47, 0.0  ;;  %v5918_v42 = vmul.f32 0.01, %v5838_v47 }
 0x45e   : > { %vm5879_vm10 = vcmp.gt.f32.partialorder %v5839_v38, 0.0  ;;  %v5919_v62 = vmul.f32 0.01, %v5839_v38 }
 0x45f   : > { %v11414_v26 = vpop.f32.mrb[32].mxu1  ;;  %v5840_v16 = vadd.f32 %v11788_v35, %v14810_v25  ;;  %v5841_v35 = vadd.f32 %v11787_v5, %v14810_v25 }
 0x460   : > { %v14817_v56 = vadd.f32 %v11414_v26, %v14557_v8  ;;  %v5620_v18 = vpop.f32.mrb[33].mxu1  ;;  %v6055_v8 = vld [vmem:[%s17167_s14 + $0x18] sm:$0xff]  ;;  %v5959_v4 = vsel %vm5879_vm10, %v5839_v38, %v5919_v62 }
 0x461   : > { %v11790_v57 = vadd.f32 %v5620_v18, %v14560_v22  ;;  %v11771_v3 = vpack.c.bf16 %v6055_v8, %v6054_v58  ;;  %v5920_v26 = vmul.f32 0.01, %v5840_v16  ;;  %vm5880_vm4 = vcmp.gt.f32.partialorder %v5840_v16, 0.0 }
 0x462   : > { %v5921_v8 = vmul.f32 0.01, %v5841_v35  ;;  %v5843_v38 = vadd.f32 %v14817_v56, %v14810_v25  ;;  %vm5881_vm8 = vcmp.gt.f32.partialorder %v5841_v35, 0.0 }
 0x463   : > { %v11417_v23 = vpop.f32.mrb[34].mxu1  ;;  %v5842_v18 = vadd.f32 %v11790_v57, %v14810_v25 }
 0x464   : > { %v11791_v54 = vadd.f32 %v11417_v23, %v14566_v53  ;;  %v5630_v60 = vpop.f32.mrb[35].mxu1  ;;  %v5956_v53 = vsel %vm5876_vm9, %v5836_v49, %v5916_v11  ;;  %v5958_v23 = vsel %vm5878_vm13, %v5838_v47, %v5918_v42  ;;  %vm5883_vm10 = vcmp.gt.f32.partialorder %v5843_v38, 0.0 }
 0x465   : > { %v11792_v22 = vadd.f32 %v5630_v60, %v14568_v30  ;;  %v5922_v47 = vmul.f32 0.01, %v5842_v18  ;;  %vm5882_vm9 = vcmp.gt.f32.partialorder %v5842_v18, 0.0 }
 0x466   : > { %v5845_v48 = vadd.f32 %v11791_v54, %v14810_v25 }
 0x467   : > { %v5844_v7 = vadd.f32 %v11792_v22, %v14810_v25  ;;  %v11420_v44 = vpop.f32.mrb[36].mxu1 }
 0x468   : > { %vm5885_vm11 = vcmp.gt.f32.partialorder %v5845_v48, 0.0  ;;  %v5925_v45 = vmul.f32 0.01, %v5845_v48  ;;  %v11793_v12 = vadd.f32 %v11420_v44, %v14579_v31  ;;  %v5640_v61 = vpop.f32.mrb[37].mxu1  ;;  %v6012_v31 = vld [vmem:[%s14987_s26 + $0x40] sm:$0xff] }
 0x469   : > { %vm5884_vm12 = vcmp.gt.f32.partialorder %v5844_v7, 0.0  ;;  %v5924_v55 = vmul.f32 0.01, %v5844_v7  ;;  %v11794_v30 = vadd.f32 %v5640_v61, %v14581_v43 }
 0x46a   : > { %v14835_v19 = vsel %vm5885_vm11, %v5845_v48, %v5925_v45  ;;  %v5847_v17 = vadd.f32 %v11793_v12, %v14810_v25  ;;  %v5960_v48 = vsel %vm5880_vm4, %v5840_v16, %v5920_v26  ;;  %v5961_v45 = vsel %vm5881_vm8, %v5841_v35, %v5921_v8 }
 0x46b   : > { %v5846_v33 = vadd.f32 %v11794_v30, %v14810_v25  ;;  %v11423_v28 = vpop.f32.mrb[38].mxu1  ;;  %v5964_v27 = vsel %vm5884_vm12, %v5844_v7, %v5924_v55  ;;  %v5997_v6 = vsel %vm12608_vm1, %v14835_v19, %v5957_v2  ;;  %v5962_v12 = vsel %vm5882_vm9, %v5842_v18, %v5922_v47 }
 0x46c   : > { %vm5887_vm15 = vcmp.gt.f32.partialorder %v5847_v17, 0.0  ;;  %v5927_v41 = vmul.f32 0.01, %v5847_v17  ;;  %v11795_v43 = vadd.f32 %v11423_v28, %v14587_v52  ;;  %v5650_v1 = vpop.f32.mrb[39].mxu1  ;;  %v5996_v15 = vsel %vm12608_vm1, %v5964_v27, %v5956_v53 }
 0x46d   : > { %vm5886_vm3 = vcmp.gt.f32.partialorder %v5846_v33, 0.0  ;;  %v5926_v37 = vmul.f32 0.01, %v5846_v33  ;;  %v11796_v49 = vadd.f32 %v5650_v1, %v14595_v59  ;;  %11471 = vmatprep.mubr.msk.f32.mxu0 %vm1234_vm0, %v5996_v15  ;;  %v17696_v59 = vld [vmem:[#allocation50_spill] sm:$0xff]  ;;  %v5923_v53 = vmul.f32 0.01, %v5843_v38 }
 0x46e   : > { %11472 = vmatmul.mubr.msk.f32.vlgmr.msra.gmra.mrb[88].mxu0 %vm1234_vm0, %v5997_v6  ;;  %v5967_v52 = vsel %vm5887_vm15, %v5847_v17, %v5927_v41  ;;  %v5849_v42 = vadd.f32 %v11795_v43, %v14810_v25 }
 0x46f   : > { %11770 = vmatpush3.bf16.msra.mxu0 %v14800_v36  ;;  %v11426_v11 = vpop.f32.mrb[0].mxu1  ;;  %v5966_v5 = vsel %vm5886_vm3, %v5846_v33, %v5926_v37  ;;  %v5999_v54 = vsel %vm12608_vm1, %v5967_v52, %v5959_v4  ;;  %v17697_v36 = vld [vmem:[#allocation51_spill] sm:$0xff] }
 0x470   : > { %v11797_v60 = vadd.f32 %v11426_v11, %v17696_v59  ;;  %v5660_v58 = vpop.f32.mrb[1].mxu1  ;;  %v5998_v57 = vsel %vm12608_vm1, %v5966_v5, %v5958_v23  ;;  %11772 = vmatprep.subr.bf16.mxu0 %v11771_v3  ;;  %v5929_v41 = vmul.f32 0.01, %v5849_v42  ;;  %vm5889_vm12 = vcmp.gt.f32.partialorder %v5849_v42, 0.0 }
 0x471   : > { %v11798_v22 = vadd.f32 %v5660_v58, %v17697_v36  ;;  %11474 = vmatprep.mubr.msk.f32.mxu0 %vm1234_vm0, %v5998_v57 }
 0x472   : > { %11475 = vmatmul.mubr.msk.f32.gmra.mrb[90].mxu0 %vm1234_vm0, %v5999_v54 }
 0x473   : > { %v11429_v2 = vpop.f32.mrb[2].mxu1  ;;  %11477 = vmatprep.mubr.msk.f32.mxu0 %vm1234_vm0, %v5960_v48  ;;  %11774 = vmatpush3.bf16.msra.mxu0 %v11771_v3  ;;  %v5963_v3 = vsel %vm5883_vm10, %v5843_v38, %v5923_v53 }
 0x474   : > { %v11799_v7 = vadd.f32 %v11429_v2, %v14422_v20  ;;  %v5670_v44 = vpop.f32.mrb[3].mxu1  ;;  %v5848_v20 = vadd.f32 %v11796_v49, %v14810_v25 }
 0x475   : > { %v11800_v56 = vadd.f32 %v5670_v44, %v14430_v51 }
 0x476   : > { %11478 = vmatmul.mubr.msk.f32.gmra.mrb[92].mxu0 %vm1234_vm0, %v5961_v45  ;;  %v5928_v28 = vmul.f32 0.01, %v5848_v20  ;;  %vm5888_vm11 = vcmp.gt.f32.partialorder %v5848_v20, 0.0  ;;  %v5853_v49 = vadd.f32 %v11799_v7, %v14810_v25 }
 0x477   : > { %v11432_v61 = vpop.f32.mrb[4].mxu1  ;;  %11480 = vmatprep.mubr.msk.f32.mxu0 %vm1234_vm0, %v5962_v12 }
 0x478   : > { %v11801_v62 = vadd.f32 %v11432_v61, %v14436_v0  ;;  %v5680_v55 = vpop.f32.mrb[5].mxu1  ;;  %v5850_v0 = vadd.f32 %v11798_v22, %v14810_v25  ;;  %v5968_v15 = vsel %vm5888_vm11, %v5848_v20, %v5928_v28  ;;  %vm5893_vm4 = vcmp.gt.f32.partialorder %v5853_v49, 0.0 }
 0x479   : > { %v11802_v30 = vadd.f32 %v5680_v55, %v14444_v10 }
 0x47a   : > { %11481 = vmatmul.mubr.msk.f32.gmra.mrb[94].mxu0 %vm1234_vm0, %v5963_v3  ;;  %v5930_v1 = vmul.f32 0.01, %v5850_v0  ;;  %vm5890_vm13 = vcmp.gt.f32.partialorder %v5850_v0, 0.0  ;;  %v5855_v54 = vadd.f32 %v11801_v62, %v14810_v25 }
 0x47b   : > { %v11435_v16 = vpop.f32.mrb[6].mxu1  ;;  %11483 = vmatprep.mubr.msk.f32.mxu0 %vm1234_vm0, %v5964_v27  ;;  %v5854_v4 = vadd.f32 %v11802_v30, %v14810_v25 }
 0x47c   : > { %v11803_v51 = vadd.f32 %v11435_v16, %v14452_v40  ;;  %v5690_v17 = vpop.f32.mrb[7].mxu1  ;;  %v5851_v40 = vadd.f32 %v11797_v60, %v14810_v25  ;;  %v5935_v22 = vmul.f32 0.01, %v5855_v54  ;;  %vm5895_vm9 = vcmp.gt.f32.partialorder %v5855_v54, 0.0 }
 0x47d   : > { %v11804_v33 = vadd.f32 %v5690_v17, %v14454_v34  ;;  %v5852_v34 = vadd.f32 %v11800_v56, %v14810_v25  ;;  %v5934_v60 = vmul.f32 0.01, %v5854_v4  ;;  %vm5894_vm8 = vcmp.gt.f32.partialorder %v5854_v4, 0.0 }
 0x47e   : > { %11484 = vmatmul.mubr.msk.f32.gmra.mrb[96].mxu0 %vm1234_vm0, %v14835_v19  ;;  %v5931_v37 = vmul.f32 0.01, %v5851_v40  ;;  %vm5891_vm15 = vcmp.gt.f32.partialorder %v5851_v40, 0.0  ;;  %v5975_v12 = vsel %vm5895_vm9, %v5855_v54, %v5935_v22 }
 0x47f   : > { %v11438_v10 = vpop.f32.mrb[8].mxu1  ;;  %11486 = vmatprep.mubr.msk.f32.mxu0 %vm1234_vm0, %v5966_v5  ;;  %v5932_v18 = vmul.f32 0.01, %v5852_v34  ;;  %vm5892_vm3 = vcmp.gt.f32.partialorder %v5852_v34, 0.0  ;;  %v5933_v5 = vmul.f32 0.01, %v5853_v49  ;;  %v5856_v58 = vadd.f32 %v11804_v33, %v14810_v25 }
 0x480   : > { %v11805_v6 = vadd.f32 %v11438_v10, %v14461_v14  ;;  %v5700_v27 = vpop.f32.mrb[9].mxu1  ;;  %v5971_v59 = vsel %vm5891_vm15, %v5851_v40, %v5931_v37  ;;  %v5974_v7 = vsel %vm5894_vm8, %v5854_v4, %v5934_v60 }
 0x481   : > { %v11806_v43 = vadd.f32 %v5700_v27, %v14463_v63  ;;  %v5969_v63 = vsel %vm5889_vm12, %v5849_v42, %v5929_v41  ;;  %v5972_v57 = vsel %vm5892_vm3, %v5852_v34, %v5932_v18  ;;  %v5973_v47 = vsel %vm5893_vm4, %v5853_v49, %v5933_v5  ;;  %v17699_v27 = vld [vmem:[#allocation61_spill] sm:$0xff]  ;;  %v17701_v18 = vld [vmem:[#allocation79_spill] sm:$0xff] }
 0x482   : > { %11487 = vmatmul.mubr.msk.f32.gmra.mrb[98].mxu0 %vm1234_vm0, %v5967_v52  ;;  %v5970_v52 = vsel %vm5890_vm13, %v5850_v0, %v5930_v1  ;;  %v5936_v48 = vmul.f32 0.01, %v5856_v58  ;;  %vm5896_vm10 = vcmp.gt.f32.partialorder %v5856_v58, 0.0  ;;  %v5859_v45 = vadd.f32 %v11805_v6, %v14810_v25  ;;  %v17700_v1 = vld [vmem:[#allocation62_spill] sm:$0xff] }
 0x483   : > { %v11441_v19 = vpop.f32.mrb[10].mxu1  ;;  %11489 = vmatprep.mubr.msk.f32.mxu0 %vm1234_vm0, %v5968_v15  ;;  %v5858_v2 = vadd.f32 %v11806_v43, %v14810_v25 }
 0x484   : > { %v11807_v35 = vadd.f32 %v11441_v19, %v14469_v50  ;;  %v5710_v14 = vpop.f32.mrb[11].mxu1  ;;  %v5976_v55 = vsel %vm5896_vm10, %v5856_v58, %v5936_v48  ;;  %v5939_v16 = vmul.f32 0.01, %v5859_v45  ;;  %vm5899_vm13 = vcmp.gt.f32.partialorder %v5859_v45, 0.0  ;;  %v17704_v48 = vld [vmem:[#allocation22_spill] sm:$0xff] }
 0x485   : > { %v11808_v26 = vadd.f32 %v5710_v14, %v14471_v32  ;;  %v5938_v61 = vmul.f32 0.01, %v5858_v2  ;;  %vm5898_vm12 = vcmp.gt.f32.partialorder %v5858_v2, 0.0 }
 0x486   : > { %11490 = vmatmul.mubr.msk.f32.gmra.mrb[100].mxu0 %vm1234_vm0, %v5969_v63  ;;  %v5979_v15 = vsel %vm5899_vm13, %v5859_v45, %v5939_v16 }
 0x487   : > { %v11444_v11 = vpop.f32.mrb[12].mxu1  ;;  %11492 = vmatprep.mubr.msk.f32.mxu0 %vm1234_vm0, %v5970_v52  ;;  %v5860_v62 = vadd.f32 %v11808_v26, %v14810_v25  ;;  %v5978_v0 = vsel %vm5898_vm12, %v5858_v2, %v5938_v61 }
 0x488   : > { %v11809_v50 = vadd.f32 %v11444_v11, %v14477_v46  ;;  %v5720_v23 = vpop.f32.mrb[13].mxu1  ;;  %v5857_v46 = vadd.f32 %v11803_v51, %v14810_v25  ;;  %v17698_v51 = vld [vmem:[#allocation57_spill] sm:$0xff] }
 0x489   : > { %v11810_v32 = vadd.f32 %v5720_v23, %v14479_v29  ;;  %v5940_v42 = vmul.f32 0.01, %v5860_v62  ;;  %vm5900_vm15 = vcmp.gt.f32.partialorder %v5860_v62, 0.0  ;;  %v17702_v11 = vld [vmem:[#allocation21_spill] sm:$0xff] }
 0x48a   : > { %11493 = vmatmul.mubr.msk.f32.gmra.mrb[102].mxu0 %vm1234_vm0, %v5971_v59  ;;  %v5937_v53 = vmul.f32 0.01, %v5857_v46  ;;  %vm5897_vm11 = vcmp.gt.f32.partialorder %v5857_v46, 0.0  ;;  %v5863_v33 = vadd.f32 %v11809_v50, %v14810_v25 }
 0x48b   : > { %v11447_v8 = vpop.f32.mrb[14].mxu1  ;;  %11495 = vmatprep.mubr.msk.f32.mxu0 %vm1234_vm0, %v5972_v57  ;;  %v5862_v28 = vadd.f32 %v11810_v32, %v14810_v25  ;;  %v5980_v14 = vsel %vm5900_vm15, %v5860_v62, %v5940_v42 }
 0x48c   : > { %v11811_v38 = vadd.f32 %v11447_v8, %v14485_v13  ;;  %v5730_v36 = vpop.f32.mrb[15].mxu1  ;;  %v5977_v20 = vsel %vm5897_vm11, %v5857_v46, %v5937_v53  ;;  %v5943_v19 = vmul.f32 0.01, %v5863_v33  ;;  %vm5903_vm4 = vcmp.gt.f32.partialorder %v5863_v33, 0.0 }
 0x48d   : > { %v11812_v29 = vadd.f32 %v5730_v36, %v14487_v24  ;;  %vm5902_vm8 = vcmp.gt.f32.partialorder %v5862_v28, 0.0  ;;  %v17703_v36 = vld [vmem:[#allocation20_spill] sm:$0xff] }
 0x48e   : > { %11496 = vmatmul.mubr.msk.f32.gmra.mrb[104].mxu0 %vm1234_vm0, %v5973_v47  ;;  %v5865_v10 = vadd.f32 %v11811_v38, %v14810_v25  ;;  %v5983_v58 = vsel %vm5903_vm4, %v5863_v33, %v5943_v19  ;;  %v6038_v19 = vld [vmem:[%s1084_s21 + $0x10] sm:$0xff] }
 0x48f   : > { %v11450_v44 = vpop.f32.mrb[16].mxu1  ;;  %11498 = vmatprep.mubr.msk.f32.mxu0 %vm1234_vm0, %v5974_v7 }
 0x490   : > { %v11813_v56 = vadd.f32 %v11450_v44, %v14493_v9  ;;  %v5740_v13 = vpop.f32.mrb[17].mxu1  ;;  %v5945_v37 = vmul.f32 0.01, %v5865_v10  ;;  %vm5905_vm10 = vcmp.gt.f32.partialorder %v5865_v10, 0.0 }
 0x491   : > { %v11814_v24 = vadd.f32 %v5740_v13, %v14495_v21  ;;  %v5861_v21 = vadd.f32 %v11807_v35, %v14810_v25  ;;  %v5942_v35 = vmul.f32 0.01, %v5862_v28 }
 0x492   : > { %11499 = vmatmul.mubr.msk.f32.gmra.mrb[106].mxu0 %vm1234_vm0, %v5975_v12  ;;  %v5867_v63 = vadd.f32 %v11813_v56, %v14810_v25  ;;  %v14943_v8 = vsel %vm5905_vm10, %v5865_v10, %v5945_v37  ;;  %v6011_v37 = vld [vmem:[%s14987_s26 + $0x38] sm:$0xff] }
 0x493   : > { %v11453_v30 = vpop.f32.mrb[18].mxu1  ;;  %11501 = vmatprep.mubr.msk.f32.mxu0 %vm1234_vm0, %v5976_v55  ;;  %v5941_v43 = vmul.f32 0.01, %v5861_v21  ;;  %vm5901_vm3 = vcmp.gt.f32.partialorder %v5861_v21, 0.0  ;;  %v5866_v5 = vadd.f32 %v11814_v24, %v14810_v25  ;;  %v5982_v32 = vsel %vm5902_vm8, %v5862_v28, %v5942_v35 }
 0x494   : > { %v14911_v3 = vadd.f32 %v11453_v30, %v14501_v39  ;;  %v5750_v9 = vpop.f32.mrb[19].mxu1  ;;  %v5864_v39 = vadd.f32 %v11812_v29, %v14810_v25  ;;  %v5947_v46 = vmul.f32 0.01, %v5867_v63  ;;  %vm5907_vm13 = vcmp.gt.f32.partialorder %v5867_v63, 0.0 }
 0x495   : > { %v11816_v17 = vadd.f32 %v5750_v9, %v17698_v51  ;;  %v5981_v23 = vsel %vm5901_vm3, %v5861_v21, %v5941_v43  ;;  %v5946_v7 = vmul.f32 0.01, %v5866_v5  ;;  %vm5906_vm15 = vcmp.gt.f32.partialorder %v5866_v5, 0.0 }
 0x496   : > { %11502 = vmatmul.mubr.msk.f32.gmra.mrb[108].mxu0 %vm1234_vm0, %v5977_v20  ;;  %v5944_v49 = vmul.f32 0.01, %v5864_v39  ;;  %vm5904_vm9 = vcmp.gt.f32.partialorder %v5864_v39, 0.0  ;;  %v5869_v55 = vadd.f32 %v14911_v3, %v14810_v25  ;;  %v5987_v9 = vsel %vm5907_vm13, %v5867_v63, %v5947_v46  ;;  %v6004_v63 = vld [vmem:[%s14987_s26] sm:$0xff] }
 0x497   : > { %v11456_v6 = vpop.f32.mrb[20].mxu1  ;;  %11504 = vmatprep.mubr.msk.f32.mxu0 %vm1234_vm0, %v5978_v0  ;;  %v5868_v44 = vadd.f32 %v11816_v17, %v14810_v25  ;;  %v5986_v21 = vsel %vm5906_vm15, %v5866_v5, %v5946_v7  ;;  %v6016_v5 = vld [vmem:[%s14987_s26 + $0x60] sm:$0xff] }
 0x498   : > { %v14922_v41 = vadd.f32 %v11456_v6, %v17699_v27  ;;  %v5760_v40 = vpop.f32.mrb[21].mxu1  ;;  %v14941_v57 = vsel %vm5904_vm9, %v5864_v39, %v5944_v49  ;;  %v5949_v33 = vmul.f32 0.01, %v5869_v55  ;;  %vm5909_vm9 = vcmp.gt.f32.partialorder %v5869_v55, 0.0  ;;  %v6039_v49 = vld [vmem:[%s1084_s21 + $0x18] sm:$0xff]  ;;  %v6024_v46 = vld [vmem:[%s14987_s26 + $0xa0] sm:$0xff] }
 0x499   : > { %v11818_v34 = vadd.f32 %v5760_v40, %v17700_v1  ;;  %v5948_v20 = vmul.f32 0.01, %v5868_v44  ;;  %vm5908_vm8 = vcmp.gt.f32.partialorder %v5868_v44, 0.0  ;;  %v6036_v40 = vld [vmem:[%s1084_s21] sm:$0xff]  ;;  %v6009_v1 = vld [vmem:[%s14987_s26 + $0x28] sm:$0xff] }
 0x49a   : > { %11505 = vmatmul.mubr.msk.f32.gmra.mrb[110].mxu0 %vm1234_vm0, %v5979_v15  ;;  %v5871_v28 = vadd.f32 %v14922_v41, %v14810_v25  ;;  %v5989_v6 = vsel %vm5909_vm9, %v5869_v55, %v5949_v33  ;;  %v6008_v41 = vld [vmem:[%s14987_s26 + $0x20] sm:$0xff]  ;;  %v6010_v15 = vld [vmem:[%s14987_s26 + $0x30] sm:$0xff] }
 0x49b   : > { %v11459_v26 = vpop.f32.mrb[22].mxu1  ;;  %11507 = vmatprep.mubr.msk.f32.mxu0 %vm1234_vm0, %v5980_v14  ;;  %v5870_v16 = vadd.f32 %v11818_v34, %v14810_v25  ;;  %v5988_v10 = vsel %vm5908_vm8, %v5868_v44, %v5948_v20  ;;  %v6040_v43 = vsel %vm12608_vm1, %v6008_v41, %v6036_v40  ;;  %v6037_v34 = vld [vmem:[%s1084_s21 + $0x8] sm:$0xff]  ;;  %v6042_v14 = vsel %vm12608_vm1, %v6010_v15, %v6038_v19  ;;  %v6032_v7 = vld [vmem:[%s14987_s26 + $0xe0] sm:$0xff]  ;;  %s9090_s21 = scalar_lea.sflag [#allocation4], %s960_s2 }
 0x49c   : > { %v11819_v4 = vadd.f32 %v11459_v26, %v17701_v18  ;;  %v5770_v52 = vpop.f32.mrb[23].mxu1  ;;  %v5951_v39 = vmul.f32 0.01, %v5871_v28  ;;  %v6041_v35 = vsel %vm12608_vm1, %v6009_v1, %v6037_v34  ;;  %v6043_v26 = vsel %vm12608_vm1, %v6011_v37, %v6039_v49  ;;  %v6005_v18 = vld [vmem:[%s14987_s26 + $0x8] sm:$0xff] }
 0x49d   : > { %v11820_v50 = vadd.f32 %v5770_v52, %v17702_v11  ;;  %v5950_v0 = vmul.f32 0.01, %v5870_v16  ;;  %vm5910_vm10 = vcmp.gt.f32.partialorder %v5870_v16, 0.0  ;;  %v6007_v52 = vld [vmem:[%s14987_s26 + $0x18] sm:$0xff]  ;;  %v6013_v11 = vld [vmem:[%s14987_s26 + $0x48] sm:$0xff]  ;;  %v17345_v20 = vlaneseq }
 0x49e   : > { %v5873_v54 = vadd.f32 %v11819_v4, %v14810_v25  ;;  %11508 = vmatmul.mubr.msk.f32.gmra.mrb[112].mxu0 %vm1234_vm0, %v5981_v23  ;;  %v6006_v4 = vld [vmem:[%s14987_s26 + $0x10] sm:$0xff]  ;;  %v6015_v23 = vld [vmem:[%s14987_s26 + $0x58] sm:$0xff]  ;;  %v6033_v44 = vld [vmem:[%s14987_s26 + $0xe8] sm:$0xff] }
 0x49f   : > { %v5872_v59 = vadd.f32 %v11820_v50, %v14810_v25  ;;  %v11462_v60 = vpop.f32.mrb[24].mxu1  ;;  %11510 = vmatprep.mubr.msk.f32.mxu0 %vm1234_vm0, %v5982_v32  ;;  %v5990_v27 = vsel %vm5910_vm10, %v5870_v16, %v5950_v0  ;;  %v6014_v50 = vld [vmem:[%s14987_s26 + $0x50] sm:$0xff]  ;;  %v15099_v16 = vshrl.u32 %v17345_v20, 7 }
 0x4a0   : > { %vm5913_vm11 = vcmp.gt.f32.partialorder %v5873_v54, 0.0  ;;  %v5953_v38 = vmul.f32 0.01, %v5873_v54  ;;  %v11821_v22 = vadd.f32 %v11462_v60, %v17703_v36  ;;  %v5780_v29 = vpop.f32.mrb[25].mxu1  ;;  %v6018_v32 = vld [vmem:[%s14987_s26 + $0x70] sm:$0xff]  ;;  %v6020_v60 = vld [vmem:[%s14987_s26 + $0x80] sm:$0xff] }
 0x4a1   : > { %vm5912_vm12 = vcmp.gt.f32.partialorder %v5872_v59, 0.0  ;;  %v5952_v47 = vmul.f32 0.01, %v5872_v59  ;;  %v11822_v2 = vadd.f32 %v5780_v29, %v17704_v48  ;;  %v6026_v36 = vld [vmem:[%s14987_s26 + $0xb0] sm:$0xff]  ;;  %v6028_v29 = vld [vmem:[%s14987_s26 + $0xc0] sm:$0xff]  ;;  %17707 = vst [vmem:[#allocation24_spill] sm:$0xff] %v15099_v16 }
 0x4a2   : > { %v5875_v53 = vadd.f32 %v11821_v22, %v14810_v25  ;;  %11511 = vmatmul.mubr.msk.f32.gmra.mrb[114].mxu0 %vm1234_vm0, %v5983_v58  ;;  %v5993_v56 = vsel %vm5913_vm11, %v5873_v54, %v5953_v38  ;;  %vm5911_vm11 = vcmp.gt.f32.partialorder %v5871_v28, 0.0  ;;  %v6017_v54 = vld [vmem:[%s14987_s26 + $0x68] sm:$0xff]  ;;  %v6027_v22 = vld [vmem:[%s14987_s26 + $0xb8] sm:$0xff]  ;;  %v6030_v48 = vld [vmem:[%s14987_s26 + $0xd0] sm:$0xff]  ;;  %v7289_v24 = vsub.s32 1, %v15099_v16 }
 0x4a3   : > { %v5874_v13 = vadd.f32 %v11822_v2, %v14810_v25  ;;  %11513 = vmatprep.mubr.msk.f32.mxu0 %vm1234_vm0, %v14941_v57  ;;  %v5992_v45 = vsel %vm5912_vm12, %v5872_v59, %v5952_v47  ;;  %v6001_v12 = vsel %vm12684_vm2, %v14943_v8, %v5993_v56  ;;  %v5991_v25 = vsel %vm5911_vm11, %v5871_v28, %v5951_v39  ;;  %v6019_v59 = vld [vmem:[%s14987_s26 + $0x78] sm:$0xff]  ;;  %v6021_v58 = vld [vmem:[%s14987_s26 + $0x88] sm:$0xff]  ;;  %v6044_v56 = vld [vmem:[%s1101_s3] sm:$0xff] }
 0x4a4   : > { %vm5915_vm3 = vcmp.gt.f32.partialorder %v5875_v53, 0.0  ;;  %v5955_v61 = vmul.f32 0.01, %v5875_v53  ;;  %v6000_v62 = vsel %vm12684_vm2, %v14941_v57, %v5992_v45  ;;  %v6022_v57 = vld [vmem:[%s14987_s26 + $0x90] sm:$0xff]  ;;  %v6025_v38 = vld [vmem:[%s14987_s26 + $0xa8] sm:$0xff]  ;;  %v6031_v2 = vld [vmem:[%s14987_s26 + $0xd8] sm:$0xff]  ;;  %v6048_v45 = vsel %vm12684_vm2, %v6028_v29, %v6044_v56 }
 0x4a5   : > { %vm5914_vm4 = vcmp.gt.f32.partialorder %v5874_v13, 0.0  ;;  %v5954_v30 = vmul.f32 0.01, %v5874_v13  ;;  %v6029_v47 = vld [vmem:[%s14987_s26 + $0xc8] sm:$0xff]  ;;  %v7797_v0 = vsub.s32 4, %v15099_v16  ;;  %v8237_v34 = vsub.s32 6, %v15099_v16 }
 0x4a6   : > { %11514 = vmatmul.mubr.msk.f32.gmra.mrb[116].mxu0 %vm1234_vm0, %v14943_v8  ;;  %v5995_v51 = vsel %vm5915_vm3, %v5875_v53, %v5955_v61  ;;  %v6023_v8 = vld [vmem:[%s14987_s26 + $0x98] sm:$0xff]  ;;  %v6034_v53 = vld [vmem:[%s14987_s26 + $0xf0] sm:$0xff] }
 0x4a7   : > { %11516 = vmatprep.mubr.msk.f32.mxu0 %vm1234_vm0, %v5986_v21  ;;  %v5994_v17 = vsel %vm5914_vm4, %v5874_v13, %v5954_v30  ;;  %v6003_v3 = vsel %vm12684_vm2, %v5987_v9, %v5995_v51  ;;  %v6035_v13 = vld [vmem:[%s14987_s26 + $0xf8] sm:$0xff]  ;;  %v6046_v61 = vld [vmem:[%s1101_s3 + $0x10] sm:$0xff]  ;;  %v7221_v51 = vsub.s32 0, %v15099_v16 }
 0x4a8   : > { %v6002_v42 = vsel %vm12684_vm2, %v5986_v21, %v5994_v17  ;;  %v6050_v55 = vsel %vm12684_vm2, %v6030_v48, %v6046_v61  ;;  %v6047_v30 = vld [vmem:[%s1101_s3 + $0x18] sm:$0xff]  ;;  %v15104_v21 = vld [vmem:[%s17708_s27] ss:$0 sm:$0xff] }
 0x4a9   : > { %v7217_v17 = vld [vmem:[%s17709_s30] sm:$0xff] }
 0x4aa   : > { %11517 = vmatmul.mubr.msk.f32.gmra.mrb[118].mxu0 %vm1234_vm0, %v5987_v9  ;;  %v6051_v9 = vsel %vm12684_vm2, %v6031_v2, %v6047_v30 }
 0x4ab   : > { %11519 = vmatprep.mubr.msk.f32.mxu0 %vm1234_vm0, %v5988_v10  ;;  %v7729_v10 = vsub.s32 3, %v15099_v16 }
 0x4ae   : > { %11520 = vmatmul.mubr.msk.f32.gmra.mrb[120].mxu0 %vm1234_vm0, %v5989_v6  ;;  %v15116_v6 = vrot.slane %v7217_v17, %v7221_v51 }
 0x4af   : > { %11522 = vmatprep.mubr.msk.f32.mxu0 %vm1234_vm0, %v5990_v27 }
 0x4b2   : > { %11523 = vmatmul.mubr.msk.f32.gmra.mrb[122].mxu0 %vm1234_vm0, %v5991_v25  ;;  %v15118_v25 = vrot.slane %v7217_v17, %v7289_v24 }
 0x4b3   : > { %11525 = vmatprep.mubr.msk.f32.mxu0 %vm1234_vm0, %v6000_v62 }
 0x4b6   : > { %11526 = vmatmul.mubr.msk.f32.gmra.mrb[124].mxu0 %vm1234_vm0, %v6001_v12  ;;  %v6045_v12 = vld [vmem:[%s1101_s3 + $0x8] sm:$0xff]  ;;  %s9971_s3 = sshll.u32 %s17901_s25, 2  ;;  %s12275_s25 = scalar_lea.vmem %s12274_s19, 256 }
 0x4b7   : > { %11528 = vmatprep.mubr.msk.f32.mxu0 %vm1234_vm0, %v6002_v42  ;;  %v6049_v62 = vsel %vm12684_vm2, %v6029_v47, %v6045_v12  ;;  %s9101_s10 = sadd.s32 %s12347_s22, %s9971_s3  ;;  %p12277_p1 = scmp.lt.s32.totalorder %s12275_s25, %s12269_s24 }
 0x4b8   : > { %s9972_s22 = sshll.u32 %s9101_s10, 7 }
 0x4b9   : > { %s17097_s16 = scalar_lea.hbm %s17903_s29, %s9972_s22  ;;  %p12278_p2 = por %p12277_p1, %p12276_p0 }
 0x4ba   : > { %11529 = vmatmul.mubr.msk.f32.gmra.mrb[126].mxu0 %vm1234_vm0, %v6003_v3  ;;  %v7509_v3 = vsub.s32 2, %v15099_v16 }
 0x4bb   : > { %11539 = vmatprep.mubr.msk.f32.mxu0 %vm1234_vm0, %v6040_v43  ;;  %p12279_p4 = pnand %p12278_p2, %p12272_p13 }
 0x4be   : > { %11540 = vmatmul.mubr.msk.f32.vlgmr.msra.gmra.mrb[88].mxu0 %vm1234_vm0, %v6041_v35 }
 0x4bf   : > { %11542 = vmatprep.mubr.msk.f32.mxu0 %vm1234_vm0, %v6042_v14  ;;  %v15125_v14 = vrot.slane %v7217_v17, %v7797_v0 }
 0x4c2   : > { %11543 = vmatmul.mubr.msk.f32.gmra.mrb[90].mxu0 %vm1234_vm0, %v6043_v26 }
 0x4c3   : > { %11545 = vmatprep.mubr.msk.f32.mxu0 %vm1234_vm0, %v6004_v63 }
 0x4c6   : > { %11546 = vmatmul.mubr.msk.f32.gmra.mrb[92].mxu0 %vm1234_vm0, %v6005_v18  ;;  %v8305_v18 = vsub.s32 7, %v15099_v16 }
 0x4c7   : > { %11548 = vmatprep.mubr.msk.f32.mxu0 %vm1234_vm0, %v6006_v4 }
 0x4ca   : > { %11549 = vmatmul.mubr.msk.f32.gmra.mrb[94].mxu0 %vm1234_vm0, %v6007_v52 }
 0x4cb   : > { %11551 = vmatprep.mubr.msk.f32.mxu0 %vm1234_vm0, %v6008_v41  ;;  %v15120_v41 = vrot.slane %v7217_v17, %v7509_v3 }
 0x4ce   : > { %11552 = vmatmul.mubr.msk.f32.gmra.mrb[96].mxu0 %vm1234_vm0, %v6009_v1  ;;  %v8017_v1 = vsub.s32 5, %v15099_v16 }
 0x4cf   : > { %11554 = vmatprep.mubr.msk.f32.mxu0 %vm1234_vm0, %v6010_v15 }
 0x4d2   : > { %11555 = vmatmul.mubr.msk.f32.gmra.mrb[98].mxu0 %vm1234_vm0, %v6011_v37  ;;  %v15127_v37 = vrot.slane %v7217_v17, %v7729_v10 }
 0x4d3   : > { %11557 = vmatprep.mubr.msk.f32.mxu0 %vm1234_vm0, %v6012_v31 }
 0x4d6   : > { %11558 = vmatmul.mubr.msk.f32.gmra.mrb[100].mxu0 %vm1234_vm0, %v6013_v11 }
 0x4d7   : > { %11560 = vmatprep.mubr.msk.f32.mxu0 %vm1234_vm0, %v6014_v50 }
 0x4da   : > { %11561 = vmatmul.mubr.msk.f32.gmra.mrb[102].mxu0 %vm1234_vm0, %v6015_v23  ;;  %v15131_v23 = vrot.slane %v7217_v17, %v8017_v1 }
 0x4db   : > { %11563 = vmatprep.mubr.msk.f32.mxu0 %vm1234_vm0, %v6016_v5  ;;  %v15133_v5 = vrot.slane %v7217_v17, %v8237_v34 }
 0x4de   : > { %11564 = vmatmul.mubr.msk.f32.gmra.mrb[104].mxu0 %vm1234_vm0, %v6017_v54 }
 0x4df   : > { %11566 = vmatprep.mubr.msk.f32.mxu0 %vm1234_vm0, %v6018_v32 }
 0x4e2   : > { %11567 = vmatmul.mubr.msk.f32.gmra.mrb[106].mxu0 %vm1234_vm0, %v6019_v59 }
 0x4e3   : > { %11569 = vmatprep.mubr.msk.f32.mxu0 %vm1234_vm0, %v6020_v60 }
 0x4e6   : > { %11570 = vmatmul.mubr.msk.f32.gmra.mrb[108].mxu0 %vm1234_vm0, %v6021_v58 }
 0x4e7   : > { %11572 = vmatprep.mubr.msk.f32.mxu0 %vm1234_vm0, %v6022_v57 }
 0x4ea   : > { %11573 = vmatmul.mubr.msk.f32.gmra.mrb[110].mxu0 %vm1234_vm0, %v6023_v8 }
 0x4eb   : > { %11575 = vmatprep.mubr.msk.f32.mxu0 %vm1234_vm0, %v6024_v46 }
 0x4ee   : > { %11576 = vmatmul.mubr.msk.f32.gmra.mrb[112].mxu0 %vm1234_vm0, %v6025_v38  ;;  %v15141_v38 = vrot.slane %v7217_v17, %v8305_v18 }
 0x4ef   : > { %11578 = vmatprep.mubr.msk.f32.mxu0 %vm1234_vm0, %v6026_v36 }
 0x4f2   : > { %11579 = vmatmul.mubr.msk.f32.gmra.mrb[114].mxu0 %vm1234_vm0, %v6027_v22 }
 0x4f3   : > { %11581 = vmatprep.mubr.msk.f32.mxu0 %vm1234_vm0, %v6028_v29 }
 0x4f6   : > { %11582 = vmatmul.mubr.msk.f32.gmra.mrb[116].mxu0 %vm1234_vm0, %v6029_v47 }
 0x4f7   : > { %11584 = vmatprep.mubr.msk.f32.mxu0 %vm1234_vm0, %v6030_v48 }
 0x4fa   : > { %11585 = vmatmul.mubr.msk.f32.gmra.mrb[118].mxu0 %vm1234_vm0, %v6031_v2 }
 0x4fb   : > { %11587 = vmatprep.mubr.msk.f32.mxu0 %vm1234_vm0, %v6032_v7 }
 0x4fe   : > { %11588 = vmatmul.mubr.msk.f32.gmra.mrb[120].mxu0 %vm1234_vm0, %v6033_v44 }
 0x4ff   : > { %11590 = vmatprep.mubr.msk.f32.mxu0 %vm1234_vm0, %v6034_v53 }
 0x502   : > { %11591 = vmatmul.mubr.msk.f32.gmra.mrb[122].mxu0 %vm1234_vm0, %v6035_v13 }
 0x503   : > { %11593 = vmatprep.mubr.msk.f32.mxu0 %vm1234_vm0, %v6048_v45 }
 0x506   : > { %11594 = vmatmul.mubr.msk.f32.gmra.mrb[124].mxu0 %vm1234_vm0, %v6049_v62 }
 0x507   : > { %11596 = vmatprep.mubr.msk.f32.mxu0 %vm1234_vm0, %v6050_v55 }
 0x50a   : > { %11597 = vmatmul.mubr.msk.f32.gmra.mrb[126].mxu0 %vm1234_vm0, %v6051_v9 }
 0x591   : > { %v11541_v42 = vpop.f32.mrb[88].mxu0 }
 0x592   : > { %v6838_v33 = vadd.f32 %v11541_v42, %v15104_v21  ;;  %v6631_v28 = vpop.f32.mrb[89].mxu0 }
 0x593   : > { %v6837_v39 = vadd.f32 %v15104_v21, %v6631_v28 }
 0x594   : > { %vm6878_vm1 = vcmp.gt.f32.partialorder %v6838_v33, 0.0  ;;  %v6918_v27 = vmul.f32 0.01, %v6838_v33 }
 0x595   : > { %vm6877_vm2 = vcmp.gt.f32.partialorder %v6837_v39, 0.0  ;;  %v6917_v40 = vmul.f32 0.01, %v6837_v39  ;;  %v11544_v43 = vpop.f32.mrb[90].mxu0 }
 0x596   : > { %v6958_v15 = vsel %vm6878_vm1, %v6838_v33, %v6918_v27  ;;  %v6840_v19 = vadd.f32 %v11544_v43, %v15104_v21  ;;  %v6641_v35 = vpop.f32.mrb[91].mxu0 }
 0x597   : > { %v7058_v49 = vrot.slane %v6958_v15, 7  ;;  %v6957_v26 = vsel %vm6877_vm2, %v6837_v39, %v6917_v40  ;;  %v6839_v63 = vadd.f32 %v15104_v21, %v6641_v35 }
 0x598   : > { %v7007_v4 = vrot.slane %v6957_v26, 1  ;;  %v7057_v52 = vrot.slane %v6957_v26, 7  ;;  %vm6880_vm12 = vcmp.gt.f32.partialorder %v6840_v19, 0.0  ;;  %v6920_v31 = vmul.f32 0.01, %v6840_v19 }
 0x599   : > { %vm6879_vm13 = vcmp.gt.f32.partialorder %v6839_v63, 0.0  ;;  %v6919_v11 = vmul.f32 0.01, %v6839_v63  ;;  %v11547_v50 = vpop.f32.mrb[92].mxu0 }
 0x59a   : > { %v7059_v54 = vsel %vm2404_vm5, %v7057_v52, %v7058_v49  ;;  %v7197_v32 = vsel %vm2404_vm5, %v7007_v4, %v7057_v52  ;;  %v6960_v59 = vsel %vm6880_vm12, %v6840_v19, %v6920_v31  ;;  %v6842_v60 = vadd.f32 %v11547_v50, %v15104_v21  ;;  %v6651_v58 = vpop.f32.mrb[93].mxu0 }
 0x59b   : > { %v7223_v57 = vmul.f32 %v15116_v6, %v7197_v32  ;;  %v7291_v8 = vmul.f32 %v15118_v25, %v7197_v32  ;;  %v7292_v46 = vmul.f32 %v15118_v25, %v7059_v54  ;;  %v15144_v36 = vmul.f32 %v15116_v6, %v7059_v54 }
 0x59c   : > { %v15147_v22 = vmul.f32 %v15120_v41, %v7197_v32  ;;  %v7062_v29 = vrot.slane %v6960_v59, 7  ;;  %v7177_v47 = vrot.slane %v6960_v59, 5  ;;  %v15150_v7 = vmul.f32 %v15120_v41, %v7059_v54 }
 0x59d   : > { %v7371_v48 = vrot.slane %v7291_v8, 1  ;;  %v7372_v2 = vrot.slane %v7292_v46, 1  ;;  %v6959_v44 = vsel %vm6879_vm13, %v6839_v63, %v6919_v11  ;;  %v11550_v53 = vpop.f32.mrb[94].mxu0  ;;  %vm6882_vm15 = vcmp.gt.f32.partialorder %v6842_v60, 0.0 }
 0x59e   : > { %v7207_v13 = vsel %vm2404_vm5, %v7062_v29, %v7177_v47  ;;  %v7060_v45 = vrot.slane %v6959_v44, 7  ;;  %v6661_v12 = vpop.f32.mrb[95].mxu0  ;;  %v6922_v30 = vmul.f32 0.01, %v6842_v60  ;;  %v6841_v24 = vadd.f32 %v15104_v21, %v6651_v58 }
 0x59f   : > { %v7373_v61 = vsel %vm2653_vm6, %v7371_v48, %v7372_v2  ;;  %v7295_v62 = vmul.f32 %v15118_v25, %v7207_v13  ;;  %v15158_v55 = vmul.f32 %v15120_v41, %v7207_v13  ;;  %v6844_v15 = vadd.f32 %v11550_v53, %v15104_v21 }
 0x5a0   : > { %v15160_v9 = vadd.f32 %v7373_v61, %v7223_v57  ;;  %v7061_v51 = vsel %vm2404_vm5, %v7058_v49, %v7060_v45  ;;  %v7063_v17 = vsel %vm2404_vm5, %v7060_v45, %v7062_v29  ;;  %v6962_v1 = vsel %vm6882_vm15, %v6842_v60, %v6922_v30 }
 0x5a1   : > { %v7378_v42 = vrot.slane %v7295_v62, 1  ;;  %v7225_v28 = vmul.f32 %v15116_v6, %v7061_v51  ;;  %v11553_v0 = vpop.f32.mrb[96].mxu0  ;;  %v7226_v10 = vmul.f32 %v15116_v6, %v7063_v17  ;;  %v7293_v39 = vmul.f32 %v15118_v25, %v7061_v51 }
 0x5a2   : > { %v7294_v27 = vmul.f32 %v15118_v25, %v7063_v17  ;;  %v15172_v40 = vmul.f32 %v15120_v41, %v7061_v51  ;;  %v6671_v43 = vpop.f32.mrb[97].mxu0  ;;  %vm6881_vm3 = vcmp.gt.f32.partialorder %v6841_v24, 0.0  ;;  %v6921_v34 = vmul.f32 0.01, %v6841_v24 }
 0x5a3   : > { %v7374_v19 = vrot.slane %v7293_v39, 1  ;;  %v15177_v49 = vmul.f32 %v15120_v41, %v7063_v17  ;;  %v7065_v63 = vrot.slane %v6962_v1, 7  ;;  %vm6884_vm4 = vcmp.gt.f32.partialorder %v6844_v15, 0.0 }
 0x5a4   : > { %v7376_v35 = vrot.slane %v7294_v27, 1  ;;  %v6961_v18 = vsel %vm6881_vm3, %v6841_v24, %v6921_v34  ;;  %v6924_v4 = vmul.f32 0.01, %v6844_v15  ;;  %v6843_v29 = vadd.f32 %v15104_v21, %v6661_v12 }
 0x5a5   : > { %v11556_v52 = vpop.f32.mrb[98].mxu0  ;;  %v15181_v31 = vsel %vm2653_vm6, %v7372_v2, %v7374_v19  ;;  %v7008_v54 = vrot.slane %v6961_v18, 1  ;;  %v7064_v58 = vrot.slane %v6961_v18, 7  ;;  %v6846_v47 = vadd.f32 %v11553_v0, %v15104_v21 }
 0x5a6   : > { %v7377_v11 = vsel %vm2653_vm6, %v7374_v19, %v7376_v35  ;;  %v7379_v50 = vsel %vm2653_vm6, %v7376_v35, %v7378_v42  ;;  %v6681_v32 = vpop.f32.mrb[99].mxu0  ;;  %v6964_v57 = vsel %vm6884_vm4, %v6844_v15, %v6924_v4  ;;  %v6845_v53 = vadd.f32 %v15104_v21, %v6671_v43 }
 0x5a7   : > { %v15185_v59 = vadd.f32 %v7377_v11, %v7225_v28  ;;  %v15187_v60 = vadd.f32 %v7379_v50, %v7226_v10  ;;  %v7069_v8 = vrot.slane %v6964_v57, 7  ;;  %v7178_v46 = vrot.slane %v6964_v57, 5 }
 0x5a8   : > { %v15193_v2 = vsel %vm2404_vm5, %v7064_v58, %v7065_v63  ;;  %v15196_v44 = vsel %vm2404_vm5, %v7008_v54, %v7064_v58  ;;  %v6848_v62 = vadd.f32 %v11556_v52, %v15104_v21  ;;  %vm6883_vm8 = vcmp.gt.f32.partialorder %v6843_v29, 0.0 }
 0x5a9   : > { %v11559_v13 = vpop.f32.mrb[100].mxu0  ;;  %v15201_v45 = vmul.f32 %v15118_v25, %v15196_v44  ;;  %v15205_v12 = vmul.f32 %v15118_v25, %v15193_v2  ;;  %v15209_v61 = vmul.f32 %v15120_v41, %v15196_v44  ;;  %v15214_v51 = vmul.f32 %v15120_v41, %v15193_v2 }
 0x5aa   : > { %v6691_v30 = vpop.f32.mrb[101].mxu0  ;;  %v15217_v17 = vsel %vm2404_vm5, %v7069_v8, %v7178_v46  ;;  %v6923_v24 = vmul.f32 0.01, %v6843_v29  ;;  %vm6886_vm9 = vcmp.gt.f32.partialorder %v6846_v47, 0.0  ;;  %v6926_v27 = vmul.f32 0.01, %v6846_v47 }
 0x5ab   : > { %17710 = vst [vmem:[#allocation25_spill] sm:$0xff] %v15217_v17  ;;  %v15222_v28 = vmul.f32 %v15118_v25, %v15217_v17  ;;  %v15226_v0 = vmul.f32 %v15120_v41, %v15217_v17  ;;  %vm6885_vm10 = vcmp.gt.f32.partialorder %v6845_v53, 0.0  ;;  %v15232_v34 = vmul.f32 %v15125_v14, %v15217_v17 }
 0x5ac   : > { %v6963_v39 = vsel %vm6883_vm8, %v6843_v29, %v6923_v24  ;;  %v6925_v19 = vmul.f32 0.01, %v6845_v53  ;;  %v6966_v4 = vsel %vm6886_vm9, %v6846_v47, %v6926_v27  ;;  %vm6888_vm11 = vcmp.gt.f32.partialorder %v6848_v62, 0.0 }
 0x5ad   : > { %17711 = vst [vmem:[#allocation26_spill] sm:$0xff] %v15222_v28  ;;  %17712 = vst [vmem:[#allocation23_spill] sm:$0xff] %v15226_v0  ;;  %v11562_v43 = vpop.f32.mrb[102].mxu0  ;;  %v7067_v15 = vrot.slane %v6963_v39, 7  ;;  %v6928_v52 = vmul.f32 0.01, %v6848_v62  ;;  %v6847_v39 = vadd.f32 %v15104_v21, %v6681_v32  ;;  %v6850_v32 = vadd.f32 %v11559_v13, %v15104_v21 }
 0x5ae   : > { %v6701_v35 = vpop.f32.mrb[103].mxu0  ;;  %v7072_v54 = vrot.slane %v6966_v4, 7  ;;  %v6965_v58 = vsel %vm6885_vm10, %v6845_v53, %v6925_v19  ;;  %v6852_v18 = vadd.f32 %v11562_v43, %v15104_v21 }
 0x5af   : > { %v15236_v11 = vsel %vm2404_vm5, %v7065_v63, %v7067_v15  ;;  %v15239_v50 = vsel %vm2404_vm5, %v7067_v15, %v7069_v8  ;;  %v7009_v47 = vrot.slane %v6965_v58, 1  ;;  %v7071_v24 = vrot.slane %v6965_v58, 7 }
 0x5b0   : > { %v15243_v57 = vmul.f32 %v15118_v25, %v15236_v11  ;;  %v15247_v46 = vmul.f32 %v15118_v25, %v15239_v50  ;;  %v15251_v29 = vmul.f32 %v15120_v41, %v15236_v11  ;;  %v15255_v63 = vmul.f32 %v15120_v41, %v15239_v50 }
 0x5b1   : > { %v11565_v8 = vpop.f32.mrb[104].mxu0  ;;  %v6968_v53 = vsel %vm6888_vm11, %v6848_v62, %v6928_v52  ;;  %v15264_v1 = vsel %vm2404_vm5, %v7071_v24, %v7072_v54  ;;  %vm6887_vm1 = vcmp.gt.f32.partialorder %v6847_v39, 0.0  ;;  %v6927_v62 = vmul.f32 0.01, %v6847_v39 }
 0x5b2   : > { %17713 = vst [vmem:[#allocation29_spill] sm:$0xff] %v15243_v57  ;;  %17714 = vst [vmem:[#allocation76_spill] sm:$0xff] %v15247_v46  ;;  %v6711_v27 = vpop.f32.mrb[105].mxu0  ;;  %v7076_v33 = vrot.slane %v6968_v53, 7  ;;  %v7179_v42 = vrot.slane %v6968_v53, 5  ;;  %v6849_v52 = vadd.f32 %v15104_v21, %v6691_v30  ;;  %v15271_v19 = vsel %vm2404_vm5, %v7009_v47, %v7071_v24 }
 0x5b3   : > { %17715 = vst [vmem:[#allocation78_spill] sm:$0xff] %v15251_v29  ;;  %17716 = vst [vmem:[#allocation33_spill] sm:$0xff] %v15255_v63  ;;  %v6851_v20 = vadd.f32 %v15104_v21, %v6701_v35  ;;  %v6967_v13 = vsel %vm6887_vm1, %v6847_v39, %v6927_v62  ;;  %vm6890_vm2 = vcmp.gt.f32.partialorder %v6850_v32, 0.0  ;;  %v6854_v30 = vadd.f32 %v11565_v8, %v15104_v21 }
 0x5b4   : > { %v15274_v4 = vsel %vm2404_vm5, %v7076_v33, %v7179_v42  ;;  %v7074_v10 = vrot.slane %v6967_v13, 7  ;;  %v6930_v47 = vmul.f32 0.01, %v6850_v32  ;;  %vm6889_vm12 = vcmp.gt.f32.partialorder %v6849_v52, 0.0 }
 0x5b5   : > { %v15268_v58 = vpop.f32.mrb[106].mxu0  ;;  %17717 = vst [vmem:[#allocation35_spill] sm:$0xff] %v15274_v4  ;;  %v15282_v53 = vmul.f32 %v15118_v25, %v15274_v4  ;;  %v6929_v24 = vmul.f32 0.01, %v6849_v52  ;;  %v15287_v42 = vmul.f32 %v15120_v41, %v15274_v4  ;;  %vm6892_vm13 = vcmp.gt.f32.partialorder %v6852_v18, 0.0 }
 0x5b6   : > { %v15278_v15 = vpop.f32.mrb[107].mxu0  ;;  %v6932_v43 = vmul.f32 0.01, %v6852_v18  ;;  %vm6891_vm15 = vcmp.gt.f32.partialorder %v6851_v20, 0.0  ;;  %v15292_v48 = vsel %vm2404_vm5, %v7072_v54, %v7074_v10  ;;  %v15295_v39 = vsel %vm2404_vm5, %v7074_v10, %v7076_v33 }
 0x5b7   : > { %17718 = vst [vmem:[#allocation77_spill] sm:$0xff] %v15282_v53  ;;  %17719 = vst [vmem:[#allocation80_spill] sm:$0xff] %v15287_v42  ;;  %v6970_v8 = vsel %vm6890_vm2, %v6850_v32, %v6930_v47  ;;  %v6969_v62 = vsel %vm6889_vm12, %v6849_v52, %v6929_v24  ;;  %v6931_v28 = vmul.f32 0.01, %v6851_v20  ;;  %vm6894_vm3 = vcmp.gt.f32.partialorder %v6854_v30, 0.0 }
 0x5b8   : > { %v7079_v26 = vrot.slane %v6970_v8, 7  ;;  %v7010_v56 = vrot.slane %v6969_v62, 1  ;;  %v7078_v3 = vrot.slane %v6969_v62, 7  ;;  %v6972_v16 = vsel %vm6892_vm13, %v6852_v18, %v6932_v43 }
 0x5b9   : > { %v15289_v35 = vpop.f32.mrb[108].mxu0  ;;  %v7083_v42 = vrot.slane %v6972_v16, 7  ;;  %v7180_v0 = vrot.slane %v6972_v16, 5  ;;  %v6934_v46 = vmul.f32 0.01, %v6854_v30  ;;  %v6853_v33 = vadd.f32 %v15104_v21, %v6711_v27 }
 0x5ba   : > { %v15297_v13 = vpop.f32.mrb[109].mxu0  ;;  %v15301_v54 = vsel %vm2404_vm5, %v7078_v3, %v7079_v26  ;;  %v6971_v52 = vsel %vm6891_vm15, %v6851_v20, %v6931_v28  ;;  %v17721_v18 = vrot.slane %v15150_v7, 2  ;;  %v17722_v16 = vrot.slane %v15147_v22, 2 }
 0x5bb   : > { %v15307_v32 = vsel %vm2404_vm5, %v7083_v42, %v7180_v0  ;;  %v7731_v24 = vmul.f32 %v15127_v37, %v15196_v44  ;;  %v15320_v27 = vsel %vm2404_vm5, %v7010_v56, %v7078_v3  ;;  %v7081_v8 = vrot.slane %v6971_v52, 7 }
 0x5bc   : > { %17720 = vst [vmem:[#allocation93_spill] sm:$0xff] %v15307_v32  ;;  %v7593_v47 = vsel %vm3435_vm14, %v17722_v16, %v17721_v18  ;;  %17723 = vst [vmem:[#allocation94_spill] sm:$0xff] %v15320_v27  ;;  %v15324_v0 = vmul.f32 %v15118_v25, %v15307_v32  ;;  %v15326_v20 = vsel %vm6894_vm3, %v6854_v30, %v6934_v46  ;;  %vm6893_vm4 = vcmp.gt.f32.partialorder %v6853_v33, 0.0 }
 0x5bd   : > { %v15304_v10 = vpop.f32.mrb[110].mxu0  ;;  %v15330_v22 = vmul.f32 %v15120_v41, %v15307_v32  ;;  %v6933_v28 = vmul.f32 0.01, %v6853_v33  ;;  %v7695_v62 = vadd.f32 %v7593_v47, %v15160_v9  ;;  %v15334_v18 = vsel %vm2404_vm5, %v7079_v26, %v7081_v8 }
 0x5be   : > { %v15317_v43 = vpop.f32.mrb[111].mxu0  ;;  %17724 = vst [vmem:[#allocation95_spill] sm:$0xff] %v15324_v0  ;;  %17726 = vst [vmem:[#allocation28_spill] sm:$0xff] %v15334_v18  ;;  %v15337_v56 = vsel %vm2404_vm5, %v7081_v8, %v7083_v42  ;;  %v7799_v46 = vmul.f32 %v15125_v14, %v15196_v44  ;;  %v15346_v63 = vmul.f32 %v15125_v14, %v15193_v2  ;;  %v15356_v8 = vld [vmem:[%s17709_s30 + $0x8] ss:$0 sm:$0xff]  ;;  %v17730_v42 = vrot.slane %v15326_v20, 7 }
 0x5bf   : > { %17725 = vst [vmem:[#allocation27_spill] sm:$0xff] %v15330_v22  ;;  %17727 = vst [vmem:[#allocation30_spill] sm:$0xff] %v15337_v56  ;;  %v6973_v52 = vsel %vm6893_vm4, %v6853_v33, %v6933_v28  ;;  %v7763_v16 = vadd.f32 %v7731_v24, %v7695_v62  ;;  %v8019_v9 = vmul.f32 %v15131_v23, %v15196_v44 }
 0x5c0   : > { %v7085_v47 = vrot.slane %v6973_v52, 7  ;;  %v7879_v3 = vrot.slane %v7799_v46, 1  ;;  %v15360_v33 = vmul.f32 %v15131_v23, %v15193_v2  ;;  %v7011_v24 = vrot.slane %v6973_v52, 1 }
 0x5c1   : > { %v15342_v30 = vpop.f32.mrb[112].mxu0  ;;  %v7880_v28 = vrot.slane %v15346_v63, 1  ;;  %v8099_v62 = vrot.slane %v8019_v9, 2  ;;  %v8307_v22 = vmul.f32 %v15141_v38, %v15271_v19  ;;  %v8239_v46 = vmul.f32 %v15133_v5, %v15271_v19 }
 0x5c2   : > { %17728 = vst [vmem:[#allocation31_spill] sm:$0xff] %v15342_v30  ;;  %v15350_v26 = vpop.f32.mrb[113].mxu0  ;;  %v15368_v0 = vsel %vm2404_vm5, %v7085_v47, %v17730_v42  ;;  %v8100_v53 = vrot.slane %v15360_v33, 2  ;;  %v8308_v32 = vmul.f32 %v15141_v38, %v15264_v1  ;;  %v8527_v56 = vmul.f32 %v15356_v8, %v15271_v19 }
 0x5c3   : > { %17729 = vst [vmem:[#allocation32_spill] sm:$0xff] %v15350_v26  ;;  %17731 = vst [vmem:[#allocation34_spill] sm:$0xff] %v15368_v0  ;;  %v7881_v63 = vsel %vm2653_vm6, %v7879_v3, %v7880_v28  ;;  %v8387_v9 = vrot.slane %v8307_v22, 1  ;;  %v15382_v42 = vmul.f32 %v15356_v8, %v15264_v1  ;;  %v6856_v18 = vadd.f32 %v15268_v58, %v15104_v21 }
 0x5c4   : > { %v7983_v33 = vadd.f32 %v7881_v63, %v7763_v16  ;;  %v8101_v26 = vsel %vm3435_vm14, %v8099_v62, %v8100_v53  ;;  %v8388_v30 = vrot.slane %v8308_v32, 1  ;;  %v8607_v22 = vrot.slane %v8527_v56, 2 }
 0x5c5   : > { %v15375_v52 = vpop.f32.mrb[114].mxu0  ;;  %v6855_v3 = vadd.f32 %v15104_v21, %v15278_v15  ;;  %v7476_v29 = vadd.f32 %v15181_v31, %v15144_v36  ;;  %vm6896_vm8 = vcmp.gt.f32.partialorder %v6856_v18, 0.0  ;;  %v6936_v16 = vmul.f32 0.01, %v6856_v18 }
 0x5c6   : > { %17732 = vst [vmem:[#allocation36_spill] sm:$0xff] %v15375_v52  ;;  %v15384_v0 = vpop.f32.mrb[115].mxu0  ;;  %v15390_v52 = vsel %vm2404_vm5, %v7011_v24, %v7085_v47  ;;  %v8203_v57 = vadd.f32 %v8101_v26, %v7983_v33  ;;  %v8389_v32 = vsel %vm2653_vm6, %v8387_v9, %v8388_v30  ;;  %v17736_v47 = vrot.slane %v15172_v40, 2 }
 0x5c7   : > { %17733 = vst [vmem:[#allocation40_spill] sm:$0xff] %v15384_v0  ;;  %17734 = vst [vmem:[#allocation41_spill] sm:$0xff] %v15390_v52  ;;  %v8608_v0 = vrot.slane %v15382_v42, 2  ;;  %vm6895_vm9 = vcmp.gt.f32.partialorder %v6855_v3, 0.0  ;;  %v6935_v58 = vmul.f32 0.01, %v6855_v3  ;;  %v6976_v31 = vsel %vm6896_vm8, %v6856_v18, %v6936_v16 }
 0x5c8   : > { %v17737_v56 = vrot.slane %v15150_v7, 2  ;;  %v8271_v36 = vadd.f32 %v8239_v46, %v8203_v57  ;;  %v7732_v63 = vmul.f32 %v15127_v37, %v15193_v2  ;;  %v7090_v42 = vrot.slane %v6976_v31, 7 }
 0x5c9   : > { %v15397_v62 = vpop.f32.mrb[116].mxu0  ;;  %v7181_v33 = vrot.slane %v6976_v31, 5  ;;  %v7801_v9 = vmul.f32 %v15125_v14, %v15236_v11  ;;  %v8021_v7 = vmul.f32 %v15131_v23, %v15236_v11  ;;  %v8609_v57 = vsel %vm3435_vm14, %v8607_v22, %v8608_v0 }
 0x5ca   : > { %17735 = vst [vmem:[#allocation43_spill] sm:$0xff] %v15397_v62  ;;  %v7595_v15 = vsel %vm3435_vm14, %v17737_v56, %v17736_v47  ;;  %v15405_v24 = vpop.f32.mrb[117].mxu0  ;;  %v6975_v62 = vsel %vm6895_vm9, %v6855_v3, %v6935_v58  ;;  %v8491_v52 = vadd.f32 %v8389_v32, %v8271_v36  ;;  %v8309_v46 = vmul.f32 %v15141_v38, %v15292_v48 }
 0x5cb   : > { %v7696_v26 = vadd.f32 %v7595_v15, %v7476_v29  ;;  %v7088_v4 = vrot.slane %v6975_v62, 7  ;;  %v15417_v29 = vsel %vm2404_vm5, %v7090_v42, %v7181_v33  ;;  %v7882_v18 = vrot.slane %v7801_v9, 1 }
 0x5cc   : > { %v8711_v16 = vadd.f32 %v8609_v57, %v8491_v52  ;;  %v15425_v62 = vmul.f32 %v15118_v25, %v15417_v29  ;;  %v17739_v32 = vrot.slane %v15326_v20, 7  ;;  %v8240_v22 = vmul.f32 %v15133_v5, %v15264_v1 }
 0x5cd   : > { %v7764_v17 = vadd.f32 %v7732_v63, %v7696_v26  ;;  %v15413_v47 = vpop.f32.mrb[118].mxu0  ;;  %v15435_v56 = vsel %vm2404_vm5, %v7088_v4, %v7090_v42  ;;  %v7883_v15 = vsel %vm2653_vm6, %v7880_v28, %v7882_v18  ;;  %v8102_v36 = vrot.slane %v8021_v7, 2 }
 0x5ce   : > { %v15421_v3 = vpop.f32.mrb[119].mxu0  ;;  %17738 = vst [vmem:[#allocation47_spill] sm:$0xff] %v15425_v62  ;;  %v15430_v58 = vsel %vm2404_vm5, %v17739_v32, %v7088_v4  ;;  %v8390_v31 = vrot.slane %v8309_v46, 1  ;;  %v8743_v52 = vsel %vm2744_vm7, %v8711_v16, 0.0  ;;  %v15441_v26 = vmul.f32 %v15120_v41, %v15417_v29 }
 0x5cf   : > { %v7984_v20 = vadd.f32 %v7883_v15, %v7764_v17  ;;  %v8529_v63 = vmul.f32 %v15356_v8, %v15292_v48  ;;  %8744 = vadd.xlane.f32.xlu0 %v8743_v52  ;;  %v8103_v4 = vsel %vm3435_vm14, %v8100_v53, %v8102_v36  ;;  %v6858_v28 = vadd.f32 %v15289_v35, %v15104_v21 }
 0x5d0   : > { %17740 = vst [vmem:[#allocation49_spill] sm:$0xff] %v15441_v26  ;;  %v8391_v42 = vsel %vm2653_vm6, %v8388_v30, %v8390_v31  ;;  %v6857_v9 = vadd.f32 %v15104_v21, %v15297_v13  ;;  %v17743_v46 = vrot.slane %v15177_v49, 2  ;;  %v17744_v16 = vrot.slane %v15172_v40, 2 }
 0x5d1   : > { %v15445_v33 = vpop.f32.mrb[120].mxu0  ;;  %v8204_v57 = vadd.f32 %v8103_v4, %v7984_v20  ;;  %v8610_v17 = vrot.slane %v8529_v63, 2  ;;  %v7733_v53 = vmul.f32 %v15127_v37, %v15236_v11  ;;  %vm6898_vm10 = vcmp.gt.f32.partialorder %v6858_v28, 0.0 }
 0x5d2   : > { %17741 = vst [vmem:[#allocation53_spill] sm:$0xff] %v15445_v33  ;;  %v15453_v7 = vpop.f32.mrb[121].mxu0  ;;  %v7597_v32 = vsel %vm3435_vm14, %v17744_v16, %v17743_v46  ;;  %v6938_v30 = vmul.f32 0.01, %v6858_v28  ;;  %vm6897_vm11 = vcmp.gt.f32.partialorder %v6857_v9, 0.0  ;;  %v15466_v20 = vmul.f32 %v15125_v14, %v15239_v50 }
 0x5d3   : > { %17742 = vst [vmem:[#allocation55_spill] sm:$0xff] %v15453_v7  ;;  %v6937_v35 = vmul.f32 0.01, %v6857_v9  ;;  %v8272_v13 = vadd.f32 %v8240_v22, %v8204_v57  ;;  %v7697_v52 = vadd.f32 %v7597_v32, %v15185_v59  ;;  %v8611_v40 = vsel %vm3435_vm14, %v8608_v0, %v8610_v17 }
 0x5d4   : > { %v15469_v63 = vsel %vm6898_vm10, %v6858_v28, %v6938_v30  ;;  %v15475_v46 = vmul.f32 %v15131_v23, %v15239_v50  ;;  %v8241_v59 = vmul.f32 %v15133_v5, %v15292_v48  ;;  %v17371_v32 = vrot.slane %v15466_v20, 1 }
 0x5d5   : > { %v15471_v4 = vsel %vm6897_vm11, %v6857_v9, %v6937_v35  ;;  %v8492_v16 = vadd.f32 %v8391_v42, %v8272_v13  ;;  %v17369_v15 = vrot.slane %v15469_v63, 7  ;;  %v7765_v57 = vadd.f32 %v7733_v53, %v7697_v52 }
 0x5d6   : > { %v7092_v22 = vrot.slane %v15471_v4, 7  ;;  %v17372_v0 = vrot.slane %v15475_v46, 2  ;;  %v15485_v28 = vmul.f32 %v15141_v38, %v15295_v39  ;;  %v7012_v30 = vrot.slane %v15471_v4, 1  ;;  %v15506_v4 = vpop.f32.mrb[122].mxu0 }
 0x5d7   : > { %v8712_v9 = vadd.f32 %v8611_v40, %v8492_v16  ;;  %v15495_v35 = vmul.f32 %v15356_v8, %v15295_v39  ;;  %v7885_v53 = vsel %vm2653_vm6, %v7882_v18, %v17371_v32  ;;  %v7227_v40 = vmul.f32 %v15116_v6, %v15196_v44  ;;  %17745 = vst [vmem:[#allocation58_spill] sm:$0xff] %v15506_v4  ;;  %v15515_v7 = vpop.f32.mrb[123].mxu0 }
 0x5d8   : > { %v15491_v42 = vsel %vm2404_vm5, %v7092_v22, %v17369_v15  ;;  %v8105_v13 = vsel %vm3435_vm14, %v8102_v36, %v17372_v0  ;;  %v17375_v52 = vrot.slane %v15485_v28, 1  ;;  %v7985_v15 = vadd.f32 %v7885_v53, %v7765_v57  ;;  %17748 = vst [vmem:[#allocation60_spill] sm:$0xff] %v15515_v7 }
 0x5d9   : > { %v8746_v16 = vsel %vm2744_vm7, %v8712_v9, 0.0  ;;  %v17373_v26 = vrot.slane %v15495_v35, 2  ;;  %v17746_v62 = vrot.slane %v15205_v12, 1  ;;  %v17747_v18 = vrot.slane %v15201_v45, 1 }
 0x5da   : > { %8747 = vadd.xlane.f32.xlu0 %v8746_v16  ;;  %v8393_v44 = vsel %vm2653_vm6, %v8390_v31, %v17375_v52  ;;  %v7600_v0 = vrot.slane %v15209_v61, 2  ;;  %v17374_v57 = vrot.slane %v15214_v51, 2  ;;  %v8205_v9 = vadd.f32 %v8105_v13, %v7985_v15 }
 0x5db   : > { %v7382_v32 = vsel %vm2653_vm6, %v17747_v18, %v17746_v62  ;;  %v8613_v53 = vsel %vm3435_vm14, %v8610_v17, %v17373_v26  ;;  %v7735_v45 = vmul.f32 %v15127_v37, %v15271_v19  ;;  %v7804_v62 = vmul.f32 %v15125_v14, %v15271_v19 }
 0x5dc   : > { %v7479_v36 = vadd.f32 %v7382_v32, %v7227_v40  ;;  %v7602_v31 = vsel %vm3435_vm14, %v7600_v0, %v17374_v57  ;;  %v15534_v61 = vmul.f32 %v15125_v14, %v15264_v1  ;;  %v8024_v15 = vmul.f32 %v15131_v23, %v15271_v19 }
 0x5dd   : > { %v15540_v17 = vmul.f32 %v15131_v23, %v15264_v1  ;;  %v8273_v32 = vadd.f32 %v8241_v59, %v8205_v9  ;;  %v7888_v40 = vrot.slane %v7804_v62, 1  ;;  %v8243_v16 = vmul.f32 %v15133_v5, %v15320_v27 }
 0x5de   : > { %v7699_v13 = vadd.f32 %v7602_v31, %v7479_v36  ;;  %v17378_v18 = vrot.slane %v15534_v61, 1  ;;  %v8108_v0 = vrot.slane %v8024_v15, 2  ;;  %v8312_v57 = vmul.f32 %v15141_v38, %v15320_v27 }
 0x5df   : > { %v17376_v26 = vrot.slane %v15540_v17, 2  ;;  %v8493_v52 = vadd.f32 %v8393_v44, %v8273_v32  ;;  %v15550_v4 = vmul.f32 %v15141_v38, %v15301_v54  ;;  %v8532_v59 = vmul.f32 %v15356_v8, %v15320_v27 }
 0x5e0   : > { %v7767_v7 = vadd.f32 %v7735_v45, %v7699_v13  ;;  %v7890_v36 = vsel %vm2653_vm6, %v7888_v40, %v17378_v18  ;;  %v8396_v62 = vrot.slane %v8312_v57, 1  ;;  %v15562_v44 = vmul.f32 %v15356_v8, %v15301_v54 }
 0x5e1   : > { %v8110_v9 = vsel %vm3435_vm14, %v8108_v0, %v17376_v26  ;;  %v8713_v45 = vadd.f32 %v8613_v53, %v8493_v52  ;;  %v17377_v15 = vrot.slane %v15550_v4, 1  ;;  %v8616_v32 = vrot.slane %v8532_v59, 2 }
 0x5e2   : > { %v7987_v31 = vadd.f32 %v7890_v36, %v7767_v7  ;;  %v17379_v13 = vrot.slane %v15562_v44, 2  ;;  %v6860_v33 = vadd.f32 %v15304_v10, %v15104_v21  ;;  %v6859_v40 = vadd.f32 %v15104_v21, %v15317_v43 }
 0x5e3   : > { %v17749_v0 = vrot.slane %v15158_v55, 2  ;;  %v17750_v57 = vrot.slane %v15177_v49, 2  ;;  %v15576_v52 = vsel %vm2404_vm5, %v7012_v30, %v7092_v22  ;;  %v8749_v7 = vsel %vm2744_vm7, %v8713_v45, 0.0 }
 0x5e4   : > { %17751 = vst [vmem:[#allocation64_spill] sm:$0xff] %v15576_v52  ;;  %v8207_v53 = vadd.f32 %v8110_v9, %v7987_v31  ;;  %8750 = vadd.xlane.f32.xlu0 %v8749_v7  ;;  %v8398_v10 = vsel %vm2653_vm6, %v8396_v62, %v17377_v15  ;;  %vm6900_vm1 = vcmp.gt.f32.partialorder %v6860_v33, 0.0  ;;  %v6940_v43 = vmul.f32 0.01, %v6860_v33  ;;  %v17754_v62 = vld [vmem:[#allocation25_spill] sm:$0xff]  ;;  %v17755_v31 = vld [vmem:[#allocation35_spill] sm:$0xff] }
 0x5e5   : > { %v7599_v26 = vsel %vm3435_vm14, %v17750_v57, %v17749_v0  ;;  %vm6899_vm2 = vcmp.gt.f32.partialorder %v6859_v40, 0.0  ;;  %v6939_v49 = vmul.f32 0.01, %v6859_v40  ;;  %v7734_v36 = vmul.f32 %v15127_v37, %v15239_v50 }
 0x5e6   : > { %v7698_v59 = vadd.f32 %v7599_v26, %v15187_v60  ;;  %v8275_v55 = vadd.f32 %v8243_v16, %v8207_v53  ;;  %v17752_v22 = vrot.slane %v15232_v34, 1  ;;  %v17753_v30 = vrot.slane %v15466_v20, 1 }
 0x5e7   : > { %v8618_v60 = vsel %vm3435_vm14, %v8616_v32, %v17379_v13  ;;  %v6980_v26 = vsel %vm6900_vm1, %v6860_v33, %v6940_v43  ;;  %v8023_v45 = vmul.f32 %v15131_v23, %v17754_v62  ;;  %v8311_v16 = vmul.f32 %v15141_v38, %v17755_v31 }
 0x5e8   : > { %v7887_v9 = vsel %vm2653_vm6, %v17753_v30, %v17752_v22  ;;  %v8495_v0 = vadd.f32 %v8398_v10, %v8275_v55  ;;  %v7097_v57 = vrot.slane %v6980_v26, 7  ;;  %v7182_v7 = vrot.slane %v6980_v26, 5 }
 0x5e9   : > { %v6979_v53 = vsel %vm6899_vm2, %v6859_v40, %v6939_v49  ;;  %v7766_v15 = vadd.f32 %v7734_v36, %v7698_v59  ;;  %v8106_v20 = vrot.slane %v8023_v45, 2  ;;  %v8394_v18 = vrot.slane %v8311_v16, 1 }
 0x5ea   : > { %v7095_v34 = vrot.slane %v6979_v53, 7  ;;  %v8715_v22 = vadd.f32 %v8618_v60, %v8495_v0  ;;  %v15598_v30 = vsel %vm2404_vm5, %v7097_v57, %v7182_v7  ;;  %v8242_v33 = vmul.f32 %v15133_v5, %v15295_v39  ;;  %v17764_v0 = vld [vmem:[#allocation29_spill] sm:$0xff]  ;;  %v17767_v53 = vld [vmem:[#allocation78_spill] sm:$0xff] }
 0x5eb   : > { %17756 = vst [vmem:[#allocation66_spill] sm:$0xff] %v15598_v30  ;;  %v8531_v32 = vmul.f32 %v15356_v8, %v17755_v31  ;;  %v15606_v10 = vmul.f32 %v15118_v25, %v15598_v30  ;;  %v17758_v40 = vrot.slane %v15469_v63, 7  ;;  %v7228_v55 = vmul.f32 %v15116_v6, %v15193_v2 }
 0x5ec   : > { %v15614_v43 = vsel %vm2404_vm5, %v7095_v34, %v7097_v57  ;;  %v8755_v49 = vsel %vm2744_vm7, %v8715_v22, 0.0  ;;  %v15621_v36 = vmul.f32 %v15120_v41, %v15598_v30  ;;  %v7986_v60 = vadd.f32 %v7887_v9, %v7766_v15  ;;  %v15639_v9 = vpop.f32.mrb[124].mxu0 }
 0x5ed   : > { %17757 = vst [vmem:[#allocation68_spill] sm:$0xff] %v15606_v10  ;;  %v15611_v59 = vsel %vm2404_vm5, %v17758_v40, %v7095_v34  ;;  %17760 = vst [vmem:[#allocation72_spill] sm:$0xff] %v15614_v43  ;;  %v17762_v26 = vrot.slane %v15475_v46, 2  ;;  %8756 = vadd.xlane.f32.xlu1 %v8755_v49  ;;  %v17763_v62 = vrot.slane %v15485_v28, 1  ;;  %v8614_v16 = vrot.slane %v8531_v32, 2  ;;  %v15644_v32 = vpop.f32.mrb[125].mxu0 }
 0x5ee   : > { %17759 = vst [vmem:[#allocation70_spill] sm:$0xff] %v15611_v59  ;;  %17761 = vst [vmem:[#allocation74_spill] sm:$0xff] %v15621_v36  ;;  %v17765_v57 = vrot.slane %v17764_v0, 1  ;;  %v17766_v2 = vrot.slane %v15205_v12, 1  ;;  %v17768_v34 = vrot.slane %v17767_v53, 2  ;;  %v17769_v15 = vrot.slane %v15214_v51, 2 }
 0x5ef   : > { %v8107_v63 = vsel %vm3435_vm14, %v17762_v26, %v8106_v20  ;;  %v8395_v45 = vsel %vm2653_vm6, %v17763_v62, %v8394_v18  ;;  %17770 = vst [vmem:[#allocation81_spill] sm:$0xff] %v15639_v9  ;;  %v7806_v18 = vmul.f32 %v15125_v14, %v15292_v48  ;;  %17771 = vst [vmem:[#allocation83_spill] sm:$0xff] %v15644_v32  ;;  %v17772_v12 = vrot.slane %v15495_v35, 2  ;;  %v17773_v26 = vld [vmem:[#allocation28_spill] sm:$0xff]  ;;  %v15805_v36 = vld [vmem:[%s17708_s27] ss:$0 sm:$0xff] }
 0x5f0   : > { %v7384_v7 = vsel %vm2653_vm6, %v17766_v2, %v17765_v57  ;;  %v7604_v46 = vsel %vm3435_vm14, %v17769_v15, %v17768_v34  ;;  %v8206_v28 = vadd.f32 %v8107_v63, %v7986_v60  ;;  %v7736_v51 = vmul.f32 %v15127_v37, %v15264_v1  ;;  %v17774_v2 = vld [vmem:[#allocation31_spill] sm:$0xff]  ;;  %v17775_v34 = vld [vmem:[#allocation32_spill] sm:$0xff] }
 0x5f1   : > { %v7480_v22 = vadd.f32 %v7384_v7, %v7228_v55  ;;  %v8615_v40 = vsel %vm3435_vm14, %v17772_v12, %v8614_v16  ;;  %v8026_v49 = vmul.f32 %v15131_v23, %v15292_v48  ;;  %v15655_v62 = vmul.f32 %v15141_v38, %v17773_v26  ;;  %v17796_v9 = vld [vmem:[#allocation40_spill] sm:$0xff] }
 0x5f2   : > { %v8274_v55 = vadd.f32 %v8242_v33, %v8206_v28  ;;  %v7891_v63 = vrot.slane %v7806_v18, 1  ;;  %v15659_v57 = vmul.f32 %v15356_v8, %v17773_v26  ;;  %v6862_v7 = vadd.f32 %v17774_v2, %v15104_v21 }
 0x5f3   : > { %v7700_v60 = vadd.f32 %v7604_v46, %v7480_v22  ;;  %v8111_v35 = vrot.slane %v8026_v49, 2  ;;  %v8399_v16 = vrot.slane %v15655_v62, 1  ;;  %v6861_v15 = vadd.f32 %v15104_v21, %v17775_v34  ;;  %v17782_v34 = vld [vmem:[#allocation33_spill] sm:$0xff] }
 0x5f4   : > { %v8494_v12 = vadd.f32 %v8395_v45, %v8274_v55  ;;  %v17776_v13 = vrot.slane %v15534_v61, 1  ;;  %v8244_v46 = vmul.f32 %v15133_v5, %v15301_v54  ;;  %v17777_v28 = vrot.slane %v15540_v17, 2  ;;  %v17779_v17 = vld [vmem:[#allocation76_spill] sm:$0xff] }
 0x5f5   : > { %v7768_v20 = vadd.f32 %v7736_v51, %v7700_v60  ;;  %v8619_v18 = vrot.slane %v15659_v57, 2  ;;  %vm6902_vm12 = vcmp.gt.f32.partialorder %v6862_v7, 0.0  ;;  %v6942_v49 = vmul.f32 0.01, %v6862_v7 }
 0x5f6   : > { %v7892_v33 = vsel %vm2653_vm6, %v17776_v13, %v7891_v63  ;;  %v8112_v22 = vsel %vm3435_vm14, %v17777_v28, %v8111_v35  ;;  %v8714_v62 = vadd.f32 %v8615_v40, %v8494_v12  ;;  %v17778_v21 = vrot.slane %v15550_v4, 1 }
 0x5f7   : > { %v7988_v2 = vadd.f32 %v7892_v33, %v7768_v20  ;;  %vm6901_vm13 = vcmp.gt.f32.partialorder %v6861_v15, 0.0  ;;  %v15678_v61 = vsel %vm6902_vm12, %v6862_v7, %v6942_v49  ;;  %v6941_v13 = vmul.f32 0.01, %v6861_v15 }
 0x5f8   : > { %v8400_v45 = vsel %vm2653_vm6, %v17778_v21, %v8399_v16  ;;  %v7229_v51 = vmul.f32 %v15116_v6, %v15236_v11  ;;  %v17780_v55 = vrot.slane %v17779_v17, 1  ;;  %v17781_v60 = vrot.slane %v17764_v0, 1 }
 0x5f9   : > { %v8752_v40 = vsel %vm2744_vm7, %v8714_v62, 0.0  ;;  %v8208_v20 = vadd.f32 %v8112_v22, %v7988_v2  ;;  %v17384_v4 = vrot.slane %v15678_v61, 7  ;;  %v17783_v12 = vrot.slane %v17782_v34, 2 }
 0x5fa   : > { %v7386_v57 = vsel %vm2653_vm6, %v17781_v60, %v17780_v55  ;;  %v17784_v7 = vrot.slane %v17767_v53, 2  ;;  %8753 = vadd.xlane.f32.xlu0 %v8752_v40  ;;  %v6981_v28 = vsel %vm6901_vm13, %v6861_v15, %v6941_v13  ;;  %v7737_v49 = vmul.f32 %v15127_v37, %v15292_v48 }
 0x5fb   : > { %v7481_v11 = vadd.f32 %v7386_v57, %v7229_v51  ;;  %v15698_v0 = vmul.f32 %v15125_v14, %v15295_v39  ;;  %v8276_v62 = vadd.f32 %v8244_v46, %v8208_v20  ;;  %v7013_v22 = vrot.slane %v6981_v28, 1  ;;  %v17786_v51 = vld [vmem:[#allocation30_spill] sm:$0xff] }
 0x5fc   : > { %v7606_v33 = vsel %vm3435_vm14, %v17784_v7, %v17783_v12  ;;  %v7099_v2 = vrot.slane %v6981_v28, 7  ;;  %v15702_v21 = vmul.f32 %v15131_v23, %v15295_v39  ;;  %v17785_v53 = vrot.slane %v15562_v44, 2 }
 0x5fd   : > { %v7701_v15 = vadd.f32 %v7606_v33, %v7481_v11  ;;  %v17383_v13 = vrot.slane %v15698_v0, 1  ;;  %v15710_v60 = vmul.f32 %v15141_v38, %v17786_v51  ;;  %v8496_v57 = vadd.f32 %v8400_v45, %v8276_v62 }
 0x5fe   : > { %v8620_v55 = vsel %vm3435_vm14, %v17785_v53, %v8619_v18  ;;  %v15715_v46 = vsel %vm2404_vm5, %v7099_v2, %v17384_v4  ;;  %v17380_v40 = vrot.slane %v15702_v21, 2  ;;  %v8245_v44 = vmul.f32 %v15133_v5, %v17773_v26 }
 0x5ff   : > { %17787 = vst [vmem:[#allocation85_spill] sm:$0xff] %v15715_v46  ;;  %v7769_v20 = vadd.f32 %v7737_v49, %v7701_v15  ;;  %v7894_v12 = vsel %vm2653_vm6, %v7891_v63, %v17383_v13  ;;  %v17382_v7 = vrot.slane %v15710_v60, 1  ;;  %v15726_v45 = vmul.f32 %v15356_v8, %v17786_v51 }
 0x600   : > { %v8716_v33 = vadd.f32 %v8620_v55, %v8496_v57  ;;  %v15729_v28 = vsel %vm2404_vm5, %v7013_v22, %v7099_v2  ;;  %v8114_v11 = vsel %vm3435_vm14, %v8111_v35, %v17380_v40  ;;  %v7301_v49 = vmul.f32 %v15118_v25, %v15271_v19 }
 0x601   : > { %17788 = vst [vmem:[#allocation87_spill] sm:$0xff] %v15729_v28  ;;  %v7989_v62 = vadd.f32 %v7894_v12, %v7769_v20  ;;  %v17381_v63 = vrot.slane %v15726_v45, 2  ;;  %v7231_v53 = vmul.f32 %v15116_v6, %v15271_v19  ;;  %v15741_v15 = vmul.f32 %v15118_v25, %v15264_v1  ;;  %v17791_v28 = vld [vmem:[#allocation41_spill] sm:$0xff] }
 0x602   : > { %v8758_v22 = vsel %vm2744_vm7, %v8716_v33, 0.0  ;;  %v7389_v2 = vrot.slane %v7301_v49, 1  ;;  %v7521_v55 = vmul.f32 %v15120_v41, %v15271_v19  ;;  %v15748_v35 = vmul.f32 %v15120_v41, %v15264_v1 }
 0x603   : > { %8759 = vadd.xlane.f32.xlu1 %v8758_v22  ;;  %v8209_v57 = vadd.f32 %v8114_v11, %v7989_v62  ;;  %v8402_v20 = vsel %vm2653_vm6, %v8399_v16, %v17382_v7  ;;  %v8622_v12 = vsel %vm3435_vm14, %v8619_v18, %v17381_v63  ;;  %v17385_v33 = vrot.slane %v15741_v15, 1 }
 0x604   : > { %v7609_v49 = vrot.slane %v7521_v55, 2  ;;  %v17388_v40 = vrot.slane %v15748_v35, 2  ;;  %v7809_v19 = vmul.f32 %v15125_v14, %v15320_v27  ;;  %v15762_v22 = vmul.f32 %v15125_v14, %v15301_v54  ;;  %v15773_v55 = vpop.f32.mrb[126].mxu0 }
 0x605   : > { %v8277_v11 = vadd.f32 %v8245_v44, %v8209_v57  ;;  %v7391_v16 = vsel %vm2653_vm6, %v7389_v2, %v17385_v33  ;;  %v8029_v18 = vmul.f32 %v15131_v23, %v15320_v27  ;;  %v15771_v62 = vmul.f32 %v15131_v23, %v15301_v54  ;;  %17789 = vst [vmem:[#allocation89_spill] sm:$0xff] %v15773_v55  ;;  %v15778_v57 = vpop.f32.mrb[127].mxu0 }
 0x606   : > { %v7483_v63 = vadd.f32 %v7391_v16, %v7231_v53  ;;  %v7739_v7 = vmul.f32 %v15127_v37, %v15320_v27  ;;  %v7897_v13 = vrot.slane %v7809_v19, 1  ;;  %17790 = vst [vmem:[#allocation91_spill] sm:$0xff] %v15778_v57  ;;  %v7611_v2 = vsel %vm3435_vm14, %v7609_v49, %v17388_v40  ;;  %v17792_v19 = vld [vmem:[#allocation34_spill] sm:$0xff] }
 0x607   : > { %v8497_v4 = vadd.f32 %v8402_v20, %v8277_v11  ;;  %v8117_v33 = vrot.slane %v8029_v18, 2  ;;  %v8247_v53 = vmul.f32 %v15133_v5, %v17791_v28  ;;  %v8317_v16 = vmul.f32 %v15141_v38, %v17791_v28 }
 0x608   : > { %v7703_v10 = vadd.f32 %v7611_v2, %v7483_v63  ;;  %v15790_v44 = vmul.f32 %v15141_v38, %v17792_v19  ;;  %v17793_v20 = vrot.slane %v15762_v22, 1  ;;  %v8537_v49 = vmul.f32 %v15356_v8, %v17791_v28 }
 0x609   : > { %v8717_v57 = vadd.f32 %v8622_v12, %v8497_v4  ;;  %v15799_v63 = vmul.f32 %v15356_v8, %v17792_v19  ;;  %v8405_v2 = vrot.slane %v8317_v16, 1  ;;  %v17794_v4 = vld [vmem:[#allocation36_spill] sm:$0xff]  ;;  %v7230_v30 = vmul.f32 %v15116_v6, %v15239_v50 }
 0x60a   : > { %v7899_v11 = vsel %vm2653_vm6, %v7897_v13, %v17793_v20  ;;  %v7771_v18 = vadd.f32 %v7739_v7, %v7703_v10  ;;  %v6864_v12 = vadd.f32 %v15805_v36, %v17794_v4  ;;  %v17795_v20 = vrot.slane %v15771_v62, 2 }
 0x60b   : > { %v8761_v13 = vsel %vm2744_vm7, %v8717_v57, 0.0  ;;  %v8625_v32 = vrot.slane %v8537_v49, 2  ;;  %v6863_v10 = vadd.f32 %v15805_v36, %v17796_v9  ;;  %v17797_v46 = vrot.slane %v15790_v44, 1 }
 0x60c   : > { %v8119_v55 = vsel %vm3435_vm14, %v8117_v33, %v17795_v20  ;;  %8762 = vadd.xlane.f32.xlu1 %v8761_v13  ;;  %v7991_v7 = vadd.f32 %v7899_v11, %v7771_v18  ;;  %vm6904_vm15 = vcmp.gt.f32.partialorder %v6864_v12, 0.0  ;;  %v6944_v40 = vmul.f32 0.01, %v6864_v12  ;;  %v17798_v20 = vld [vmem:[#allocation26_spill] sm:$0xff]  ;;  %v17801_v18 = vld [vmem:[#allocation23_spill] sm:$0xff] }
 0x60d   : > { %v8407_v4 = vsel %vm2653_vm6, %v8405_v2, %v17797_v46  ;;  %vm6903_vm3 = vcmp.gt.f32.partialorder %v6863_v10, 0.0  ;;  %v6943_v57 = vmul.f32 0.01, %v6863_v10  ;;  %v17799_v43 = vrot.slane %v17798_v20, 1 }
 0x60e   : > { %v8211_v33 = vadd.f32 %v8119_v55, %v7991_v7  ;;  %v6984_v49 = vsel %vm6904_vm15, %v6864_v12, %v6944_v40  ;;  %v17800_v9 = vrot.slane %v17779_v17, 1  ;;  %v17802_v13 = vrot.slane %v17801_v18, 2 }
 0x60f   : > { %v17803_v16 = vrot.slane %v17782_v34, 2  ;;  %v7104_v46 = vrot.slane %v6984_v49, 7  ;;  %v7183_v2 = vrot.slane %v6984_v49, 5  ;;  %v6983_v28 = vsel %vm6903_vm3, %v6863_v10, %v6943_v57 }
 0x610   : > { %v7388_v11 = vsel %vm2653_vm6, %v17800_v9, %v17799_v43  ;;  %v8279_v59 = vadd.f32 %v8247_v53, %v8211_v33  ;;  %v7102_v50 = vrot.slane %v6983_v28, 7  ;;  %v7738_v40 = vmul.f32 %v15127_v37, %v15295_v39 }
 0x611   : > { %v7608_v52 = vsel %vm3435_vm14, %v17803_v16, %v17802_v13  ;;  %v7482_v27 = vadd.f32 %v7388_v11, %v7230_v30  ;;  %v7808_v17 = vmul.f32 %v15125_v14, %v17755_v31  ;;  %v17804_v43 = vrot.slane %v15799_v63, 2 }
 0x612   : > { %v15839_v34 = vsel %vm2404_vm5, %v7104_v46, %v7183_v2  ;;  %v8028_v10 = vmul.f32 %v15131_v23, %v17755_v31  ;;  %v8499_v30 = vadd.f32 %v8407_v4, %v8279_v59  ;;  %v17807_v53 = vrot.slane %v15678_v61, 7  ;;  %v17810_v4 = vld [vmem:[#allocation93_spill] sm:$0xff] }
 0x613   : > { %v8627_v55 = vsel %vm3435_vm14, %v8625_v32, %v17804_v43  ;;  %17805 = vst [vmem:[#allocation38_spill] sm:$0xff] %v15839_v34  ;;  %v7702_v12 = vadd.f32 %v7608_v52, %v7482_v27  ;;  %v15845_v28 = vmul.f32 %v15118_v25, %v15839_v34  ;;  %v8246_v32 = vmul.f32 %v15133_v5, %v17786_v51 }
 0x614   : > { %v15850_v7 = vsel %vm2404_vm5, %v17807_v53, %v7102_v50  ;;  %v15855_v16 = vsel %vm2404_vm5, %v7102_v50, %v7104_v46  ;;  %v7895_v52 = vrot.slane %v7808_v17, 1  ;;  %v8115_v57 = vrot.slane %v8028_v10, 2 }
 0x615   : > { %17806 = vst [vmem:[#allocation39_spill] sm:$0xff] %v15845_v28  ;;  %17808 = vst [vmem:[#allocation96_spill] sm:$0xff] %v15855_v16  ;;  %v7770_v27 = vadd.f32 %v7738_v40, %v7702_v12  ;;  %v8719_v31 = vadd.f32 %v8627_v55, %v8499_v30  ;;  %v15859_v59 = vmul.f32 %v15120_v41, %v15839_v34  ;;  %v17811_v20 = vrot.slane %v15698_v0, 1 }
 0x616   : > { %v8316_v61 = vmul.f32 %v15141_v38, %v17810_v4  ;;  %v8536_v33 = vmul.f32 %v15356_v8, %v17810_v4  ;;  %v17812_v11 = vrot.slane %v15702_v21, 2  ;;  %v7303_v13 = vmul.f32 %v15118_v25, %v15292_v48 }
 0x617   : > { %17809 = vst [vmem:[#allocation37_spill] sm:$0xff] %v15859_v59  ;;  %v7896_v9 = vsel %vm2653_vm6, %v17811_v20, %v7895_v52  ;;  %v8767_v46 = vsel %vm2744_vm7, %v8719_v31, 0.0  ;;  %v15877_v17 = vmul.f32 %v15118_v25, %v15295_v39  ;;  %v7523_v43 = vmul.f32 %v15120_v41, %v15292_v48 }
 0x618   : > { %v8116_v18 = vsel %vm3435_vm14, %v17812_v11, %v8115_v57  ;;  %v7990_v2 = vadd.f32 %v7896_v9, %v7770_v27  ;;  %v8403_v50 = vrot.slane %v8316_v61, 1  ;;  %v8623_v40 = vrot.slane %v8536_v33, 2  ;;  %8768 = vadd.xlane.f32.xlu0 %v8767_v46 }
 0x619   : > { %v7392_v0 = vrot.slane %v7303_v13, 1  ;;  %v15883_v21 = vmul.f32 %v15120_v41, %v15295_v39  ;;  %v17813_v12 = vrot.slane %v15710_v60, 1  ;;  %v17814_v30 = vrot.slane %v15726_v45, 2 }
 0x61a   : > { %v8210_v55 = vadd.f32 %v8116_v18, %v7990_v2  ;;  %v7233_v27 = vmul.f32 %v15116_v6, %v15292_v48  ;;  %v17401_v52 = vrot.slane %v15877_v17, 1  ;;  %v7612_v57 = vrot.slane %v7523_v43, 2 }
 0x61b   : > { %v8404_v10 = vsel %vm2653_vm6, %v17813_v12, %v8403_v50  ;;  %v8624_v53 = vsel %vm3435_vm14, %v17814_v30, %v8623_v40  ;;  %v17398_v31 = vrot.slane %v15883_v21, 2  ;;  %v7811_v61 = vmul.f32 %v15125_v14, %v17773_v26 }
 0x61c   : > { %v8278_v33 = vadd.f32 %v8246_v32, %v8210_v55  ;;  %v15899_v60 = vmul.f32 %v15125_v14, %v17786_v51  ;;  %v8031_v45 = vmul.f32 %v15131_v23, %v17773_v26  ;;  %v15905_v20 = vmul.f32 %v15131_v23, %v17786_v51 }
 0x61d   : > { %v7395_v48 = vsel %vm2653_vm6, %v7392_v0, %v17401_v52  ;;  %v7615_v9 = vsel %vm3435_vm14, %v7612_v57, %v17398_v31  ;;  %v7741_v32 = vmul.f32 %v15127_v37, %v17773_v26  ;;  %v7900_v11 = vrot.slane %v7811_v61, 1 }
 0x61e   : > { %v8498_v18 = vadd.f32 %v8404_v10, %v8278_v33  ;;  %v7485_v13 = vadd.f32 %v7395_v48, %v7233_v27  ;;  %v17399_v46 = vrot.slane %v15899_v60, 1  ;;  %v8120_v2 = vrot.slane %v8031_v45, 2 }
 0x61f   : > { %v17400_v50 = vrot.slane %v15905_v20, 2  ;;  %v8319_v40 = vmul.f32 %v15141_v38, %v15430_v58  ;;  %v15921_v43 = vmul.f32 %v15141_v38, %v15435_v56  ;;  %v8539_v55 = vmul.f32 %v15356_v8, %v15430_v58 }
 0x620   : > { %v8718_v12 = vadd.f32 %v8624_v53, %v8498_v18  ;;  %v7705_v30 = vadd.f32 %v7615_v9, %v7485_v13  ;;  %v8249_v10 = vmul.f32 %v15133_v5, %v15430_v58  ;;  %v15929_v27 = vmul.f32 %v15356_v8, %v15435_v56  ;;  %v17815_v9 = vld [vmem:[#allocation43_spill] sm:$0xff] }
 0x621   : > { %v7903_v61 = vsel %vm2653_vm6, %v7900_v11, %v17399_v46  ;;  %v8408_v33 = vrot.slane %v8319_v40, 1  ;;  %v17402_v45 = vrot.slane %v15921_v43, 1  ;;  %v8628_v48 = vrot.slane %v8539_v55, 2 }
 0x622   : > { %v8764_v49 = vsel %vm2744_vm7, %v8718_v12, 0.0  ;;  %v7773_v31 = vadd.f32 %v7741_v32, %v7705_v30  ;;  %v17404_v53 = vrot.slane %v15929_v27, 2  ;;  %v6866_v18 = vadd.f32 %v15805_v36, %v17815_v9 }
 0x623   : > { %8765 = vadd.xlane.f32.xlu1 %v8764_v49  ;;  %v8123_v13 = vsel %vm3435_vm14, %v8120_v2, %v17400_v50  ;;  %v6865_v46 = vadd.f32 %v15805_v36, %v15405_v24  ;;  %v7232_v40 = vmul.f32 %v15116_v6, %v15264_v1  ;;  %v17816_v55 = vrot.slane %v15741_v15, 1 }
 0x624   : > { %v7993_v12 = vadd.f32 %v7903_v61, %v7773_v31  ;;  %v8411_v30 = vsel %vm2653_vm6, %v8408_v33, %v17402_v45  ;;  %vm6906_vm4 = vcmp.gt.f32.partialorder %v6866_v18, 0.0  ;;  %v6946_v49 = vmul.f32 0.01, %v6866_v18 }
 0x625   : > { %v7393_v32 = vsel %vm2653_vm6, %v17816_v55, %v7392_v0  ;;  %v8631_v9 = vsel %vm3435_vm14, %v8628_v48, %v17404_v53  ;;  %vm6905_vm8 = vcmp.gt.f32.partialorder %v6865_v46, 0.0  ;;  %v6945_v24 = vmul.f32 0.01, %v6865_v46 }
 0x626   : > { %v7484_v50 = vadd.f32 %v7393_v32, %v7232_v40  ;;  %v8213_v52 = vadd.f32 %v8123_v13, %v7993_v12  ;;  %v6986_v1 = vsel %vm6906_vm4, %v6866_v18, %v6946_v49  ;;  %v17817_v15 = vrot.slane %v15748_v35, 2  ;;  %v17825_v49 = vld [vmem:[#allocation80_spill] sm:$0xff] }
 0x627   : > { %v7740_v31 = vmul.f32 %v15127_v37, %v15301_v54  ;;  %v7107_v61 = vrot.slane %v6986_v1, 7  ;;  %v6985_v55 = vsel %vm6905_vm8, %v6865_v46, %v6945_v24  ;;  %v17818_v59 = vrot.slane %v15762_v22, 1 }
 0x628   : > { %v7613_v0 = vsel %vm3435_vm14, %v17817_v15, %v7612_v57  ;;  %v8281_v53 = vadd.f32 %v8249_v10, %v8213_v52  ;;  %v7014_v34 = vrot.slane %v6985_v55, 1  ;;  %v7106_v16 = vrot.slane %v6985_v55, 7 }
 0x629   : > { %v7704_v45 = vadd.f32 %v7613_v0, %v7484_v50  ;;  %v7901_v28 = vsel %vm2653_vm6, %v17818_v59, %v7900_v11  ;;  %v17819_v13 = vrot.slane %v15771_v62, 2  ;;  %v8248_v57 = vmul.f32 %v15133_v5, %v17792_v19 }
 0x62a   : > { %v17820_v40 = vrot.slane %v15790_v44, 1  ;;  %v6868_v22 = vadd.f32 %v15805_v36, %v15413_v47  ;;  %v8501_v50 = vadd.f32 %v8411_v30, %v8281_v53  ;;  %v15974_v59 = vsel %vm2404_vm5, %v7106_v16, %v7107_v61 }
 0x62b   : > { %v8121_v18 = vsel %vm3435_vm14, %v17819_v13, %v8120_v2  ;;  %v7772_v35 = vadd.f32 %v7740_v31, %v7704_v45  ;;  %v17821_v52 = vrot.slane %v15799_v63, 2  ;;  %v6867_v11 = vadd.f32 %v15805_v36, %v15421_v3  ;;  %v17822_v45 = vld [vmem:[#allocation77_spill] sm:$0xff] }
 0x62c   : > { %v8409_v46 = vsel %vm2653_vm6, %v17820_v40, %v8408_v33  ;;  %vm6908_vm9 = vcmp.gt.f32.partialorder %v6868_v22, 0.0  ;;  %v6948_v10 = vmul.f32 0.01, %v6868_v22  ;;  %v7234_v44 = vmul.f32 %v15116_v6, %v15295_v39 }
 0x62d   : > { %v8629_v62 = vsel %vm3435_vm14, %v17821_v52, %v8628_v48  ;;  %v7992_v2 = vadd.f32 %v7901_v28, %v7772_v35  ;;  %v8721_v33 = vadd.f32 %v8631_v9, %v8501_v50  ;;  %vm6907_vm10 = vcmp.gt.f32.partialorder %v6867_v11, 0.0 }
 0x62e   : > { %v6947_v47 = vmul.f32 0.01, %v6867_v11  ;;  %v17823_v53 = vrot.slane %v17822_v45, 1  ;;  %v17824_v32 = vrot.slane %v15877_v17, 1  ;;  %v6988_v48 = vsel %vm6908_vm9, %v6868_v22, %v6948_v10 }
 0x62f   : > { %v8212_v12 = vadd.f32 %v8121_v18, %v7992_v2  ;;  %v7616_v3 = vrot.slane %v17825_v49, 2  ;;  %v8773_v28 = vsel %vm2744_vm7, %v8721_v33, 0.0  ;;  %v7111_v24 = vrot.slane %v6988_v48, 7 }
 0x630   : > { %v7397_v63 = vsel %vm2653_vm6, %v17824_v32, %v17823_v53  ;;  %v7184_v1 = vrot.slane %v6988_v48, 5  ;;  %v6987_v15 = vsel %vm6907_vm10, %v6867_v11, %v6947_v47  ;;  %8774 = vadd.xlane.f32.xlu0 %v8773_v28  ;;  %v17826_v0 = vrot.slane %v15883_v21, 2 }
 0x631   : > { %v7486_v30 = vadd.f32 %v7397_v63, %v7234_v44  ;;  %v8280_v39 = vadd.f32 %v8248_v57, %v8212_v12  ;;  %v7109_v9 = vrot.slane %v6987_v15, 7  ;;  %v7742_v17 = vmul.f32 %v15127_v37, %v17786_v51 }
 0x632   : > { %v7617_v31 = vsel %vm3435_vm14, %v17826_v0, %v7616_v3  ;;  %v15996_v55 = vsel %vm2404_vm5, %v7111_v24, %v7184_v1  ;;  %v7813_v18 = vmul.f32 %v15125_v14, %v17810_v4  ;;  %v8033_v35 = vmul.f32 %v15131_v23, %v17810_v4 }
 0x633   : > { %v7706_v13 = vadd.f32 %v7617_v31, %v7486_v30  ;;  %v16003_v57 = vsel %vm2404_vm5, %v7014_v34, %v7106_v16  ;;  %v8500_v40 = vadd.f32 %v8409_v46, %v8280_v39  ;;  %v16007_v21 = vmul.f32 %v15118_v25, %v15996_v55 }
 0x634   : > { %v16010_v22 = vsel %vm2404_vm5, %v7107_v61, %v7109_v9  ;;  %v16013_v50 = vsel %vm2404_vm5, %v7109_v9, %v7111_v24  ;;  %v7904_v11 = vrot.slane %v7813_v18, 1  ;;  %v8124_v2 = vrot.slane %v8033_v35, 2 }
 0x635   : > { %17827 = vst [vmem:[#allocation42_spill] sm:$0xff] %v16007_v21  ;;  %v7774_v52 = vadd.f32 %v7742_v17, %v7706_v13  ;;  %v8720_v10 = vadd.f32 %v8629_v62, %v8500_v40  ;;  %v16018_v34 = vmul.f32 %v15120_v41, %v15996_v55  ;;  %v8321_v16 = vmul.f32 %v15141_v38, %v15417_v29 }
 0x636   : > { %v17829_v46 = vrot.slane %v15899_v60, 1  ;;  %v17830_v44 = vrot.slane %v15905_v20, 2  ;;  %v8250_v62 = vmul.f32 %v15133_v5, %v15435_v56  ;;  %v8541_v47 = vmul.f32 %v15356_v8, %v15417_v29 }
 0x637   : > { %17828 = vst [vmem:[#allocation44_spill] sm:$0xff] %v16018_v34  ;;  %v8770_v45 = vsel %vm2744_vm7, %v8720_v10, 0.0  ;;  %v8412_v32 = vrot.slane %v8321_v16, 1  ;;  %v16035_v63 = vmul.f32 %v15118_v25, %v15301_v54  ;;  %v16039_v20 = vmul.f32 %v15118_v25, %v17773_v26 }
 0x638   : > { %v7905_v61 = vsel %vm2653_vm6, %v17829_v46, %v7904_v11  ;;  %v8125_v33 = vsel %vm3435_vm14, %v17830_v44, %v8124_v2  ;;  %8771 = vadd.xlane.f32.xlu1 %v8770_v45  ;;  %v8632_v60 = vrot.slane %v8541_v47, 2  ;;  %v16043_v12 = vmul.f32 %v15120_v41, %v15301_v54 }
 0x639   : > { %v7994_v53 = vadd.f32 %v7905_v61, %v7774_v52  ;;  %v16047_v48 = vmul.f32 %v15120_v41, %v17773_v26  ;;  %v17831_v49 = vrot.slane %v15921_v43, 1  ;;  %v7236_v28 = vmul.f32 %v15116_v6, %v15301_v54  ;;  %v17833_v61 = vld [vmem:[#allocation70_spill] sm:$0xff] }
 0x63a   : > { %v7399_v24 = vrot.slane %v16035_v63, 1  ;;  %v17412_v1 = vrot.slane %v16039_v20, 1  ;;  %v7619_v15 = vrot.slane %v16043_v12, 2  ;;  %v7744_v9 = vmul.f32 %v15127_v37, %v17792_v19 }
 0x63b   : > { %v8214_v30 = vadd.f32 %v8125_v33, %v7994_v53  ;;  %v8413_v3 = vsel %vm2653_vm6, %v17831_v49, %v8412_v32  ;;  %v17411_v39 = vrot.slane %v16047_v48, 2  ;;  %v16062_v43 = vmul.f32 %v15125_v14, %v17792_v19 }
 0x63c   : > { %v16066_v31 = vmul.f32 %v15125_v14, %v15430_v58  ;;  %v16070_v54 = vmul.f32 %v15131_v23, %v17792_v19  ;;  %v17832_v17 = vrot.slane %v15929_v27, 2  ;;  %v7402_v18 = vsel %vm2653_vm6, %v7399_v24, %v17412_v1 }
 0x63d   : > { %v8282_v0 = vadd.f32 %v8250_v62, %v8214_v30  ;;  %v7622_v35 = vsel %vm3435_vm14, %v7619_v15, %v17411_v39  ;;  %v16085_v40 = vmul.f32 %v15131_v23, %v15430_v58  ;;  %v7488_v11 = vadd.f32 %v7402_v18, %v7236_v28  ;;  %v17834_v28 = vld [vmem:[#allocation53_spill] sm:$0xff] }
 0x63e   : > { %v8633_v13 = vsel %vm3435_vm14, %v17832_v17, %v8632_v60  ;;  %v17410_v27 = vrot.slane %v16066_v31, 1  ;;  %v8252_v2 = vmul.f32 %v15133_v5, %v15491_v42  ;;  %v7907_v10 = vrot.slane %v16062_v43, 1  ;;  %v17835_v17 = vld [vmem:[#allocation55_spill] sm:$0xff] }
 0x63f   : > { %v8502_v52 = vadd.f32 %v8413_v3, %v8282_v0  ;;  %v17409_v16 = vrot.slane %v16085_v40, 2  ;;  %v16094_v46 = vmul.f32 %v15141_v38, %v15491_v42  ;;  %v16098_v44 = vmul.f32 %v15141_v38, %v17833_v61 }
 0x640   : > { %v7708_v62 = vadd.f32 %v7622_v35, %v7488_v11  ;;  %v8127_v47 = vrot.slane %v16070_v54, 2  ;;  %v16103_v45 = vmul.f32 %v15356_v8, %v15491_v42  ;;  %v7910_v53 = vsel %vm2653_vm6, %v7907_v10, %v17410_v27  ;;  %v17836_v35 = vld [vmem:[#allocation94_spill] sm:$0xff] }
 0x641   : > { %v8722_v33 = vadd.f32 %v8633_v13, %v8502_v52  ;;  %v8415_v32 = vrot.slane %v16094_v46, 1  ;;  %v17408_v63 = vrot.slane %v16098_v44, 1  ;;  %v16112_v60 = vmul.f32 %v15356_v8, %v17833_v61  ;;  %v17841_v46 = vld [vmem:[#allocation72_spill] sm:$0xff] }
 0x642   : > { %v7776_v49 = vadd.f32 %v7744_v9, %v7708_v62  ;;  %v8130_v3 = vsel %vm3435_vm14, %v8127_v47, %v17409_v16  ;;  %v6870_v0 = vadd.f32 %v15805_v36, %v17834_v28  ;;  %v8635_v8 = vrot.slane %v16103_v45, 2 }
 0x643   : > { %v8776_v30 = vsel %vm2744_vm7, %v8722_v33, 0.0  ;;  %v8418_v43 = vsel %vm2653_vm6, %v8415_v32, %v17408_v63  ;;  %v17413_v54 = vrot.slane %v16112_v60, 2  ;;  %v6869_v9 = vadd.f32 %v15805_v36, %v17835_v17  ;;  %v17837_v63 = vld [vmem:[#allocation41_spill] sm:$0xff] }
 0x644   : > { %8777 = vadd.xlane.f32.xlu1 %v8776_v30  ;;  %v7996_v13 = vadd.f32 %v7910_v53, %v7776_v49  ;;  %vm6910_vm11 = vcmp.gt.f32.partialorder %v6870_v0, 0.0  ;;  %v6950_v18 = vmul.f32 0.01, %v6870_v0  ;;  %v7306_v52 = vmul.f32 %v15118_v25, %v17836_v35 }
 0x645   : > { %vm6909_vm1 = vcmp.gt.f32.partialorder %v6869_v9, 0.0  ;;  %v6949_v11 = vmul.f32 0.01, %v6869_v9  ;;  %v7235_v33 = vmul.f32 %v15116_v6, %v17836_v35  ;;  %v7526_v62 = vmul.f32 %v15120_v41, %v17836_v35 }
 0x646   : > { %v8216_v45 = vadd.f32 %v8130_v3, %v7996_v13  ;;  %v8638_v30 = vsel %vm3435_vm14, %v8635_v8, %v17413_v54  ;;  %v16138_v28 = vsel %vm6910_vm11, %v6870_v0, %v6950_v18  ;;  %v7398_v53 = vrot.slane %v7306_v52, 1 }
 0x647   : > { %v17414_v49 = vrot.slane %v16138_v28, 7  ;;  %v6989_v17 = vsel %vm6909_vm1, %v6869_v9, %v6949_v11  ;;  %v7618_v4 = vrot.slane %v7526_v62, 2  ;;  %v7814_v16 = vmul.f32 %v15125_v14, %v17837_v63 }
 0x648   : > { %v8284_v27 = vadd.f32 %v8252_v2, %v8216_v45  ;;  %v7015_v39 = vrot.slane %v6989_v17, 1  ;;  %v7113_v1 = vrot.slane %v6989_v17, 7  ;;  %v7400_v35 = vsel %vm2653_vm6, %v7398_v53, %v7399_v24 }
 0x649   : > { %v7487_v3 = vadd.f32 %v7400_v35, %v7235_v33  ;;  %v7743_v13 = vmul.f32 %v15127_v37, %v17837_v63  ;;  %v7906_v54 = vrot.slane %v7814_v16, 1  ;;  %v8034_v0 = vmul.f32 %v15131_v23, %v17837_v63  ;;  %v17838_v33 = vld [vmem:[#allocation64_spill] sm:$0xff] }
 0x64a   : > { %v8504_v18 = vadd.f32 %v8418_v43, %v8284_v27  ;;  %v16151_v9 = vsel %vm2404_vm5, %v7113_v1, %v17414_v49  ;;  %v16154_v2 = vsel %vm2404_vm5, %v7015_v39, %v7113_v1  ;;  %v7620_v24 = vsel %vm3435_vm14, %v7618_v4, %v7619_v15  ;;  %v16167_v1 = vld [vmem:[%s17709_s30 + $0x8] ss:$0 sm:$0xff] }
 0x64b   : > { %v7707_v52 = vadd.f32 %v7620_v24, %v7487_v3  ;;  %v8126_v11 = vrot.slane %v8034_v0, 2  ;;  %v8251_v16 = vmul.f32 %v15133_v5, %v17838_v33  ;;  %v8322_v27 = vmul.f32 %v15141_v38, %v17838_v33 }
 0x64c   : > { %v8724_v43 = vadd.f32 %v8638_v30, %v8504_v18  ;;  %v7908_v62 = vsel %vm2653_vm6, %v7906_v54, %v7907_v10  ;;  %v8542_v12 = vmul.f32 %v16167_v1, %v17838_v33  ;;  %v7309_v4 = vmul.f32 %v15118_v25, %v17786_v51 }
 0x64d   : > { %v7775_v15 = vadd.f32 %v7743_v13, %v7707_v52  ;;  %v8414_v39 = vrot.slane %v8322_v27, 1  ;;  %v7237_v45 = vmul.f32 %v15116_v6, %v17773_v26  ;;  %v7529_v30 = vmul.f32 %v15120_v41, %v17786_v51 }
 0x64e   : > { %v8782_v10 = vsel %vm2744_vm7, %v8724_v43, 0.0  ;;  %v8128_v54 = vsel %vm3435_vm14, %v8126_v11, %v8127_v47  ;;  %v8634_v53 = vrot.slane %v8542_v12, 2  ;;  %v7403_v17 = vrot.slane %v7309_v4, 1 }
 0x64f   : > { %8783 = vadd.xlane.f32.xlu0 %v8782_v10  ;;  %v7995_v35 = vadd.f32 %v7908_v62, %v7775_v15  ;;  %v7623_v3 = vrot.slane %v7529_v30, 2  ;;  %v7745_v0 = vmul.f32 %v15127_v37, %v15430_v58  ;;  %v7817_v13 = vmul.f32 %v15125_v14, %v15435_v56 }
 0x650   : > { %v8416_v26 = vsel %vm2653_vm6, %v8414_v39, %v8415_v32  ;;  %v8636_v18 = vsel %vm3435_vm14, %v8634_v53, %v8635_v8  ;;  %v17839_v24 = vrot.slane %v16039_v20, 1  ;;  %v8037_v52 = vmul.f32 %v15131_v23, %v15435_v56  ;;  %v17842_v8 = vld [vmem:[#allocation58_spill] sm:$0xff] }
 0x651   : > { %v8215_v11 = vadd.f32 %v8128_v54, %v7995_v35  ;;  %v17840_v43 = vrot.slane %v16047_v48, 2  ;;  %v7911_v12 = vrot.slane %v7817_v13, 1  ;;  %v16197_v32 = vmul.f32 %v15141_v38, %v17841_v46 }
 0x652   : > { %v7404_v47 = vsel %vm2653_vm6, %v17839_v24, %v7403_v17  ;;  %v8131_v4 = vrot.slane %v8037_v52, 2  ;;  %v16201_v20 = vmul.f32 %v16167_v1, %v17841_v46  ;;  %v6872_v15 = vadd.f32 %v15805_v36, %v17842_v8 }
 0x653   : > { %v7489_v27 = vadd.f32 %v7404_v47, %v7237_v45  ;;  %v7624_v62 = vsel %vm3435_vm14, %v17840_v43, %v7623_v3  ;;  %v8283_v39 = vadd.f32 %v8251_v16, %v8215_v11  ;;  %v8253_v48 = vmul.f32 %v15133_v5, %v17833_v61  ;;  %v17843_v45 = vld [vmem:[#allocation60_spill] sm:$0xff] }
 0x654   : > { %v6871_v10 = vadd.f32 %v15805_v36, %v17843_v45  ;;  %v17844_v54 = vrot.slane %v16066_v31, 1  ;;  %v17845_v35 = vrot.slane %v16085_v40, 2  ;;  %v8419_v24 = vrot.slane %v16197_v32, 1 }
 0x655   : > { %v7709_v30 = vadd.f32 %v7624_v62, %v7489_v27  ;;  %vm6912_vm2 = vcmp.gt.f32.partialorder %v6872_v15, 0.0  ;;  %v8503_v47 = vadd.f32 %v8416_v26, %v8283_v39  ;;  %v6952_v52 = vmul.f32 0.01, %v6872_v15 }
 0x656   : > { %v7912_v53 = vsel %vm2653_vm6, %v17844_v54, %v7911_v12  ;;  %v8132_v13 = vsel %vm3435_vm14, %v17845_v35, %v8131_v4  ;;  %vm6911_vm12 = vcmp.gt.f32.partialorder %v6871_v10, 0.0  ;;  %v17846_v11 = vrot.slane %v16098_v44, 1  ;;  %v17847_v54 = vld [vmem:[#allocation95_spill] sm:$0xff] }
 0x657   : > { %v7777_v16 = vadd.f32 %v7745_v0, %v7709_v30  ;;  %v8639_v43 = vrot.slane %v16201_v20, 2  ;;  %v6951_v31 = vmul.f32 0.01, %v6871_v10  ;;  %v7238_v62 = vmul.f32 %v15116_v6, %v17786_v51  ;;  %v17849_v20 = vld [vmem:[#allocation27_spill] sm:$0xff] }
 0x658   : > { %v8420_v27 = vsel %vm2653_vm6, %v17846_v11, %v8419_v24  ;;  %v8723_v40 = vadd.f32 %v8636_v18, %v8503_v47  ;;  %v6992_v45 = vsel %vm6912_vm2, %v6872_v15, %v6952_v52  ;;  %v17848_v32 = vrot.slane %v17847_v54, 1 }
 0x659   : > { %v7997_v8 = vadd.f32 %v7912_v53, %v7777_v16  ;;  %v7118_v0 = vrot.slane %v6992_v45, 7  ;;  %v7185_v39 = vrot.slane %v6992_v45, 5  ;;  %v6991_v30 = vsel %vm6911_vm12, %v6871_v10, %v6951_v31 }
 0x65a   : > { %v7406_v26 = vsel %vm2653_vm6, %v7403_v17, %v17848_v32  ;;  %v8779_v44 = vsel %vm2744_vm7, %v8723_v40, 0.0  ;;  %v7116_v49 = vrot.slane %v6991_v30, 7  ;;  %v7625_v34 = vrot.slane %v17849_v20, 2 }
 0x65b   : > { %v7490_v35 = vadd.f32 %v7406_v26, %v7238_v62  ;;  %v8217_v11 = vadd.f32 %v8132_v13, %v7997_v8  ;;  %8780 = vadd.xlane.f32.xlu1 %v8779_v44  ;;  %v16228_v51 = vsel %vm2404_vm5, %v7118_v0, %v7185_v39  ;;  %v7746_v18 = vmul.f32 %v15127_v37, %v15435_v56 }
 0x65c   : > { %17850 = vst [vmem:[#allocation48_spill] sm:$0xff] %v16228_v51  ;;  %v7818_v17 = vmul.f32 %v15125_v14, %v15417_v29  ;;  %v8038_v15 = vmul.f32 %v15131_v23, %v15417_v29  ;;  %v16238_v53 = vmul.f32 %v15125_v14, %v16228_v51  ;;  %v17852_v13 = vrot.slane %v16138_v28, 7  ;;  %v17855_v28 = vld [vmem:[#allocation66_spill] sm:$0xff] }
 0x65d   : > { %v8285_v10 = vadd.f32 %v8253_v48, %v8217_v11  ;;  %v16246_v16 = vsel %vm2404_vm5, %v7116_v49, %v7118_v0  ;;  %v17854_v52 = vrot.slane %v16112_v60, 2  ;;  %v7626_v62 = vsel %vm3435_vm14, %v7623_v3, %v7625_v34 }
 0x65e   : > { %17851 = vst [vmem:[#allocation52_spill] sm:$0xff] %v16238_v53  ;;  %v16243_v47 = vsel %vm2404_vm5, %v17852_v13, %v7116_v49  ;;  %17853 = vst [vmem:[#allocation54_spill] sm:$0xff] %v16246_v16  ;;  %v7913_v29 = vrot.slane %v7818_v17, 1  ;;  %v8133_v48 = vrot.slane %v8038_v15, 2  ;;  %v7710_v8 = vadd.f32 %v7626_v62, %v7490_v35 }
 0x65f   : > { %v8640_v31 = vsel %vm3435_vm14, %v17854_v52, %v8639_v43  ;;  %v8505_v40 = vadd.f32 %v8420_v27, %v8285_v10  ;;  %v8254_v45 = vmul.f32 %v15133_v5, %v17841_v46  ;;  %v8326_v54 = vmul.f32 %v15141_v38, %v17855_v28 }
 0x660   : > { %v7914_v49 = vsel %vm2653_vm6, %v7911_v12, %v7913_v29  ;;  %v8134_v60 = vsel %vm3435_vm14, %v8131_v4, %v8133_v48  ;;  %v8546_v26 = vmul.f32 %v16167_v1, %v17855_v28  ;;  %v7778_v3 = vadd.f32 %v7746_v18, %v7710_v8 }
 0x661   : > { %v8725_v34 = vadd.f32 %v8640_v31, %v8505_v40  ;;  %v8421_v0 = vrot.slane %v8326_v54, 1  ;;  %v16263_v27 = vmul.f32 %v15118_v25, %v17792_v19  ;;  %v16267_v30 = vmul.f32 %v15118_v25, %v15430_v58 }
 0x662   : > { %v8641_v39 = vrot.slane %v8546_v26, 2  ;;  %v16271_v12 = vmul.f32 %v15120_v41, %v17792_v19  ;;  %v16275_v4 = vmul.f32 %v15120_v41, %v15430_v58  ;;  %v7998_v44 = vadd.f32 %v7914_v49, %v7778_v3 }
 0x663   : > { %v8785_v35 = vsel %vm2744_vm7, %v8725_v34, 0.0  ;;  %v8422_v11 = vsel %vm2653_vm6, %v8419_v24, %v8421_v0  ;;  %v7240_v20 = vmul.f32 %v15116_v6, %v17792_v19  ;;  %v17421_v17 = vrot.slane %v16263_v27, 1  ;;  %v17856_v34 = vld [vmem:[#allocation85_spill] sm:$0xff] }
 0x664   : > { %8786 = vadd.xlane.f32.xlu0 %v8785_v35  ;;  %v8642_v18 = vsel %vm3435_vm14, %v8639_v43, %v8641_v39  ;;  %v17418_v15 = vrot.slane %v16267_v30, 1  ;;  %v17417_v10 = vrot.slane %v16275_v4, 2  ;;  %v8218_v13 = vadd.f32 %v8134_v60, %v7998_v44 }
 0x665   : > { %v7628_v52 = vrot.slane %v16271_v12, 2  ;;  %v16288_v31 = vmul.f32 %v15125_v14, %v15491_v42  ;;  %v16292_v24 = vmul.f32 %v15125_v14, %v17833_v61  ;;  %v7748_v43 = vmul.f32 %v15127_v37, %v15491_v42 }
 0x666   : > { %v7411_v19 = vsel %vm2653_vm6, %v17421_v17, %v17418_v15  ;;  %v16303_v62 = vmul.f32 %v15131_v23, %v15491_v42  ;;  %v16307_v29 = vmul.f32 %v15131_v23, %v17833_v61  ;;  %v8286_v48 = vadd.f32 %v8254_v45, %v8218_v13 }
 0x667   : > { %v7492_v40 = vadd.f32 %v7411_v19, %v7240_v20  ;;  %v7631_v8 = vsel %vm3435_vm14, %v7628_v52, %v17417_v10  ;;  %v17416_v54 = vrot.slane %v16292_v24, 1  ;;  %v7916_v49 = vrot.slane %v16288_v31, 1 }
 0x668   : > { %v8136_v60 = vrot.slane %v16303_v62, 2  ;;  %v17415_v26 = vrot.slane %v16307_v29, 2  ;;  %v16318_v3 = vmul.f32 %v15141_v38, %v17856_v34  ;;  %v8506_v0 = vadd.f32 %v8422_v11, %v8286_v48  ;;  %v17857_v62 = vld [vmem:[#allocation81_spill] sm:$0xff] }
 0x669   : > { %v7712_v39 = vadd.f32 %v7631_v8, %v7492_v40  ;;  %v8256_v45 = vmul.f32 %v15133_v5, %v17856_v34  ;;  %v16324_v12 = vmul.f32 %v15141_v38, %v15850_v7  ;;  %v7919_v35 = vsel %vm2653_vm6, %v7916_v49, %v17416_v54 }
 0x66a   : > { %v8139_v44 = vsel %vm3435_vm14, %v8136_v60, %v17415_v26  ;;  %v16334_v20 = vmul.f32 %v16167_v1, %v17856_v34  ;;  %v16338_v11 = vmul.f32 %v16167_v1, %v15850_v7  ;;  %v8726_v13 = vadd.f32 %v8642_v18, %v8506_v0  ;;  %v17858_v26 = vld [vmem:[#allocation83_spill] sm:$0xff] }
 0x66b   : > { %v7780_v31 = vadd.f32 %v7748_v43, %v7712_v39  ;;  %v17419_v19 = vrot.slane %v16324_v12, 1  ;;  %v6874_v48 = vadd.f32 %v15805_v36, %v17857_v62  ;;  %v8424_v40 = vrot.slane %v16318_v3, 1 }
 0x66c   : > { %v8644_v8 = vrot.slane %v16334_v20, 2  ;;  %v17420_v32 = vrot.slane %v16338_v11, 2  ;;  %v6873_v54 = vadd.f32 %v15805_v36, %v17858_v26  ;;  %v8788_v10 = vsel %vm2744_vm7, %v8726_v13, 0.0 }
 0x66d   : > { %v8000_v15 = vadd.f32 %v7919_v35, %v7780_v31  ;;  %vm6914_vm13 = vcmp.gt.f32.partialorder %v6874_v48, 0.0  ;;  %v7239_v18 = vmul.f32 %v15116_v6, %v17837_v63  ;;  %8789 = vadd.xlane.f32.xlu1 %v8788_v10  ;;  %v8427_v43 = vsel %vm2653_vm6, %v8424_v40, %v17419_v19 }
 0x66e   : > { %v6954_v3 = vmul.f32 0.01, %v6874_v48  ;;  %vm6913_vm15 = vcmp.gt.f32.partialorder %v6873_v54, 0.0  ;;  %v6953_v0 = vmul.f32 0.01, %v6873_v54  ;;  %v8647_v26 = vsel %vm3435_vm14, %v8644_v8, %v17420_v32 }
 0x66f   : > { %v8220_v39 = vadd.f32 %v8139_v44, %v8000_v15  ;;  %v7311_v35 = vmul.f32 %v15118_v25, %v17837_v63  ;;  %v7531_v20 = vmul.f32 %v15120_v41, %v17837_v63  ;;  %v7819_v31 = vmul.f32 %v15125_v14, %v17838_v33 }
 0x670   : > { %v16361_v13 = vsel %vm6914_vm13, %v6874_v48, %v6954_v3  ;;  %v6993_v10 = vsel %vm6913_vm15, %v6873_v54, %v6953_v0  ;;  %v8039_v62 = vmul.f32 %v15131_v23, %v17838_v33  ;;  %v17861_v48 = vrot.slane %v16263_v27, 1 }
 0x671   : > { %v8288_v15 = vadd.f32 %v8256_v45, %v8220_v39  ;;  %v17427_v44 = vrot.slane %v16361_v13, 7  ;;  %v7016_v19 = vrot.slane %v6993_v10, 1  ;;  %v7120_v32 = vrot.slane %v6993_v10, 7 }
 0x672   : > { %v7407_v17 = vrot.slane %v7311_v35, 1  ;;  %v7627_v53 = vrot.slane %v7531_v20, 2  ;;  %v7915_v21 = vrot.slane %v7819_v31, 1  ;;  %v8135_v51 = vrot.slane %v8039_v62, 2 }
 0x673   : > { %v8508_v16 = vadd.f32 %v8427_v43, %v8288_v15  ;;  %v16371_v63 = vsel %vm2404_vm5, %v7120_v32, %v17427_v44  ;;  %v16374_v54 = vsel %vm2404_vm5, %v7016_v19, %v7120_v32  ;;  %v7747_v45 = vmul.f32 %v15127_v37, %v17838_v33  ;;  %v17862_v43 = vld [vmem:[#allocation87_spill] sm:$0xff] }
 0x674   : > { %17859 = vst [vmem:[#allocation56_spill] sm:$0xff] %v16371_v63  ;;  %17860 = vst [vmem:[#allocation59_spill] sm:$0xff] %v16374_v54  ;;  %v7409_v3 = vsel %vm2653_vm6, %v7407_v17, %v17861_v48  ;;  %v7629_v0 = vsel %vm3435_vm14, %v7627_v53, %v7628_v52  ;;  %v7917_v39 = vsel %vm2653_vm6, %v7915_v21, %v7916_v49  ;;  %v17870_v54 = vrot.slane %v16324_v12, 1 }
 0x675   : > { %v8255_v35 = vmul.f32 %v15133_v5, %v17862_v43  ;;  %v8728_v20 = vadd.f32 %v8647_v26, %v8508_v16  ;;  %v7491_v10 = vadd.f32 %v7409_v3, %v7239_v18  ;;  %v8327_v32 = vmul.f32 %v15141_v38, %v17862_v43 }
 0x676   : > { %v8547_v19 = vmul.f32 %v16167_v1, %v17862_v43  ;;  %v8137_v31 = vsel %vm3435_vm14, %v8135_v51, %v8136_v60  ;;  %v7241_v27 = vmul.f32 %v15116_v6, %v15430_v58  ;;  %v7314_v53 = vmul.f32 %v15118_v25, %v15435_v56 }
 0x677   : > { %v7534_v21 = vmul.f32 %v15120_v41, %v15435_v56  ;;  %v8794_v16 = vsel %vm2744_vm7, %v8728_v20, 0.0  ;;  %v7711_v17 = vadd.f32 %v7629_v0, %v7491_v10  ;;  %v8423_v52 = vrot.slane %v8327_v32, 1 }
 0x678   : > { %v8643_v49 = vrot.slane %v8547_v19, 2  ;;  %8795 = vadd.xlane.f32.xlu0 %v8794_v16  ;;  %v7412_v18 = vrot.slane %v7314_v53, 1  ;;  %v16399_v51 = vmul.f32 %v15125_v14, %v17841_v46  ;;  %v16403_v58 = vmul.f32 %v15131_v23, %v17841_v46  ;;  %v17864_v53 = vld [vmem:[#allocation96_spill] sm:$0xff] }
 0x679   : > { %v7632_v26 = vrot.slane %v7534_v21, 2  ;;  %v7779_v60 = vadd.f32 %v7747_v45, %v7711_v17  ;;  %v8425_v62 = vsel %vm2653_vm6, %v8423_v52, %v8424_v40  ;;  %v7749_v48 = vmul.f32 %v15127_v37, %v17833_v61  ;;  %v17867_v52 = vld [vmem:[#allocation89_spill] sm:$0xff] }
 0x67a   : > { %v8645_v15 = vsel %vm3435_vm14, %v8643_v49, %v8644_v8  ;;  %v17863_v3 = vrot.slane %v16267_v30, 1  ;;  %v7920_v20 = vrot.slane %v16399_v51, 1  ;;  %v8140_v10 = vrot.slane %v16403_v58, 2  ;;  %v17868_v51 = vld [vmem:[#allocation91_spill] sm:$0xff] }
 0x67b   : > { %v8257_v32 = vmul.f32 %v15133_v5, %v15850_v7  ;;  %v7999_v19 = vadd.f32 %v7917_v39, %v7779_v60  ;;  %v8330_v40 = vmul.f32 %v15141_v38, %v17864_v53  ;;  %v8550_v8 = vmul.f32 %v16167_v1, %v17864_v53 }
 0x67c   : > { %v7413_v0 = vsel %vm2653_vm6, %v17863_v3, %v7412_v18  ;;  %v17865_v21 = vrot.slane %v16275_v4, 2  ;;  %v17866_v16 = vrot.slane %v16292_v24, 1  ;;  %v6876_v49 = vadd.f32 %v15805_v36, %v17867_v52 }
 0x67d   : > { %v7493_v45 = vadd.f32 %v7413_v0, %v7241_v27  ;;  %v6875_v39 = vadd.f32 %v15805_v36, %v17868_v51  ;;  %v8219_v27 = vadd.f32 %v8137_v31, %v7999_v19  ;;  %v8428_v60 = vrot.slane %v8330_v40, 1  ;;  %v17871_v19 = vld [vmem:[#allocation47_spill] sm:$0xff] }
 0x67e   : > { %v7633_v30 = vsel %vm3435_vm14, %v17865_v21, %v7632_v26  ;;  %v7921_v17 = vsel %vm2653_vm6, %v17866_v16, %v7920_v20  ;;  %v8648_v3 = vrot.slane %v8550_v8, 2  ;;  %vm6916_vm3 = vcmp.gt.f32.partialorder %v6876_v49, 0.0 }
 0x67f   : > { %v7713_v58 = vadd.f32 %v7633_v30, %v7493_v45  ;;  %v6956_v0 = vmul.f32 0.01, %v6876_v49  ;;  %vm6915_vm4 = vcmp.gt.f32.partialorder %v6875_v39, 0.0  ;;  %v6955_v4 = vmul.f32 0.01, %v6875_v39 }
 0x680   : > { %v8287_v44 = vadd.f32 %v8255_v35, %v8219_v27  ;;  %v17869_v24 = vrot.slane %v16307_v29, 2  ;;  %v8429_v52 = vsel %vm2653_vm6, %v17870_v54, %v8428_v60  ;;  %v7242_v31 = vmul.f32 %v15116_v6, %v15435_v56 }
 0x681   : > { %v7781_v21 = vadd.f32 %v7749_v48, %v7713_v58  ;;  %v16436_v63 = vsel %vm6916_vm3, %v6876_v49, %v6956_v0  ;;  %v6995_v36 = vsel %vm6915_vm4, %v6875_v39, %v6955_v4  ;;  %v17872_v45 = vrot.slane %v17871_v19, 1  ;;  %v17874_v49 = vld [vmem:[#allocation49_spill] sm:$0xff] }
 0x682   : > { %v8141_v16 = vsel %vm3435_vm14, %v17869_v24, %v8140_v10  ;;  %v8507_v35 = vadd.f32 %v8425_v62, %v8287_v44  ;;  %v17873_v29 = vrot.slane %v16338_v11, 2  ;;  %v17430_v12 = vrot.slane %v16436_v63, 7 }
 0x683   : > { %v7415_v40 = vsel %vm2653_vm6, %v7412_v18, %v17872_v45  ;;  %v8001_v48 = vadd.f32 %v7921_v17, %v7781_v21  ;;  %v7123_v30 = vrot.slane %v6995_v36, 7  ;;  %v7634_v51 = vrot.slane %v17874_v49, 2 }
 0x684   : > { %v8649_v8 = vsel %vm3435_vm14, %v17873_v29, %v8648_v3  ;;  %v7494_v54 = vadd.f32 %v7415_v40, %v7242_v31  ;;  %v7750_v39 = vmul.f32 %v15127_v37, %v17841_v46  ;;  %v8727_v56 = vadd.f32 %v8645_v15, %v8507_v35 }
 0x685   : > { %v8221_v27 = vadd.f32 %v8141_v16, %v8001_v48  ;;  %v7823_v18 = vmul.f32 %v15125_v14, %v17855_v28  ;;  %v8043_v44 = vmul.f32 %v15131_v23, %v17855_v28  ;;  %v17875_v62 = vrot.slane %v16361_v13, 7  ;;  %v17876_v16 = vld [vmem:[#allocation38_spill] sm:$0xff] }
 0x686   : > { %v16463_v58 = vsel %vm2404_vm5, %v7123_v30, %v17430_v12  ;;  %v7635_v15 = vsel %vm3435_vm14, %v7632_v26, %v7634_v51  ;;  %v8791_v0 = vsel %vm2744_vm7, %v8727_v56, 0.0  ;;  %v8258_v13 = vmul.f32 %v15133_v5, %v17864_v53 }
 0x687   : > { %v16458_v17 = vsel %vm2404_vm5, %v17875_v62, %v7123_v30  ;;  %v8289_v4 = vadd.f32 %v8257_v32, %v8221_v27  ;;  %v7714_v21 = vadd.f32 %v7635_v15, %v7494_v54  ;;  %v7922_v24 = vrot.slane %v7823_v18, 1  ;;  %8792 = vadd.xlane.f32.xlu1 %v8791_v0 }
 0x688   : > { %v8142_v28 = vrot.slane %v8043_v44, 2  ;;  %v8331_v36 = vmul.f32 %v15141_v38, %v17876_v16  ;;  %v8551_v31 = vmul.f32 %v16167_v1, %v17876_v16  ;;  %v16476_v32 = vmul.f32 %v15118_v25, %v15491_v42 }
 0x689   : > { %v8509_v19 = vadd.f32 %v8429_v52, %v8289_v4  ;;  %v7782_v45 = vadd.f32 %v7750_v39, %v7714_v21  ;;  %v7923_v26 = vsel %vm2653_vm6, %v7920_v20, %v7922_v24  ;;  %v16481_v29 = vmul.f32 %v15118_v25, %v17833_v61 }
 0x68a   : > { %v8143_v40 = vsel %vm3435_vm14, %v8140_v10, %v8142_v28  ;;  %v8430_v35 = vrot.slane %v8331_v36, 1  ;;  %v8650_v48 = vrot.slane %v8551_v31, 2  ;;  %v7417_v49 = vrot.slane %v16476_v32, 1 }
 0x68b   : > { %v8729_v30 = vadd.f32 %v8649_v8, %v8509_v19  ;;  %v8002_v54 = vadd.f32 %v7923_v26, %v7782_v45  ;;  %v16486_v52 = vmul.f32 %v15120_v41, %v15491_v42  ;;  %v7419_v10 = vrot.slane %v16481_v29, 1 }
 0x68c   : > { %v8431_v20 = vsel %vm2653_vm6, %v8428_v60, %v8430_v35  ;;  %v8651_v51 = vsel %vm3435_vm14, %v8648_v3, %v8650_v48  ;;  %v16493_v39 = vmul.f32 %v15120_v41, %v17833_v61  ;;  %v7244_v27 = vmul.f32 %v15116_v6, %v15491_v42 }
 0x68d   : > { %v8797_v56 = vsel %vm2744_vm7, %v8729_v30, 0.0  ;;  %v8222_v8 = vadd.f32 %v8143_v40, %v8002_v54  ;;  %v7637_v18 = vrot.slane %v16486_v52, 2  ;;  %v7420_v60 = vsel %vm2653_vm6, %v7417_v49, %v7419_v10 }
 0x68e   : > { %8798 = vadd.xlane.f32.xlu0 %v8797_v56  ;;  %v7639_v3 = vrot.slane %v16493_v39, 2  ;;  %v7825_v44 = vmul.f32 %v15125_v14, %v17856_v34  ;;  %v16507_v62 = vmul.f32 %v15125_v14, %v15850_v7  ;;  %v7496_v0 = vadd.f32 %v7420_v60, %v7244_v27 }
 0x68f   : > { %v8290_v15 = vadd.f32 %v8258_v13, %v8222_v8  ;;  %v8045_v42 = vmul.f32 %v15131_v23, %v17856_v34  ;;  %v16513_v4 = vmul.f32 %v15131_v23, %v15850_v7  ;;  %v7752_v24 = vmul.f32 %v15127_v37, %v17856_v34 }
 0x690   : > { %v7640_v21 = vsel %vm3435_vm14, %v7637_v18, %v7639_v3  ;;  %v7925_v28 = vrot.slane %v7825_v44, 1  ;;  %v17434_v36 = vrot.slane %v16507_v62, 1  ;;  %v8333_v32 = vmul.f32 %v15141_v38, %v15974_v59 }
 0x691   : > { %v8510_v31 = vadd.f32 %v8431_v20, %v8290_v15  ;;  %v7716_v13 = vadd.f32 %v7640_v21, %v7496_v0  ;;  %v8145_v19 = vrot.slane %v8045_v42, 2  ;;  %v17432_v45 = vrot.slane %v16513_v4, 2 }
 0x692   : > { %v7928_v26 = vsel %vm2653_vm6, %v7925_v28, %v17434_v36  ;;  %v16529_v40 = vmul.f32 %v15141_v38, %v16010_v22  ;;  %v8553_v35 = vmul.f32 %v16167_v1, %v15974_v59  ;;  %v8260_v54 = vmul.f32 %v15133_v5, %v15974_v59 }
 0x693   : > { %v8730_v48 = vadd.f32 %v8651_v51, %v8510_v31  ;;  %v7784_v30 = vadd.f32 %v7752_v24, %v7716_v13  ;;  %v16537_v52 = vmul.f32 %v16167_v1, %v16010_v22  ;;  %v8148_v20 = vsel %vm3435_vm14, %v8145_v19, %v17432_v45 }
 0x694   : > { %v8433_v56 = vrot.slane %v8333_v32, 1  ;;  %v17431_v8 = vrot.slane %v16529_v40, 1  ;;  %v8653_v27 = vrot.slane %v8553_v35, 2  ;;  %v7316_v15 = vmul.f32 %v15118_v25, %v17838_v33 }
 0x695   : > { %v8800_v60 = vsel %vm2744_vm7, %v8730_v48, 0.0  ;;  %v8004_v44 = vadd.f32 %v7928_v26, %v7784_v30  ;;  %v17433_v51 = vrot.slane %v16537_v52, 2  ;;  %v7243_v42 = vmul.f32 %v15116_v6, %v17838_v33 }
 0x696   : > { %8801 = vadd.xlane.f32.xlu1 %v8800_v60  ;;  %v8436_v0 = vsel %vm2653_vm6, %v8433_v56, %v17431_v8  ;;  %v7536_v21 = vmul.f32 %v15120_v41, %v17838_v33  ;;  %v7824_v24 = vmul.f32 %v15125_v14, %v17862_v43  ;;  %v7416_v13 = vrot.slane %v7316_v15, 1 }
 0x697   : > { %v8224_v31 = vadd.f32 %v8148_v20, %v8004_v44  ;;  %v7751_v26 = vmul.f32 %v15127_v37, %v17862_v43  ;;  %v8044_v32 = vmul.f32 %v15131_v23, %v17862_v43  ;;  %v8656_v35 = vsel %vm3435_vm14, %v8653_v27, %v17433_v51 }
 0x698   : > { %v7636_v48 = vrot.slane %v7536_v21, 2  ;;  %v7924_v30 = vrot.slane %v7824_v24, 1  ;;  %v8332_v33 = vmul.f32 %v15141_v38, %v16003_v57  ;;  %v7418_v12 = vsel %vm2653_vm6, %v7416_v13, %v7417_v49 }
 0x699   : > { %v8292_v60 = vadd.f32 %v8260_v54, %v8224_v31  ;;  %v8144_v20 = vrot.slane %v8044_v32, 2  ;;  %v8552_v44 = vmul.f32 %v16167_v1, %v16003_v57  ;;  %v7495_v15 = vadd.f32 %v7418_v12, %v7243_v42 }
 0x69a   : > { %v7926_v11 = vsel %vm2653_vm6, %v7924_v30, %v7925_v28  ;;  %v8259_v8 = vmul.f32 %v15133_v5, %v16003_v57  ;;  %v8432_v45 = vrot.slane %v8332_v33, 1  ;;  %v7638_v21 = vsel %vm3435_vm14, %v7636_v48, %v7637_v18 }
 0x69b   : > { %v8512_v51 = vadd.f32 %v8436_v0, %v8292_v60  ;;  %v8146_v24 = vsel %vm3435_vm14, %v8144_v20, %v8145_v19  ;;  %v8652_v36 = vrot.slane %v8552_v44, 2  ;;  %v7715_v54 = vadd.f32 %v7638_v21, %v7495_v15  ;;  %v17878_v15 = vld [vmem:[#allocation68_spill] sm:$0xff] }
 0x69c   : > { %v8434_v49 = vsel %vm2653_vm6, %v8432_v45, %v8433_v56  ;;  %v7319_v31 = vmul.f32 %v15118_v25, %v17841_v46  ;;  %v7539_v12 = vmul.f32 %v15120_v41, %v17841_v46  ;;  %v7245_v0 = vmul.f32 %v15116_v6, %v17833_v61 }
 0x69d   : > { %v8732_v28 = vadd.f32 %v8656_v35, %v8512_v51  ;;  %v8654_v42 = vsel %vm3435_vm14, %v8652_v36, %v8653_v27  ;;  %v7827_v18 = vmul.f32 %v15125_v14, %v17864_v53  ;;  %v7783_v19 = vadd.f32 %v7751_v26, %v7715_v54 }
 0x69e   : > { %v7421_v13 = vrot.slane %v7319_v31, 1  ;;  %v7641_v32 = vrot.slane %v7539_v12, 2  ;;  %v8047_v45 = vmul.f32 %v15131_v23, %v17864_v53  ;;  %v7753_v48 = vmul.f32 %v15127_v37, %v15850_v7 }
 0x69f   : > { %v8806_v56 = vsel %vm2744_vm7, %v8732_v28, 0.0  ;;  %v7929_v51 = vrot.slane %v7827_v18, 1  ;;  %v8335_v36 = vmul.f32 %v15141_v38, %v16013_v50  ;;  %v8003_v61 = vadd.f32 %v7926_v11, %v7783_v19  ;;  %v17881_v28 = vld [vmem:[#allocation74_spill] sm:$0xff] }
 0x6a0   : > { %8807 = vadd.xlane.f32.xlu0 %v8806_v56  ;;  %v7422_v27 = vsel %vm2653_vm6, %v7419_v10, %v7421_v13  ;;  %v8149_v26 = vrot.slane %v8047_v45, 2  ;;  %v8261_v35 = vmul.f32 %v15133_v5, %v16010_v22  ;;  %v7642_v33 = vsel %vm3435_vm14, %v7639_v3, %v7641_v32 }
 0x6a1   : > { %v7497_v30 = vadd.f32 %v7422_v27, %v7245_v0  ;;  %v8437_v60 = vrot.slane %v8335_v36, 1  ;;  %v8555_v20 = vmul.f32 %v16167_v1, %v16013_v50  ;;  %v8223_v44 = vadd.f32 %v8146_v24, %v8003_v61 }
 0x6a2   : > { %v17877_v11 = vrot.slane %v16507_v62, 1  ;;  %v7246_v10 = vmul.f32 %v15116_v6, %v17841_v46  ;;  %v17879_v21 = vrot.slane %v17878_v15, 1  ;;  %v17880_v39 = vrot.slane %v16513_v4, 2 }
 0x6a3   : > { %v7717_v31 = vadd.f32 %v7642_v33, %v7497_v30  ;;  %v8657_v12 = vrot.slane %v8555_v20, 2  ;;  %v7643_v0 = vrot.slane %v17881_v28, 2  ;;  %v8291_v24 = vadd.f32 %v8259_v8, %v8223_v44 }
 0x6a4   : > { %v7930_v29 = vsel %vm2653_vm6, %v17877_v11, %v7929_v51  ;;  %v7424_v54 = vsel %vm2653_vm6, %v7421_v13, %v17879_v21  ;;  %v8150_v3 = vsel %vm3435_vm14, %v17880_v39, %v8149_v26  ;;  %v7754_v62 = vmul.f32 %v15127_v37, %v17864_v53 }
 0x6a5   : > { %v7498_v18 = vadd.f32 %v7424_v54, %v7246_v10  ;;  %v7828_v46 = vmul.f32 %v15125_v14, %v17876_v16  ;;  %v7785_v19 = vadd.f32 %v7753_v48, %v7717_v31  ;;  %v17882_v45 = vrot.slane %v16529_v40, 1 }
 0x6a6   : > { %v7644_v4 = vsel %vm3435_vm14, %v7641_v32, %v7643_v0  ;;  %v8048_v56 = vmul.f32 %v15131_v23, %v17876_v16  ;;  %v8511_v36 = vadd.f32 %v8434_v49, %v8291_v24  ;;  %v17883_v8 = vrot.slane %v16537_v52, 2 }
 0x6a7   : > { %v8438_v13 = vsel %vm2653_vm6, %v17882_v45, %v8437_v60  ;;  %v7718_v27 = vadd.f32 %v7644_v4, %v7498_v18  ;;  %v7931_v30 = vrot.slane %v7828_v46, 1  ;;  %v8005_v33 = vadd.f32 %v7930_v29, %v7785_v19 }
 0x6a8   : > { %v8658_v61 = vsel %vm3435_vm14, %v17883_v8, %v8657_v12  ;;  %v8151_v20 = vrot.slane %v8048_v56, 2  ;;  %v8336_v48 = vmul.f32 %v15141_v38, %v15996_v55  ;;  %v8556_v40 = vmul.f32 %v16167_v1, %v15996_v55 }
 0x6a9   : > { %v8731_v44 = vadd.f32 %v8654_v42, %v8511_v36  ;;  %v7786_v32 = vadd.f32 %v7754_v62, %v7718_v27  ;;  %v7932_v11 = vsel %vm2653_vm6, %v7929_v51, %v7931_v30  ;;  %v8262_v16 = vmul.f32 %v15133_v5, %v16013_v50 }
 0x6aa   : > { %v8225_v52 = vadd.f32 %v8150_v3, %v8005_v33  ;;  %v8152_v49 = vsel %vm3435_vm14, %v8149_v26, %v8151_v20  ;;  %v8439_v10 = vrot.slane %v8336_v48, 1  ;;  %v8659_v15 = vrot.slane %v8556_v40, 2 }
 0x6ab   : > { %v8803_v29 = vsel %vm2744_vm7, %v8731_v44, 0.0  ;;  %v8006_v21 = vadd.f32 %v7932_v11, %v7786_v32  ;;  %v16636_v54 = vmul.f32 %v15118_v25, %v17856_v34  ;;  %v16640_v42 = vmul.f32 %v15118_v25, %v15850_v7 }
 0x6ac   : > { %8804 = vadd.xlane.f32.xlu1 %v8803_v29  ;;  %v8293_v51 = vadd.f32 %v8261_v35, %v8225_v52  ;;  %v8440_v31 = vsel %vm2653_vm6, %v8437_v60, %v8439_v10  ;;  %v8660_v39 = vsel %vm3435_vm14, %v8657_v12, %v8659_v15  ;;  %v7542_v26 = vmul.f32 %v15120_v41, %v17856_v34 }
 0x6ad   : > { %v8226_v3 = vadd.f32 %v8152_v49, %v8006_v21  ;;  %v7426_v28 = vrot.slane %v16636_v54, 1  ;;  %v7428_v0 = vrot.slane %v16640_v42, 1  ;;  %v16650_v24 = vmul.f32 %v15120_v41, %v15850_v7 }
 0x6ae   : > { %v8513_v18 = vadd.f32 %v8438_v13, %v8293_v51  ;;  %v7248_v35 = vmul.f32 %v15116_v6, %v17856_v34  ;;  %v7646_v62 = vrot.slane %v7542_v26, 2  ;;  %v7830_v60 = vmul.f32 %v15125_v14, %v15974_v59 }
 0x6af   : > { %v8294_v12 = vadd.f32 %v8262_v16, %v8226_v3  ;;  %v7429_v46 = vsel %vm2653_vm6, %v7426_v28, %v7428_v0  ;;  %v7648_v19 = vrot.slane %v16650_v24, 2  ;;  %v16662_v45 = vmul.f32 %v15125_v14, %v16010_v22 }
 0x6b0   : > { %v8733_v4 = vadd.f32 %v8658_v61, %v8513_v18  ;;  %v7500_v13 = vadd.f32 %v7429_v46, %v7248_v35  ;;  %v7934_v56 = vrot.slane %v7830_v60, 1  ;;  %v8050_v34 = vmul.f32 %v15131_v23, %v15974_v59 }
 0x6b1   : > { %v8514_v36 = vadd.f32 %v8440_v31, %v8294_v12  ;;  %v7649_v8 = vsel %vm3435_vm14, %v7646_v62, %v7648_v19  ;;  %v7936_v27 = vrot.slane %v16662_v45, 1  ;;  %v16672_v30 = vmul.f32 %v15131_v23, %v16010_v22 }
 0x6b2   : > { %v8809_v33 = vsel %vm2744_vm7, %v8733_v4, 0.0  ;;  %v7720_v20 = vadd.f32 %v7649_v8, %v7500_v13  ;;  %v7756_v61 = vmul.f32 %v15127_v37, %v15974_v59  ;;  %v8154_v48 = vrot.slane %v8050_v34, 2 }
 0x6b3   : > { %8810 = vadd.xlane.f32.xlu0 %v8809_v33  ;;  %v8734_v40 = vadd.f32 %v8660_v39, %v8514_v36  ;;  %v7937_v44 = vsel %vm2653_vm6, %v7934_v56, %v7936_v27  ;;  %v8156_v32 = vrot.slane %v16672_v30, 2  ;;  %v8338_v11 = vmul.f32 %v15141_v38, %v16151_v9 }
 0x6b4   : > { %v7788_v16 = vadd.f32 %v7756_v61, %v7720_v20  ;;  %v16685_v52 = vmul.f32 %v15141_v38, %v16243_v47  ;;  %v8558_v49 = vmul.f32 %v16167_v1, %v16151_v9  ;;  %v16691_v10 = vmul.f32 %v16167_v1, %v16243_v47 }
 0x6b5   : > { %v8812_v15 = vsel %vm2744_vm7, %v8734_v40, 0.0  ;;  %v8157_v29 = vsel %vm3435_vm14, %v8154_v48, %v8156_v32  ;;  %v8264_v21 = vmul.f32 %v15133_v5, %v16151_v9  ;;  %v8442_v54 = vrot.slane %v8338_v11, 1 }
 0x6b6   : > { %8813 = vadd.xlane.f32.xlu1 %v8812_v15  ;;  %v8008_v51 = vadd.f32 %v7937_v44, %v7788_v16  ;;  %v8444_v31 = vrot.slane %v16685_v52, 1  ;;  %v8662_v39 = vrot.slane %v8558_v49, 2  ;;  %v8664_v26 = vrot.slane %v16691_v10, 2 }
 0x6b7   : > { %v7247_v3 = vmul.f32 %v15116_v6, %v17862_v43  ;;  %v7321_v18 = vmul.f32 %v15118_v25, %v17862_v43  ;;  %v7541_v35 = vmul.f32 %v15120_v41, %v17862_v43  ;;  %v7829_v60 = vmul.f32 %v15125_v14, %v16003_v57 }
 0x6b8   : > { %v8228_v12 = vadd.f32 %v8157_v29, %v8008_v51  ;;  %v8445_v46 = vsel %vm2653_vm6, %v8442_v54, %v8444_v31  ;;  %v8665_v4 = vsel %vm3435_vm14, %v8662_v39, %v8664_v26  ;;  %v8049_v13 = vmul.f32 %v15131_v23, %v16003_v57 }
 0x6b9   : > { %v7425_v34 = vrot.slane %v7321_v18, 1  ;;  %v7645_v36 = vrot.slane %v7541_v35, 2  ;;  %v7755_v8 = vmul.f32 %v15127_v37, %v16003_v57  ;;  %v7933_v33 = vrot.slane %v7829_v60, 1 }
 0x6ba   : > { %v8296_v43 = vadd.f32 %v8264_v21, %v8228_v12  ;;  %v8153_v20 = vrot.slane %v8049_v13, 2  ;;  %v8337_v61 = vmul.f32 %v15141_v38, %v16154_v2  ;;  %v8557_v40 = vmul.f32 %v16167_v1, %v16154_v2 }
 0x6bb   : > { %v7427_v44 = vsel %vm2653_vm6, %v7425_v34, %v7426_v28  ;;  %v7647_v11 = vsel %vm3435_vm14, %v7645_v36, %v7646_v62  ;;  %v7935_v16 = vsel %vm2653_vm6, %v7933_v33, %v7934_v56  ;;  %v8263_v52 = vmul.f32 %v15133_v5, %v16154_v2 }
 0x6bc   : > { %v8516_v49 = vadd.f32 %v8445_v46, %v8296_v43  ;;  %v7499_v15 = vadd.f32 %v7427_v44, %v7247_v3  ;;  %v8155_v29 = vsel %vm3435_vm14, %v8153_v20, %v8154_v48  ;;  %v8441_v21 = vrot.slane %v8337_v61, 1  ;;  %v17884_v43 = vld [vmem:[#allocation54_spill] sm:$0xff] }
 0x6bd   : > { %v8661_v51 = vrot.slane %v8557_v40, 2  ;;  %v7249_v18 = vmul.f32 %v15116_v6, %v15850_v7  ;;  %v7324_v35 = vmul.f32 %v15118_v25, %v17864_v53  ;;  %v7544_v28 = vmul.f32 %v15120_v41, %v17864_v53 }
 0x6be   : > { %v8736_v62 = vadd.f32 %v8665_v4, %v8516_v49  ;;  %v7719_v56 = vadd.f32 %v7647_v11, %v7499_v15  ;;  %v8443_v60 = vsel %vm2653_vm6, %v8441_v21, %v8442_v54  ;;  %v7832_v3 = vmul.f32 %v15125_v14, %v16013_v50 }
 0x6bf   : > { %v8663_v48 = vsel %vm3435_vm14, %v8661_v51, %v8662_v39  ;;  %v7430_v12 = vrot.slane %v7324_v35, 1  ;;  %v7650_v46 = vrot.slane %v7544_v28, 2  ;;  %v8052_v7 = vmul.f32 %v15131_v23, %v16013_v50  ;;  %v17887_v51 = vld [vmem:[#allocation37_spill] sm:$0xff] }
 0x6c0   : > { %v8818_v13 = vsel %vm2744_vm7, %v8736_v62, 0.0  ;;  %v7787_v34 = vadd.f32 %v7755_v8, %v7719_v56  ;;  %v7757_v36 = vmul.f32 %v15127_v37, %v16010_v22  ;;  %v7938_v4 = vrot.slane %v7832_v3, 1 }
 0x6c1   : > { %8819 = vadd.xlane.f32.xlu0 %v8818_v13  ;;  %v7431_v54 = vsel %vm2653_vm6, %v7428_v0, %v7430_v12  ;;  %v7651_v39 = vsel %vm3435_vm14, %v7648_v19, %v7650_v46  ;;  %v8265_v33 = vmul.f32 %v15133_v5, %v16243_v47  ;;  %v8340_v20 = vmul.f32 %v15141_v38, %v17884_v43  ;;  %v17885_v19 = vld [vmem:[#allocation39_spill] sm:$0xff] }
 0x6c2   : > { %v8007_v8 = vadd.f32 %v7935_v16, %v7787_v34  ;;  %v7501_v61 = vadd.f32 %v7431_v54, %v7249_v18  ;;  %v8158_v40 = vrot.slane %v8052_v7, 2  ;;  %v8560_v44 = vmul.f32 %v16167_v1, %v17884_v43  ;;  %v17888_v54 = vld [vmem:[#allocation48_spill] sm:$0xff] }
 0x6c3   : > { %v7939_v42 = vsel %vm2653_vm6, %v7936_v27, %v7938_v4  ;;  %v8446_v0 = vrot.slane %v8340_v20, 1  ;;  %v7250_v24 = vmul.f32 %v15116_v6, %v17864_v53  ;;  %v17886_v11 = vrot.slane %v17885_v19, 1 }
 0x6c4   : > { %v8227_v15 = vadd.f32 %v8155_v29, %v8007_v8  ;;  %v7721_v21 = vadd.f32 %v7651_v39, %v7501_v61  ;;  %v8666_v16 = vrot.slane %v8560_v44, 2  ;;  %v7652_v18 = vrot.slane %v17887_v51, 2 }
 0x6c5   : > { %v7433_v49 = vsel %vm2653_vm6, %v7430_v12, %v17886_v11  ;;  %v8447_v35 = vsel %vm2653_vm6, %v8444_v31, %v8446_v0  ;;  %v7758_v45 = vmul.f32 %v15127_v37, %v16013_v50  ;;  %v7833_v27 = vmul.f32 %v15125_v14, %v15996_v55 }
 0x6c6   : > { %v7502_v28 = vadd.f32 %v7433_v49, %v7250_v24  ;;  %v8295_v62 = vadd.f32 %v8263_v52, %v8227_v15  ;;  %v7789_v53 = vadd.f32 %v7757_v36, %v7721_v21  ;;  %v8667_v56 = vsel %vm3435_vm14, %v8664_v26, %v8666_v16 }
 0x6c7   : > { %v7653_v29 = vsel %vm3435_vm14, %v7650_v46, %v7652_v18  ;;  %v8159_v3 = vsel %vm3435_vm14, %v8156_v32, %v8158_v40  ;;  %v7940_v12 = vrot.slane %v7833_v27, 1  ;;  %v8053_v7 = vmul.f32 %v15131_v23, %v15996_v55 }
 0x6c8   : > { %v7722_v31 = vadd.f32 %v7653_v29, %v7502_v28  ;;  %v8515_v13 = vadd.f32 %v8443_v60, %v8295_v62  ;;  %v8009_v34 = vadd.f32 %v7939_v42, %v7789_v53  ;;  %v8341_v52 = vmul.f32 %v15141_v38, %v17888_v54 }
 0x6c9   : > { %v8561_v10 = vmul.f32 %v16167_v1, %v17888_v54  ;;  %v7941_v46 = vsel %vm2653_vm6, %v7938_v4, %v7940_v12  ;;  %v8160_v36 = vrot.slane %v8053_v7, 2  ;;  %v8266_v30 = vmul.f32 %v15133_v5, %v17884_v43  ;;  %v17889_v12 = vld [vmem:[#allocation56_spill] sm:$0xff] }
 0x6ca   : > { %v7790_v26 = vadd.f32 %v7758_v45, %v7722_v31  ;;  %v8735_v32 = vadd.f32 %v8663_v48, %v8515_v13  ;;  %v8229_v39 = vadd.f32 %v8159_v3, %v8009_v34  ;;  %v8448_v20 = vrot.slane %v8341_v52, 1 }
 0x6cb   : > { %v8668_v8 = vrot.slane %v8561_v10, 2  ;;  %v8161_v60 = vsel %vm3435_vm14, %v8158_v40, %v8160_v36  ;;  %v16787_v61 = vmul.f32 %v15118_v25, %v15974_v59  ;;  %v16791_v1 = vmul.f32 %v15118_v25, %v16010_v22 }
 0x6cc   : > { %v8010_v55 = vadd.f32 %v7941_v46, %v7790_v26  ;;  %v8815_v4 = vsel %vm2744_vm7, %v8735_v32, 0.0  ;;  %v8297_v44 = vadd.f32 %v8265_v33, %v8229_v39  ;;  %v8449_v42 = vsel %vm2653_vm6, %v8446_v0, %v8448_v20 }
 0x6cd   : > { %v8669_v48 = vsel %vm3435_vm14, %v8666_v16, %v8668_v8  ;;  %8816 = vadd.xlane.f32.xlu1 %v8815_v4  ;;  %v7435_v19 = vrot.slane %v16787_v61, 1  ;;  %v7437_v40 = vrot.slane %v16791_v1, 1  ;;  %v7547_v11 = vmul.f32 %v15120_v41, %v15974_v59 }
 0x6ce   : > { %v8230_v24 = vadd.f32 %v8161_v60, %v8010_v55  ;;  %v8517_v49 = vadd.f32 %v8447_v35, %v8297_v44  ;;  %v7252_v15 = vmul.f32 %v15116_v6, %v15974_v59  ;;  %v16804_v33 = vmul.f32 %v15120_v41, %v16010_v22 }
 0x6cf   : > { %v7835_v0 = vmul.f32 %v15125_v14, %v16151_v9  ;;  %v7438_v16 = vsel %vm2653_vm6, %v7435_v19, %v7437_v40  ;;  %v7655_v51 = vrot.slane %v7547_v11, 2  ;;  %v16813_v18 = vmul.f32 %v15125_v14, %v16243_v47 }
 0x6d0   : > { %v8298_v21 = vadd.f32 %v8266_v30, %v8230_v24  ;;  %v8737_v35 = vadd.f32 %v8667_v56, %v8517_v49  ;;  %v7504_v28 = vadd.f32 %v7438_v16, %v7252_v15  ;;  %v7657_v59 = vrot.slane %v16804_v33, 2 }
 0x6d1   : > { %v7943_v45 = vrot.slane %v7835_v0, 1  ;;  %v7945_v62 = vrot.slane %v16813_v18, 1  ;;  %v8055_v53 = vmul.f32 %v15131_v23, %v16151_v9  ;;  %v16821_v29 = vmul.f32 %v15131_v23, %v16243_v47 }
 0x6d2   : > { %v8518_v27 = vadd.f32 %v8449_v42, %v8298_v21  ;;  %v8821_v3 = vsel %vm2744_vm7, %v8737_v35, 0.0  ;;  %v7658_v56 = vsel %vm3435_vm14, %v7655_v51, %v7657_v59  ;;  %v7760_v31 = vmul.f32 %v15127_v37, %v16151_v9  ;;  %v16844_v9 = vld [vmem:[%s17709_s30 + $0x8] ss:$0 sm:$0xff] }
 0x6d3   : > { %v8343_v7 = vmul.f32 %v15141_v38, %v17889_v12  ;;  %8822 = vadd.xlane.f32.xlu0 %v8821_v3  ;;  %v7724_v34 = vadd.f32 %v7658_v56, %v7504_v28  ;;  %v7946_v52 = vsel %vm2653_vm6, %v7943_v45, %v7945_v62  ;;  %v8268_v10 = vmul.f32 %v15133_v5, %v17889_v12  ;;  %v17890_v3 = vld [vmem:[#allocation59_spill] sm:$0xff] }
 0x6d4   : > { %v8738_v13 = vadd.f32 %v8669_v48, %v8518_v27  ;;  %v8163_v26 = vrot.slane %v8055_v53, 2  ;;  %v8165_v46 = vrot.slane %v16821_v29, 2  ;;  %v16839_v36 = vmul.f32 %v15141_v38, %v16458_v17 }
 0x6d5   : > { %v8563_v30 = vmul.f32 %v16844_v9, %v17889_v12  ;;  %v7792_v39 = vadd.f32 %v7760_v31, %v7724_v34  ;;  %v8451_v20 = vrot.slane %v8343_v7, 1  ;;  %v16851_v8 = vmul.f32 %v16844_v9, %v16458_v17 }
 0x6d6   : > { %v8824_v32 = vsel %vm2744_vm7, %v8738_v13, 0.0  ;;  %v8166_v55 = vsel %vm3435_vm14, %v8163_v26, %v8165_v46  ;;  %v8453_v60 = vrot.slane %v16839_v36, 1  ;;  %v7251_v61 = vmul.f32 %v15116_v6, %v16003_v57 }
 0x6d7   : > { %8825 = vadd.xlane.f32.xlu1 %v8824_v32  ;;  %v7326_v4 = vmul.f32 %v15118_v25, %v16003_v57  ;;  %v8012_v44 = vadd.f32 %v7946_v52, %v7792_v39  ;;  %v8671_v42 = vrot.slane %v8563_v30, 2  ;;  %v8673_v48 = vrot.slane %v16851_v8, 2 }
 0x6d8   : > { %v7546_v24 = vmul.f32 %v15120_v41, %v16003_v57  ;;  %v8454_v11 = vsel %vm2653_vm6, %v8451_v20, %v8453_v60  ;;  %v7834_v15 = vmul.f32 %v15125_v14, %v16154_v2  ;;  %v8054_v0 = vmul.f32 %v15131_v23, %v16154_v2 }
 0x6d9   : > { %v7434_v49 = vrot.slane %v7326_v4, 1  ;;  %v8232_v21 = vadd.f32 %v8166_v55, %v8012_v44  ;;  %v8674_v16 = vsel %vm3435_vm14, %v8671_v42, %v8673_v48  ;;  %v7759_v28 = vmul.f32 %v15127_v37, %v16154_v2 }
 0x6da   : > { %v7654_v35 = vrot.slane %v7546_v24, 2  ;;  %v7942_v27 = vrot.slane %v7834_v15, 1  ;;  %v8162_v53 = vrot.slane %v8054_v0, 2  ;;  %v8342_v56 = vmul.f32 %v15141_v38, %v17890_v3 }
 0x6db   : > { %v7436_v57 = vsel %vm2653_vm6, %v7434_v49, %v7435_v19  ;;  %v8300_v31 = vadd.f32 %v8268_v10, %v8232_v21  ;;  %v8562_v13 = vmul.f32 %v16844_v9, %v17890_v3  ;;  %v8267_v2 = vmul.f32 %v15133_v5, %v17890_v3 }
 0x6dc   : > { %v7503_v12 = vadd.f32 %v7436_v57, %v7251_v61  ;;  %v7656_v7 = vsel %vm3435_vm14, %v7654_v35, %v7655_v51  ;;  %v7944_v34 = vsel %vm2653_vm6, %v7942_v27, %v7943_v45  ;;  %v8164_v52 = vsel %vm3435_vm14, %v8162_v53, %v8163_v26 }
 0x6dd   : > { %v8450_v19 = vrot.slane %v8342_v56, 1  ;;  %v8520_v36 = vadd.f32 %v8454_v11, %v8300_v31  ;;  %v8670_v32 = vrot.slane %v8562_v13, 2  ;;  %v7329_v10 = vmul.f32 %v15118_v25, %v16013_v50  ;;  %v17895_v31 = vld [vmem:[#allocation44_spill] sm:$0xff] }
 0x6de   : > { %v7723_v30 = vadd.f32 %v7656_v7, %v7503_v12  ;;  %v7253_v51 = vmul.f32 %v15116_v6, %v16010_v22  ;;  %v7549_v45 = vmul.f32 %v15120_v41, %v16013_v50  ;;  %v7837_v26 = vmul.f32 %v15125_v14, %v17884_v43  ;;  %v17896_v13 = vld [vmem:[#allocation52_spill] sm:$0xff] }
 0x6df   : > { %v8452_v39 = vsel %vm2653_vm6, %v8450_v19, %v8451_v20  ;;  %v8740_v55 = vadd.f32 %v8674_v16, %v8520_v36  ;;  %v8672_v4 = vsel %vm3435_vm14, %v8670_v32, %v8671_v42  ;;  %v7439_v44 = vrot.slane %v7329_v10, 1 }
 0x6e0   : > { %v7791_v61 = vadd.f32 %v7759_v28, %v7723_v30  ;;  %v7659_v24 = vrot.slane %v7549_v45, 2  ;;  %v7761_v25 = vmul.f32 %v15127_v37, %v16243_v47  ;;  %v7947_v11 = vrot.slane %v7837_v26, 1 }
 0x6e1   : > { %v8057_v20 = vmul.f32 %v15131_v23, %v17884_v43  ;;  %v8830_v22 = vsel %vm2744_vm7, %v8740_v55, 0.0  ;;  %v7440_v41 = vsel %vm2653_vm6, %v7437_v40, %v7439_v44  ;;  %v8345_v14 = vmul.f32 %v15141_v38, %v16463_v58 }
 0x6e2   : > { %v8011_v49 = vadd.f32 %v7944_v34, %v7791_v61  ;;  %8831 = vadd.xlane.f32.xlu0 %v8830_v22  ;;  %v7505_v42 = vadd.f32 %v7440_v41, %v7253_v51  ;;  %v7660_v47 = vsel %vm3435_vm14, %v7657_v59, %v7659_v24  ;;  %v7948_v15 = vsel %vm2653_vm6, %v7945_v62, %v7947_v11  ;;  %v17893_v59 = vld [vmem:[#allocation42_spill] sm:$0xff]  ;;  %v9969_v22 = vld [vmem:[#allocation2] ss:$0 sm:$0xff] }
 0x6e3   : > { %v8167_v0 = vrot.slane %v8057_v20, 2  ;;  %v8455_v16 = vrot.slane %v8345_v14, 1  ;;  %v8565_v1 = vmul.f32 %v16844_v9, %v16463_v58  ;;  %v17891_v40 = vrot.slane %v16436_v63, 5 }
 0x6e4   : > { %v8231_v21 = vadd.f32 %v8164_v52, %v8011_v49  ;;  %v17892_v35 = vrot.slane %v16436_v63, 7  ;;  %v7725_v57 = vadd.f32 %v7660_v47, %v7505_v42  ;;  %v7254_v18 = vmul.f32 %v15116_v6, %v16013_v50  ;;  %v8757_v49 = vpop.xlane.xlu1 %8756 }
 0x6e5   : > { %v8168_v33 = vsel %vm3435_vm14, %v8165_v46, %v8167_v0  ;;  %v17894_v62 = vrot.slane %v17893_v59, 1  ;;  %v8456_v3 = vsel %vm2653_vm6, %v8453_v60, %v8455_v16  ;;  %v8675_v56 = vrot.slane %v8565_v1, 2 }
 0x6e6   : > { %v7216_v28 = vsel %vm2404_vm5, %v17892_v35, %v17891_v40  ;;  %v8299_v53 = vadd.f32 %v8267_v2, %v8231_v21  ;;  %v7661_v63 = vrot.slane %v17895_v31, 2  ;;  %v7793_v12 = vadd.f32 %v7761_v25, %v7725_v57 }
 0x6e7   : > { %v7442_v27 = vsel %vm2653_vm6, %v7439_v44, %v17894_v62  ;;  %v7762_v29 = vmul.f32 %v15127_v37, %v17884_v43  ;;  %v17897_v46 = vrot.slane %v17896_v13, 1  ;;  %v8676_v50 = vsel %vm3435_vm14, %v8673_v48, %v8675_v56 }
 0x6e8   : > { %v7506_v7 = vadd.f32 %v7442_v27, %v7254_v18  ;;  %v8519_v6 = vadd.f32 %v8452_v39, %v8299_v53  ;;  %v7662_v52 = vsel %vm3435_vm14, %v7659_v24, %v7661_v63  ;;  %v8058_v60 = vmul.f32 %v15131_v23, %v17888_v54 }
 0x6e9   : > { %v7950_v34 = vsel %vm2653_vm6, %v7947_v11, %v17897_v46  ;;  %v8013_v2 = vadd.f32 %v7948_v15, %v7793_v12  ;;  %v8269_v19 = vmul.f32 %v15133_v5, %v16458_v17  ;;  %v8346_v37 = vmul.f32 %v15141_v38, %v7216_v28 }
 0x6ea   : > { %v7726_v36 = vadd.f32 %v7662_v52, %v7506_v7  ;;  %v8739_v43 = vadd.f32 %v8672_v4, %v8519_v6  ;;  %v8169_v30 = vrot.slane %v8058_v60, 2  ;;  %v8566_v32 = vmul.f32 %v16844_v9, %v7216_v28 }
 0x6eb   : > { %v8233_v10 = vadd.f32 %v8168_v33, %v8013_v2  ;;  %v8457_v39 = vrot.slane %v8346_v37, 1  ;;  %v12365_v48 = vmov 0   ;;  %v8270_v38 = vmul.f32 %v15133_v5, %v16463_v58  ;;  %v8745_v5 = vpop.xlane.xlu0 %8744  ;;  %v8760_v58 = vpop.xlane.xlu1 %8759 }
 0x6ec   : > { %v7794_v8 = vadd.f32 %v7762_v29, %v7726_v36  ;;  %12263 = vset.pattern.permute.xlu1 %v12365_v48  ;;  %12264 = vset.pattern.permute.xlu0 %v12365_v48  ;;  %v8827_v51 = vsel %vm2744_vm7, %v8739_v43, 0.0  ;;  %v8170_v23 = vsel %vm3435_vm14, %v8167_v0, %v8169_v30  ;;  %v8677_v54 = vrot.slane %v8566_v32, 2 }
 0x6ed   : > { %8828 = vadd.xlane.f32.xlu1 %v8827_v51  ;;  %v8301_v17 = vadd.f32 %v8269_v19, %v8233_v10  ;;  %v8458_v26 = vsel %vm2653_vm6, %v8455_v16, %v8457_v39  ;;  %v17898_v29 = vlaneseq  ;;  %vm8924_vm5 = vcmask 130112  }
 0x6ee   : > { %v8014_v45 = vadd.f32 %v7950_v34, %v7794_v8  ;;  %v8678_v9 = vsel %vm3435_vm14, %v8675_v56, %v8677_v54  ;;  %vm8931_vm6 = vcmask 195712   ;;  %vm9073_vm14 = vcmask 1041409  }
 0x6ef   : > { %v8521_v55 = vadd.f32 %v8456_v3, %v8301_v17  ;;  %v8748_v41 = vpop.xlane.xlu0 %8747  ;;  %v8763_v14 = vpop.xlane.xlu1 %8762  ;;  %v8914_v13 = vand.u32 127, %v17898_v29  ;;  %vm9075_vm8 = vcmask 1042434   ;;  %vm9077_vm9 = vcmask 1043459  }
 0x6f0   : > { %v8234_v61 = vadd.f32 %v8170_v23, %v8014_v45  ;;  %vm9079_vm10 = vcmask 1044484   ;;  %vm9081_vm11 = vcmask 1045509   ;;  %vm9083_vm1 = vcmask 1046534  }
 0x6f1   : > { %v8741_v4 = vadd.f32 %v8676_v50, %v8521_v55  ;;  %v8919_v46 = vadd.s32 4294967288, %v8914_v13  ;;  %v17899_v50 = vld [vmem:[#allocation24_spill] sm:$0xff]  ;;  %v8926_v2 = vadd.s32 4294967280, %v8914_v13  ;;  %v8933_v36 = vadd.s32 4294967272, %v8914_v13 }
 0x6f2   : > { %v8302_v44 = vadd.f32 %v8270_v38, %v8234_v61  ;;  %v16954_v52 = vsub.s32 %v8914_v13, %v17899_v50  ;;  %vm9085_vm2 = vcmask 1047559  }
 0x6f3   : > { %v8833_v24 = vsel %vm2744_vm7, %v8741_v4, 0.0  ;;  %v8751_v42 = vpop.xlane.xlu0 %8750  ;;  %v8766_v47 = vpop.xlane.xlu1 %8765  ;;  %v16957_v60 = vsub.s32 %v8919_v46, %v17899_v50  ;;  %v16964_v32 = vsub.s32 %v8926_v2, %v17899_v50  ;;  %v16972_v48 = vsub.s32 %v8933_v36, %v17899_v50 }
 0x6f4   : > { %v8522_v25 = vadd.f32 %v8458_v26, %v8302_v44  ;;  %8834 = vadd.xlane.f32.xlu0 %v8833_v24 }
 0x6f6   : > { %v8742_v11 = vadd.f32 %v8678_v9, %v8522_v25 }
 0x6f7   : > { %v8754_v15 = vpop.xlane.xlu0 %8753  ;;  %v8772_v0 = vpop.xlane.xlu1 %8771 }
 0x6f8   : > { %v8836_v20 = vsel %vm2744_vm7, %v8742_v11, 0.0  ;;  %vm8938_vm7 = vcmask 261312  }
 0x6f9   : > { %8837 = vadd.xlane.f32.xlu0 %v8836_v20 }
 0x6fb   : > { %v8769_v21 = vpop.xlane.xlu0 %8768  ;;  %v8778_v16 = vpop.xlane.xlu1 %8777 }
 0x6fe   : > { %8846 = vperm.xlu1 %12263, %v9969_v22  }
 0x6ff   : > { %v8775_v1 = vpop.xlane.xlu0 %8774  ;;  %v8781_v40 = vpop.xlane.xlu1 %8780 }
 0x703   : > { %v8784_v35 = vpop.xlane.xlu0 %8783  ;;  %v8790_v28 = vpop.xlane.xlu1 %8789 }
 0x707   : > { %v8787_v57 = vpop.xlane.xlu0 %8786 }
 0x70b   : > { %v8796_v18 = vpop.xlane.xlu0 %8795 }
 0x714   : > { %v8793_v33 = vpop.xlane.xlu1 %8792 }
 0x71b   : > { %v8799_v62 = vpop.xlane.xlu0 %8798 }
 0x723   : > { %v8802_v59 = vpop.xlane.xlu1 %8801 }
 0x72d   : > { %v8808_v53 = vpop.xlane.xlu0 %8807 }
 0x739   : > { %v8805_v27 = vpop.xlane.xlu1 %8804 }
 0x740   : > { %v8811_v56 = vpop.xlane.xlu0 %8810 }
 0x743   : > { %v8814_v3 = vpop.xlane.xlu1 %8813 }
 0x74e   : > { %v8820_v63 = vpop.xlane.xlu0 %8819 }
 0x75a   : > { %v8817_v31 = vpop.xlane.xlu1 %8816 }
 0x760   : > { %v8823_v7 = vpop.xlane.xlu0 %8822 }
 0x764   : > { %v16950_v12 = vpop.xlane.xlu1 %8825 }
 0x76f   : > { %v8832_v6 = vpop.xlane.xlu0 %8831 }
 0x77a   : > { %v8829_v34 = vpop.xlane.xlu1 %8828 }
 0x77e   : > { %v16959_v19 = vpop.permute.xlu1 %8846 }
 0x77f   : > { %v8877_v37 = vadd.f32 %v16959_v19, %v8829_v34  ;;  %v8878_v43 = vadd.f32 %v16959_v19, %v8832_v6  ;;  %v8849_v51 = vadd.f32 %v16959_v19, %v8745_v5  ;;  %v8850_v23 = vadd.f32 %v16959_v19, %v8748_v41 }
 0x780   : > { %v8851_v54 = vadd.f32 %v16959_v19, %v8751_v42  ;;  %v16978_v17 = vadd.f32 %v16959_v19, %v8754_v15  ;;  %v8853_v45 = vadd.f32 %v16959_v19, %v8757_v49  ;;  %v8854_v38 = vadd.f32 %v16959_v19, %v8760_v58 }
 0x781   : > { %v8835_v30 = vpop.xlane.xlu0 %8834  ;;  %v9057_v10 = vrot.slane %v8877_v37, %v16954_v52  ;;  %v9061_v8 = vrot.slane %v8878_v43, %v16957_v60  ;;  %v8855_v26 = vadd.f32 %v16959_v19, %v8763_v14  ;;  %v16984_v9 = vadd.f32 %v16959_v19, %v8766_v47 }
 0x782   : > { %v16969_v39 = vadd.f32 %v16959_v19, %v8835_v30  ;;  %v8857_v55 = vadd.f32 %v16959_v19, %v8769_v21  ;;  %v8858_v61 = vadd.f32 %v16959_v19, %v8772_v0  ;;  %v8859_v44 = vadd.f32 %v16959_v19, %v8775_v1 }
 0x783   : > { %v16989_v4 = vsel %vm8924_vm5, %v9061_v8, %v9057_v10  ;;  %v8860_v24 = vadd.f32 %v16959_v19, %v8778_v16  ;;  %v8861_v25 = vadd.f32 %v16959_v19, %v8781_v40  ;;  %v8862_v20 = vadd.f32 %v16959_v19, %v8784_v35 }
 0x784   : > { %v9066_v11 = vrot.slane %v16969_v39, %v16964_v32  ;;  %v8863_v22 = vadd.f32 %v16959_v19, %v8787_v57  ;;  %v16999_v49 = vadd.f32 %v16959_v19, %v8790_v28  ;;  %v8865_v5 = vadd.f32 %v16959_v19, %v8793_v33 }
 0x785   : > { %v8866_v58 = vadd.f32 %v16959_v19, %v8796_v18  ;;  %v8867_v41 = vadd.f32 %v16959_v19, %v8799_v62  ;;  %v17005_v14 = vadd.f32 %v16959_v19, %v8802_v59  ;;  %v8869_v42 = vadd.f32 %v16959_v19, %v8805_v27 }
 0x786   : > { %v8870_v47 = vadd.f32 %v16959_v19, %v8808_v53  ;;  %v8918_v15 = vrot.slane %v8849_v51, %v16954_v52  ;;  %v8923_v0 = vrot.slane %v8850_v23, %v16957_v60  ;;  %v8871_v21 = vadd.f32 %v16959_v19, %v8811_v56  ;;  %v8838_v30 = vpop.xlane.xlu0 %8837 }
 0x787   : > { %v8930_v16 = vrot.slane %v8851_v54, %v16964_v32  ;;  %v8943_v1 = vrot.slane %v8853_v45, %v16954_v52  ;;  %v8947_v40 = vrot.slane %v8854_v38, %v16957_v60  ;;  %v17016_v35 = vadd.f32 %v16959_v19, %v8814_v3 }
 0x788   : > { %v8873_v28 = vadd.f32 %v16959_v19, %v8817_v31  ;;  %v8925_v57 = vsel %vm8924_vm5, %v8923_v0, %v8918_v15  ;;  %v8952_v33 = vrot.slane %v8855_v26, %v16964_v32  ;;  %v8874_v18 = vadd.f32 %v16959_v19, %v8820_v63 }
 0x789   : > { %v8948_v59 = vsel %vm8924_vm5, %v8947_v40, %v8943_v1  ;;  %v8962_v62 = vrot.slane %v8857_v55, %v16954_v52  ;;  %v8966_v27 = vrot.slane %v8858_v61, %v16957_v60  ;;  %v8875_v53 = vadd.f32 %v16959_v19, %v8823_v7 }
 0x78a   : > { %v8937_v3 = vrot.slane %v16978_v17, %v16972_v48  ;;  %v8957_v56 = vrot.slane %v16984_v9, %v16972_v48  ;;  %v8971_v31 = vrot.slane %v8859_v44, %v16964_v32  ;;  %v8932_v63 = vsel %vm8931_vm6, %v8930_v16, %v8925_v57 }
 0x78b   : > { %v8967_v29 = vsel %vm8924_vm5, %v8966_v27, %v8962_v62  ;;  %v8981_v13 = vrot.slane %v8861_v25, %v16954_v52  ;;  %v8985_v46 = vrot.slane %v8862_v20, %v16957_v60  ;;  %v8953_v7 = vsel %vm8931_vm6, %v8952_v33, %v8948_v59 }
 0x78c   : > { %v8972_v34 = vsel %vm8931_vm6, %v8971_v31, %v8967_v29  ;;  %v8990_v6 = vrot.slane %v8863_v22, %v16964_v32  ;;  %v9000_v50 = vrot.slane %v8865_v5, %v16954_v52  ;;  %v8976_v2 = vrot.slane %v8860_v24, %v16972_v48 }
 0x78d   : > { %v8986_v36 = vsel %vm8924_vm5, %v8985_v46, %v8981_v13  ;;  %v9004_v37 = vrot.slane %v8866_v58, %v16957_v60  ;;  %v9009_v43 = vrot.slane %v8867_v41, %v16964_v32  ;;  %v8876_v10 = vadd.f32 %v16959_v19, %v16950_v12 }
 0x78e   : > { %v8939_v8 = vsel %vm8938_vm7, %v8937_v3, %v8932_v63  ;;  %v9019_v51 = vrot.slane %v8869_v42, %v16954_v52  ;;  %v9023_v23 = vrot.slane %v8870_v47, %v16957_v60  ;;  %v8958_v54 = vsel %vm8938_vm7, %v8957_v56, %v8953_v7 }
 0x78f   : > { %v8977_v17 = vsel %vm8938_vm7, %v8976_v2, %v8972_v34  ;;  %v9005_v45 = vsel %vm8924_vm5, %v9004_v37, %v9000_v50  ;;  %v9028_v38 = vrot.slane %v8871_v21, %v16964_v32  ;;  %v8991_v26 = vsel %vm8931_vm6, %v8990_v6, %v8986_v36 }
 0x790   : > { %v9024_v12 = vsel %vm8924_vm5, %v9023_v23, %v9019_v51  ;;  %v9038_v9 = vrot.slane %v8873_v28, %v16954_v52  ;;  %v9042_v55 = vrot.slane %v8874_v18, %v16957_v60  ;;  %v8880_v61 = vadd.f32 %v16959_v19, %v8838_v30 }
 0x791   : > { %v8995_v44 = vrot.slane %v16999_v49, %v16972_v48  ;;  %v9010_v24 = vsel %vm8931_vm6, %v9009_v43, %v9005_v45  ;;  %v9047_v25 = vrot.slane %v8875_v53, %v16964_v32  ;;  %v9014_v20 = vrot.slane %v17005_v14, %v16972_v48 }
 0x792   : > { %v9029_v22 = vsel %vm8931_vm6, %v9028_v38, %v9024_v12  ;;  %v9043_v52 = vsel %vm8924_vm5, %v9042_v55, %v9038_v9  ;;  %v9074_v60 = vsel %vm9073_vm14, %v8958_v54, %v8939_v8  ;;  %v9033_v49 = vrot.slane %v17016_v35, %v16972_v48 }
 0x793   : > { %v8996_v19 = vsel %vm8938_vm7, %v8995_v44, %v8991_v26  ;;  %v9048_v5 = vsel %vm8931_vm6, %v9047_v25, %v9043_v52  ;;  %v9076_v58 = vsel %vm9075_vm8, %v8977_v17, %v9074_v60  ;;  %v9067_v41 = vsel %vm8931_vm6, %v9066_v11, %v16989_v4 }
 0x794   : > { %v9015_v14 = vsel %vm8938_vm7, %v9014_v20, %v9010_v24  ;;  %v9052_v42 = vrot.slane %v8876_v10, %v16972_v48  ;;  %v9078_v47 = vsel %vm9077_vm9, %v8996_v19, %v9076_v58  ;;  %v9071_v15 = vrot.slane %v8880_v61, %v16972_v48 }
 0x795   : > { %v9034_v0 = vsel %vm8938_vm7, %v9033_v49, %v9029_v22  ;;  %v9080_v21 = vsel %vm9079_vm10, %v9015_v14, %v9078_v47 }
 0x796   : > { %v9053_v32 = vsel %vm8938_vm7, %v9052_v42, %v9048_v5  ;;  %v9082_v39 = vsel %vm9081_vm11, %v9034_v0, %v9080_v21  ;;  %v9072_v4 = vsel %vm8938_vm7, %v9071_v15, %v9067_v41 }
 0x797   : > { %v9084_v11 = vsel %vm9083_vm1, %v9053_v32, %v9082_v39 }
 0x798   : > { %v9086_v48 = vsel %vm9085_vm2, %v9072_v4, %v9084_v11 }
 0x799   : > { %9088 = vst.msk [vmem:[%s962_s20] sm:$0xff] %vm1234_vm0, %v9086_v48 }
 0x79a   : > { %12282 = shalt.err (!%p12279_p4)
}
 0x79b   : > { %s12283_s17 = scalar_lea.hbm %s17097_s16, 128  ;;  %s12287_s3 = scalar_lea.hbm %s17903_s29, 1024 }
 0x79c   : > { %p12284_p5 = scmp.ne.s32.totalorder %s17097_s16, %s12283_s17  ;;  %p12288_p9 = scmp.lt.u32.totalorder %s17097_s16, %s17903_s29 }
 0x79d   : > { %p12289_p10 = scmp.lt.u32.totalorder %s12287_s3, %s12283_s17  ;;  %p12291_p12 = scmp.lt.u32.totalorder %s12283_s17, %s17097_s16 }
 0x79e   : > { %p12285_p6 = pnand %p12284_p5, %p12521_p3 }
 0x79f   : > { %p12290_p11 = por %p12289_p10, %p12288_p9 }
 0x7a0   : > { %p12286_p7 = pneg %p12285_p6 }
 0x7a1   : > { %p12292_p13 = por %p12291_p12, %p12290_p11 }
 0x7a3   : > { %p12293_p0 = pnand %p12292_p13, %p12286_p7 }
 0x7a5   : > { %12296 = shalt.err (!%p12293_p0)
}
 0x7a6   : > { %12191 = dma.vmem_to_hbm [thread:$0]  (%p12521_p3), %s17099_s23, 128, %s17097_s16, %s9090_s21  }
 0x7a7 PF: > { %s17904_s20 = sld [smem:[#allocation12_spill]]  ;;  %s17905_s1 = sld [smem:[#allocation6_spill]] }
 0x7ad   : > { %p12197_p1 = scmp.ge.s32.totalorder %s17904_s20, 2  ;;  %s9117_s24 = sand.u32 1, %s17905_s1  }
 0x7ae   : > { %s9118_s0 = scalar_lea.sflag [#allocation4], %s9117_s24 }
 0x7af   : > { %p12194_p2 = pnand %p12197_p1, %p12530_p8 }
 0x7b1   : > { %12330 = dma.done.wait (!%p12194_p2), %s9118_s0, 128  }
 0x7b2   : > { %12332 = vsyncadd (!%p12194_p2), %s9118_s0, 4294967168  ;;  %s34_s25 = sadd.s32 1, %s17904_s20   ;;  %s17907_s20 = sld [smem:[#allocation7_spill]] }
 0x7b3   : > { %p31_p4 = scmp.ge.s32.totalorder %s34_s25, 10   ;;  %s17908_s21 = sld [smem:[#allocation8_spill]] }
 0x7b4   : > { %s17909_s1 = sld [smem:[#allocation17_spill]]  ;;  %s17910_s22 = sld [smem:[#allocation10_spill]] }
 0x7b5   : > { %s17911_s2 = sld [smem:[#allocation11_spill]]  ;;  %s17912_s23 = sld [smem:[#allocation13_spill]] }
 0x7b6   : > { %s17913_s24 = sld [smem:[#allocation15_spill]]  ;;  %33 = sbr.rel (!%p31_p4) target bundleno = 14 (0xe), region = 155 }
 0x7bd   :  { %9123 = vsyncpa [#allocation4], 1 }
 0x7be   :  { %9125 = vsyncpa [#allocation4 + $0x1], 1 }

</bundles_post_ra>
